<compile_context>
chip_gen: v5e
topology: v5e:2x2
jax: 0.10.0
libtpu: 0.0.40
codegen_flags: <defaults>
</compile_context>

<pallas_src>
import functools

import jax
import jax.numpy as jnp
from jax.experimental import pallas as pl
from jax.experimental.pallas import tpu as pltpu

_EPS = 1e-5                      # nn.BatchNorm2d default eps
_LANE = 128                      # pad channel dims to lane-width multiples


def _rup(x, m):
    return (x + m - 1) // m * m


def _pick_row_tile(rows, cap=2048):
    """Largest multiple-of-8 divisor of `rows` <= cap, keeping >= 2 grid steps."""
    cap = min(cap, rows)
    if rows >= 16:
        cap = min(cap, rows // 2)   # at least 2 grid steps -> pipelining / megacore
    best = None
    t = 8
    while t <= cap:
        if rows % t == 0:
            best = t
        t += 8
    return best if best is not None else rows


def _vmem_limit_bytes():
    """Generation-aware scoped-VMEM cap: ~52 MiB on v7x, up to 96 MiB on v5e/v6e."""
    try:
        cap = int(pltpu.get_tpu_info().vmem_capacity_bytes)
    except Exception:
        return 48 * 1024 * 1024
    return max(32 * 1024 * 1024, min(cap - 12 * 1024 * 1024, 96 * 1024 * 1024))


# --------------------------------------------------------------------------
# Kernels
# --------------------------------------------------------------------------
def _conv1x1_stat_kernel(x_ref, s_ref, t_ref, w_ref, b_ref, o_ref, stat_ref):
    """o = relu(x * s + t) @ w + b; also emits per-tile (sum, sumsq) of o."""
    h = jnp.maximum(x_ref[...].astype(jnp.float32) * s_ref[...] + t_ref[...], 0.0)
    y = jnp.dot(h.astype(jnp.bfloat16), w_ref[...],
                preferred_element_type=jnp.float32) + b_ref[...]
    stat_ref[0, 0:1, :] = jnp.sum(y, axis=0, keepdims=True)
    stat_ref[0, 1:2, :] = jnp.sum(y * y, axis=0, keepdims=True)
    o_ref[...] = y.astype(o_ref.dtype)


def _conv3x3_kernel(y1_ref, s_ref, t_ref, w_ref, y2_ref, stat_ref, halo_ref,
                    *, H, W, C, PAD):
    """Per-image 3x3 conv (stride 1, pad 1) on relu(bn2(y1)).

    relu(bn2(y1)) is written (bf16) into a VMEM scratch with PAD zero halo
    rows above and below the image; each of the 9 taps is a static-offset
    slice (vector loads, no XLU rolls), masked only at the left/right image
    columns, and matmul-accumulated into an f32 accumulator (no staged-tap
    scratch, no extra vector-store pass).  Also emits (sum, sumsq) partials
    for bn3.
    """
    # TODO(synk): row-block very large images (H*W*C > ~few MiB) with a 1-row
    # halo per block so VMEM stays bounded on v7x; per-image blocks are fine
    # for the sizes used here.
    HW = H * W
    h2 = jnp.maximum(y1_ref[0].astype(jnp.float32) * s_ref[...] + t_ref[...], 0.0)
    # Zero halo rows every step (cheap vs the HW*C interior write; also avoids
    # stale-scratch hazards if the grid axis gets sharded across cores).
    halo_ref[0:PAD, :] = jnp.zeros((PAD, C), jnp.bfloat16)
    halo_ref[PAD + HW:PAD + HW + PAD, :] = jnp.zeros((PAD, C), jnp.bfloat16)
    halo_ref[PAD:PAD + HW, :] = h2.astype(jnp.bfloat16)

    # Column masks for horizontally shifted taps (vertical boundaries are
    # handled by the zero halo rows).
    col = jax.lax.broadcasted_iota(jnp.int32, (HW, 1), 0) % W
    mask_l = col >= 1            # tap reads column c-1
    mask_r = col < (W - 1)       # tap reads column c+1

    acc = None
    for k in range(9):                              # static unroll, 9 taps
        oy, ox = k // 3 - 1, k % 3 - 1
        start = PAD + oy * W + ox                   # static offset
        tap = halo_ref[start:start + HW, :]
        if ox == -1:
            tap = jnp.where(mask_l, tap, jnp.zeros_like(tap))
        elif ox == 1:
            tap = jnp.where(mask_r, tap, jnp.zeros_like(tap))
        part = jnp.dot(tap, w_ref[k], preferred_element_type=jnp.float32)
        acc = part if acc is None else acc + part

    stat_ref[0, 0:1, :] = jnp.sum(acc, axis=0, keepdims=True)
    stat_ref[0, 1:2, :] = jnp.sum(acc * acc, axis=0, keepdims=True)
    y2_ref[0] = acc.astype(y2_ref.dtype)


def _conv1x1_res_ds_kernel(y2_ref, x_ref, s_ref, t_ref, w_ref, b_ref, wd_ref,
                           o_ref):
    """o = relu(y2 * s + t) @ w3 + b3 + x @ wd   (projected residual)."""
    h = jnp.maximum(y2_ref[...].astype(jnp.float32) * s_ref[...] + t_ref[...], 0.0)
    out = jnp.dot(h.astype(jnp.bfloat16), w_ref[...],
                  preferred_element_type=jnp.float32) + b_ref[...]
    res = jnp.dot(x_ref[...], wd_ref[...], preferred_element_type=jnp.float32)
    o_ref[...] = (out + res).astype(o_ref.dtype)


def _conv1x1_res_id_kernel(y2_ref, x_ref, s_ref, t_ref, w_ref, b_ref, o_ref):
    """o = relu(y2 * s + t) @ w3 + b3 + x   (identity residual)."""
    h = jnp.maximum(y2_ref[...].astype(jnp.float32) * s_ref[...] + t_ref[...], 0.0)
    out = jnp.dot(h.astype(jnp.bfloat16), w_ref[...],
                  preferred_element_type=jnp.float32) + b_ref[...]
    o_ref[...] = (out + x_ref[...].astype(jnp.float32)).astype(o_ref.dtype)


# --------------------------------------------------------------------------
# BN folding helpers (tiny, plain XLA)
# --------------------------------------------------------------------------
def _scale_shift(mean, var, gamma, beta, c_pad):
    """Fold mean/var + affine into per-channel scale/shift, zero-padded."""
    c = gamma.shape[0]
    scale = gamma.astype(jnp.float32) * jax.lax.rsqrt(var + _EPS)
    shift = beta.astype(jnp.float32) - mean * scale
    pad = (0, c_pad - c)
    return (jnp.pad(scale, pad).reshape(1, c_pad),
            jnp.pad(shift, pad).reshape(1, c_pad))


def _scale_shift_from_partials(partials, count, gamma, beta, c_pad):
    """Finish BN stats from in-kernel (sum, sumsq) partials of shape (G,2,C)."""
    c = gamma.shape[0]
    sums = jnp.sum(partials, axis=0)                 # (2, c_pad)
    mean = sums[0, :c] / count
    var = jnp.maximum(sums[1, :c] / count - mean * mean, 0.0)
    return _scale_shift(mean, var, gamma, beta, c_pad)


# --------------------------------------------------------------------------
# Wrapper
# --------------------------------------------------------------------------
@functools.partial(jax.jit, static_argnames=("inplanes", "outplanes", "stride"))
def res_unit_forward(x_nchw, params, *, inplanes, outplanes, stride=1):
    if stride != 1:
        # TODO(synk): strided 3x3 conv / strided downsample path not implemented.
        raise NotImplementedError("stride != 1 not supported by this kernel")
    N, C, H, W = x_nchw.shape
    assert C == inplanes and outplanes % 4 == 0
    mid = outplanes // 4
    use_ds = (inplanes != outplanes) or (stride != 1)

    cin_p = _rup(inplanes, _LANE)
    mid_p = _rup(mid, _LANE)
    cout_p = _rup(outplanes, _LANE)
    HW = H * W
    rows = N * HW
    tr = _pick_row_tile(rows)
    grid_a = rows // tr
    pad_rows = _rup(W + 1, 8)            # zero halo rows above/below each image
    vmem_limit = _vmem_limit_bytes()
    cparams = pltpu.CompilerParams(dimension_semantics=("parallel",),
                                   vmem_limit_bytes=vmem_limit)

    # NCHW -> NHWC -> (N*H*W, Cin), channels zero-padded, bf16 (MXU dtype).
    # TODO(synk): for stacked ResUnits keep activations in this padded NHWC
    # bf16 layout end-to-end instead of transposing to/from NCHW per unit.
    x_p = jnp.transpose(x_nchw, (0, 2, 3, 1)).reshape(rows, inplanes)
    x_p = jnp.pad(x_p, ((0, 0), (0, cin_p - inplanes))).astype(jnp.bfloat16)

    # Weights repacked for matmul layout, zero-padded, bf16 for the MXU.
    w1 = jnp.pad(params["w1_oihw"][:, :, 0, 0].T,
                 ((0, cin_p - inplanes), (0, mid_p - mid))).astype(jnp.bfloat16)
    w2 = jnp.transpose(params["w2_oihw"], (2, 3, 1, 0)).reshape(9, mid, mid)
    w2 = jnp.pad(w2, ((0, 0), (0, mid_p - mid), (0, mid_p - mid))).astype(jnp.bfloat16)
    w3 = jnp.pad(params["w3_oihw"][:, :, 0, 0].T,
                 ((0, mid_p - mid), (0, cout_p - outplanes))).astype(jnp.bfloat16)
    b1 = jnp.pad(params["b1"].astype(jnp.float32), (0, mid_p - mid)).reshape(1, mid_p)
    b3 = jnp.pad(params["b3"].astype(jnp.float32),
                 (0, cout_p - outplanes)).reshape(1, cout_p)

    # bn1 stats over the f32 input (single XLA pass; must precede stage A).
    mean1 = jnp.mean(x_nchw, axis=(0, 2, 3))
    var1 = jnp.maximum(jnp.mean(jnp.square(x_nchw), axis=(0, 2, 3)) - mean1 * mean1, 0.0)
    s1, t1 = _scale_shift(mean1, var1, params["g1"], params["be1"], cin_p)

    # ---- stage A: y1 = conv1(relu(bn1(x))), + bn2 partial stats -----------
    y1, st1 = pl.pallas_call(
        _conv1x1_stat_kernel,
        out_shape=(jax.ShapeDtypeStruct((rows, mid_p), jnp.bfloat16),
                   jax.ShapeDtypeStruct((grid_a, 2, mid_p), jnp.float32)),
        grid_spec=pltpu.PrefetchScalarGridSpec(
            num_scalar_prefetch=0,
            grid=(grid_a,),
            in_specs=[
                pl.BlockSpec((tr, cin_p), lambda i: (i, 0)),
                pl.BlockSpec((1, cin_p), lambda i: (0, 0)),
                pl.BlockSpec((1, cin_p), lambda i: (0, 0)),
                pl.BlockSpec((cin_p, mid_p), lambda i: (0, 0)),
                pl.BlockSpec((1, mid_p), lambda i: (0, 0)),
            ],
            out_specs=(
                pl.BlockSpec((tr, mid_p), lambda i: (i, 0)),
                pl.BlockSpec((1, 2, mid_p), lambda i: (i, 0, 0)),
            ),
        ),
        compiler_params=cparams,
        cost_estimate=pl.CostEstimate(
            flops=2 * rows * cin_p * mid_p, transcendentals=0,
            bytes_accessed=2 * rows * (cin_p + mid_p) + 2 * cin_p * mid_p),
    )(x_p, s1, t1, w1, b1)

    # ---- stage B: y2 = conv2_3x3(relu(bn2(y1))), + bn3 partial stats ------
    s2, t2 = _scale_shift_from_partials(st1, rows, params["g2"], params["be2"], mid_p)
    y2, st2 = pl.pallas_call(
        functools.partial(_conv3x3_kernel, H=H, W=W, C=mid_p, PAD=pad_rows),
        out_shape=(jax.ShapeDtypeStruct((N, HW, mid_p), jnp.bfloat16),
                   jax.ShapeDtypeStruct((N, 2, mid_p), jnp.float32)),
        grid_spec=pltpu.PrefetchScalarGridSpec(
            num_scalar_prefetch=0,
            grid=(N,),
            in_specs=[
                pl.BlockSpec((1, HW, mid_p), lambda n: (n, 0, 0)),
                pl.BlockSpec((1, mid_p), lambda n: (0, 0)),
                pl.BlockSpec((1, mid_p), lambda n: (0, 0)),
                pl.BlockSpec((9, mid_p, mid_p), lambda n: (0, 0, 0)),
            ],
            out_specs=(
                pl.BlockSpec((1, HW, mid_p), lambda n: (n, 0, 0)),
                pl.BlockSpec((1, 2, mid_p), lambda n: (n, 0, 0)),
            ),
            scratch_shapes=[
                pltpu.VMEM((HW + 2 * pad_rows, mid_p), jnp.bfloat16),  # halo buf
            ],
        ),
        compiler_params=cparams,
        cost_estimate=pl.CostEstimate(
            flops=2 * rows * 9 * mid_p * mid_p, transcendentals=0,
            bytes_accessed=2 * rows * 2 * mid_p + 2 * 9 * mid_p * mid_p),
    )(y1.reshape(N, HW, mid_p), s2, t2, w2)
    y2 = y2.reshape(rows, mid_p)

    # ---- stage C: out = conv3(relu(bn3(y2))) + residual -------------------
    s3, t3 = _scale_shift_from_partials(st2, rows, params["g3"], params["be3"], mid_p)
    in_specs = [
        pl.BlockSpec((tr, mid_p), lambda i: (i, 0)),    # y2
        pl.BlockSpec((tr, cin_p), lambda i: (i, 0)),    # x (residual)
        pl.BlockSpec((1, mid_p), lambda i: (0, 0)),
        pl.BlockSpec((1, mid_p), lambda i: (0, 0)),
        pl.BlockSpec((mid_p, cout_p), lambda i: (0, 0)),
        pl.BlockSpec((1, cout_p), lambda i: (0, 0)),
    ]
    args = [y2, x_p, s3, t3, w3, b3]
    ds_flops = 0
    if use_ds:
        wd = jnp.pad(params["wd_oihw"][:, :, 0, 0].T,
                     ((0, cin_p - inplanes), (0, cout_p - outplanes))).astype(jnp.bfloat16)
        in_specs.append(pl.BlockSpec((cin_p, cout_p), lambda i: (0, 0)))
        args.append(wd)
        kernel_c = _conv1x1_res_ds_kernel
        ds_flops = 2 * rows * cin_p * cout_p
    else:
        kernel_c = _conv1x1_res_id_kernel   # no wd DMA / residency when identity

    out_p = pl.pallas_call(
        kernel_c,
        out_shape=jax.ShapeDtypeStruct((rows, cout_p), jnp.float32),
        grid_spec=pltpu.PrefetchScalarGridSpec(
            num_scalar_prefetch=0,
            grid=(grid_a,),
            in_specs=in_specs,
            out_specs=pl.BlockSpec((tr, cout_p), lambda i: (i, 0)),
        ),
        compiler_params=cparams,
        cost_estimate=pl.CostEstimate(
            flops=2 * rows * mid_p * cout_p + ds_flops, transcendentals=0,
            bytes_accessed=2 * rows * (mid_p + cin_p) + 4 * rows * cout_p
            + 2 * (mid_p + cin_p) * cout_p),
    )(*args)

    # TODO(synk): when stacking ResUnits, skip this slice/transpose and keep
    # the padded NHWC layout between units.
    out = out_p[:, :outplanes].reshape(N, H, W, outplanes)
    return jnp.transpose(out, (0, 3, 1, 2))        # back to NCHW


# --------------------------------------------------------------------------
# Params / reference / test
# --------------------------------------------------------------------------
def init_params(key, inplanes, outplanes):
    mid = outplanes // 4
    ks = jax.random.split(key, 12)
    n = lambda k, shape, s: s * jax.random.normal(k, shape, jnp.float32)
    return {
        # BatchNorm affine params; running stats unused (training-mode forward).
        "g1": 1.0 + n(ks[0], (inplanes,), 0.1), "be1": n(ks[1], (inplanes,), 0.1),
        "g2": 1.0 + n(ks[2], (mid,), 0.1),      "be2": n(ks[3], (mid,), 0.1),
        "g3": 1.0 + n(ks[4], (mid,), 0.1),      "be3": n(ks[5], (mid,), 0.1),
        # Convs, PyTorch OIHW convention.
        "w1_oihw": n(ks[6], (mid, inplanes, 1, 1), 0.2), "b1": n(ks[7], (mid,), 0.1),
        "w2_oihw": n(ks[8], (mid, mid, 3, 3), 0.2),
        "w3_oihw": n(ks[9], (outplanes, mid, 1, 1), 0.2), "b3": n(ks[10], (outplanes,), 0.1),
        "wd_oihw": n(ks[11], (outplanes, inplanes, 1, 1), 0.2),
    }


def _reference(x, p, *, inplanes, outplanes, stride=1):
    # Pure-JAX f32 reference mirroring the PyTorch forward (training-mode BN).
    def bn(t, gamma, beta):
        mean = jnp.mean(t, axis=(0, 2, 3), keepdims=True)
        var = jnp.mean((t - mean) ** 2, axis=(0, 2, 3), keepdims=True)
        return ((t - mean) / jnp.sqrt(var + _EPS) * gamma[None, :, None, None]
                + beta[None, :, None, None])

    def conv(t, w, b=None, stride=1, pad=0):
        y = jax.lax.conv_general_dilated(
            t, w, (stride, stride), [(pad, pad), (pad, pad)],
            dimension_numbers=("NCHW", "OIHW", "NCHW"),
            precision=jax.lax.Precision.HIGHEST)
        return y if b is None else y + b[None, :, None, None]

    relu = lambda t: jnp.maximum(t, 0.0)
    out = conv(relu(bn(x, p["g1"], p["be1"])), p["w1_oihw"], p["b1"])
    out = conv(relu(bn(out, p["g2"], p["be2"])), p["w2_oihw"], None, stride=stride, pad=1)
    out = conv(relu(bn(out, p["g3"], p["be3"])), p["w3_oihw"], p["b3"])
    residual = x
    if inplanes != outplanes or stride != 1:
        residual = conv(residual, p["wd_oihw"], None, stride=stride)
    return out + residual


if __name__ == "__main__":
    inplanes, outplanes, stride = 4, 16, 1
    N, H, W = 2, 16, 16

    key = jax.random.PRNGKey(0)
    kx, kp = jax.random.split(key)
    x = jax.random.normal(kx, (N, inplanes, H, W), jnp.float32)
    params = init_params(kp, inplanes, outplanes)

    out = res_unit_forward(x, params, inplanes=inplanes, outplanes=outplanes,
                           stride=stride)
    out = jax.block_until_ready(out)

    ref = _reference(x, params, inplanes=inplanes, outplanes=outplanes,
                     stride=stride)
    assert out.shape == (N, outplanes, H, W)
    max_err = float(jnp.max(jnp.abs(out - ref)))
    # bf16 activations + bf16 MXU operands with f32 accumulation vs f32 reference.
    assert jnp.allclose(out, ref, rtol=3e-2, atol=3e-2), max_err
    print("KERNEL_OK")
</pallas_src>

<mosaic_0001>
module attributes {stable_mosaic.version = 11 : i64} {
  func.func @_conv1x1_stat_kernel(%arg0: i32, %arg1: memref<256x128xbf16, #tpu.memory_space<vmem>>, %arg2: memref<1x128xf32, #tpu.memory_space<vmem>>, %arg3: memref<1x128xf32, #tpu.memory_space<vmem>>, %arg4: memref<128x128xbf16, #tpu.memory_space<vmem>>, %arg5: memref<1x128xf32, #tpu.memory_space<vmem>>, %arg6: memref<256x128xbf16, #tpu.memory_space<vmem>>, %arg7: memref<1x2x128xf32, #tpu.memory_space<vmem>>) attributes {dimension_semantics = [#tpu.dimension_semantics<parallel>], iteration_bounds = array<i64: 2>, scalar_prefetch = 0 : i64, scratch_operands = 0 : i64, tpu.core_type = #tpu.core_type<tc>, window_params = [{transform_indices = @transform_0, window_bounds = array<i64: 256, 128>}, {pipeline_mode = #tpu.pipeline_mode<synchronous>, transform_indices = @transform_1, window_bounds = array<i64: 1, 128>}, {pipeline_mode = #tpu.pipeline_mode<synchronous>, transform_indices = @transform_2, window_bounds = array<i64: 1, 128>}, {pipeline_mode = #tpu.pipeline_mode<synchronous>, transform_indices = @transform_3, window_bounds = array<i64: 128, 128>}, {pipeline_mode = #tpu.pipeline_mode<synchronous>, transform_indices = @transform_4, window_bounds = array<i64: 1, 128>}, {transform_indices = @transform_5, window_bounds = array<i64: 256, 128>}, {transform_indices = @transform_6, window_bounds = array<i64: 1, 2, 128>}]} {
    %c0 = arith.constant 0 : index
    %c0_0 = arith.constant 0 : index
    %0 = vector.load %arg1[%c0, %c0_0] : memref<256x128xbf16, #tpu.memory_space<vmem>>, vector<256x128xbf16>
    %1 = arith.extf %0 : vector<256x128xbf16> to vector<256x128xf32>
    %c0_1 = arith.constant 0 : index
    %c0_2 = arith.constant 0 : index
    %2 = vector.load %arg2[%c0_1, %c0_2] : memref<1x128xf32, #tpu.memory_space<vmem>>, vector<1x128xf32>
    %3 = vector.broadcast %2 : vector<1x128xf32> to vector<256x128xf32>
    %4 = arith.mulf %1, %3 : vector<256x128xf32>
    %c0_3 = arith.constant 0 : index
    %c0_4 = arith.constant 0 : index
    %5 = vector.load %arg3[%c0_3, %c0_4] : memref<1x128xf32, #tpu.memory_space<vmem>>, vector<1x128xf32>
    %6 = vector.broadcast %5 : vector<1x128xf32> to vector<256x128xf32>
    %7 = arith.addf %4, %6 : vector<256x128xf32>
    %cst = arith.constant 0.000000e+00 : f32
    %8 = vector.broadcast %cst : f32 to vector<256x128xf32>
    %9 = arith.maximumf %7, %8 : vector<256x128xf32>
    %10 = arith.truncf %9 : vector<256x128xf32> to vector<256x128xbf16>
    %c0_5 = arith.constant 0 : index
    %c0_6 = arith.constant 0 : index
    %11 = vector.load %arg4[%c0_5, %c0_6] : memref<128x128xbf16, #tpu.memory_space<vmem>>, vector<128x128xbf16>
    %cst_7 = arith.constant dense<0.000000e+00> : vector<256x128xf32>
    %12 = tpu.matmul %10, %11, %cst_7 {dimension_numbers = #tpu.dot_dimension_numbers<[1], [0], [0], [1], [0, 0, 1, 1], [], []>} : vector<256x128xbf16>, vector<128x128xbf16>, vector<256x128xf32> -> vector<256x128xf32>
    %c0_8 = arith.constant 0 : index
    %c0_9 = arith.constant 0 : index
    %13 = vector.load %arg5[%c0_8, %c0_9] : memref<1x128xf32, #tpu.memory_space<vmem>>, vector<1x128xf32>
    %14 = vector.broadcast %13 : vector<1x128xf32> to vector<256x128xf32>
    %15 = arith.addf %12, %14 : vector<256x128xf32>
    %cst_10 = arith.constant dense<0.000000e+00> : vector<128xf32>
    %16 = vector.multi_reduction <add>, %15, %cst_10 [0] : vector<256x128xf32> to vector<128xf32>
    %17 = vector.shape_cast %16 : vector<128xf32> to vector<1x128xf32>
    %c0_11 = arith.constant 0 : index
    %c0_12 = arith.constant 0 : index
    %c0_13 = arith.constant 0 : index
    %18 = vector.load %arg7[%c0_11, %c0_12, %c0_13] : memref<1x2x128xf32, #tpu.memory_space<vmem>>, vector<1x1x128xf32>
    %19 = vector.shape_cast %18 : vector<1x1x128xf32> to vector<1x128xf32>
    %20 = vector.shape_cast %17 : vector<1x128xf32> to vector<1x1x128xf32>
    tpu.vector_store %arg7[%c0_11, %c0_12, %c0_13], %20 {strides = array<i32>} : memref<1x2x128xf32, #tpu.memory_space<vmem>>, vector<1x1x128xf32>,
    %21 = arith.mulf %15, %15 : vector<256x128xf32>
    %cst_14 = arith.constant dense<0.000000e+00> : vector<128xf32>
    %22 = vector.multi_reduction <add>, %21, %cst_14 [0] : vector<256x128xf32> to vector<128xf32>
    %23 = vector.shape_cast %22 : vector<128xf32> to vector<1x128xf32>
    %c0_15 = arith.constant 0 : index
    %c1 = arith.constant 1 : index
    %c0_16 = arith.constant 0 : index
    %24 = vector.load %arg7[%c0_15, %c1, %c0_16] : memref<1x2x128xf32, #tpu.memory_space<vmem>>, vector<1x1x128xf32>
    %25 = vector.shape_cast %24 : vector<1x1x128xf32> to vector<1x128xf32>
    %26 = vector.shape_cast %23 : vector<1x128xf32> to vector<1x1x128xf32>
    tpu.vector_store %arg7[%c0_15, %c1, %c0_16], %26 {strides = array<i32>} : memref<1x2x128xf32, #tpu.memory_space<vmem>>, vector<1x1x128xf32>,
    %27 = arith.truncf %15 : vector<256x128xf32> to vector<256x128xbf16>
    %c0_17 = arith.constant 0 : index
    %c0_18 = arith.constant 0 : index
    %28 = vector.load %arg6[%c0_17, %c0_18] : memref<256x128xbf16, #tpu.memory_space<vmem>>, vector<256x128xbf16>
    tpu.vector_store %arg6[%c0_17, %c0_18], %27 {strides = array<i32>} : memref<256x128xbf16, #tpu.memory_space<vmem>>, vector<256x128xbf16>,
    return
  }
  func.func @transform_0(%arg0: i32) -> (i32, i32) {
    %c0_i32 = arith.constant 0 : i32
    %c0_i32_0 = arith.constant 0 : i32
    return %arg0, %c0_i32 : i32, i32
  }
  func.func @transform_1(%arg0: i32) -> (i32, i32) {
    %c0_i32 = arith.constant 0 : i32
    %c0_i32_0 = arith.constant 0 : i32
    %c0_i32_1 = arith.constant 0 : i32
    return %c0_i32, %c0_i32_0 : i32, i32
  }
  func.func @transform_2(%arg0: i32) -> (i32, i32) {
    %c0_i32 = arith.constant 0 : i32
    %c0_i32_0 = arith.constant 0 : i32
    %c0_i32_1 = arith.constant 0 : i32
    return %c0_i32, %c0_i32_0 : i32, i32
  }
  func.func @transform_3(%arg0: i32) -> (i32, i32) {
    %c0_i32 = arith.constant 0 : i32
    %c0_i32_0 = arith.constant 0 : i32
    %c0_i32_1 = arith.constant 0 : i32
    return %c0_i32, %c0_i32_0 : i32, i32
  }
  func.func @transform_4(%arg0: i32) -> (i32, i32) {
    %c0_i32 = arith.constant 0 : i32
    %c0_i32_0 = arith.constant 0 : i32
    %c0_i32_1 = arith.constant 0 : i32
    return %c0_i32, %c0_i32_0 : i32, i32
  }
  func.func @transform_5(%arg0: i32) -> (i32, i32) {
    %c0_i32 = arith.constant 0 : i32
    %c0_i32_0 = arith.constant 0 : i32
    return %arg0, %c0_i32 : i32, i32
  }
  func.func @transform_6(%arg0: i32) -> (i32, i32, i32) {
    %c0_i32 = arith.constant 0 : i32
    %c0_i32_0 = arith.constant 0 : i32
    %c0_i32_1 = arith.constant 0 : i32
    return %arg0, %c0_i32, %c0_i32_0 : i32, i32, i32
  }
}

module attributes {stable_mosaic.version = 11 : i64} {
  func.func @_conv3x3_kernel(%arg0: i32, %arg1: memref<1x256x128xbf16, #tpu.memory_space<vmem>>, %arg2: memref<1x128xf32, #tpu.memory_space<vmem>>, %arg3: memref<1x128xf32, #tpu.memory_space<vmem>>, %arg4: memref<9x128x128xbf16, #tpu.memory_space<vmem>>, %arg5: memref<1x256x128xbf16, #tpu.memory_space<vmem>>, %arg6: memref<1x2x128xf32, #tpu.memory_space<vmem>>, %arg7: memref<304x128xbf16, #tpu.memory_space<vmem>>) attributes {dimension_semantics = [#tpu.dimension_semantics<parallel>], iteration_bounds = array<i64: 2>, scalar_prefetch = 0 : i64, scratch_operands = 1 : i64, tpu.core_type = #tpu.core_type<tc>, window_params = [{transform_indices = @transform_0, window_bounds = array<i64: 1, 256, 128>}, {pipeline_mode = #tpu.pipeline_mode<synchronous>, transform_indices = @transform_1, window_bounds = array<i64: 1, 128>}, {pipeline_mode = #tpu.pipeline_mode<synchronous>, transform_indices = @transform_2, window_bounds = array<i64: 1, 128>}, {pipeline_mode = #tpu.pipeline_mode<synchronous>, transform_indices = @transform_3, window_bounds = array<i64: 9, 128, 128>}, {transform_indices = @transform_4, window_bounds = array<i64: 1, 256, 128>}, {transform_indices = @transform_5, window_bounds = array<i64: 1, 2, 128>}]} {
    %c0 = arith.constant 0 : index
    %c0_0 = arith.constant 0 : index
    %c0_1 = arith.constant 0 : index
    %0 = vector.load %arg1[%c0, %c0_0, %c0_1] : memref<1x256x128xbf16, #tpu.memory_space<vmem>>, vector<1x256x128xbf16>
    %1 = vector.shape_cast %0 : vector<1x256x128xbf16> to vector<256x128xbf16>
    %2 = arith.extf %1 : vector<256x128xbf16> to vector<256x128xf32>
    %c0_2 = arith.constant 0 : index
    %c0_3 = arith.constant 0 : index
    %3 = vector.load %arg2[%c0_2, %c0_3] : memref<1x128xf32, #tpu.memory_space<vmem>>, vector<1x128xf32>
    %4 = vector.broadcast %3 : vector<1x128xf32> to vector<256x128xf32>
    %5 = arith.mulf %2, %4 : vector<256x128xf32>
    %c0_4 = arith.constant 0 : index
    %c0_5 = arith.constant 0 : index
    %6 = vector.load %arg3[%c0_4, %c0_5] : memref<1x128xf32, #tpu.memory_space<vmem>>, vector<1x128xf32>
    %7 = vector.broadcast %6 : vector<1x128xf32> to vector<256x128xf32>
    %8 = arith.addf %5, %7 : vector<256x128xf32>
    %cst = arith.constant 0.000000e+00 : f32
    %9 = vector.broadcast %cst : f32 to vector<256x128xf32>
    %10 = arith.maximumf %8, %9 : vector<256x128xf32>
    %cst_6 = arith.constant 0.000000e+00 : bf16
    %11 = vector.broadcast %cst_6 : bf16 to vector<24x128xbf16>
    %c0_7 = arith.constant 0 : index
    %c0_8 = arith.constant 0 : index
    %12 = vector.load %arg7[%c0_7, %c0_8] : memref<304x128xbf16, #tpu.memory_space<vmem>>, vector<24x128xbf16>
    tpu.vector_store %arg7[%c0_7, %c0_8], %11 {strides = array<i32>} : memref<304x128xbf16, #tpu.memory_space<vmem>>, vector<24x128xbf16>,
    %cst_9 = arith.constant 0.000000e+00 : bf16
    %13 = vector.broadcast %cst_9 : bf16 to vector<24x128xbf16>
    %c280 = arith.constant 280 : index
    %c0_10 = arith.constant 0 : index
    %14 = vector.load %arg7[%c280, %c0_10] : memref<304x128xbf16, #tpu.memory_space<vmem>>, vector<24x128xbf16>
    tpu.vector_store %arg7[%c280, %c0_10], %13 {strides = array<i32>} : memref<304x128xbf16, #tpu.memory_space<vmem>>, vector<24x128xbf16>,
    %15 = arith.truncf %10 : vector<256x128xf32> to vector<256x128xbf16>
    %c24 = arith.constant 24 : index
    %c0_11 = arith.constant 0 : index
    %16 = vector.load %arg7[%c24, %c0_11] : memref<304x128xbf16, #tpu.memory_space<vmem>>, vector<256x128xbf16>
    tpu.vector_store %arg7[%c24, %c0_11], %15 {strides = array<i32>} : memref<304x128xbf16, #tpu.memory_space<vmem>>, vector<256x128xbf16>,
    %17 = tpu.iota {dimensions = array<i32: 0>} : vector<256x1xi32>
    %c16_i32 = arith.constant 16 : i32
    %c0_i32 = arith.constant 0 : i32
    %18 = arith.cmpi eq, %c16_i32, %c0_i32 : i32
    %c1_i32 = arith.constant 1 : i32
    %19 = arith.select %18, %c1_i32, %c16_i32 : i32
    %20 = vector.broadcast %19 : i32 to vector<256x1xi32>
    %21 = arith.remsi %17, %20 : vector<256x1xi32>
    %c0_i32_12 = arith.constant 0 : i32
    %22 = vector.broadcast %c0_i32_12 : i32 to vector<256x1xi32>
    %23 = arith.cmpi ne, %21, %22 : vector<256x1xi32>
    %c0_i32_13 = arith.constant 0 : i32
    %24 = vector.broadcast %c0_i32_13 : i32 to vector<256x1xi32>
    %25 = arith.cmpi slt, %21, %24 : vector<256x1xi32>
    %c0_i32_14 = arith.constant 0 : i32
    %26 = arith.cmpi slt, %19, %c0_i32_14 : i32
    %27 = vector.broadcast %26 : i1 to vector<256x1xi1>
    %28 = vector.broadcast %27 : vector<256x1xi1> to vector<256x1xi1>
    %29 = arith.xori %25, %28 : vector<256x1xi1>
    %30 = arith.andi %29, %23 : vector<256x1xi1>
    %31 = vector.broadcast %19 : i32 to vector<256x1xi32>
    %32 = arith.addi %21, %31 : vector<256x1xi32>
    %33 = arith.select %30, %32, %21 : vector<256x1xi1>, vector<256x1xi32>
    %c1_i32_15 = arith.constant 1 : i32
    %34 = vector.broadcast %c1_i32_15 : i32 to vector<256x1xi32>
    %35 = arith.cmpi sge, %33, %34 : vector<256x1xi32>
    %c15_i32 = arith.constant 15 : i32
    %36 = vector.broadcast %c15_i32 : i32 to vector<256x1xi32>
    %37 = arith.cmpi slt, %33, %36 : vector<256x1xi32>
    %c7 = arith.constant 7 : index
    %c0_16 = arith.constant 0 : index
    %38 = vector.load %arg7[%c7, %c0_16] : memref<304x128xbf16, #tpu.memory_space<vmem>>, vector<256x128xbf16>
    %cst_17 = arith.constant 0.000000e+00 : bf16
    %39 = vector.broadcast %cst_17 : bf16 to vector<256x128xbf16>
    %40 = vector.shape_cast %35 : vector<256x1xi1> to vector<256x1xi1>
    %41 = vector.broadcast %40 : vector<256x1xi1> to vector<256x128xi1>
    %42 = arith.select %41, %38, %39 : vector<256x128xi1>, vector<256x128xbf16>
    %c0_18 = arith.constant 0 : index
    %c0_19 = arith.constant 0 : index
    %c0_20 = arith.constant 0 : index
    %43 = vector.load %arg4[%c0_18, %c0_19, %c0_20] : memref<9x128x128xbf16, #tpu.memory_space<vmem>>, vector<1x128x128xbf16>
    %44 = vector.shape_cast %43 : vector<1x128x128xbf16> to vector<128x128xbf16>
    %cst_21 = arith.constant dense<0.000000e+00> : vector<256x128xf32>
    %45 = tpu.matmul %42, %44, %cst_21 {dimension_numbers = #tpu.dot_dimension_numbers<[1], [0], [0], [1], [0, 0, 1, 1], [], []>} : vector<256x128xbf16>, vector<128x128xbf16>, vector<256x128xf32> -> vector<256x128xf32>
    %c8 = arith.constant 8 : index
    %c0_22 = arith.constant 0 : index
    %46 = vector.load %arg7[%c8, %c0_22] : memref<304x128xbf16, #tpu.memory_space<vmem>>, vector<256x128xbf16>
    %c1 = arith.constant 1 : index
    %c0_23 = arith.constant 0 : index
    %c0_24 = arith.constant 0 : index
    %47 = vector.load %arg4[%c1, %c0_23, %c0_24] : memref<9x128x128xbf16, #tpu.memory_space<vmem>>, vector<1x128x128xbf16>
    %48 = vector.shape_cast %47 : vector<1x128x128xbf16> to vector<128x128xbf16>
    %cst_25 = arith.constant dense<0.000000e+00> : vector<256x128xf32>
    %49 = tpu.matmul %46, %48, %cst_25 {dimension_numbers = #tpu.dot_dimension_numbers<[1], [0], [0], [1], [0, 0, 1, 1], [], []>} : vector<256x128xbf16>, vector<128x128xbf16>, vector<256x128xf32> -> vector<256x128xf32>
    %50 = arith.addf %45, %49 : vector<256x128xf32>
    %c9 = arith.constant 9 : index
    %c0_26 = arith.constant 0 : index
    %51 = vector.load %arg7[%c9, %c0_26] : memref<304x128xbf16, #tpu.memory_space<vmem>>, vector<256x128xbf16>
    %cst_27 = arith.constant 0.000000e+00 : bf16
    %52 = vector.broadcast %cst_27 : bf16 to vector<256x128xbf16>
    %53 = vector.shape_cast %37 : vector<256x1xi1> to vector<256x1xi1>
    %54 = vector.broadcast %53 : vector<256x1xi1> to vector<256x128xi1>
    %55 = arith.select %54, %51, %52 : vector<256x128xi1>, vector<256x128xbf16>
    %c2 = arith.constant 2 : index
    %c0_28 = arith.constant 0 : index
    %c0_29 = arith.constant 0 : index
    %56 = vector.load %arg4[%c2, %c0_28, %c0_29] : memref<9x128x128xbf16, #tpu.memory_space<vmem>>, vector<1x128x128xbf16>
    %57 = vector.shape_cast %56 : vector<1x128x128xbf16> to vector<128x128xbf16>
    %cst_30 = arith.constant dense<0.000000e+00> : vector<256x128xf32>
    %58 = tpu.matmul %55, %57, %cst_30 {dimension_numbers = #tpu.dot_dimension_numbers<[1], [0], [0], [1], [0, 0, 1, 1], [], []>} : vector<256x128xbf16>, vector<128x128xbf16>, vector<256x128xf32> -> vector<256x128xf32>
    %59 = arith.addf %50, %58 : vector<256x128xf32>
    %c23 = arith.constant 23 : index
    %c0_31 = arith.constant 0 : index
    %60 = vector.load %arg7[%c23, %c0_31] : memref<304x128xbf16, #tpu.memory_space<vmem>>, vector<256x128xbf16>
    %cst_32 = arith.constant 0.000000e+00 : bf16
    %61 = vector.broadcast %cst_32 : bf16 to vector<256x128xbf16>
    %62 = vector.shape_cast %35 : vector<256x1xi1> to vector<256x1xi1>
    %63 = vector.broadcast %62 : vector<256x1xi1> to vector<256x128xi1>
    %64 = arith.select %63, %60, %61 : vector<256x128xi1>, vector<256x128xbf16>
    %c3 = arith.constant 3 : index
    %c0_33 = arith.constant 0 : index
    %c0_34 = arith.constant 0 : index
    %65 = vector.load %arg4[%c3, %c0_33, %c0_34] : memref<9x128x128xbf16, #tpu.memory_space<vmem>>, vector<1x128x128xbf16>
    %66 = vector.shape_cast %65 : vector<1x128x128xbf16> to vector<128x128xbf16>
    %cst_35 = arith.constant dense<0.000000e+00> : vector<256x128xf32>
    %67 = tpu.matmul %64, %66, %cst_35 {dimension_numbers = #tpu.dot_dimension_numbers<[1], [0], [0], [1], [0, 0, 1, 1], [], []>} : vector<256x128xbf16>, vector<128x128xbf16>, vector<256x128xf32> -> vector<256x128xf32>
    %68 = arith.addf %59, %67 : vector<256x128xf32>
    %c24_36 = arith.constant 24 : index
    %c0_37 = arith.constant 0 : index
    %69 = vector.load %arg7[%c24_36, %c0_37] : memref<304x128xbf16, #tpu.memory_space<vmem>>, vector<256x128xbf16>
    %c4 = arith.constant 4 : index
    %c0_38 = arith.constant 0 : index
    %c0_39 = arith.constant 0 : index
    %70 = vector.load %arg4[%c4, %c0_38, %c0_39] : memref<9x128x128xbf16, #tpu.memory_space<vmem>>, vector<1x128x128xbf16>
    %71 = vector.shape_cast %70 : vector<1x128x128xbf16> to vector<128x128xbf16>
    %cst_40 = arith.constant dense<0.000000e+00> : vector<256x128xf32>
    %72 = tpu.matmul %69, %71, %cst_40 {dimension_numbers = #tpu.dot_dimension_numbers<[1], [0], [0], [1], [0, 0, 1, 1], [], []>} : vector<256x128xbf16>, vector<128x128xbf16>, vector<256x128xf32> -> vector<256x128xf32>
    %73 = arith.addf %68, %72 : vector<256x128xf32>
    %c25 = arith.constant 25 : index
    %c0_41 = arith.constant 0 : index
    %74 = vector.load %arg7[%c25, %c0_41] : memref<304x128xbf16, #tpu.memory_space<vmem>>, vector<256x128xbf16>
    %cst_42 = arith.constant 0.000000e+00 : bf16
    %75 = vector.broadcast %cst_42 : bf16 to vector<256x128xbf16>
    %76 = vector.shape_cast %37 : vector<256x1xi1> to vector<256x1xi1>
    %77 = vector.broadcast %76 : vector<256x1xi1> to vector<256x128xi1>
    %78 = arith.select %77, %74, %75 : vector<256x128xi1>, vector<256x128xbf16>
    %c5 = arith.constant 5 : index
    %c0_43 = arith.constant 0 : index
    %c0_44 = arith.constant 0 : index
    %79 = vector.load %arg4[%c5, %c0_43, %c0_44] : memref<9x128x128xbf16, #tpu.memory_space<vmem>>, vector<1x128x128xbf16>
    %80 = vector.shape_cast %79 : vector<1x128x128xbf16> to vector<128x128xbf16>
    %cst_45 = arith.constant dense<0.000000e+00> : vector<256x128xf32>
    %81 = tpu.matmul %78, %80, %cst_45 {dimension_numbers = #tpu.dot_dimension_numbers<[1], [0], [0], [1], [0, 0, 1, 1], [], []>} : vector<256x128xbf16>, vector<128x128xbf16>, vector<256x128xf32> -> vector<256x128xf32>
    %82 = arith.addf %73, %81 : vector<256x128xf32>
    %c39 = arith.constant 39 : index
    %c0_46 = arith.constant 0 : index
    %83 = vector.load %arg7[%c39, %c0_46] : memref<304x128xbf16, #tpu.memory_space<vmem>>, vector<256x128xbf16>
    %cst_47 = arith.constant 0.000000e+00 : bf16
    %84 = vector.broadcast %cst_47 : bf16 to vector<256x128xbf16>
    %85 = vector.shape_cast %35 : vector<256x1xi1> to vector<256x1xi1>
    %86 = vector.broadcast %85 : vector<256x1xi1> to vector<256x128xi1>
    %87 = arith.select %86, %83, %84 : vector<256x128xi1>, vector<256x128xbf16>
    %c6 = arith.constant 6 : index
    %c0_48 = arith.constant 0 : index
    %c0_49 = arith.constant 0 : index
    %88 = vector.load %arg4[%c6, %c0_48, %c0_49] : memref<9x128x128xbf16, #tpu.memory_space<vmem>>, vector<1x128x128xbf16>
    %89 = vector.shape_cast %88 : vector<1x128x128xbf16> to vector<128x128xbf16>
    %cst_50 = arith.constant dense<0.000000e+00> : vector<256x128xf32>
    %90 = tpu.matmul %87, %89, %cst_50 {dimension_numbers = #tpu.dot_dimension_numbers<[1], [0], [0], [1], [0, 0, 1, 1], [], []>} : vector<256x128xbf16>, vector<128x128xbf16>, vector<256x128xf32> -> vector<256x128xf32>
    %91 = arith.addf %82, %90 : vector<256x128xf32>
    %c40 = arith.constant 40 : index
    %c0_51 = arith.constant 0 : index
    %92 = vector.load %arg7[%c40, %c0_51] : memref<304x128xbf16, #tpu.memory_space<vmem>>, vector<256x128xbf16>
    %c7_52 = arith.constant 7 : index
    %c0_53 = arith.constant 0 : index
    %c0_54 = arith.constant 0 : index
    %93 = vector.load %arg4[%c7_52, %c0_53, %c0_54] : memref<9x128x128xbf16, #tpu.memory_space<vmem>>, vector<1x128x128xbf16>
    %94 = vector.shape_cast %93 : vector<1x128x128xbf16> to vector<128x128xbf16>
    %cst_55 = arith.constant dense<0.000000e+00> : vector<256x128xf32>
    %95 = tpu.matmul %92, %94, %cst_55 {dimension_numbers = #tpu.dot_dimension_numbers<[1], [0], [0], [1], [0, 0, 1, 1], [], []>} : vector<256x128xbf16>, vector<128x128xbf16>, vector<256x128xf32> -> vector<256x128xf32>
    %96 = arith.addf %91, %95 : vector<256x128xf32>
    %c41 = arith.constant 41 : index
    %c0_56 = arith.constant 0 : index
    %97 = vector.load %arg7[%c41, %c0_56] : memref<304x128xbf16, #tpu.memory_space<vmem>>, vector<256x128xbf16>
    %cst_57 = arith.constant 0.000000e+00 : bf16
    %98 = vector.broadcast %cst_57 : bf16 to vector<256x128xbf16>
    %99 = vector.shape_cast %37 : vector<256x1xi1> to vector<256x1xi1>
    %100 = vector.broadcast %99 : vector<256x1xi1> to vector<256x128xi1>
    %101 = arith.select %100, %97, %98 : vector<256x128xi1>, vector<256x128xbf16>
    %c8_58 = arith.constant 8 : index
    %c0_59 = arith.constant 0 : index
    %c0_60 = arith.constant 0 : index
    %102 = vector.load %arg4[%c8_58, %c0_59, %c0_60] : memref<9x128x128xbf16, #tpu.memory_space<vmem>>, vector<1x128x128xbf16>
    %103 = vector.shape_cast %102 : vector<1x128x128xbf16> to vector<128x128xbf16>
    %cst_61 = arith.constant dense<0.000000e+00> : vector<256x128xf32>
    %104 = tpu.matmul %101, %103, %cst_61 {dimension_numbers = #tpu.dot_dimension_numbers<[1], [0], [0], [1], [0, 0, 1, 1], [], []>} : vector<256x128xbf16>, vector<128x128xbf16>, vector<256x128xf32> -> vector<256x128xf32>
    %105 = arith.addf %96, %104 : vector<256x128xf32>
    %cst_62 = arith.constant dense<0.000000e+00> : vector<128xf32>
    %106 = vector.multi_reduction <add>, %105, %cst_62 [0] : vector<256x128xf32> to vector<128xf32>
    %107 = vector.shape_cast %106 : vector<128xf32> to vector<1x128xf32>
    %c0_63 = arith.constant 0 : index
    %c0_64 = arith.constant 0 : index
    %c0_65 = arith.constant 0 : index
    %108 = vector.load %arg6[%c0_63, %c0_64, %c0_65] : memref<1x2x128xf32, #tpu.memory_space<vmem>>, vector<1x1x128xf32>
    %109 = vector.shape_cast %108 : vector<1x1x128xf32> to vector<1x128xf32>
    %110 = vector.shape_cast %107 : vector<1x128xf32> to vector<1x1x128xf32>
    tpu.vector_store %arg6[%c0_63, %c0_64, %c0_65], %110 {strides = array<i32>} : memref<1x2x128xf32, #tpu.memory_space<vmem>>, vector<1x1x128xf32>,
    %111 = arith.mulf %105, %105 : vector<256x128xf32>
    %cst_66 = arith.constant dense<0.000000e+00> : vector<128xf32>
    %112 = vector.multi_reduction <add>, %111, %cst_66 [0] : vector<256x128xf32> to vector<128xf32>
    %113 = vector.shape_cast %112 : vector<128xf32> to vector<1x128xf32>
    %c0_67 = arith.constant 0 : index
    %c1_68 = arith.constant 1 : index
    %c0_69 = arith.constant 0 : index
    %114 = vector.load %arg6[%c0_67, %c1_68, %c0_69] : memref<1x2x128xf32, #tpu.memory_space<vmem>>, vector<1x1x128xf32>
    %115 = vector.shape_cast %114 : vector<1x1x128xf32> to vector<1x128xf32>
    %116 = vector.shape_cast %113 : vector<1x128xf32> to vector<1x1x128xf32>
    tpu.vector_store %arg6[%c0_67, %c1_68, %c0_69], %116 {strides = array<i32>} : memref<1x2x128xf32, #tpu.memory_space<vmem>>, vector<1x1x128xf32>,
    %117 = arith.truncf %105 : vector<256x128xf32> to vector<256x128xbf16>
    %c0_70 = arith.constant 0 : index
    %c0_71 = arith.constant 0 : index
    %c0_72 = arith.constant 0 : index
    %118 = vector.load %arg5[%c0_70, %c0_71, %c0_72] : memref<1x256x128xbf16, #tpu.memory_space<vmem>>, vector<1x256x128xbf16>
    %119 = vector.shape_cast %118 : vector<1x256x128xbf16> to vector<256x128xbf16>
    %120 = vector.shape_cast %117 : vector<256x128xbf16> to vector<1x256x128xbf16>
    tpu.vector_store %arg5[%c0_70, %c0_71, %c0_72], %120 {strides = array<i32>} : memref<1x256x128xbf16, #tpu.memory_space<vmem>>, vector<1x256x128xbf16>,
    return
  }
  func.func @transform_0(%arg0: i32) -> (i32, i32, i32) {
    %c0_i32 = arith.constant 0 : i32
    %c0_i32_0 = arith.constant 0 : i32
    %c0_i32_1 = arith.constant 0 : i32
    return %arg0, %c0_i32, %c0_i32_0 : i32, i32, i32
  }
  func.func @transform_1(%arg0: i32) -> (i32, i32) {
    %c0_i32 = arith.constant 0 : i32
    %c0_i32_0 = arith.constant 0 : i32
    %c0_i32_1 = arith.constant 0 : i32
    return %c0_i32, %c0_i32_0 : i32, i32
  }
  func.func @transform_2(%arg0: i32) -> (i32, i32) {
    %c0_i32 = arith.constant 0 : i32
    %c0_i32_0 = arith.constant 0 : i32
    %c0_i32_1 = arith.constant 0 : i32
    return %c0_i32, %c0_i32_0 : i32, i32
  }
  func.func @transform_3(%arg0: i32) -> (i32, i32, i32) {
    %c0_i32 = arith.constant 0 : i32
    %c0_i32_0 = arith.constant 0 : i32
    %c0_i32_1 = arith.constant 0 : i32
    %c0_i32_2 = arith.constant 0 : i32
    return %c0_i32, %c0_i32_0, %c0_i32_1 : i32, i32, i32
  }
  func.func @transform_4(%arg0: i32) -> (i32, i32, i32) {
    %c0_i32 = arith.constant 0 : i32
    %c0_i32_0 = arith.constant 0 : i32
    %c0_i32_1 = arith.constant 0 : i32
    return %arg0, %c0_i32, %c0_i32_0 : i32, i32, i32
  }
  func.func @transform_5(%arg0: i32) -> (i32, i32, i32) {
    %c0_i32 = arith.constant 0 : i32
    %c0_i32_0 = arith.constant 0 : i32
    %c0_i32_1 = arith.constant 0 : i32
    return %arg0, %c0_i32, %c0_i32_0 : i32, i32, i32
  }
}

module attributes {stable_mosaic.version = 11 : i64} {
  func.func @_conv1x1_res_ds_kernel(%arg0: i32, %arg1: memref<256x128xbf16, #tpu.memory_space<vmem>>, %arg2: memref<256x128xbf16, #tpu.memory_space<vmem>>, %arg3: memref<1x128xf32, #tpu.memory_space<vmem>>, %arg4: memref<1x128xf32, #tpu.memory_space<vmem>>, %arg5: memref<128x128xbf16, #tpu.memory_space<vmem>>, %arg6: memref<1x128xf32, #tpu.memory_space<vmem>>, %arg7: memref<128x128xbf16, #tpu.memory_space<vmem>>, %arg8: memref<256x128xf32, #tpu.memory_space<vmem>>) attributes {dimension_semantics = [#tpu.dimension_semantics<parallel>], iteration_bounds = array<i64: 2>, scalar_prefetch = 0 : i64, scratch_operands = 0 : i64, tpu.core_type = #tpu.core_type<tc>, window_params = [{transform_indices = @transform_0, window_bounds = array<i64: 256, 128>}, {transform_indices = @transform_1, window_bounds = array<i64: 256, 128>}, {pipeline_mode = #tpu.pipeline_mode<synchronous>, transform_indices = @transform_2, window_bounds = array<i64: 1, 128>}, {pipeline_mode = #tpu.pipeline_mode<synchronous>, transform_indices = @transform_3, window_bounds = array<i64: 1, 128>}, {pipeline_mode = #tpu.pipeline_mode<synchronous>, transform_indices = @transform_4, window_bounds = array<i64: 128, 128>}, {pipeline_mode = #tpu.pipeline_mode<synchronous>, transform_indices = @transform_5, window_bounds = array<i64: 1, 128>}, {pipeline_mode = #tpu.pipeline_mode<synchronous>, transform_indices = @transform_6, window_bounds = array<i64: 128, 128>}, {transform_indices = @transform_7, window_bounds = array<i64: 256, 128>}]} {
    %c0 = arith.constant 0 : index
    %c0_0 = arith.constant 0 : index
    %0 = vector.load %arg1[%c0, %c0_0] : memref<256x128xbf16, #tpu.memory_space<vmem>>, vector<256x128xbf16>
    %1 = arith.extf %0 : vector<256x128xbf16> to vector<256x128xf32>
    %c0_1 = arith.constant 0 : index
    %c0_2 = arith.constant 0 : index
    %2 = vector.load %arg3[%c0_1, %c0_2] : memref<1x128xf32, #tpu.memory_space<vmem>>, vector<1x128xf32>
    %3 = vector.broadcast %2 : vector<1x128xf32> to vector<256x128xf32>
    %4 = arith.mulf %1, %3 : vector<256x128xf32>
    %c0_3 = arith.constant 0 : index
    %c0_4 = arith.constant 0 : index
    %5 = vector.load %arg4[%c0_3, %c0_4] : memref<1x128xf32, #tpu.memory_space<vmem>>, vector<1x128xf32>
    %6 = vector.broadcast %5 : vector<1x128xf32> to vector<256x128xf32>
    %7 = arith.addf %4, %6 : vector<256x128xf32>
    %cst = arith.constant 0.000000e+00 : f32
    %8 = vector.broadcast %cst : f32 to vector<256x128xf32>
    %9 = arith.maximumf %7, %8 : vector<256x128xf32>
    %10 = arith.truncf %9 : vector<256x128xf32> to vector<256x128xbf16>
    %c0_5 = arith.constant 0 : index
    %c0_6 = arith.constant 0 : index
    %11 = vector.load %arg5[%c0_5, %c0_6] : memref<128x128xbf16, #tpu.memory_space<vmem>>, vector<128x128xbf16>
    %cst_7 = arith.constant dense<0.000000e+00> : vector<256x128xf32>
    %12 = tpu.matmul %10, %11, %cst_7 {dimension_numbers = #tpu.dot_dimension_numbers<[1], [0], [0], [1], [0, 0, 1, 1], [], []>} : vector<256x128xbf16>, vector<128x128xbf16>, vector<256x128xf32> -> vector<256x128xf32>
    %c0_8 = arith.constant 0 : index
    %c0_9 = arith.constant 0 : index
    %13 = vector.load %arg6[%c0_8, %c0_9] : memref<1x128xf32, #tpu.memory_space<vmem>>, vector<1x128xf32>
    %14 = vector.broadcast %13 : vector<1x128xf32> to vector<256x128xf32>
    %15 = arith.addf %12, %14 : vector<256x128xf32>
    %c0_10 = arith.constant 0 : index
    %c0_11 = arith.constant 0 : index
    %16 = vector.load %arg2[%c0_10, %c0_11] : memref<256x128xbf16, #tpu.memory_space<vmem>>, vector<256x128xbf16>
    %c0_12 = arith.constant 0 : index
    %c0_13 = arith.constant 0 : index
    %17 = vector.load %arg7[%c0_12, %c0_13] : memref<128x128xbf16, #tpu.memory_space<vmem>>, vector<128x128xbf16>
    %cst_14 = arith.constant dense<0.000000e+00> : vector<256x128xf32>
    %18 = tpu.matmul %16, %17, %cst_14 {dimension_numbers = #tpu.dot_dimension_numbers<[1], [0], [0], [1], [0, 0, 1, 1], [], []>} : vector<256x128xbf16>, vector<128x128xbf16>, vector<256x128xf32> -> vector<256x128xf32>
    %19 = arith.addf %15, %18 : vector<256x128xf32>
    %c0_15 = arith.constant 0 : index
    %c0_16 = arith.constant 0 : index
    %20 = vector.load %arg8[%c0_15, %c0_16] : memref<256x128xf32, #tpu.memory_space<vmem>>, vector<256x128xf32>
    tpu.vector_store %arg8[%c0_15, %c0_16], %19 {strides = array<i32>} : memref<256x128xf32, #tpu.memory_space<vmem>>, vector<256x128xf32>,
    return
  }
  func.func @transform_0(%arg0: i32) -> (i32, i32) {
    %c0_i32 = arith.constant 0 : i32
    %c0_i32_0 = arith.constant 0 : i32
    return %arg0, %c0_i32 : i32, i32
  }
  func.func @transform_1(%arg0: i32) -> (i32, i32) {
    %c0_i32 = arith.constant 0 : i32
    %c0_i32_0 = arith.constant 0 : i32
    return %arg0, %c0_i32 : i32, i32
  }
  func.func @transform_2(%arg0: i32) -> (i32, i32) {
    %c0_i32 = arith.constant 0 : i32
    %c0_i32_0 = arith.constant 0 : i32
    %c0_i32_1 = arith.constant 0 : i32
    return %c0_i32, %c0_i32_0 : i32, i32
  }
  func.func @transform_3(%arg0: i32) -> (i32, i32) {
    %c0_i32 = arith.constant 0 : i32
    %c0_i32_0 = arith.constant 0 : i32
    %c0_i32_1 = arith.constant 0 : i32
    return %c0_i32, %c0_i32_0 : i32, i32
  }
  func.func @transform_4(%arg0: i32) -> (i32, i32) {
    %c0_i32 = arith.constant 0 : i32
    %c0_i32_0 = arith.constant 0 : i32
    %c0_i32_1 = arith.constant 0 : i32
    return %c0_i32, %c0_i32_0 : i32, i32
  }
  func.func @transform_5(%arg0: i32) -> (i32, i32) {
    %c0_i32 = arith.constant 0 : i32
    %c0_i32_0 = arith.constant 0 : i32
    %c0_i32_1 = arith.constant 0 : i32
    return %c0_i32, %c0_i32_0 : i32, i32
  }
  func.func @transform_6(%arg0: i32) -> (i32, i32) {
    %c0_i32 = arith.constant 0 : i32
    %c0_i32_0 = arith.constant 0 : i32
    %c0_i32_1 = arith.constant 0 : i32
    return %c0_i32, %c0_i32_0 : i32, i32
  }
  func.func @transform_7(%arg0: i32) -> (i32, i32) {
    %c0_i32 = arith.constant 0 : i32
    %c0_i32_0 = arith.constant 0 : i32
    return %arg0, %c0_i32 : i32, i32
  }
}

</mosaic_0001>

<bundles_post_ra>
// kernel: res_unit_forward.5
= control target key start
LH: loop header
LB: loop body
LE: loop exit
PB: predicated region body
PF: predicated region fallthrough
CT: control target
= control target key end

     0   :  { %s1385_s24 = smov 0   ;;  %s1642_s0 = inlined_call_operand.vmem [shape: bf16[512,128], index: 0, kind: input, shape index: {}]   ;;  %s1643_s1 = inlined_call_operand.vmem [shape: bf16[512,128], index: 1, kind: input, shape index: {}]   ;;  %s1644_s2 = inlined_call_operand.vmem [shape: f32[1,128], index: 2, kind: input, shape index: {}]   ;;  %s1645_s3 = inlined_call_operand.vmem [shape: f32[1,128], index: 3, kind: input, shape index: {}]   ;;  %s1646_s4 = inlined_call_operand.vmem [shape: bf16[128,128], index: 4, kind: input, shape index: {}]   ;;  %s1647_s5 = inlined_call_operand.vmem [shape: f32[1,128], index: 5, kind: input, shape index: {}]   ;;  %s1648_s6 = inlined_call_operand.vmem [shape: bf16[128,128], index: 6, kind: input, shape index: {}]   ;;  %s1649_s7 = inlined_call_operand.vmem [shape: f32[512,128], index: 7, kind: output, shape index: {}]  }
   0x1 LB: > { %s1058_s25 = sadd.s32 4294967295, %s1343_s24   ;;  %p1062_p0 = scmp.ge.s32.totalorder %s1343_s24, 1  ;;  %s1343_s24 = sphi %s1385_s24, %s17_s24  }
   0x2   : > { %p249_p1 = scmp.lt.s32.totalorder %s1343_s24, 3 }
   0x4   : > { %p250_p2 = pnand %p1062_p0, %p249_p1 }
   0x5   : > { %s1063_s30 = sshll.u32 (!%p250_p2), %s1058_s25, 5 }
   0x6   : > { %253 = sbr.rel (%p250_p2) target bundleno = 300 (0x12c), region = 48  ;;  %p287_p3 = scmp.lt.s32.totalorder (!%p250_p2), %s1063_s30, 63 }
   0xb   : > { %v1206_v0 = vld [vmem:[%s1646_s4 + $0x38] sm:$0xff]  ;;  %v1205_v2 = vld [vmem:[%s1646_s4 + $0x30] sm:$0xff]  ;;  %s1651_s30 = smov (!%p287_p3, %s1063_s30), 63  ;;  %v1204_v4 = vld [vmem:[%s1646_s4 + $0x28] sm:$0xff] }
   0xc   : > { %v1230_v1 = vld [vmem:[%s1648_s6 + $0x38] sm:$0xff]  ;;  %556 = vmatpush.bf16.msra.mxu0 %v1206_v0  ;;  %1310 = vmatpush.bf16.msra.mxu2 %v1206_v0  ;;  %v1229_v3 = vld [vmem:[%s1648_s6 + $0x30] sm:$0xff]  ;;  %s1064_s12 = sshll.u32 %s1651_s30, 2  ;;  %v1228_v5 = vld [vmem:[%s1648_s6 + $0x28] sm:$0xff]  ;;  %s1068_s29 = sshll.u32 %s1651_s30, 3 }
   0xd   : > { %837 = vmatpush.bf16.msra.mxu1 %v1230_v1  ;;  %1318 = vmatpush.bf16.msra.mxu3 %v1230_v1  ;;  %s1419_s19 = scalar_lea.vmem %s1642_s0, %s1064_s12  ;;  %v1203_v6 = vld [vmem:[%s1646_s4 + $0x20] sm:$0xff]  ;;  %v1202_v15 = vld [vmem:[%s1646_s4 + $0x18] sm:$0xff]  ;;  %v1201_v22 = vld [vmem:[%s1646_s4 + $0x10] sm:$0xff]  ;;  %s1478_s28 = scalar_lea.vmem %s1643_s1, %s1064_s12 }
   0xe   : > { %v1232_v7 = vld [vmem:[%s1419_s19] sm:$0xff]   ;;  %v1226_v16 = vld [vmem:[%s1648_s6 + $0x18] sm:$0xff]  ;;  %v1225_v23 = vld [vmem:[%s1648_s6 + $0x10] sm:$0xff]  ;;  %s1574_s10 = scalar_lea.vmem %s1649_s7, %s1068_s29 }
   0xf   : > { %v1302_v8 = vld [vmem:[%s1419_s19 + $0x40] sm:$0xff]   ;;  %v1233_v10 = vunpack.c.l.bf16 %v1232_v7  ;;  %v1234_v11 = vunpack.c.h.bf16 %v1232_v7  ;;  %v1200_v28 = vld [vmem:[%s1646_s4 + $0x8] sm:$0xff]  ;;  %v1296_v58 = vld [vmem:[%s1419_s19 + $0x10] sm:$0xff]  }
  0x10   : > { %557 = vmatpush.bf16.msra.mxu0 %v1205_v2  ;;  %1311 = vmatpush.bf16.msra.mxu2 %v1205_v2  ;;  %v1227_v9 = vld [vmem:[%s1648_s6 + $0x20] sm:$0xff]  ;;  %v1265_v13 = vunpack.c.l.bf16 %v1302_v8  ;;  %v1266_v14 = vunpack.c.h.bf16 %v1302_v8  ;;  %v1224_v29 = vld [vmem:[%s1648_s6 + $0x8] sm:$0xff]  ;;  %v1304_v59 = vld [vmem:[%s1419_s19 + $0x50] sm:$0xff]   ;;  %v1241_v60 = vunpack.c.l.bf16 %v1296_v58  ;;  %v1242_v61 = vunpack.c.h.bf16 %v1296_v58 }
  0x11   : > { %838 = vmatpush.bf16.msra.mxu1 %v1229_v3  ;;  %1319 = vmatpush.bf16.msra.mxu3 %v1229_v3  ;;  %v1432_v12 = vld [vmem:[%s1644_s2] ss:$0 sm:$0xff]  ;;  %v1295_v34 = vld [vmem:[%s1419_s19 + $0x8] sm:$0xff]   ;;  %v1273_v0 = vunpack.c.l.bf16 %v1304_v59  ;;  %v1274_v1 = vunpack.c.h.bf16 %v1304_v59 }
  0x12   : > { %v372_v17 = vmul.f32 %v1432_v12, %v1233_v10  ;;  %v373_v18 = vmul.f32 %v1432_v12, %v1234_v11  ;;  %v1445_v19 = vld [vmem:[%s1645_s3] ss:$0 sm:$0xff]  ;;  %v388_v20 = vmul.f32 %v1432_v12, %v1265_v13  ;;  %v389_v21 = vmul.f32 %v1432_v12, %v1266_v14  ;;  %v1303_v36 = vld [vmem:[%s1419_s19 + $0x48] sm:$0xff]  }
  0x13   : > { %v1199_v35 = vld [vmem:[%s1646_s4] sm:$0xff]  ;;  %v1237_v38 = vunpack.c.l.bf16 %v1295_v34  ;;  %v1238_v39 = vunpack.c.h.bf16 %v1295_v34  ;;  %v1269_v42 = vunpack.c.l.bf16 %v1303_v36  ;;  %v1270_v43 = vunpack.c.h.bf16 %v1303_v36  ;;  %v1208_v2 = vld [vmem:[%s1478_s28 + $0x8] sm:$0xff] }
  0x14   : > { %558 = vmatpush.bf16.msra.mxu0 %v1204_v4  ;;  %1312 = vmatpush.bf16.msra.mxu2 %v1204_v4  ;;  %v408_v24 = vadd.f32 %v1445_v19, %v372_v17  ;;  %v409_v25 = vadd.f32 %v1445_v19, %v373_v18  ;;  %v424_v26 = vadd.f32 %v1445_v19, %v388_v20  ;;  %v1223_v37 = vld [vmem:[%s1648_s6] sm:$0xff]  ;;  %v1216_v3 = vld [vmem:[%s1478_s28 + $0x48] sm:$0xff]  ;;  %v1297_v17 = vld [vmem:[%s1419_s19 + $0x18] sm:$0xff]  }
  0x15   : > { %839 = vmatpush.bf16.msra.mxu1 %v1228_v5  ;;  %1320 = vmatpush.bf16.msra.mxu3 %v1228_v5  ;;  %v425_v27 = vadd.f32 %v1445_v19, %v389_v21  ;;  %v1207_v44 = vld [vmem:[%s1478_s28] sm:$0xff]  ;;  %v374_v46 = vmul.f32 %v1432_v12, %v1237_v38  ;;  %v375_v47 = vmul.f32 %v1432_v12, %v1238_v39  ;;  %v1305_v18 = vld [vmem:[%s1419_s19 + $0x58] sm:$0xff]   ;;  %v1245_v21 = vunpack.c.l.bf16 %v1297_v17 }
  0x16   : > { %v440_v30 = vmax.f32 %v408_v24, 0.0  ;;  %v441_v31 = vmax.f32 %v409_v25, 0.0  ;;  %v456_v32 = vmax.f32 %v424_v26, 0.0  ;;  %v1215_v45 = vld [vmem:[%s1478_s28 + $0x40] sm:$0xff]  ;;  %v390_v48 = vmul.f32 %v1432_v12, %v1269_v42  ;;  %v1209_v26 = vld [vmem:[%s1478_s28 + $0x10] sm:$0xff] }
  0x17   : > { %v457_v33 = vmax.f32 %v425_v27, 0.0  ;;  %v391_v49 = vmul.f32 %v1432_v12, %v1270_v43  ;;  %v410_v50 = vadd.f32 %v1445_v19, %v374_v46  ;;  %v411_v51 = vadd.f32 %v1445_v19, %v375_v47  ;;  %v1217_v27 = vld [vmem:[%s1478_s28 + $0x50] sm:$0xff] }
  0x18   : > { %559 = vmatpush.bf16.msra.mxu0 %v1203_v6  ;;  %1313 = vmatpush.bf16.msra.mxu2 %v1203_v6  ;;  %v472_v40 = vpack.c.bf16 %v441_v31, %v440_v30  ;;  %v426_v52 = vadd.f32 %v1445_v19, %v390_v48  ;;  %v376_v4 = vmul.f32 %v1432_v12, %v1241_v60  ;;  %v1277_v24 = vunpack.c.l.bf16 %v1305_v18  ;;  %v1210_v48 = vld [vmem:[%s1478_s28 + $0x18] sm:$0xff] }
  0x19   : > { %840 = vmatpush.bf16.msra.mxu1 %v1227_v9  ;;  %1321 = vmatpush.bf16.msra.mxu3 %v1227_v9  ;;  %v480_v41 = vpack.c.bf16 %v457_v33, %v456_v32  ;;  %v427_v53 = vadd.f32 %v1445_v19, %v391_v49  ;;  %v442_v54 = vmax.f32 %v410_v50, 0.0  ;;  %v443_v55 = vmax.f32 %v411_v51, 0.0  ;;  %v1218_v49 = vld [vmem:[%s1478_s28 + $0x58] sm:$0xff] }
  0x1a   : > { %v458_v56 = vmax.f32 %v426_v52, 0.0  ;;  %v377_v5 = vmul.f32 %v1432_v12, %v1242_v61  ;;  %v392_v6 = vmul.f32 %v1432_v12, %v1273_v0  ;;  %v393_v7 = vmul.f32 %v1432_v12, %v1274_v1 }
  0x1b   : > { %v459_v57 = vmax.f32 %v427_v53, 0.0  ;;  %v473_v62 = vpack.c.bf16 %v443_v55, %v442_v54  ;;  %v412_v8 = vadd.f32 %v1445_v19, %v376_v4  ;;  %v1278_v25 = vunpack.c.h.bf16 %v1305_v18 }
  0x1c   : > { %560 = vmatpush.bf16.msra.mxu0 %v1202_v15  ;;  %1314 = vmatpush.bf16.msra.mxu2 %v1202_v15  ;;  %v413_v9 = vadd.f32 %v1445_v19, %v377_v5  ;;  %v428_v10 = vadd.f32 %v1445_v19, %v392_v6  ;;  %v429_v11 = vadd.f32 %v1445_v19, %v393_v7  ;;  %v1211_v6 = vld [vmem:[%s1478_s28 + $0x20] sm:$0xff] }
  0x1d   : > { %841 = vmatpush.bf16.msra.mxu1 %v1226_v16  ;;  %1322 = vmatpush.bf16.msra.mxu3 %v1226_v16  ;;  %v481_v63 = vpack.c.bf16 %v459_v57, %v458_v56  ;;  %v444_v13 = vmax.f32 %v412_v8, 0.0  ;;  %v394_v30 = vmul.f32 %v1432_v12, %v1277_v24  ;;  %v395_v31 = vmul.f32 %v1432_v12, %v1278_v25  ;;  %v1219_v7 = vld [vmem:[%s1478_s28 + $0x60] sm:$0xff] }
  0x1e   : > { %v445_v14 = vmax.f32 %v413_v9, 0.0  ;;  %v460_v15 = vmax.f32 %v428_v10, 0.0  ;;  %v461_v16 = vmax.f32 %v429_v11, 0.0 }
  0x1f   : > { %v430_v34 = vadd.f32 %v1445_v19, %v394_v30  ;;  %v1212_v30 = vld [vmem:[%s1478_s28 + $0x28] sm:$0xff] }
  0x20   : > { %561 = vmatpush.bf16.msra.mxu0 %v1201_v22  ;;  %1315 = vmatpush.bf16.msra.mxu2 %v1201_v22  ;;  %v474_v20 = vpack.c.bf16 %v445_v14, %v444_v13  ;;  %v482_v22 = vpack.c.bf16 %v461_v16, %v460_v15 }
  0x21   : > { %842 = vmatpush.bf16.msra.mxu1 %v1225_v23  ;;  %1323 = vmatpush.bf16.msra.mxu3 %v1225_v23  ;;  %v1246_v23 = vunpack.c.h.bf16 %v1297_v17  ;;  %v462_v38 = vmax.f32 %v430_v34, 0.0 }
  0x24   : > { %562 = vmatpush.bf16.msra.mxu0 %v1200_v28  ;;  %1316 = vmatpush.bf16.msra.mxu2 %v1200_v28  ;;  %v378_v28 = vmul.f32 %v1432_v12, %v1245_v21 }
  0x25   : > { %843 = vmatpush.bf16.msra.mxu1 %v1224_v29  ;;  %1324 = vmatpush.bf16.msra.mxu3 %v1224_v29  ;;  %v379_v29 = vmul.f32 %v1432_v12, %v1246_v23  ;;  %v1308_v23 = vld [vmem:[%s1419_s19 + $0x70] sm:$0xff]  }
  0x26   : > { %v414_v32 = vadd.f32 %v1445_v19, %v378_v28  ;;  %v1289_v28 = vunpack.c.l.bf16 %v1308_v23 }
  0x27   : > { %v415_v33 = vadd.f32 %v1445_v19, %v379_v29  ;;  %v1290_v29 = vunpack.c.h.bf16 %v1308_v23 }
  0x28   : > { %563 = vmatpush.bf16.msra.mxu0 %v1199_v35  ;;  %1317 = vmatpush.bf16.msra.mxu2 %v1199_v35  ;;  %v431_v35 = vadd.f32 %v1445_v19, %v395_v31  ;;  %v446_v36 = vmax.f32 %v414_v32, 0.0  ;;  %v1220_v31 = vld [vmem:[%s1478_s28 + $0x68] sm:$0xff]  ;;  %v400_v34 = vmul.f32 %v1432_v12, %v1289_v28 }
  0x29   : > { %844 = vmatpush.bf16.msra.mxu1 %v1223_v37  ;;  %1325 = vmatpush.bf16.msra.mxu3 %v1223_v37  ;;  %v447_v37 = vmax.f32 %v415_v33, 0.0 }
  0x2a   : > { %v463_v39 = vmax.f32 %v431_v35, 0.0  ;;  %v401_v35 = vmul.f32 %v1432_v12, %v1290_v29 }
  0x2b   : > { %564 = vmatmul.bf16.vlgmr.msra.gmra.mxu0 %v472_v40  ;;  %604 = vmatmul.bf16.vlgmr.msra.gmra.mxu2 %v480_v41  ;;  %v1298_v40 = vld [vmem:[%s1419_s19 + $0x20] sm:$0xff]  }
  0x2c   : > { %845 = vmatmul.bf16.vlgmr.msra.gmra.mxu1 %v1207_v44  ;;  %885 = vmatmul.bf16.vlgmr.msra.gmra.mxu3 %v1215_v45  ;;  %v1306_v41 = vld [vmem:[%s1419_s19 + $0x60] sm:$0xff]   ;;  %v1249_v42 = vunpack.c.l.bf16 %v1298_v40  ;;  %v1250_v43 = vunpack.c.h.bf16 %v1298_v40  ;;  %v475_v44 = vpack.c.bf16 %v447_v37, %v446_v36  ;;  %v483_v45 = vpack.c.bf16 %v463_v39, %v462_v38 }
  0x2d   : > { %v1281_v46 = vunpack.c.l.bf16 %v1306_v41  ;;  %v1282_v47 = vunpack.c.h.bf16 %v1306_v41  ;;  %v436_v38 = vadd.f32 %v1445_v19, %v400_v34  ;;  %v437_v39 = vadd.f32 %v1445_v19, %v401_v35 }
  0x2e   : > { %v380_v50 = vmul.f32 %v1432_v12, %v1249_v42  ;;  %v381_v51 = vmul.f32 %v1432_v12, %v1250_v43 }
  0x2f   : > { %v396_v52 = vmul.f32 %v1432_v12, %v1281_v46  ;;  %v397_v53 = vmul.f32 %v1432_v12, %v1282_v47  ;;  %v468_v42 = vmax.f32 %v436_v38, 0.0  ;;  %v469_v43 = vmax.f32 %v437_v39, 0.0 }
  0x30   : > { %v416_v54 = vadd.f32 %v1445_v19, %v380_v50  ;;  %v417_v55 = vadd.f32 %v1445_v19, %v381_v51 }
  0x31   : > { %v432_v56 = vadd.f32 %v1445_v19, %v396_v52  ;;  %v433_v57 = vadd.f32 %v1445_v19, %v397_v53  ;;  %v1213_v52 = vld [vmem:[%s1478_s28 + $0x30] sm:$0xff] }
  0x32   : > { %v448_v58 = vmax.f32 %v416_v54, 0.0  ;;  %v449_v59 = vmax.f32 %v417_v55, 0.0  ;;  %v1221_v53 = vld [vmem:[%s1478_s28 + $0x70] sm:$0xff] }
  0x33   : > { %v464_v60 = vmax.f32 %v432_v56, 0.0  ;;  %v465_v61 = vmax.f32 %v433_v57, 0.0 }
  0x34   : > { %v476_v0 = vpack.c.bf16 %v449_v59, %v448_v58 }
  0x3b   : > { %569 = vmatmul.bf16.gmra.mxu0 %v473_v62  ;;  %609 = vmatmul.bf16.gmra.mxu2 %v481_v63  ;;  %v1299_v62 = vld [vmem:[%s1419_s19 + $0x28] sm:$0xff]  }
  0x3c   : > { %850 = vmatmul.bf16.gmra.mxu1 %v1208_v2  ;;  %890 = vmatmul.bf16.gmra.mxu3 %v1216_v3  ;;  %v1307_v63 = vld [vmem:[%s1419_s19 + $0x68] sm:$0xff]   ;;  %v1253_v1 = vunpack.c.l.bf16 %v1299_v62  ;;  %v484_v2 = vpack.c.bf16 %v465_v61, %v464_v60  ;;  %v1254_v3 = vunpack.c.h.bf16 %v1299_v62 }
  0x3d   : > { %v1285_v4 = vunpack.c.l.bf16 %v1307_v63  ;;  %v1286_v5 = vunpack.c.h.bf16 %v1307_v63 }
  0x3e   : > { %v382_v8 = vmul.f32 %v1432_v12, %v1253_v1  ;;  %v383_v9 = vmul.f32 %v1432_v12, %v1254_v3 }
  0x3f   : > { %v398_v10 = vmul.f32 %v1432_v12, %v1285_v4  ;;  %v399_v11 = vmul.f32 %v1432_v12, %v1286_v5  ;;  %v1214_v4 = vld [vmem:[%s1478_s28 + $0x38] sm:$0xff] }
  0x40   : > { %v418_v13 = vadd.f32 %v1445_v19, %v382_v8  ;;  %v419_v14 = vadd.f32 %v1445_v19, %v383_v9  ;;  %v1222_v5 = vld [vmem:[%s1478_s28 + $0x78] sm:$0xff] }
  0x41   : > { %v434_v15 = vadd.f32 %v1445_v19, %v398_v10  ;;  %v435_v16 = vadd.f32 %v1445_v19, %v399_v11 }
  0x42   : > { %v450_v17 = vmax.f32 %v418_v13, 0.0  ;;  %v451_v18 = vmax.f32 %v419_v14, 0.0 }
  0x43   : > { %v467_v21 = vmax.f32 %v435_v16, 0.0 }
  0x4b   : > { %574 = vmatmul.bf16.gmra.mxu0 %v474_v20  ;;  %614 = vmatmul.bf16.gmra.mxu2 %v482_v22  ;;  %v466_v20 = vmax.f32 %v434_v15, 0.0  ;;  %v1300_v22 = vld [vmem:[%s1419_s19 + $0x30] sm:$0xff]  }
  0x4c   : > { %855 = vmatmul.bf16.gmra.mxu1 %v1209_v26  ;;  %895 = vmatmul.bf16.gmra.mxu3 %v1217_v27  ;;  %v1257_v24 = vunpack.c.l.bf16 %v1300_v22  ;;  %v1258_v25 = vunpack.c.h.bf16 %v1300_v22  ;;  %v477_v26 = vpack.c.bf16 %v451_v18, %v450_v17 }
  0x4d   : > { %v485_v27 = vpack.c.bf16 %v467_v21, %v466_v20 }
  0x4e   : > { %v384_v32 = vmul.f32 %v1432_v12, %v1257_v24  ;;  %v385_v33 = vmul.f32 %v1432_v12, %v1258_v25 }
  0x50   : > { %v420_v36 = vadd.f32 %v1445_v19, %v384_v32  ;;  %v421_v37 = vadd.f32 %v1445_v19, %v385_v33 }
  0x52   : > { %v452_v40 = vmax.f32 %v420_v36, 0.0  ;;  %v453_v41 = vmax.f32 %v421_v37, 0.0 }
  0x54   : > { %v478_v46 = vpack.c.bf16 %v453_v41, %v452_v40 }
  0x5b   : > { %579 = vmatmul.bf16.gmra.mxu0 %v475_v44  ;;  %619 = vmatmul.bf16.gmra.mxu2 %v483_v45  ;;  %v1301_v44 = vld [vmem:[%s1419_s19 + $0x38] sm:$0xff]  }
  0x5c   : > { %860 = vmatmul.bf16.gmra.mxu1 %v1210_v48  ;;  %900 = vmatmul.bf16.gmra.mxu3 %v1218_v49  ;;  %v1309_v45 = vld [vmem:[%s1419_s19 + $0x78] sm:$0xff]   ;;  %v1261_v47 = vunpack.c.l.bf16 %v1301_v44  ;;  %v486_v48 = vpack.c.bf16 %v469_v43, %v468_v42  ;;  %v1262_v49 = vunpack.c.h.bf16 %v1301_v44 }
  0x5d   : > { %v1293_v50 = vunpack.c.l.bf16 %v1309_v45  ;;  %v1294_v51 = vunpack.c.h.bf16 %v1309_v45 }
  0x5e   : > { %v386_v54 = vmul.f32 %v1432_v12, %v1261_v47  ;;  %v387_v55 = vmul.f32 %v1432_v12, %v1262_v49 }
  0x5f   : > { %v402_v56 = vmul.f32 %v1432_v12, %v1293_v50  ;;  %v403_v57 = vmul.f32 %v1432_v12, %v1294_v51  ;;  %v1567_v12 = vld [vmem:[%s1647_s5] ss:$0 sm:$0xff] }
  0x60   : > { %v422_v58 = vadd.f32 %v1445_v19, %v386_v54  ;;  %v423_v59 = vadd.f32 %v1445_v19, %v387_v55 }
  0x61   : > { %v438_v60 = vadd.f32 %v1445_v19, %v402_v56  ;;  %v439_v61 = vadd.f32 %v1445_v19, %v403_v57 }
  0x62   : > { %v454_v62 = vmax.f32 %v422_v58, 0.0  ;;  %v455_v63 = vmax.f32 %v423_v59, 0.0 }
  0x63   : > { %v471_v1 = vmax.f32 %v439_v61, 0.0 }
  0x6b   : > { %584 = vmatmul.bf16.gmra.mxu0 %v476_v0  ;;  %624 = vmatmul.bf16.gmra.mxu2 %v484_v2  ;;  %v470_v0 = vmax.f32 %v438_v60, 0.0  ;;  %v479_v2 = vpack.c.bf16 %v455_v63, %v454_v62 }
  0x6c   : > { %865 = vmatmul.bf16.gmra.mxu1 %v1211_v6  ;;  %905 = vmatmul.bf16.gmra.mxu3 %v1219_v7 }
  0x6d   : > { %v487_v3 = vpack.c.bf16 %v471_v1, %v470_v0 }
  0x7b   : > { %589 = vmatmul.bf16.gmra.mxu0 %v477_v26  ;;  %629 = vmatmul.bf16.gmra.mxu2 %v485_v27 }
  0x7c   : > { %870 = vmatmul.bf16.gmra.mxu1 %v1212_v30  ;;  %910 = vmatmul.bf16.gmra.mxu3 %v1220_v31 }
  0x8b   : > { %594 = vmatmul.bf16.gmra.mxu0 %v478_v46  ;;  %634 = vmatmul.bf16.gmra.mxu2 %v486_v48 }
  0x8c   : > { %875 = vmatmul.bf16.gmra.mxu1 %v1213_v52  ;;  %915 = vmatmul.bf16.gmra.mxu3 %v1221_v53 }
  0x9b   : > { %599 = vmatmul.bf16.gmra.mxu0 %v479_v2  ;;  %639 = vmatmul.bf16.gmra.mxu2 %v487_v3 }
  0x9c   : > { %880 = vmatmul.bf16.gmra.mxu1 %v1214_v4  ;;  %920 = vmatmul.bf16.gmra.mxu3 %v1222_v5 }
  0xa8   : > { %v565_v6 = vpop.f32.mrf.mxu0 }
  0xa9   : > { %v566_v19 = vadd.f32 %v1567_v12, %v565_v6  ;;  %v846_v7 = vpop.f32.mrf.mxu1 }
  0xab   : > { %v926_v8 = vadd.f32 %v846_v7, %v566_v19 }
  0xad   : > { %958 = vst [vmem:[%s1574_s10] sm:$0xff] %v926_v8 }
  0xae   : > { %v605_v9 = vpop.f32.mrf.mxu2 }
  0xaf   : > { %v606_v10 = vadd.f32 %v1567_v12, %v605_v9  ;;  %v886_v11 = vpop.f32.mrf.mxu3 }
  0xb0   : > { %v567_v13 = vpop.f32.mrf.mxu0 }
  0xb1   : > { %v942_v14 = vadd.f32 %v886_v11, %v606_v10  ;;  %v568_v15 = vadd.f32 %v1567_v12, %v567_v13  ;;  %v848_v16 = vpop.f32.mrf.mxu1 }
  0xb3   : > { %974 = vst [vmem:[%s1574_s10 + $0x80] sm:$0xff] %v942_v14  ;;  %v927_v17 = vadd.f32 %v848_v16, %v568_v15 }
  0xb5   : > { %959 = vst [vmem:[%s1574_s10 + $0x8] sm:$0xff] %v927_v17 }
  0xb6   : > { %v607_v18 = vpop.f32.mrf.mxu2 }
  0xb7   : > { %v608_v20 = vadd.f32 %v1567_v12, %v607_v18  ;;  %v888_v21 = vpop.f32.mrf.mxu3 }
  0xb8   : > { %v570_v22 = vpop.f32.mrf.mxu0 }
  0xb9   : > { %v943_v23 = vadd.f32 %v888_v21, %v608_v20  ;;  %v571_v24 = vadd.f32 %v1567_v12, %v570_v22  ;;  %v851_v25 = vpop.f32.mrf.mxu1 }
  0xbb   : > { %975 = vst [vmem:[%s1574_s10 + $0x88] sm:$0xff] %v943_v23  ;;  %v928_v26 = vadd.f32 %v851_v25, %v571_v24 }
  0xbd   : > { %960 = vst [vmem:[%s1574_s10 + $0x10] sm:$0xff] %v928_v26 }
  0xbe   : > { %v610_v27 = vpop.f32.mrf.mxu2 }
  0xbf   : > { %v611_v28 = vadd.f32 %v1567_v12, %v610_v27  ;;  %v891_v29 = vpop.f32.mrf.mxu3 }
  0xc0   : > { %v572_v30 = vpop.f32.mrf.mxu0 }
  0xc1   : > { %v944_v31 = vadd.f32 %v891_v29, %v611_v28  ;;  %v573_v32 = vadd.f32 %v1567_v12, %v572_v30  ;;  %v853_v33 = vpop.f32.mrf.mxu1 }
  0xc3   : > { %976 = vst [vmem:[%s1574_s10 + $0x90] sm:$0xff] %v944_v31  ;;  %v929_v34 = vadd.f32 %v853_v33, %v573_v32 }
  0xc5   : > { %961 = vst [vmem:[%s1574_s10 + $0x18] sm:$0xff] %v929_v34 }
  0xc6   : > { %v612_v35 = vpop.f32.mrf.mxu2 }
  0xc7   : > { %v613_v36 = vadd.f32 %v1567_v12, %v612_v35  ;;  %v893_v37 = vpop.f32.mrf.mxu3 }
  0xc8   : > { %v575_v38 = vpop.f32.mrf.mxu0 }
  0xc9   : > { %v945_v39 = vadd.f32 %v893_v37, %v613_v36  ;;  %v576_v40 = vadd.f32 %v1567_v12, %v575_v38  ;;  %v856_v41 = vpop.f32.mrf.mxu1 }
  0xcb   : > { %977 = vst [vmem:[%s1574_s10 + $0x98] sm:$0xff] %v945_v39  ;;  %v930_v42 = vadd.f32 %v856_v41, %v576_v40 }
  0xcd   : > { %962 = vst [vmem:[%s1574_s10 + $0x20] sm:$0xff] %v930_v42 }
  0xce   : > { %v615_v43 = vpop.f32.mrf.mxu2 }
  0xcf   : > { %v616_v44 = vadd.f32 %v1567_v12, %v615_v43  ;;  %v896_v45 = vpop.f32.mrf.mxu3 }
  0xd0   : > { %v577_v46 = vpop.f32.mrf.mxu0 }
  0xd1   : > { %v946_v47 = vadd.f32 %v896_v45, %v616_v44  ;;  %v578_v48 = vadd.f32 %v1567_v12, %v577_v46  ;;  %v858_v49 = vpop.f32.mrf.mxu1 }
  0xd3   : > { %978 = vst [vmem:[%s1574_s10 + $0xa0] sm:$0xff] %v946_v47  ;;  %v931_v50 = vadd.f32 %v858_v49, %v578_v48 }
  0xd5   : > { %963 = vst [vmem:[%s1574_s10 + $0x28] sm:$0xff] %v931_v50 }
  0xd6   : > { %v617_v51 = vpop.f32.mrf.mxu2 }
  0xd7   : > { %v618_v52 = vadd.f32 %v1567_v12, %v617_v51  ;;  %v898_v53 = vpop.f32.mrf.mxu3 }
  0xd8   : > { %v580_v54 = vpop.f32.mrf.mxu0 }
  0xd9   : > { %v947_v55 = vadd.f32 %v898_v53, %v618_v52  ;;  %v581_v56 = vadd.f32 %v1567_v12, %v580_v54  ;;  %v861_v57 = vpop.f32.mrf.mxu1 }
  0xdb   : > { %979 = vst [vmem:[%s1574_s10 + $0xa8] sm:$0xff] %v947_v55  ;;  %v932_v58 = vadd.f32 %v861_v57, %v581_v56 }
  0xdd   : > { %964 = vst [vmem:[%s1574_s10 + $0x30] sm:$0xff] %v932_v58 }
  0xde   : > { %v620_v59 = vpop.f32.mrf.mxu2 }
  0xdf   : > { %v621_v60 = vadd.f32 %v1567_v12, %v620_v59  ;;  %v901_v61 = vpop.f32.mrf.mxu3 }
  0xe0   : > { %v582_v62 = vpop.f32.mrf.mxu0 }
  0xe1   : > { %v948_v63 = vadd.f32 %v901_v61, %v621_v60  ;;  %v583_v0 = vadd.f32 %v1567_v12, %v582_v62  ;;  %v863_v1 = vpop.f32.mrf.mxu1 }
  0xe3   : > { %980 = vst [vmem:[%s1574_s10 + $0xb0] sm:$0xff] %v948_v63  ;;  %v933_v2 = vadd.f32 %v863_v1, %v583_v0 }
  0xe5   : > { %965 = vst [vmem:[%s1574_s10 + $0x38] sm:$0xff] %v933_v2 }
  0xe6   : > { %v622_v3 = vpop.f32.mrf.mxu2 }
  0xe7   : > { %v623_v4 = vadd.f32 %v1567_v12, %v622_v3  ;;  %v903_v5 = vpop.f32.mrf.mxu3 }
  0xe8   : > { %v585_v6 = vpop.f32.mrf.mxu0 }
  0xe9   : > { %v949_v19 = vadd.f32 %v903_v5, %v623_v4  ;;  %v586_v7 = vadd.f32 %v1567_v12, %v585_v6  ;;  %v866_v8 = vpop.f32.mrf.mxu1 }
  0xeb   : > { %981 = vst [vmem:[%s1574_s10 + $0xb8] sm:$0xff] %v949_v19  ;;  %v934_v9 = vadd.f32 %v866_v8, %v586_v7 }
  0xed   : > { %966 = vst [vmem:[%s1574_s10 + $0x40] sm:$0xff] %v934_v9 }
  0xee   : > { %v625_v10 = vpop.f32.mrf.mxu2 }
  0xef   : > { %v626_v11 = vadd.f32 %v1567_v12, %v625_v10  ;;  %v906_v13 = vpop.f32.mrf.mxu3 }
  0xf0   : > { %v587_v14 = vpop.f32.mrf.mxu0 }
  0xf1   : > { %v950_v15 = vadd.f32 %v906_v13, %v626_v11  ;;  %v588_v16 = vadd.f32 %v1567_v12, %v587_v14  ;;  %v868_v17 = vpop.f32.mrf.mxu1 }
  0xf3   : > { %982 = vst [vmem:[%s1574_s10 + $0xc0] sm:$0xff] %v950_v15  ;;  %v935_v18 = vadd.f32 %v868_v17, %v588_v16 }
  0xf5   : > { %967 = vst [vmem:[%s1574_s10 + $0x48] sm:$0xff] %v935_v18 }
  0xf6   : > { %v627_v20 = vpop.f32.mrf.mxu2 }
  0xf7   : > { %v628_v21 = vadd.f32 %v1567_v12, %v627_v20  ;;  %v908_v22 = vpop.f32.mrf.mxu3 }
  0xf8   : > { %v590_v23 = vpop.f32.mrf.mxu0 }
  0xf9   : > { %v951_v24 = vadd.f32 %v908_v22, %v628_v21  ;;  %v591_v25 = vadd.f32 %v1567_v12, %v590_v23  ;;  %v871_v26 = vpop.f32.mrf.mxu1 }
  0xfb   : > { %983 = vst [vmem:[%s1574_s10 + $0xc8] sm:$0xff] %v951_v24  ;;  %v936_v27 = vadd.f32 %v871_v26, %v591_v25 }
  0xfd   : > { %968 = vst [vmem:[%s1574_s10 + $0x50] sm:$0xff] %v936_v27 }
  0xfe   : > { %v630_v28 = vpop.f32.mrf.mxu2 }
  0xff   : > { %v631_v29 = vadd.f32 %v1567_v12, %v630_v28  ;;  %v911_v30 = vpop.f32.mrf.mxu3 }
 0x100   : > { %v592_v31 = vpop.f32.mrf.mxu0 }
 0x101   : > { %v952_v32 = vadd.f32 %v911_v30, %v631_v29  ;;  %v593_v33 = vadd.f32 %v1567_v12, %v592_v31  ;;  %v873_v34 = vpop.f32.mrf.mxu1 }
 0x103   : > { %984 = vst [vmem:[%s1574_s10 + $0xd0] sm:$0xff] %v952_v32  ;;  %v937_v35 = vadd.f32 %v873_v34, %v593_v33 }
 0x105   : > { %969 = vst [vmem:[%s1574_s10 + $0x58] sm:$0xff] %v937_v35 }
 0x106   : > { %v632_v36 = vpop.f32.mrf.mxu2 }
 0x107   : > { %v633_v37 = vadd.f32 %v1567_v12, %v632_v36  ;;  %v913_v38 = vpop.f32.mrf.mxu3 }
 0x108   : > { %v595_v39 = vpop.f32.mrf.mxu0 }
 0x109   : > { %v953_v40 = vadd.f32 %v913_v38, %v633_v37  ;;  %v596_v41 = vadd.f32 %v1567_v12, %v595_v39  ;;  %v876_v42 = vpop.f32.mrf.mxu1 }
 0x10b   : > { %985 = vst [vmem:[%s1574_s10 + $0xd8] sm:$0xff] %v953_v40  ;;  %v938_v43 = vadd.f32 %v876_v42, %v596_v41 }
 0x10d   : > { %970 = vst [vmem:[%s1574_s10 + $0x60] sm:$0xff] %v938_v43 }
 0x10e   : > { %v635_v44 = vpop.f32.mrf.mxu2 }
 0x10f   : > { %v636_v45 = vadd.f32 %v1567_v12, %v635_v44  ;;  %v916_v46 = vpop.f32.mrf.mxu3 }
 0x110   : > { %v597_v47 = vpop.f32.mrf.mxu0 }
 0x111   : > { %v954_v48 = vadd.f32 %v916_v46, %v636_v45  ;;  %v598_v49 = vadd.f32 %v1567_v12, %v597_v47  ;;  %v878_v50 = vpop.f32.mrf.mxu1 }
 0x113   : > { %986 = vst [vmem:[%s1574_s10 + $0xe0] sm:$0xff] %v954_v48  ;;  %v939_v51 = vadd.f32 %v878_v50, %v598_v49 }
 0x115   : > { %971 = vst [vmem:[%s1574_s10 + $0x68] sm:$0xff] %v939_v51 }
 0x116   : > { %v637_v52 = vpop.f32.mrf.mxu2 }
 0x117   : > { %v638_v53 = vadd.f32 %v1567_v12, %v637_v52  ;;  %v918_v54 = vpop.f32.mrf.mxu3 }
 0x118   : > { %v600_v55 = vpop.f32.mrf.mxu0 }
 0x119   : > { %v955_v56 = vadd.f32 %v918_v54, %v638_v53  ;;  %v601_v57 = vadd.f32 %v1567_v12, %v600_v55  ;;  %v881_v58 = vpop.f32.mrf.mxu1 }
 0x11b   : > { %987 = vst [vmem:[%s1574_s10 + $0xe8] sm:$0xff] %v955_v56  ;;  %v940_v59 = vadd.f32 %v881_v58, %v601_v57 }
 0x11d   : > { %972 = vst [vmem:[%s1574_s10 + $0x70] sm:$0xff] %v940_v59 }
 0x11e   : > { %v640_v60 = vpop.f32.mrf.mxu2 }
 0x11f   : > { %v641_v61 = vadd.f32 %v1567_v12, %v640_v60  ;;  %v921_v62 = vpop.f32.mrf.mxu3 }
 0x120   : > { %v602_v63 = vpop.f32.mrf.mxu0 }
 0x121   : > { %v956_v0 = vadd.f32 %v921_v62, %v641_v61  ;;  %v603_v1 = vadd.f32 %v1567_v12, %v602_v63  ;;  %v883_v2 = vpop.f32.mrf.mxu1 }
 0x123   : > { %988 = vst [vmem:[%s1574_s10 + $0xf0] sm:$0xff] %v956_v0  ;;  %v941_v3 = vadd.f32 %v883_v2, %v603_v1 }
 0x125   : > { %973 = vst [vmem:[%s1574_s10 + $0x78] sm:$0xff] %v941_v3 }
 0x126   : > { %v642_v4 = vpop.f32.mrf.mxu2 }
 0x127   : > { %v643_v5 = vadd.f32 %v1567_v12, %v642_v4  ;;  %v923_v6 = vpop.f32.mrf.mxu3 }
 0x129   : > { %v957_v19 = vadd.f32 %v923_v6, %v643_v5 }
 0x12b   : > { %989 = vst [vmem:[%s1574_s10 + $0xf8] sm:$0xff] %v957_v19 }
 0x12c PF: > { %s17_s24 = sadd.s32 1, %s1343_s24  }
 0x12d   : > { %p14_p4 = scmp.ge.s32.totalorder %s17_s24, 4  }
 0x12f   :  { %16 = sbr.rel (!%p14_p4) target bundleno = 1 (0x1), region = 81 }

// kernel: res_unit_forward.3
= control target key start
LH: loop header
LB: loop body
LE: loop exit
PB: predicated region body
PF: predicated region fallthrough
CT: control target
= control target key end

     0   :  { %s1170_s21 = smov 0   ;;  %s1493_s0 = inlined_call_operand.vmem [shape: bf16[512,128], index: 0, kind: input, shape index: {}]   ;;  %s1494_s1 = inlined_call_operand.vmem [shape: f32[1,128], index: 1, kind: input, shape index: {}]   ;;  %s1495_s2 = inlined_call_operand.vmem [shape: f32[1,128], index: 2, kind: input, shape index: {}]   ;;  %s1496_s3 = inlined_call_operand.vmem [shape: bf16[128,128], index: 3, kind: input, shape index: {}]   ;;  %s1497_s4 = inlined_call_operand.vmem [shape: f32[1,128], index: 4, kind: input, shape index: {}]   ;;  %s1498_s5 = inlined_call_operand.vmem [shape: bf16[512,128], index: 5, kind: output, shape index: {0}]   ;;  %s1499_s6 = inlined_call_operand.vmem [shape: f32[2,2,128], index: 6, kind: output, shape index: {1}]  }
   0x1 LB: > { %s1176_s22 = sadd.s32 4294967295, %s1133_s21   ;;  %p870_p0 = scmp.ge.s32.totalorder %s1133_s21, 1  ;;  %s1133_s21 = sphi %s1170_s21, %s17_s21  }
   0x2   : > { %p216_p1 = scmp.lt.s32.totalorder %s1133_s21, 3 }
   0x4   : > { %p217_p2 = pnand %p870_p0, %p216_p1 }
   0x5   : > { %s871_s25 = sshll.u32 (!%p217_p2), %s1176_s22, 5  ;;  %p262_p4 = scmp.lt.s32.totalorder (!%p217_p2), %s1176_s22, 1 }
   0x6   : > { %220 = sbr.rel (%p217_p2) target bundleno = 292 (0x124), region = 40  ;;  %p251_p3 = scmp.lt.s32.totalorder (!%p217_p2), %s871_s25, 63 }
   0xb   : > { %v917_v0 = vld [vmem:[%s1496_s3 + $0x38] sm:$0xff]  ;;  %v916_v1 = vld [vmem:[%s1496_s3 + $0x30] sm:$0xff]  ;;  %s1501_s25 = smov (!%p251_p3, %s871_s25), 63  ;;  %v915_v2 = vld [vmem:[%s1496_s3 + $0x28] sm:$0xff]  ;;  %s1503_s22 = smov (!%p262_p4, %s1176_s22), 1 }
   0xc   : > { %518 = vmatpush.bf16.msra.mxu0 %v917_v0  ;;  %1092 = vmatpush.bf16.msra.mxu1 %v917_v0  ;;  %s872_s28 = sshll.u32 %s1501_s25, 2  ;;  %v914_v4 = vld [vmem:[%s1496_s3 + $0x20] sm:$0xff]  ;;  %v913_v12 = vld [vmem:[%s1496_s3 + $0x18] sm:$0xff]  ;;  %v912_v20 = vld [vmem:[%s1496_s3 + $0x10] sm:$0xff]  ;;  %s875_s25 = sshll.u32 %s1503_s22, 1 }
   0xd   : > { %1093 = vmatpush.bf16.msra.mxu2 %v917_v0  ;;  %1094 = vmatpush.bf16.msra.mxu3 %v917_v0  ;;  %s1198_s9 = scalar_lea.vmem %s1493_s0, %s872_s28  ;;  %v1209_v9 = vld [vmem:[%s1494_s1] ss:$0 sm:$0xff]  ;;  %v911_v27 = vld [vmem:[%s1496_s3 + $0x8] sm:$0xff]  ;;  %s1323_s8 = scalar_lea.vmem %s1498_s5, %s872_s28 }
   0xe   : > { %v919_v3 = vld [vmem:[%s1198_s9] sm:$0xff]   ;;  %v1062_v32 = vld [vmem:[%s1198_s9 + $0x8] sm:$0xff]   ;;  %s265_s10 = scalar_lea.vmem %s1499_s6, %s875_s25 }
   0xf   : > { %v1065_v5 = vld [vmem:[%s1198_s9 + $0x20] sm:$0xff]   ;;  %v920_v7 = vunpack.c.l.bf16 %v919_v3  ;;  %v921_v8 = vunpack.c.h.bf16 %v919_v3  ;;  %v1066_v36 = vld [vmem:[%s1198_s9 + $0x28] sm:$0xff]   ;;  %v924_v42 = vunpack.c.l.bf16 %v1062_v32  ;;  %v925_v45 = vunpack.c.h.bf16 %v1062_v32 }
  0x10   : > { %519 = vmatpush.bf16.msra.mxu0 %v916_v1  ;;  %1095 = vmatpush.bf16.msra.mxu1 %v916_v1  ;;  %v1069_v6 = vld [vmem:[%s1198_s9 + $0x40] sm:$0xff]   ;;  %v936_v10 = vunpack.c.l.bf16 %v1065_v5  ;;  %v937_v11 = vunpack.c.h.bf16 %v1065_v5  ;;  %v1070_v43 = vld [vmem:[%s1198_s9 + $0x48] sm:$0xff]   ;;  %v940_v46 = vunpack.c.l.bf16 %v1066_v36  ;;  %v941_v47 = vunpack.c.h.bf16 %v1066_v36 }
  0x11   : > { %1096 = vmatpush.bf16.msra.mxu2 %v916_v1  ;;  %1097 = vmatpush.bf16.msra.mxu3 %v916_v1  ;;  %v952_v13 = vunpack.c.l.bf16 %v1069_v6  ;;  %v953_v14 = vunpack.c.h.bf16 %v1069_v6  ;;  %v334_v15 = vmul.f32 %v1209_v9, %v920_v7  ;;  %v335_v16 = vmul.f32 %v1209_v9, %v921_v8  ;;  %v1219_v17 = vld [vmem:[%s1495_s2] ss:$0 sm:$0xff] }
  0x12   : > { %v342_v18 = vmul.f32 %v1209_v9, %v936_v10  ;;  %v343_v19 = vmul.f32 %v1209_v9, %v937_v11  ;;  %v1073_v33 = vld [vmem:[%s1198_s9 + $0x60] sm:$0xff]   ;;  %v956_v53 = vunpack.c.l.bf16 %v1070_v43  ;;  %v957_v54 = vunpack.c.h.bf16 %v1070_v43  ;;  %v1075_v43 = vld [vmem:[%s1198_s9 + $0x70] sm:$0xff]  }
  0x13   : > { %v350_v21 = vmul.f32 %v1209_v9, %v952_v13  ;;  %v351_v22 = vmul.f32 %v1209_v9, %v953_v14  ;;  %v370_v23 = vadd.f32 %v1219_v17, %v334_v15  ;;  %v371_v24 = vadd.f32 %v1219_v17, %v335_v16  ;;  %v910_v39 = vld [vmem:[%s1496_s3] sm:$0xff]  ;;  %v1063_v13 = vld [vmem:[%s1198_s9 + $0x10] sm:$0xff]  }
  0x14   : > { %520 = vmatpush.bf16.msra.mxu0 %v915_v2  ;;  %1098 = vmatpush.bf16.msra.mxu1 %v915_v2  ;;  %v378_v25 = vadd.f32 %v1219_v17, %v342_v18  ;;  %v379_v26 = vadd.f32 %v1219_v17, %v343_v19  ;;  %v968_v37 = vunpack.c.l.bf16 %v1073_v33  ;;  %v969_v38 = vunpack.c.h.bf16 %v1073_v33  ;;  %v1067_v19 = vld [vmem:[%s1198_s9 + $0x30] sm:$0xff]  }
  0x15   : > { %1099 = vmatpush.bf16.msra.mxu2 %v915_v2  ;;  %1100 = vmatpush.bf16.msra.mxu3 %v915_v2  ;;  %v386_v28 = vadd.f32 %v1219_v17, %v350_v21  ;;  %v387_v29 = vadd.f32 %v1219_v17, %v351_v22  ;;  %v402_v30 = vmax.f32 %v370_v23, 0.0  ;;  %v403_v31 = vmax.f32 %v371_v24, 0.0 }
  0x16   : > { %v410_v34 = vmax.f32 %v378_v25, 0.0  ;;  %v411_v35 = vmax.f32 %v379_v26, 0.0  ;;  %v358_v44 = vmul.f32 %v1209_v9, %v968_v37  ;;  %v359_v48 = vmul.f32 %v1209_v9, %v969_v38 }
  0x17   : > { %v418_v40 = vmax.f32 %v386_v28, 0.0  ;;  %v419_v41 = vmax.f32 %v387_v29, 0.0  ;;  %v434_v49 = vpack.c.bf16 %v403_v31, %v402_v30  ;;  %v336_v56 = vmul.f32 %v1209_v9, %v924_v42 }
  0x18   : > { %521 = vmatpush.bf16.msra.mxu0 %v914_v4  ;;  %1101 = vmatpush.bf16.msra.mxu1 %v914_v4  ;;  %v438_v50 = vpack.c.bf16 %v411_v35, %v410_v34  ;;  %v394_v51 = vadd.f32 %v1219_v17, %v358_v44  ;;  %v395_v55 = vadd.f32 %v1219_v17, %v359_v48  ;;  %v928_v25 = vunpack.c.l.bf16 %v1063_v13 }
  0x19   : > { %1102 = vmatpush.bf16.msra.mxu2 %v914_v4  ;;  %1103 = vmatpush.bf16.msra.mxu3 %v914_v4  ;;  %v442_v52 = vpack.c.bf16 %v419_v41, %v418_v40  ;;  %v337_v58 = vmul.f32 %v1209_v9, %v925_v45  ;;  %v344_v59 = vmul.f32 %v1209_v9, %v940_v46  ;;  %v929_v26 = vunpack.c.h.bf16 %v1063_v13 }
  0x1a   : > { %v426_v57 = vmax.f32 %v394_v51, 0.0  ;;  %v345_v60 = vmul.f32 %v1209_v9, %v941_v47  ;;  %v427_v61 = vmax.f32 %v395_v55, 0.0  ;;  %v352_v62 = vmul.f32 %v1209_v9, %v956_v53 }
  0x1b   : > { %v353_v63 = vmul.f32 %v1209_v9, %v957_v54  ;;  %v372_v1 = vadd.f32 %v1219_v17, %v336_v56  ;;  %v373_v2 = vadd.f32 %v1219_v17, %v337_v58  ;;  %v380_v3 = vadd.f32 %v1219_v17, %v344_v59 }
  0x1c   : > { %522 = vmatpush.bf16.msra.mxu0 %v913_v12  ;;  %1104 = vmatpush.bf16.msra.mxu1 %v913_v12  ;;  %v446_v0 = vpack.c.bf16 %v427_v61, %v426_v57  ;;  %v381_v4 = vadd.f32 %v1219_v17, %v345_v60  ;;  %v388_v5 = vadd.f32 %v1219_v17, %v352_v62  ;;  %v945_v28 = vunpack.c.h.bf16 %v1067_v19  ;;  %v1064_v60 = vld [vmem:[%s1198_s9 + $0x18] sm:$0xff]  }
  0x1d   : > { %1105 = vmatpush.bf16.msra.mxu2 %v913_v12  ;;  %1106 = vmatpush.bf16.msra.mxu3 %v913_v12  ;;  %v389_v6 = vadd.f32 %v1219_v17, %v353_v63  ;;  %v404_v7 = vmax.f32 %v372_v1, 0.0  ;;  %v405_v8 = vmax.f32 %v373_v2, 0.0  ;;  %v412_v10 = vmax.f32 %v380_v3, 0.0  ;;  %v1074_v12 = vld [vmem:[%s1198_s9 + $0x68] sm:$0xff]   ;;  %v1068_v63 = vld [vmem:[%s1198_s9 + $0x38] sm:$0xff]  }
  0x1e   : > { %v413_v11 = vmax.f32 %v381_v4, 0.0  ;;  %v972_v14 = vunpack.c.l.bf16 %v1074_v12  ;;  %v973_v15 = vunpack.c.h.bf16 %v1074_v12  ;;  %v420_v16 = vmax.f32 %v388_v5, 0.0 }
  0x1f   : > { %v421_v18 = vmax.f32 %v389_v6, 0.0  ;;  %v435_v23 = vpack.c.bf16 %v405_v8, %v404_v7  ;;  %v338_v36 = vmul.f32 %v1209_v9, %v928_v25  ;;  %v339_v37 = vmul.f32 %v1209_v9, %v929_v26 }
  0x20   : > { %523 = vmatpush.bf16.msra.mxu0 %v912_v20  ;;  %1107 = vmatpush.bf16.msra.mxu1 %v912_v20  ;;  %v360_v21 = vmul.f32 %v1209_v9, %v972_v14  ;;  %v361_v22 = vmul.f32 %v1209_v9, %v973_v15  ;;  %v439_v24 = vpack.c.bf16 %v413_v11, %v412_v10  ;;  %v976_v44 = vunpack.c.l.bf16 %v1075_v43  ;;  %v1076_v10 = vld [vmem:[%s1198_s9 + $0x78] sm:$0xff]  }
  0x21   : > { %1108 = vmatpush.bf16.msra.mxu2 %v912_v20  ;;  %1109 = vmatpush.bf16.msra.mxu3 %v912_v20  ;;  %v1071_v20 = vld [vmem:[%s1198_s9 + $0x50] sm:$0xff]   ;;  %v443_v31 = vpack.c.bf16 %v421_v18, %v420_v16  ;;  %v977_v45 = vunpack.c.h.bf16 %v1075_v43  ;;  %v374_v46 = vadd.f32 %v1219_v17, %v338_v36  ;;  %v375_v47 = vadd.f32 %v1219_v17, %v339_v37 }
  0x22   : > { %v396_v29 = vadd.f32 %v1219_v17, %v360_v21  ;;  %v397_v30 = vadd.f32 %v1219_v17, %v361_v22  ;;  %v960_v32 = vunpack.c.l.bf16 %v1071_v20  ;;  %v961_v33 = vunpack.c.h.bf16 %v1071_v20 }
  0x23   : > { %v363_v51 = vmul.f32 %v1209_v9, %v977_v45  ;;  %v406_v54 = vmax.f32 %v374_v46, 0.0  ;;  %v407_v55 = vmax.f32 %v375_v47, 0.0  ;;  %v932_v2 = vunpack.c.l.bf16 %v1064_v60 }
  0x24   : > { %524 = vmatpush.bf16.msra.mxu0 %v911_v27  ;;  %1110 = vmatpush.bf16.msra.mxu1 %v911_v27  ;;  %v428_v34 = vmax.f32 %v396_v29, 0.0  ;;  %v429_v35 = vmax.f32 %v397_v30, 0.0  ;;  %v354_v41 = vmul.f32 %v1209_v9, %v960_v32  ;;  %v355_v42 = vmul.f32 %v1209_v9, %v961_v33 }
  0x25   : > { %1111 = vmatpush.bf16.msra.mxu2 %v911_v27  ;;  %1112 = vmatpush.bf16.msra.mxu3 %v911_v27  ;;  %v944_v27 = vunpack.c.l.bf16 %v1067_v19  ;;  %v399_v57 = vadd.f32 %v1219_v17, %v363_v51  ;;  %v436_v1 = vpack.c.bf16 %v407_v55, %v406_v54  ;;  %v933_v6 = vunpack.c.h.bf16 %v1064_v60 }
  0x26   : > { %v447_v40 = vpack.c.bf16 %v429_v35, %v428_v34  ;;  %v391_v53 = vadd.f32 %v1219_v17, %v355_v42  ;;  %v948_v7 = vunpack.c.l.bf16 %v1068_v63  ;;  %v949_v8 = vunpack.c.h.bf16 %v1068_v63 }
  0x27   : > { %v346_v38 = vmul.f32 %v1209_v9, %v944_v27  ;;  %v431_v4 = vmax.f32 %v399_v57, 0.0  ;;  %v340_v14 = vmul.f32 %v1209_v9, %v932_v2  ;;  %v980_v16 = vunpack.c.l.bf16 %v1076_v10 }
  0x28   : > { %525 = vmatpush.bf16.msra.mxu0 %v910_v39  ;;  %1113 = vmatpush.bf16.msra.mxu1 %v910_v39  ;;  %v423_v62 = vmax.f32 %v391_v53, 0.0  ;;  %v981_v18 = vunpack.c.h.bf16 %v1076_v10  ;;  %v341_v19 = vmul.f32 %v1209_v9, %v933_v6  ;;  %v348_v20 = vmul.f32 %v1209_v9, %v948_v7 }
  0x29   : > { %1114 = vmatpush.bf16.msra.mxu2 %v910_v39  ;;  %1115 = vmatpush.bf16.msra.mxu3 %v910_v39  ;;  %v347_v39 = vmul.f32 %v1209_v9, %v945_v28  ;;  %v382_v48 = vadd.f32 %v1219_v17, %v346_v38  ;;  %v349_v21 = vmul.f32 %v1209_v9, %v949_v8 }
  0x2a   : > { %v365_v25 = vmul.f32 %v1209_v9, %v981_v18  ;;  %v376_v26 = vadd.f32 %v1219_v17, %v340_v14  ;;  %v377_v27 = vadd.f32 %v1219_v17, %v341_v19  ;;  %v384_v28 = vadd.f32 %v1219_v17, %v348_v20 }
  0x2b   : > { %526 = vmatmul.bf16.vlgmr.msra.gmra.mxu0 %v434_v49  ;;  %546 = vmatmul.bf16.vlgmr.msra.gmra.mxu1 %v438_v50  ;;  %v383_v49 = vadd.f32 %v1219_v17, %v347_v39  ;;  %v362_v50 = vmul.f32 %v1209_v9, %v976_v44  ;;  %v414_v58 = vmax.f32 %v382_v48, 0.0  ;;  %v385_v29 = vadd.f32 %v1219_v17, %v349_v21 }
  0x2c   : > { %566 = vmatmul.bf16.vlgmr.msra.gmra.mxu2 %v442_v52  ;;  %586 = vmatmul.bf16.vlgmr.msra.gmra.mxu3 %v446_v0  ;;  %v390_v52 = vadd.f32 %v1219_v17, %v354_v41  ;;  %v1072_v0 = vld [vmem:[%s1198_s9 + $0x58] sm:$0xff]   ;;  %v401_v33 = vadd.f32 %v1219_v17, %v365_v25  ;;  %v408_v34 = vmax.f32 %v376_v26, 0.0  ;;  %v409_v35 = vmax.f32 %v377_v27, 0.0 }
  0x2d   : > { %v398_v56 = vadd.f32 %v1219_v17, %v362_v50  ;;  %v415_v59 = vmax.f32 %v383_v49, 0.0  ;;  %v964_v12 = vunpack.c.l.bf16 %v1072_v0  ;;  %v965_v13 = vunpack.c.h.bf16 %v1072_v0 }
  0x2e   : > { %v422_v61 = vmax.f32 %v390_v52, 0.0  ;;  %v416_v36 = vmax.f32 %v384_v28, 0.0  ;;  %v437_v41 = vpack.c.bf16 %v409_v35, %v408_v34 }
  0x2f   : > { %v430_v3 = vmax.f32 %v398_v56, 0.0  ;;  %v440_v5 = vpack.c.bf16 %v415_v59, %v414_v58  ;;  %v356_v22 = vmul.f32 %v1209_v9, %v964_v12 }
  0x30   : > { %v444_v11 = vpack.c.bf16 %v423_v62, %v422_v61 }
  0x31   : > { %v448_v15 = vpack.c.bf16 %v431_v4, %v430_v3  ;;  %v392_v30 = vadd.f32 %v1219_v17, %v356_v22 }
  0x33   : > { %v424_v37 = vmax.f32 %v392_v30, 0.0 }
  0x3b   : > { %531 = vmatmul.bf16.gmra.mxu0 %v435_v23  ;;  %551 = vmatmul.bf16.gmra.mxu1 %v439_v24  ;;  %v357_v23 = vmul.f32 %v1209_v9, %v965_v13  ;;  %v364_v24 = vmul.f32 %v1209_v9, %v980_v16  ;;  %v417_v9 = vmax.f32 %v385_v29, 0.0 }
  0x3c   : > { %571 = vmatmul.bf16.gmra.mxu2 %v443_v31  ;;  %591 = vmatmul.bf16.gmra.mxu3 %v447_v40  ;;  %v433_v40 = vmax.f32 %v401_v33, 0.0 }
  0x3d   : > { %v393_v31 = vadd.f32 %v1219_v17, %v357_v23  ;;  %v400_v32 = vadd.f32 %v1219_v17, %v364_v24  ;;  %v441_v42 = vpack.c.bf16 %v417_v9, %v416_v36  ;;  %v1308_v17 = vld [vmem:[%s1497_s4] ss:$0 sm:$0xff] }
  0x3f   : > { %v425_v38 = vmax.f32 %v393_v31, 0.0  ;;  %v432_v39 = vmax.f32 %v400_v32, 0.0 }
  0x41   : > { %v445_v43 = vpack.c.bf16 %v425_v38, %v424_v37  ;;  %v449_v44 = vpack.c.bf16 %v433_v40, %v432_v39 }
  0x4b   : > { %536 = vmatmul.bf16.gmra.mxu0 %v436_v1  ;;  %556 = vmatmul.bf16.gmra.mxu1 %v440_v5 }
  0x4c   : > { %576 = vmatmul.bf16.gmra.mxu2 %v444_v11  ;;  %596 = vmatmul.bf16.gmra.mxu3 %v448_v15 }
  0x5b   : > { %541 = vmatmul.bf16.gmra.mxu0 %v437_v41  ;;  %561 = vmatmul.bf16.gmra.mxu1 %v441_v42 }
  0x5c   : > { %581 = vmatmul.bf16.gmra.mxu2 %v445_v43  ;;  %601 = vmatmul.bf16.gmra.mxu3 %v449_v44 }
  0xa8   : > { %v527_v45 = vpop.f32.mrf.mxu0  ;;  %v547_v46 = vpop.f32.mrf.mxu1 }
  0xa9   : > { %v1311_v49 = vadd.f32 %v1308_v17, %v547_v46  ;;  %v528_v51 = vadd.f32 %v1308_v17, %v527_v45 }
  0xab   : > { %v645_v9 = vmul.f32 %v528_v51, %v528_v51 }
  0xaf   : > { %v567_v47 = vpop.f32.mrf.mxu2  ;;  %v587_v54 = vpop.f32.mrf.mxu3 }
  0xb0   : > { %v529_v48 = vpop.f32.mrf.mxu0  ;;  %v549_v50 = vpop.f32.mrf.mxu1  ;;  %v1330_v57 = vadd.f32 %v1308_v17, %v567_v47  ;;  %v1336_v62 = vadd.f32 %v1308_v17, %v587_v54 }
  0xb1   : > { %v530_v52 = vadd.f32 %v1308_v17, %v529_v48  ;;  %v1316_v53 = vadd.f32 %v1308_v17, %v549_v50 }
  0xb3   : > { %v985_v55 = vpack.c.bf16 %v530_v52, %v528_v51  ;;  %v1005_v56 = vpack.c.bf16 %v1316_v53, %v1311_v49  ;;  %v646_v35 = vmul.f32 %v530_v52, %v530_v52  ;;  %v607_v37 = vadd.f32 %v530_v52, %v528_v51 }
  0xb5   : > { %986 = vst [vmem:[%s1323_s8] sm:$0xff] %v985_v55   ;;  %v677_v43 = vadd.f32 %v646_v35, %v645_v9 }
  0xb6   : > { %1080 = vst [vmem:[%s1323_s8 + $0x20] sm:$0xff] %v1005_v56  }
  0xb7   : > { %v569_v58 = vpop.f32.mrf.mxu2  ;;  %v589_v63 = vpop.f32.mrf.mxu3 }
  0xb8   : > { %v532_v59 = vpop.f32.mrf.mxu0  ;;  %v552_v60 = vpop.f32.mrf.mxu1  ;;  %v1333_v61 = vadd.f32 %v1308_v17, %v569_v58  ;;  %v1341_v1 = vadd.f32 %v1308_v17, %v589_v63 }
  0xb9   : > { %v1348_v5 = vadd.f32 %v1308_v17, %v552_v60  ;;  %v533_v7 = vadd.f32 %v1308_v17, %v532_v59 }
  0xba   : > { %v1025_v0 = vpack.c.bf16 %v1333_v61, %v1330_v57  ;;  %v1045_v2 = vpack.c.bf16 %v1341_v1, %v1336_v62 }
  0xbb   : > { %v647_v38 = vmul.f32 %v533_v7, %v533_v7  ;;  %v608_v44 = vadd.f32 %v607_v37, %v533_v7  ;;  %v655_v9 = vmul.f32 %v1348_v5, %v1348_v5 }
  0xbc   : > { %1084 = vst [vmem:[%s1323_s8 + $0x40] sm:$0xff] %v1025_v0  }
  0xbd   : > { %1088 = vst [vmem:[%s1323_s8 + $0x60] sm:$0xff] %v1045_v2   ;;  %v678_v51 = vadd.f32 %v677_v43, %v647_v38 }
  0xbf   : > { %v572_v3 = vpop.f32.mrf.mxu2  ;;  %v592_v11 = vpop.f32.mrf.mxu3 }
  0xc0   : > { %v534_v4 = vpop.f32.mrf.mxu0  ;;  %v554_v6 = vpop.f32.mrf.mxu1  ;;  %v1360_v14 = vadd.f32 %v1308_v17, %v572_v3  ;;  %v1366_v20 = vadd.f32 %v1308_v17, %v592_v11 }
  0xc1   : > { %v535_v8 = vadd.f32 %v1308_v17, %v534_v4  ;;  %v1353_v10 = vadd.f32 %v1308_v17, %v554_v6 }
  0xc3   : > { %v990_v12 = vpack.c.bf16 %v535_v8, %v533_v7  ;;  %v1010_v13 = vpack.c.bf16 %v1353_v10, %v1348_v5  ;;  %v648_v45 = vmul.f32 %v535_v8, %v535_v8  ;;  %v609_v52 = vadd.f32 %v608_v44, %v535_v8 }
  0xc5   : > { %1077 = vst [vmem:[%s1323_s8 + $0x8] sm:$0xff] %v990_v12   ;;  %v679_v58 = vadd.f32 %v678_v51, %v648_v45 }
  0xc6   : > { %1081 = vst [vmem:[%s1323_s8 + $0x28] sm:$0xff] %v1010_v13  }
  0xc7   : > { %v574_v15 = vpop.f32.mrf.mxu2  ;;  %v594_v21 = vpop.f32.mrf.mxu3 }
  0xc8   : > { %v537_v16 = vpop.f32.mrf.mxu0  ;;  %v557_v18 = vpop.f32.mrf.mxu1  ;;  %v1363_v19 = vadd.f32 %v1308_v17, %v574_v15  ;;  %v1371_v23 = vadd.f32 %v1308_v17, %v594_v21 }
  0xc9   : > { %v1378_v27 = vadd.f32 %v1308_v17, %v557_v18  ;;  %v538_v29 = vadd.f32 %v1308_v17, %v537_v16 }
  0xca   : > { %v1030_v22 = vpack.c.bf16 %v1363_v19, %v1360_v14  ;;  %v1050_v24 = vpack.c.bf16 %v1371_v23, %v1366_v20 }
  0xcb   : > { %v649_v54 = vmul.f32 %v538_v29, %v538_v29  ;;  %v610_v59 = vadd.f32 %v609_v52, %v538_v29 }
  0xcc   : > { %1085 = vst [vmem:[%s1323_s8 + $0x48] sm:$0xff] %v1030_v22  }
  0xcd   : > { %1089 = vst [vmem:[%s1323_s8 + $0x68] sm:$0xff] %v1050_v24   ;;  %v680_v63 = vadd.f32 %v679_v58, %v649_v54 }
  0xcf   : > { %v577_v25 = vpop.f32.mrf.mxu2  ;;  %v597_v32 = vpop.f32.mrf.mxu3 }
  0xd0   : > { %v539_v26 = vpop.f32.mrf.mxu0  ;;  %v559_v28 = vpop.f32.mrf.mxu1  ;;  %v1390_v36 = vadd.f32 %v1308_v17, %v577_v25  ;;  %v1396_v46 = vadd.f32 %v1308_v17, %v597_v32  ;;  %v653_v25 = vmul.f32 %v1311_v49, %v1311_v49 }
  0xd1   : > { %v540_v30 = vadd.f32 %v1308_v17, %v539_v26  ;;  %v1383_v31 = vadd.f32 %v1308_v17, %v559_v28 }
  0xd3   : > { %v995_v33 = vpack.c.bf16 %v540_v30, %v538_v29  ;;  %v1015_v34 = vpack.c.bf16 %v1383_v31, %v1378_v27  ;;  %v650_v60 = vmul.f32 %v540_v30, %v540_v30  ;;  %v611_v0 = vadd.f32 %v610_v59, %v540_v30 }
  0xd4   : > { %v654_v30 = vmul.f32 %v1316_v53, %v1316_v53 }
  0xd5   : > { %1078 = vst [vmem:[%s1323_s8 + $0x10] sm:$0xff] %v995_v33   ;;  %v681_v8 = vadd.f32 %v680_v63, %v650_v60  ;;  %v661_v60 = vmul.f32 %v1330_v57, %v1330_v57 }
  0xd6   : > { %1082 = vst [vmem:[%s1323_s8 + $0x30] sm:$0xff] %v1015_v34  }
  0xd7   : > { %v579_v39 = vpop.f32.mrf.mxu2  ;;  %v599_v47 = vpop.f32.mrf.mxu3 }
  0xd8   : > { %v542_v40 = vpop.f32.mrf.mxu0  ;;  %v562_v41 = vpop.f32.mrf.mxu1  ;;  %v1393_v42 = vadd.f32 %v1308_v17, %v579_v39  ;;  %v1401_v50 = vadd.f32 %v1308_v17, %v599_v47 }
  0xd9   : > { %v543_v55 = vadd.f32 %v1308_v17, %v542_v40  ;;  %v563_v6 = vadd.f32 %v1308_v17, %v562_v41 }
  0xda   : > { %v1035_v48 = vpack.c.bf16 %v1393_v42, %v1390_v36  ;;  %v1055_v56 = vpack.c.bf16 %v1401_v50, %v1396_v46 }
  0xdb   : > { %v651_v2 = vmul.f32 %v543_v55, %v543_v55  ;;  %v612_v11 = vadd.f32 %v611_v0, %v543_v55  ;;  %v662_v0 = vmul.f32 %v1333_v61, %v1333_v61 }
  0xdc   : > { %1086 = vst [vmem:[%s1323_s8 + $0x50] sm:$0xff] %v1035_v48  }
  0xdd   : > { %1090 = vst [vmem:[%s1323_s8 + $0x70] sm:$0xff] %v1055_v56   ;;  %v682_v16 = vadd.f32 %v681_v8, %v651_v2 }
  0xdf   : > { %v582_v3 = vpop.f32.mrf.mxu2  ;;  %v602_v15 = vpop.f32.mrf.mxu3 }
  0xe0   : > { %v544_v4 = vpop.f32.mrf.mxu0  ;;  %v564_v7 = vpop.f32.mrf.mxu1  ;;  %v583_v29 = vadd.f32 %v1308_v17, %v582_v3  ;;  %v1425_v38 = vadd.f32 %v1308_v17, %v602_v15  ;;  %v666_v15 = vmul.f32 %v1393_v42, %v1393_v42 }
  0xe1   : > { %v545_v12 = vadd.f32 %v1308_v17, %v544_v4  ;;  %v565_v13 = vadd.f32 %v1308_v17, %v564_v7  ;;  %v664_v7 = vmul.f32 %v1363_v19, %v1363_v19 }
  0xe3   : > { %v613_v18 = vadd.f32 %v612_v11, %v545_v12  ;;  %v652_v21 = vmul.f32 %v545_v12, %v545_v12  ;;  %v1000_v22 = vpack.c.bf16 %v545_v12, %v543_v55  ;;  %v1020_v24 = vpack.c.bf16 %v565_v13, %v563_v6 }
  0xe4   : > { %v659_v55 = vmul.f32 %v563_v6, %v563_v6  ;;  %v660_v59 = vmul.f32 %v565_v13, %v565_v13 }
  0xe5   : > { %v614_v26 = vadd.f32 %v613_v18, %v1311_v49  ;;  %v683_v28 = vadd.f32 %v682_v16, %v652_v21  ;;  %1079 = vst [vmem:[%s1323_s8 + $0x18] sm:$0xff] %v1000_v22   ;;  %v667_v21 = vmul.f32 %v583_v29, %v583_v29 }
  0xe6   : > { %1083 = vst [vmem:[%s1323_s8 + $0x38] sm:$0xff] %v1020_v24  }
  0xe7   : > { %v615_v32 = vadd.f32 %v614_v26, %v1316_v53  ;;  %v684_v33 = vadd.f32 %v683_v28, %v653_v25  ;;  %v584_v34 = vpop.f32.mrf.mxu2  ;;  %v604_v39 = vpop.f32.mrf.mxu3  ;;  %v656_v53 = vmul.f32 %v1353_v10, %v1353_v10 }
  0xe8   : > { %v585_v35 = vadd.f32 %v1308_v17, %v584_v34  ;;  %v1428_v41 = vadd.f32 %v1308_v17, %v604_v39  ;;  %v658_v17 = vmul.f32 %v1383_v31, %v1383_v31  ;;  %v672_v34 = vmul.f32 %v1371_v23, %v1371_v23 }
  0xe9   : > { %v616_v49 = vadd.f32 %v615_v32, %v1348_v5  ;;  %v685_v37 = vadd.f32 %v684_v33, %v654_v30  ;;  %v657_v5 = vmul.f32 %v1378_v27, %v1378_v27  ;;  %v674_v39 = vmul.f32 %v1401_v50, %v1401_v50 }
  0xea   : > { %v1040_v40 = vpack.c.bf16 %v585_v35, %v583_v29  ;;  %v1060_v45 = vpack.c.bf16 %v1428_v41, %v1425_v38  ;;  %v668_v25 = vmul.f32 %v585_v35, %v585_v35 }
  0xeb   : > { %v686_v43 = vadd.f32 %v685_v37, %v655_v9  ;;  %v617_v44 = vadd.f32 %v616_v49, %v1353_v10  ;;  %v673_v9 = vmul.f32 %v1396_v46, %v1396_v46 }
  0xec   : > { %1087 = vst [vmem:[%s1323_s8 + $0x58] sm:$0xff] %v1040_v40  }
  0xed   : > { %v618_v47 = vadd.f32 %v617_v44, %v1378_v27  ;;  %v687_v48 = vadd.f32 %v686_v43, %v656_v53  ;;  %1091 = vst [vmem:[%s1323_s8 + $0x78] sm:$0xff] %v1060_v45  }
  0xef   : > { %v619_v51 = vadd.f32 %v618_v47, %v1383_v31  ;;  %v688_v52 = vadd.f32 %v687_v48, %v657_v5  ;;  %v663_v31 = vmul.f32 %v1360_v14, %v1360_v14 }
  0xf1   : > { %v620_v54 = vadd.f32 %v619_v51, %v563_v6  ;;  %v689_v10 = vadd.f32 %v688_v52, %v658_v17 }
  0xf3   : > { %v690_v56 = vadd.f32 %v689_v10, %v659_v55  ;;  %v621_v58 = vadd.f32 %v620_v54, %v565_v13 }
  0xf5   : > { %v622_v63 = vadd.f32 %v621_v58, %v1330_v57  ;;  %v691_v27 = vadd.f32 %v690_v56, %v660_v59  ;;  %v665_v57 = vmul.f32 %v1390_v36, %v1390_v36 }
  0xf7   : > { %v623_v2 = vadd.f32 %v622_v63, %v1333_v61  ;;  %v692_v3 = vadd.f32 %v691_v27, %v661_v60 }
  0xf9   : > { %v693_v4 = vadd.f32 %v692_v3, %v662_v0  ;;  %v624_v6 = vadd.f32 %v623_v2, %v1360_v14 }
  0xfb   : > { %v625_v8 = vadd.f32 %v624_v6, %v1363_v19  ;;  %v694_v11 = vadd.f32 %v693_v4, %v663_v31  ;;  %v669_v19 = vmul.f32 %v1336_v62, %v1336_v62 }
  0xfd   : > { %v626_v12 = vadd.f32 %v625_v8, %v1390_v36  ;;  %v695_v13 = vadd.f32 %v694_v11, %v664_v7  ;;  %v670_v36 = vmul.f32 %v1341_v1, %v1341_v1 }
  0xff   : > { %v627_v61 = vadd.f32 %v626_v12, %v1393_v42  ;;  %v696_v16 = vadd.f32 %v695_v13, %v665_v57  ;;  %v671_v42 = vmul.f32 %v1366_v20, %v1366_v20 }
 0x101   : > { %v697_v18 = vadd.f32 %v696_v16, %v666_v15  ;;  %v628_v14 = vadd.f32 %v627_v61, %v583_v29 }
 0x103   : > { %v698_v22 = vadd.f32 %v697_v18, %v667_v21  ;;  %v629_v24 = vadd.f32 %v628_v14, %v585_v35 }
 0x105   : > { %v630_v26 = vadd.f32 %v629_v24, %v1336_v62  ;;  %v699_v28 = vadd.f32 %v698_v22, %v668_v25 }
 0x107   : > { %v631_v30 = vadd.f32 %v630_v26, %v1341_v1  ;;  %v700_v32 = vadd.f32 %v699_v28, %v669_v19 }
 0x109   : > { %v701_v29 = vadd.f32 %v700_v32, %v670_v36  ;;  %v632_v33 = vadd.f32 %v631_v30, %v1366_v20 }
 0x10b   : > { %v633_v35 = vadd.f32 %v632_v33, %v1371_v23  ;;  %v702_v62 = vadd.f32 %v701_v29, %v671_v42  ;;  %v675_v23 = vmul.f32 %v1425_v38, %v1425_v38 }
 0x10d   : > { %v634_v1 = vadd.f32 %v633_v35, %v1396_v46  ;;  %v703_v49 = vadd.f32 %v702_v62, %v672_v34  ;;  %v676_v46 = vmul.f32 %v1428_v41, %v1428_v41 }
 0x10f   : > { %v635_v37 = vadd.f32 %v634_v1, %v1401_v50  ;;  %v704_v40 = vadd.f32 %v703_v49, %v673_v9 }
 0x111   : > { %v705_v20 = vadd.f32 %v704_v40, %v674_v39  ;;  %v636_v53 = vadd.f32 %v635_v37, %v1425_v38 }
 0x113   : > { %v706_v43 = vadd.f32 %v705_v20, %v675_v23  ;;  %v637_v44 = vadd.f32 %v636_v53, %v1428_v41 }
 0x115   : > { %v638_v45 = vrot.slane %v637_v44, 4  ;;  %v707_v5 = vadd.f32 %v706_v43, %v676_v46 }
 0x117   : > { %v639_v47 = vadd.f32 %v638_v45, %v637_v44  ;;  %v708_v48 = vrot.slane %v707_v5, 4 }
 0x119   : > { %v640_v50 = vrot.slane %v639_v47, 2  ;;  %v709_v17 = vadd.f32 %v708_v48, %v707_v5 }
 0x11b   : > { %v641_v51 = vadd.f32 %v640_v50, %v639_v47  ;;  %v710_v52 = vrot.slane %v709_v17, 2 }
 0x11d   : > { %v642_v54 = vrot.slane %v641_v51, 1  ;;  %v711_v55 = vadd.f32 %v710_v52, %v709_v17 }
 0x11f   : > { %v643_v38 = vadd.f32 %v642_v54, %v641_v51  ;;  %v712_v10 = vrot.slane %v711_v55, 1 }
 0x121   : > { %644 = vst [vmem:[%s265_s10] sm:$0x1] %v643_v38  ;;  %v713_v41 = vadd.f32 %v712_v10, %v711_v55 }
 0x123   : > { %714 = vst [vmem:[%s265_s10 + $0x1] sm:$0x1] %v713_v41 }
 0x124 PF: > { %s17_s21 = sadd.s32 1, %s1133_s21  }
 0x125   : > { %p14_p5 = scmp.ge.s32.totalorder %s17_s21, 4  }
 0x127   :  { %16 = sbr.rel (!%p14_p5) target bundleno = 1 (0x1), region = 82 }

// kernel: res_unit_forward.4
= control target key start
LH: loop header
LB: loop body
LE: loop exit
PB: predicated region body
PF: predicated region fallthrough
CT: control target
= control target key end

     0   :  { %s7370_s18 = smov 0   ;;  %s9964_s0 = inlined_call_operand.vmem [shape: bf16[2,256,128], index: 0, kind: input, shape index: {}]   ;;  %s9965_s1 = inlined_call_operand.vmem [shape: f32[1,128], index: 1, kind: input, shape index: {}]   ;;  %s9966_s2 = inlined_call_operand.vmem [shape: f32[1,128], index: 2, kind: input, shape index: {}]   ;;  %s9967_s3 = inlined_call_operand.vmem [shape: bf16[9,128,128], index: 3, kind: input, shape index: {}]   ;;  %s9968_s4 = inlined_call_operand.vmem [shape: bf16[2,256,128], index: 4, kind: output, shape index: {0}]   ;;  %s9969_s5 = inlined_call_operand.vmem [shape: f32[2,2,128], index: 5, kind: output, shape index: {1}]  }
   0x1 LB: > { %s6287_s19 = sadd.s32 4294967295, %s7336_s18   ;;  %p6291_p0 = scmp.ge.s32.totalorder %s7336_s18, 1  ;;  %s7336_s18 = sphi %s7370_s18, %s16_s18  }
   0x2   : > { %p190_p1 = scmp.lt.s32.totalorder %s7336_s18, 3 }
   0x4   : > { %p191_p2 = pnand %p6291_p0, %p190_p1 }
   0x6   : > { %194 = sbr.rel (%p191_p2) target bundleno = 824 (0x338), region = 36 }
   0xb   : > { %v6940_v0 = vld [vmem:[%s9967_s3 + $0x78] sm:$0xff]  ;;  %p222_p3 = scmp.lt.s32.totalorder %s6287_s19, 1  ;;  %v9994_v1 = vmov 0   ;;  %v6939_v2 = vld [vmem:[%s9967_s3 + $0x70] sm:$0xff]  ;;  %v6938_v3 = vld [vmem:[%s9967_s3 + $0x68] sm:$0xff]  ;;  %vm7339_vm0 = vmmov 1  }
   0xc   : > { %408 = vst [vmem:[#allocation2 + $0x4] sm:$0xf] %v9994_v1  ;;  %7293 = vmatpush.bf16.msra.mxu1 %v6940_v0  ;;  %7294 = vmatpush.bf16.msra.mxu2 %v6940_v0  ;;  %v7402_v4 = vld [vmem:[%s9965_s1] ss:$0 sm:$0xff]  ;;  %v6936_v44 = vld [vmem:[%s9967_s3 + $0x58] sm:$0xff]  ;;  %v6935_v63 = vld [vmem:[%s9967_s3 + $0x50] sm:$0xff] }
   0xd   : > { %s10681_s19 = smov (!%p222_p3, %s6287_s19), 1  ;;  %7295 = vmatpush.bf16.msra.mxu3 %v6940_v0  ;;  %1882 = vmatpush.bf16.msra.mxu0 %v6940_v0  ;;  %409 = vst [vmem:[#allocation2 + $0x8] sm:$0xf] %v9994_v1  ;;  %v7407_v5 = vld [vmem:[%s9966_s2] ss:$0 sm:$0xff]  ;;  %vm1056_vm1 = vmpackc.low %vm7339_vm0, %vm7339_vm0 }
   0xe   : > { %s6907_s26 = sshll.u32 %s10681_s19, 7  ;;  %407 = vst [vmem:[#allocation2] sm:$0xf] %v9994_v1  ;;  %v6937_v26 = vld [vmem:[%s9967_s3 + $0x60] sm:$0xff]  ;;  %vm1119_vm7 = vsmask.f32 3328 }
   0xf   : > { %s7397_s29 = scalar_lea.vmem %s9964_s0, %s6907_s26  ;;  %410 = vst [vmem:[#allocation2 + $0x8c] sm:$0xf] %v9994_v1  ;;  %vm1120_vm8 = vsmask.f32 7440  ;;  %vm2521_vm13 = vsmask.f32 256  ;;  %s9668_s21 = scalar_lea.vmem %s9968_s4, %s6907_s26 }
  0x10   : > { %7296 = vmatpush.bf16.msra.mxu1 %v6939_v2  ;;  %7297 = vmatpush.bf16.msra.mxu2 %v6939_v2  ;;  %v7411_v6 = vld [vmem:[%s7397_s29 + $0x10] sm:$0xff]   ;;  %v7250_v7 = vld [vmem:[%s7397_s29 + $0x18] sm:$0xff]   ;;  %v7415_v8 = vld [vmem:[%s7397_s29 + $0x20] sm:$0xff]   ;;  %411 = vst [vmem:[#allocation2 + $0x90] sm:$0xf] %v9994_v1  ;;  %s6296_s26 = sshll.u32 %s10681_s19, 1 }
  0x11   : > { %7298 = vmatpush.bf16.msra.mxu3 %v6939_v2  ;;  %1883 = vmatpush.bf16.msra.mxu0 %v6939_v2  ;;  %v7040_v9 = vunpack.c.h.bf16 %v7411_v6  ;;  %v7043_v10 = vunpack.c.l.bf16 %v7250_v7  ;;  %v7044_v11 = vunpack.c.h.bf16 %v7250_v7  ;;  %v7047_v12 = vunpack.c.l.bf16 %v7415_v8  ;;  %v7421_v13 = vld [vmem:[%s7397_s29 + $0x30] sm:$0xff]   ;;  %v7254_v14 = vld [vmem:[%s7397_s29 + $0x38] sm:$0xff]   ;;  %v7425_v15 = vld [vmem:[%s7397_s29 + $0x40] sm:$0xff]   ;;  %412 = vst [vmem:[#allocation2 + $0x94] sm:$0xf] %v9994_v1  ;;  %s235_s24 = scalar_lea.vmem %s9969_s5, %s6296_s26 }
  0x12   : > { %v7056_v16 = vunpack.c.h.bf16 %v7421_v13  ;;  %v7059_v17 = vunpack.c.l.bf16 %v7254_v14  ;;  %v7060_v18 = vunpack.c.h.bf16 %v7254_v14  ;;  %v7063_v19 = vunpack.c.l.bf16 %v7425_v15  ;;  %v7431_v20 = vld [vmem:[%s7397_s29 + $0x50] sm:$0xff]   ;;  %v7258_v21 = vld [vmem:[%s7397_s29 + $0x58] sm:$0xff]   ;;  %v7454_v39 = vld [vmem:[%s7397_s29 + $0x60] sm:$0xff]  }
  0x13   : > { %v312_v22 = vmul.f32 %v7402_v4, %v7040_v9  ;;  %v313_v23 = vmul.f32 %v7402_v4, %v7043_v10  ;;  %v314_v24 = vmul.f32 %v7402_v4, %v7044_v11  ;;  %v315_v25 = vmul.f32 %v7402_v4, %v7047_v12  ;;  %v7463_v53 = vld [vmem:[%s7397_s29 + $0x28] sm:$0xff]   ;;  %vm7664_vm10 = vmor %vm1119_vm7, %vm1120_vm8 }
  0x14   : > { %7299 = vmatpush.bf16.msra.mxu1 %v6938_v3  ;;  %7300 = vmatpush.bf16.msra.mxu2 %v6938_v3  ;;  %v320_v27 = vmul.f32 %v7402_v4, %v7056_v16  ;;  %v321_v28 = vmul.f32 %v7402_v4, %v7059_v17  ;;  %v322_v29 = vmul.f32 %v7402_v4, %v7060_v18  ;;  %v7072_v30 = vunpack.c.h.bf16 %v7431_v20  ;;  %v7471_v62 = vld [vmem:[%s7397_s29 + $0x48] sm:$0xff]  }
  0x15   : > { %7301 = vmatpush.bf16.msra.mxu3 %v6938_v3  ;;  %1884 = vmatpush.bf16.msra.mxu0 %v6938_v3  ;;  %v348_v31 = vadd.f32 %v7407_v5, %v312_v22  ;;  %v349_v32 = vadd.f32 %v7407_v5, %v313_v23  ;;  %v350_v33 = vadd.f32 %v7407_v5, %v314_v24  ;;  %v7075_v34 = vunpack.c.l.bf16 %v7258_v21  ;;  %v7486_v17 = vld [vmem:[%s7397_s29 + $0x68] sm:$0xff]  }
  0x16   : > { %v351_v35 = vadd.f32 %v7407_v5, %v315_v25  ;;  %v323_v36 = vmul.f32 %v7402_v4, %v7063_v19  ;;  %v356_v37 = vadd.f32 %v7407_v5, %v320_v27  ;;  %v357_v38 = vadd.f32 %v7407_v5, %v321_v28  ;;  %v6934_v22 = vld [vmem:[%s9967_s3 + $0x48] sm:$0xff]  ;;  %v7030_v27 = vld [vmem:[%s7397_s29] sm:$0xff]  }
  0x17   : > { %v380_v40 = vmax.f32 %v348_v31, 0.0  ;;  %v381_v41 = vmax.f32 %v349_v32, 0.0  ;;  %v382_v42 = vmax.f32 %v350_v33, 0.0  ;;  %v358_v43 = vadd.f32 %v7407_v5, %v322_v29  ;;  %v7500_v32 = vld [vmem:[%s7397_s29 + $0x8] sm:$0xff]  }
  0x18   : > { %7302 = vmatpush.bf16.msra.mxu1 %v6937_v26  ;;  %7303 = vmatpush.bf16.msra.mxu2 %v6937_v26  ;;  %v383_v45 = vmax.f32 %v351_v35, 0.0  ;;  %v359_v46 = vadd.f32 %v7407_v5, %v323_v36  ;;  %v388_v47 = vmax.f32 %v356_v37, 0.0  ;;  %v389_v48 = vmax.f32 %v357_v38, 0.0 }
  0x19   : > { %7304 = vmatpush.bf16.msra.mxu3 %v6937_v26  ;;  %1885 = vmatpush.bf16.msra.mxu0 %v6937_v26  ;;  %v7106_v49 = vpack.c.bf16 %v381_v41, %v380_v40  ;;  %v390_v50 = vmax.f32 %v358_v43, 0.0  ;;  %v7076_v51 = vunpack.c.h.bf16 %v7258_v21  ;;  %v7079_v52 = vunpack.c.l.bf16 %v7454_v39  ;;  %v6933_v41 = vld [vmem:[%s9967_s3 + $0x40] sm:$0xff] }
  0x1a   : > { %v7111_v54 = vpack.c.bf16 %v383_v45, %v382_v42  ;;  %v391_v55 = vmax.f32 %v359_v46, 0.0  ;;  %v7126_v56 = vpack.c.bf16 %v389_v48, %v388_v47  ;;  %v328_v57 = vmul.f32 %v7402_v4, %v7072_v30 }
  0x1b   : > { %7265 = vst [vmem:[#allocation2 + $0x20] sm:$0xff] %v7106_v49   ;;  %v329_v58 = vmul.f32 %v7402_v4, %v7075_v34  ;;  %v330_v59 = vmul.f32 %v7402_v4, %v7076_v51  ;;  %v331_v60 = vmul.f32 %v7402_v4, %v7079_v52  ;;  %v7048_v61 = vunpack.c.h.bf16 %v7415_v8  ;;  %v6972_v51 = vld [vmem:[%s9967_s3 + $0xf8] sm:$0xff] }
  0x1c   : > { %7305 = vmatpush.bf16.msra.mxu1 %v6936_v44  ;;  %7306 = vmatpush.bf16.msra.mxu2 %v6936_v44  ;;  %7266 = vst [vmem:[#allocation2 + $0x28] sm:$0xff] %v7111_v54   ;;  %v7131_v0 = vpack.c.bf16 %v391_v55, %v390_v50  ;;  %v364_v2 = vadd.f32 %v7407_v5, %v328_v57  ;;  %v7051_v3 = vunpack.c.l.bf16 %v7463_v53  ;;  %v7064_v7 = vunpack.c.h.bf16 %v7425_v15  ;;  %v6948_v50 = vld [vmem:[%s9967_s3 + $0xb8] sm:$0xff] }
  0x1d   : > { %7307 = vmatpush.bf16.msra.mxu3 %v6936_v44  ;;  %1886 = vmatpush.bf16.msra.mxu0 %v6936_v44  ;;  %7269 = vst [vmem:[#allocation2 + $0x40] sm:$0xff] %v7126_v56   ;;  %v365_v8 = vadd.f32 %v7407_v5, %v329_v58  ;;  %v366_v9 = vadd.f32 %v7407_v5, %v330_v59  ;;  %v7067_v16 = vunpack.c.l.bf16 %v7471_v62  ;;  %v7080_v26 = vunpack.c.h.bf16 %v7454_v39 }
  0x1e   : > { %v367_v10 = vadd.f32 %v7407_v5, %v331_v60  ;;  %7270 = vst [vmem:[#allocation2 + $0x48] sm:$0xff] %v7131_v0   ;;  %v396_v11 = vmax.f32 %v364_v2, 0.0  ;;  %v316_v12 = vmul.f32 %v7402_v4, %v7048_v61  ;;  %v317_v14 = vmul.f32 %v7402_v4, %v7051_v3  ;;  %v6932_v0 = vld [vmem:[%s9967_s3 + $0x38] sm:$0xff] }
  0x1f   : > { %v397_v15 = vmax.f32 %v365_v8, 0.0  ;;  %v398_v18 = vmax.f32 %v366_v9, 0.0  ;;  %v324_v21 = vmul.f32 %v7402_v4, %v7064_v7  ;;  %v325_v25 = vmul.f32 %v7402_v4, %v7067_v16  ;;  %v7261_v8 = vld [vmem:[%s7397_s29 + $0x70] sm:$0xff]   ;;  %v6980_v9 = vld [vmem:[%s9967_s3 + $0x138] sm:$0xff] }
  0x20   : > { %v399_v19 = vmax.f32 %v367_v10, 0.0  ;;  %7308 = vmatpush.bf16.msra.mxu1 %v6935_v63  ;;  %7309 = vmatpush.bf16.msra.mxu2 %v6935_v63  ;;  %v352_v23 = vadd.f32 %v7407_v5, %v316_v12  ;;  %v353_v24 = vadd.f32 %v7407_v5, %v317_v14  ;;  %v7083_v31 = vunpack.c.l.bf16 %v7486_v17 }
  0x21   : > { %7310 = vmatpush.bf16.msra.mxu3 %v6935_v63  ;;  %1887 = vmatpush.bf16.msra.mxu0 %v6935_v63  ;;  %v7146_v28 = vpack.c.bf16 %v397_v15, %v396_v11  ;;  %v360_v30 = vadd.f32 %v7407_v5, %v324_v21  ;;  %v361_v35 = vadd.f32 %v7407_v5, %v325_v25  ;;  %v7031_v39 = vunpack.c.l.bf16 %v7030_v27  ;;  %v6909_v63 = vld [vmem:[#allocation2 + $0x4] sm:$0xff] }
  0x22   : > { %v7151_v29 = vpack.c.bf16 %v399_v19, %v398_v18  ;;  %v384_v33 = vmax.f32 %v352_v23, 0.0  ;;  %v385_v34 = vmax.f32 %v353_v24, 0.0  ;;  %v332_v36 = vmul.f32 %v7402_v4, %v7080_v26  ;;  %v6931_v26 = vld [vmem:[%s9967_s3 + $0x30] sm:$0xff] }
  0x23   : > { %7273 = vst [vmem:[#allocation2 + $0x60] sm:$0xff] %v7146_v28   ;;  %v392_v37 = vmax.f32 %v360_v30, 0.0  ;;  %v333_v38 = vmul.f32 %v7402_v4, %v7083_v31  ;;  %v7032_v40 = vunpack.c.h.bf16 %v7030_v27  ;;  %v393_v43 = vmax.f32 %v361_v35, 0.0  ;;  %v6913_v57 = vld [vmem:[#allocation2 + $0x24] sm:$0xff] }
  0x24   : > { %7311 = vmatpush.bf16.msra.mxu1 %v6934_v22  ;;  %7312 = vmatpush.bf16.msra.mxu2 %v6934_v22  ;;  %7274 = vst [vmem:[#allocation2 + $0x68] sm:$0xff] %v7151_v29   ;;  %v7116_v42 = vpack.c.bf16 %v385_v34, %v384_v33  ;;  %v368_v44 = vadd.f32 %v7407_v5, %v332_v36  ;;  %v7035_v45 = vunpack.c.l.bf16 %v7500_v32  ;;  %v7052_v49 = vunpack.c.h.bf16 %v7463_v53  ;;  %v7560_v36 = vld [vmem:[%s7397_s29 + $0x78] sm:$0xff]  }
  0x25   : > { %7313 = vmatpush.bf16.msra.mxu3 %v6934_v22  ;;  %1888 = vmatpush.bf16.msra.mxu0 %v6934_v22  ;;  %v369_v46 = vadd.f32 %v7407_v5, %v333_v38  ;;  %v307_v47 = vmul.f32 %v7402_v4, %v7031_v39  ;;  %v308_v48 = vmul.f32 %v7402_v4, %v7032_v40  ;;  %v7055_v56 = vunpack.c.l.bf16 %v7421_v13  ;;  %v6917_v58 = vld [vmem:[#allocation2 + $0x44] sm:$0xff] }
  0x26   : > { %7267 = vst [vmem:[#allocation2 + $0x30] sm:$0xff] %v7116_v42   ;;  %v7136_v52 = vpack.c.bf16 %v393_v43, %v392_v37  ;;  %v400_v54 = vmax.f32 %v368_v44, 0.0  ;;  %v309_v55 = vmul.f32 %v7402_v4, %v7035_v45  ;;  %v318_v61 = vmul.f32 %v7402_v4, %v7052_v49  ;;  %v6946_v37 = vld [vmem:[%s9967_s3 + $0xa8] sm:$0xff] }
  0x27   : > { %v401_v59 = vmax.f32 %v369_v46, 0.0  ;;  %v343_v53 = vadd.f32 %v7407_v5, %v307_v47  ;;  %v344_v60 = vadd.f32 %v7407_v5, %v308_v48  ;;  %v319_v2 = vmul.f32 %v7402_v4, %v7055_v56  ;;  %v6970_v38 = vld [vmem:[%s9967_s3 + $0xe8] sm:$0xff]  ;;  %v6945_v56 = vld [vmem:[%s9967_s3 + $0xa0] sm:$0xff] }
  0x28   : > { %7314 = vmatpush.bf16.msra.mxu1 %v6933_v41  ;;  %7315 = vmatpush.bf16.msra.mxu2 %v6933_v41  ;;  %7271 = vst [vmem:[#allocation2 + $0x50] sm:$0xff] %v7136_v52   ;;  %v345_v13 = vadd.f32 %v7407_v5, %v309_v55  ;;  %v7068_v3 = vunpack.c.h.bf16 %v7471_v62  ;;  %v7071_v7 = vunpack.c.l.bf16 %v7431_v20  ;;  %v354_v14 = vadd.f32 %v7407_v5, %v318_v61  ;;  %v6947_v62 = vld [vmem:[%s9967_s3 + $0xb0] sm:$0xff]  ;;  %v6930_v45 = vld [vmem:[%s9967_s3 + $0x28] sm:$0xff] }
  0x29   : > { %7316 = vmatpush.bf16.msra.mxu3 %v6933_v41  ;;  %1889 = vmatpush.bf16.msra.mxu0 %v6933_v41  ;;  %v7156_v10 = vpack.c.bf16 %v401_v59, %v400_v54  ;;  %v375_v11 = vmax.f32 %v343_v53, 0.0  ;;  %v376_v12 = vmax.f32 %v344_v60, 0.0  ;;  %v6971_v20 = vld [vmem:[%s9967_s3 + $0xf0] sm:$0xff]  ;;  %v355_v15 = vadd.f32 %v7407_v5, %v319_v2 }
  0x2a   : > { %v377_v16 = vmax.f32 %v345_v13, 0.0  ;;  %v326_v18 = vmul.f32 %v7402_v4, %v7068_v3  ;;  %v327_v19 = vmul.f32 %v7402_v4, %v7071_v7  ;;  %v386_v23 = vmax.f32 %v354_v14, 0.0  ;;  %v6944_v14 = vld [vmem:[%s9967_s3 + $0x98] sm:$0xff] }
  0x2b   : > { %1910 = vmatmul.bf16.vlgmr.msra.gmra.mxu1 %v6913_v57  ;;  %1930 = vmatmul.bf16.vlgmr.msra.gmra.mxu2 %v6917_v58  ;;  %v6921_v21 = vld [vmem:[#allocation2 + $0x64] sm:$0xff]  ;;  %7275 = vst [vmem:[#allocation2 + $0x70] sm:$0xff] %v7156_v10   ;;  %v413_v22 = vpack.c.bf16 %v375_v11, %v375_v11  ;;  %v7084_v24 = vunpack.c.h.bf16 %v7486_v17  ;;  %v7087_v25 = vunpack.c.l.bf16 %v7261_v8  ;;  %v387_v28 = vmax.f32 %v355_v15, 0.0  ;;  %v6979_v17 = vld [vmem:[%s9967_s3 + $0x130] sm:$0xff] }
  0x2c   : > { %3372 = vmatpush.bf16.msrb.mxu2 %v6948_v50  ;;  %1890 = vmatmul.bf16.vlgmr.msra.gmra.mxu0 %v6909_v63  ;;  %v7096_v27 = vpack.c.bf16 %v377_v16, %v376_v12  ;;  %v362_v29 = vadd.f32 %v7407_v5, %v326_v18  ;;  %v363_v30 = vadd.f32 %v7407_v5, %v327_v19  ;;  %v7036_v34 = vunpack.c.h.bf16 %v7500_v32  ;;  %v6978_v50 = vld [vmem:[%s9967_s3 + $0x128] sm:$0xff]  ;;  %v6969_v57 = vld [vmem:[%s9967_s3 + $0xe0] sm:$0xff] }
  0x2d   : > { %3875 = vmatpush.bf16.msrb.mxu3 %v6972_v51  ;;  %2271 = vmatpush.bf16.msrb.mxu1 %v6932_v0  ;;  %445 = vst [vmem:[#allocation2 + $0xc] sm:$0xf] %v413_v22  ;;  %v334_v31 = vmul.f32 %v7402_v4, %v7084_v24  ;;  %v335_v33 = vmul.f32 %v7402_v4, %v7087_v25  ;;  %v7039_v35 = vunpack.c.l.bf16 %v7411_v6  ;;  %v7088_v42 = vunpack.c.h.bf16 %v7261_v8  ;;  %v6929_v0 = vld [vmem:[%s9967_s3 + $0x20] sm:$0xff]  ;;  %v6914_v8 = vld [vmem:[#allocation2 + $0x2c] sm:$0xff] }
  0x2e   : > { %1950 = vmatmul.bf16.vlgmr.msra.gmra.mxu3 %v6921_v21  ;;  %4157 = vmatpush.bf16.msrb.mxu0 %v6980_v9  ;;  %7263 = vst [vmem:[#allocation2 + $0x10] sm:$0xff] %v7096_v27   ;;  %v7121_v39 = vpack.c.bf16 %v387_v28, %v386_v23  ;;  %v394_v40 = vmax.f32 %v362_v29, 0.0  ;;  %v395_v41 = vmax.f32 %v363_v30, 0.0  ;;  %v310_v43 = vmul.f32 %v7402_v4, %v7036_v34  ;;  %v6977_v10 = vld [vmem:[%s9967_s3 + $0x120] sm:$0xff]  ;;  %v6928_v21 = vld [vmem:[%s9967_s3 + $0x18] sm:$0xff]  ;;  %v6967_v27 = vld [vmem:[%s9967_s3 + $0xd0] sm:$0xff] }
  0x2f   : > { %v370_v32 = vadd.f32 %v7407_v5, %v334_v31  ;;  %v371_v6 = vadd.f32 %v7407_v5, %v335_v33  ;;  %v311_v44 = vmul.f32 %v7402_v4, %v7039_v35  ;;  %v7091_v47 = vunpack.c.l.bf16 %v7560_v36  ;;  %v6918_v19 = vld [vmem:[#allocation2 + $0x4c] sm:$0xff]  ;;  %v6976_v31 = vld [vmem:[%s9967_s3 + $0x118] sm:$0xff] }
  0x30   : > { %3373 = vmatpush.bf16.msrb.mxu2 %v6947_v62  ;;  %7268 = vst [vmem:[#allocation2 + $0x38] sm:$0xff] %v7121_v39   ;;  %v7141_v46 = vpack.c.bf16 %v395_v41, %v394_v40  ;;  %v336_v48 = vmul.f32 %v7402_v4, %v7088_v42  ;;  %v477_v49 = vlaneseq  ;;  %v346_v54 = vadd.f32 %v7407_v5, %v310_v43  ;;  %v6968_v62 = vld [vmem:[%s9967_s3 + $0xd8] sm:$0xff] }
  0x31   : > { %3876 = vmatpush.bf16.msrb.mxu3 %v6971_v20  ;;  %2272 = vmatpush.bf16.msrb.mxu1 %v6931_v26  ;;  %v402_v51 = vmax.f32 %v370_v32, 0.0  ;;  %v403_v52 = vmax.f32 %v371_v6, 0.0  ;;  %v347_v55 = vadd.f32 %v7407_v5, %v311_v44  ;;  %v337_v58 = vmul.f32 %v7402_v4, %v7091_v47  ;;  %v6943_v26 = vld [vmem:[%s9967_s3 + $0x90] sm:$0xff] }
  0x32   : > { %4158 = vmatpush.bf16.msrb.mxu0 %v6979_v17  ;;  %7272 = vst [vmem:[#allocation2 + $0x58] sm:$0xff] %v7141_v46   ;;  %v372_v59 = vadd.f32 %v7407_v5, %v336_v48  ;;  %v7590_v53 = vshrl.u32 %v477_v49, 7  ;;  %v378_v61 = vmax.f32 %v346_v54, 0.0  ;;  %v7602_v11 = vsel %vm1056_vm1, 65537, %v9994_v1  ;;  %v6922_v17 = vld [vmem:[#allocation2 + $0x6c] sm:$0xff] }
  0x33   : > { %v7161_v60 = vpack.c.bf16 %v403_v52, %v402_v51  ;;  %v379_v63 = vmax.f32 %v347_v55, 0.0  ;;  %v373_v13 = vadd.f32 %v7407_v5, %v337_v58  ;;  %v1132_v18 = vshll.u32 %v7602_v11, 16  ;;  %v6927_v32 = vld [vmem:[%s9967_s3 + $0x10] sm:$0xff]  ;;  %v6966_v49 = vld [vmem:[%s9967_s3 + $0xc8] sm:$0xff] }
  0x34   : > { %3374 = vmatpush.bf16.msrb.mxu2 %v6946_v37  ;;  %v404_v2 = vmax.f32 %v372_v59, 0.0  ;;  %v480_v3 = vadd.s32 16, %v7590_v53  ;;  %v514_v7 = vand.u32 15, %v7590_v53  ;;  %v479_v12 = vadd.s32 8, %v7590_v53  ;;  %v6975_v44 = vld [vmem:[%s9967_s3 + $0x110] sm:$0xff]  ;;  %v6926_v59 = vld [vmem:[%s9967_s3 + $0x8] sm:$0xff] }
  0x35   : > { %3877 = vmatpush.bf16.msrb.mxu3 %v6970_v38  ;;  %2273 = vmatpush.bf16.msrb.mxu1 %v6930_v45  ;;  %7276 = vst [vmem:[#allocation2 + $0x78] sm:$0xff] %v7161_v60   ;;  %v7101_v9 = vpack.c.bf16 %v379_v63, %v378_v61  ;;  %v7606_v5 = vadd.s32 24, %v7590_v53  ;;  %v405_v20 = vmax.f32 %v373_v13, 0.0  ;;  %v1136_v22 = vshrl.u32 %v7602_v11, 16  ;;  %v6910_v25 = vld [vmem:[#allocation2 + $0xc] sm:$0xff] }
  0x36   : > { %4159 = vmatpush.bf16.msrb.mxu0 %v6978_v50  ;;  %v528_v16 = vand.u32 15, %v480_v3  ;;  %vm7614_vm2 = vcmp.ge.s32.totalorder %v514_v7, 1  ;;  %v521_v23 = vand.u32 15, %v479_v12  ;;  %v7636_v30 = vrot.slane %v1132_v18, 5  ;;  %v958_v60 = vld [vmem:[#allocation2] sm:$0x8] }
  0x37   : > { %7264 = vst [vmem:[#allocation2 + $0x18] sm:$0xff] %v7101_v9   ;;  %vm1055_vm3 = vmpackc.low %vm7614_vm2, %vm7614_vm2  ;;  %v535_v24 = vand.u32 15, %v7606_v5  ;;  %v7166_v28 = vpack.c.bf16 %v405_v20, %v404_v2  ;;  %v1138_v35 = vrot.slane %v1136_v22, 4  ;;  %v7092_v39 = vunpack.c.h.bf16 %v7560_v36  ;;  %v6974_v13 = vld [vmem:[%s9967_s3 + $0x108] sm:$0xff]  ;;  %v959_v20 = vld [vmem:[#allocation2 + $0x4] sm:$0xf] }
  0x38   : > { %3375 = vmatpush.bf16.msrb.mxu2 %v6945_v56  ;;  %vm896_vm4 = vcmp.ge.s32.totalorder %v528_v16, 1  ;;  %v1087_v29 = vsel %vm1055_vm3, 65537, %v9994_v1  ;;  %vm7643_vm6 = vcmp.lt.s32.totalorder %v521_v23, 15  ;;  %v7677_v54 = vunpack.c.l.b16 %v9994_v1  ;;  %v960_v9 = vld [vmem:[#allocation2 + $0x8] sm:$0xf] }
  0x39   : > { %3878 = vmatpush.bf16.msrb.mxu3 %v6969_v57  ;;  %2274 = vmatpush.bf16.msrb.mxu1 %v6929_v0  ;;  %vm1057_vm5 = vmpackc.low %vm896_vm4, %vm896_vm4  ;;  %v1123_v33 = vshll.u32 %v1087_v29, 16  ;;  %v1126_v34 = vshrl.u32 %v1087_v29, 16  ;;  %7277 = vst [vmem:[#allocation2 + $0x80] sm:$0xff] %v7166_v28   ;;  %v1139_v42 = vor.u32 %v1138_v35, %v7636_v30  ;;  %v7657_v36 = vmul.f32 %v7402_v4, %v7092_v39  ;;  %v6942_v4 = vld [vmem:[%s9967_s3 + $0x88] sm:$0xff]  ;;  %v6941_v0 = vld [vmem:[%s9967_s3 + $0x80] sm:$0xff] }
  0x3a   : > { %4160 = vmatpush.bf16.msrb.mxu0 %v6977_v10  ;;  %v1089_v38 = vsel %vm1057_vm5, 65537, %v9994_v1  ;;  %vm2458_vm9 = vmpackc.low %vm7643_vm6, %vm7643_vm6  ;;  %v7680_v56 = vunpack.c.h.b16 %v9994_v1  ;;  %vm7682_vm11 = vcmp.lt.s32.totalorder %v535_v24, 15  ;;  %v6973_v24 = vld [vmem:[%s9967_s3 + $0x100] sm:$0xff]  ;;  %vm2522_vm7 = vsmask.f32 4368  ;;  %v6915_v35 = vld [vmem:[#allocation2 + $0x34] sm:$0xff] }
  0x3b   : > { %1915 = vmatmul.bf16.gmra.mxu1 %v6914_v8  ;;  %1935 = vmatmul.bf16.gmra.mxu2 %v6918_v19  ;;  %v1125_v40 = vrot.slane %v1123_v33, 5  ;;  %v1128_v41 = vrot.slane %v1126_v34, 4  ;;  %v1142_v6 = vshll.u32 %v1089_v38, 16  ;;  %v1146_v43 = vshrl.u32 %v1089_v38, 16  ;;  %v6965_v8 = vld [vmem:[%s9967_s3 + $0xc0] sm:$0xff]  ;;  %vm2460_vm2 = vmpackc.low %vm7682_vm11, %vm7682_vm11  ;;  %v6919_v37 = vld [vmem:[#allocation2 + $0x54] sm:$0xff] }
  0x3c   : > { %3376 = vmatpush.bf16.msrb.mxu2 %v6944_v14  ;;  %1895 = vmatmul.bf16.gmra.mxu0 %v6910_v25  ;;  %v7668_v47 = vrot.slane %v1139_v42, 4  ;;  %v7692_v58 = vsel %vm2458_vm9, 65537, %v9994_v1  ;;  %v6925_v19 = vld [vmem:[%s9967_s3] sm:$0xff]  ;;  %v2492_v29 = vsel %vm2460_vm2, 65537, %v9994_v1 }
  0x3d   : > { %3879 = vmatpush.bf16.msrb.mxu3 %v6968_v62  ;;  %2275 = vmatpush.bf16.msrb.mxu1 %v6928_v21  ;;  %v1129_v46 = vor.u32 %v1128_v41, %v1125_v40  ;;  %v1441_v48 = vunpack.c.l.b16 %v1125_v40  ;;  %v1144_v50 = vrot.slane %v1142_v6, 5  ;;  %v1148_v51 = vrot.slane %v1146_v43, 4  ;;  %v6923_v6 = vld [vmem:[#allocation2 + $0x74] sm:$0xff] }
  0x3e   : > { %1955 = vmatmul.bf16.gmra.mxu3 %v6922_v17  ;;  %4161 = vmatpush.bf16.msrb.mxu0 %v6976_v31  ;;  %v1442_v52 = vunpack.c.h.b16 %v1125_v40  ;;  %v2527_v62 = vrot.slane %v1136_v22, 7  ;;  %v2533_v15 = vshrl.u32 %v7692_v58, 16  ;;  %v10113_v22 = vmov 0  ;;  %v961_v17 = vld [vmem:[#allocation2 + $0xc] sm:$0xf]  ;;  %v6911_v40 = vld [vmem:[#allocation2 + $0x14] sm:$0xff] }
  0x3f   : > { %v1130_v55 = vrot.slane %v1129_v46, 4  ;;  %v1145_v61 = vsel %vm7664_vm10, %v7668_v47, %v1144_v50  ;;  %v1149_v63 = vor.u32 %v1148_v51, %v1144_v50  ;;  %vm1445_vm12 = vcmp.ne.s32.totalorder %v1441_v48, %v7677_v54 }
  0x40   : > { %3377 = vmatpush.bf16.msrb.mxu2 %v6943_v26  ;;  %vm1446_vm14 = vcmp.ne.s32.totalorder %v1442_v52, %v7680_v56  ;;  %v1455_v3 = vunpack.c.l.b16 %v1145_v61  ;;  %v1456_v7 = vunpack.c.h.b16 %v1145_v61  ;;  %v7754_v34 = vor.u32 %v2527_v62, %v1132_v18  ;;  %v2360_v61 = vld [vmem:[#allocation2 + $0x4] sm:$0xf] }
  0x41   : > { %3880 = vmatpush.bf16.msrb.mxu3 %v6967_v27  ;;  %2276 = vmatpush.bf16.msrb.mxu1 %v6927_v32  ;;  %v1135_v2 = vsel %vm7664_vm10, %v1130_v55, %v7636_v30  ;;  %v1150_v10 = vrot.slane %v1149_v63, 4  ;;  %vm7714_vm15 = vmpackc.low %vm1446_vm14, %vm1445_vm12  ;;  %v7758_v39 = vrot.slane %v2527_v62, 4  ;;  %v10117_v41 = vmov 0 }
  0x42   : > { %4162 = vmatpush.bf16.msrb.mxu0 %v6975_v44  ;;  %v1448_v5 = vunpack.c.l.b16 %v1135_v2  ;;  %v1449_v14 = vunpack.c.h.b16 %v1135_v2  ;;  %vm1459_vm0 = vcmp.ne.s32.totalorder %v1455_v3, %v7677_v54  ;;  %vm1460_vm1 = vcmp.ne.s32.totalorder %v1456_v7, %v7680_v56  ;;  %vm7769_vm14 = vmor %vm2521_vm13, %vm2522_vm7  ;;  %v2361_v7 = vld [vmem:[#allocation2 + $0x8] sm:$0xf] }
  0x43   : > { %v1672_v16 = vsel %vm7714_vm15, %v958_v60, 0  ;;  %v1155_v21 = vsel %vm7664_vm10, %v1150_v10, %v7636_v30  ;;  %vm7736_vm5 = vmpackc.low %vm1460_vm1, %vm1459_vm0  ;;  %v2535_v42 = vrot.slane %v2533_v15, 7  ;;  %v2536_v11 = vshll.u32 %v7692_v58, 16  ;;  %v7012_v10 = vld [vmem:[%s9967_s3 + $0x1b8] sm:$0xff] }
  0x44   : > { %3378 = vmatpush.bf16.msrb.mxu2 %v6942_v4  ;;  %vm1452_vm3 = vcmp.ne.s32.totalorder %v1448_v5, %v7677_v54  ;;  %vm1453_vm4 = vcmp.ne.s32.totalorder %v1449_v14, %v7680_v56  ;;  %v10114_v22 = vsel %vm7736_vm5, 4294967295, %v10113_v22  ;;  %v2004_v23 = vunpack.c.l.b16 %v1672_v16  ;;  %v7020_v5 = vld [vmem:[%s9967_s3 + $0x1f8] sm:$0xff] }
  0x45   : > { %3881 = vmatpush.bf16.msrb.mxu3 %v6966_v49  ;;  %2277 = vmatpush.bf16.msrb.mxu1 %v6926_v59  ;;  %vm7743_vm6 = vmpackc.low %vm1453_vm4, %vm1452_vm3  ;;  %v1462_v26 = vunpack.c.l.b16 %v1155_v21  ;;  %v1463_v27 = vunpack.c.h.b16 %v1155_v21  ;;  %v1674_v28 = vsel %vm7736_vm5, %v960_v9, 0  ;;  %v2551_v18 = vshrl.u32 %v2492_v29, 16  ;;  %v7028_v21 = vld [vmem:[%s9967_s3 + $0x238] sm:$0xff] }
  0x46   : > { %4163 = vmatpush.bf16.msrb.mxu0 %v6974_v13  ;;  %v1673_v31 = vsel %vm7743_vm6, %v959_v20, 0  ;;  %v2006_v33 = vunpack.c.l.b16 %v1674_v28  ;;  %v2554_v32 = vshll.u32 %v2492_v29, 16  ;;  %vm9970_vm12 = vsmask.f32 4352  ;;  %v2362_v28 = vld [vmem:[#allocation2 + $0xc] sm:$0xf] }
  0x47   : > { %vm1466_vm8 = vcmp.ne.s32.totalorder %v1462_v26, %v7677_v54  ;;  %vm1467_vm9 = vcmp.ne.s32.totalorder %v1463_v27, %v7680_v56  ;;  %v2005_v38 = vunpack.c.l.b16 %v1673_v31  ;;  %v2811_v48 = vunpack.c.l.b16 %v7754_v34  ;;  %v3493_v31 = vld [vmem:[#allocation2 + $0x8] sm:$0x8] }
  0x48   : > { %3379 = vmatpush.bf16.msrb.mxu2 %v6941_v0  ;;  %vm7760_vm11 = vmpackc.low %vm1467_vm9, %vm1466_vm8  ;;  %v2812_v4 = vunpack.c.h.b16 %v7754_v34  ;;  %v2538_v50 = vor.u32 %v2536_v11, %v2535_v42  ;;  %v2540_v51 = vrot.slane %v2535_v42, 4  ;;  %v7775_v52 = vrot.slane %v2551_v18, 7 }
  0x49   : > { %3882 = vmatpush.bf16.msrb.mxu3 %v6965_v8  ;;  %2278 = vmatpush.bf16.msrb.mxu1 %v6925_v19  ;;  %v10118_v41 = vsel %vm7760_vm11, 4294967295, %v10117_v41  ;;  %v1675_v43 = vsel %vm7760_vm11, %v961_v17, 0  ;;  %v2037_v44 = vpack.c.b16 %v2005_v38, %v2004_v23  ;;  %vm7778_vm0 = vcmp.ne.s32.totalorder %v2811_v48, %v7677_v54  ;;  %v6988_v19 = vld [vmem:[%s9967_s3 + $0x178] sm:$0xff] }
  0x4a   : > { %4164 = vmatpush.bf16.msrb.mxu0 %v6973_v24  ;;  %v2007_v49 = vunpack.c.l.b16 %v1675_v43  ;;  %vm7783_vm13 = vcmp.ne.s32.totalorder %v2812_v4, %v7680_v56  ;;  %v2539_v63 = vsel %vm7769_vm14, %v7758_v39, %v2538_v50  ;;  %v2548_v0 = vsel %vm7769_vm14, %v2540_v51, %v7754_v34  ;;  %v3496_v43 = vld [vmem:[#allocation2 + $0x14] sm:$0xf] }
  0x4b   : > { %1920 = vmatmul.bf16.gmra.mxu1 %v6915_v35  ;;  %1940 = vmatmul.bf16.gmra.mxu2 %v6919_v37  ;;  %v2056_v55 = vshrl.u32 %v2037_v44, 16  ;;  %v2059_v57 = vshll.u32 %v2037_v44, 16  ;;  %v2556_v13 = vor.u32 %v2554_v32, %v7775_v52  ;;  %v2818_v8 = vunpack.c.l.b16 %v2539_v63  ;;  %vm7807_vm1 = vmpackc.low %vm7783_vm13, %vm7778_vm0 }
  0x4c   : > { %1900 = vmatmul.bf16.gmra.mxu0 %v6911_v40  ;;  %v2038_v60 = vpack.c.b16 %v2007_v49, %v2006_v33  ;;  %v2819_v9 = vunpack.c.h.b16 %v2539_v63  ;;  %v2825_v15 = vunpack.c.l.b16 %v2548_v0  ;;  %v2826_v24 = vunpack.c.h.b16 %v2548_v0  ;;  %5143 = vmatpush.bf16.msra.mxu2 %v7012_v10  ;;  %v2363_v33 = vld [vmem:[#allocation2 + $0x10] sm:$0xf]  ;;  %v3494_v40 = vld [vmem:[#allocation2 + $0xc] sm:$0xf] }
  0x4d   : > { %v2058_v2 = vrot.slane %v2056_v55, 3  ;;  %v2061_v3 = vrot.slane %v2059_v57, 4  ;;  %v2557_v20 = vsel %vm7769_vm14, %v7758_v39, %v2556_v13  ;;  %vm2822_vm2 = vcmp.ne.s32.totalorder %v2818_v8, %v7677_v54  ;;  %5425 = vmatpush.bf16.msra.mxu3 %v7020_v5  ;;  %4640 = vmatpush.bf16.msra.mxu1 %v6988_v19  ;;  %v6912_v5 = vld [vmem:[#allocation2 + $0x1c] sm:$0xff] }
  0x4e   : > { %1960 = vmatmul.bf16.gmra.mxu3 %v6923_v6  ;;  %v2064_v14 = vshrl.u32 %v2038_v60, 16  ;;  %v2067_v62 = vshll.u32 %v2038_v60, 16  ;;  %vm2823_vm3 = vcmp.ne.s32.totalorder %v2819_v9, %v7680_v56  ;;  %vm2829_vm7 = vcmp.ne.s32.totalorder %v2825_v15, %v7677_v54  ;;  %5908 = vmatpush.bf16.msra.mxu0 %v7028_v21  ;;  %v3495_v6 = vld [vmem:[#allocation2 + $0x10] sm:$0xf]  ;;  %v6924_v19 = vld [vmem:[#allocation2 + $0x7c] sm:$0xff] }
  0x4f   : > { %v2062_v23 = vor.u32 %v2061_v3, %v2058_v2  ;;  %vm7819_vm4 = vmpackc.low %vm2823_vm3, %vm2822_vm2  ;;  %v2832_v17 = vunpack.c.l.b16 %v2557_v20  ;;  %vm2830_vm8 = vcmp.ne.s32.totalorder %v2826_v24, %v7680_v56  ;;  %v2833_v35 = vunpack.c.h.b16 %v2557_v20  ;;  %v6916_v2 = vld [vmem:[#allocation2 + $0x3c] sm:$0xff] }
  0x50   : > { %v2066_v26 = vrot.slane %v2064_v14, 3  ;;  %v2069_v27 = vrot.slane %v2067_v62, 4  ;;  %v3042_v37 = vsel %vm7807_vm1, %v2360_v61, 0  ;;  %v3043_v38 = vsel %vm7819_vm4, %v2361_v7, 0  ;;  %vm7831_vm9 = vmpackc.low %vm2830_vm8, %vm2829_vm7  ;;  %v6920_v3 = vld [vmem:[#allocation2 + $0x5c] sm:$0xff] }
  0x51   : > { %vm2836_vm0 = vcmp.ne.s32.totalorder %v2832_v17, %v7677_v54  ;;  %v3125_v18 = vunpack.c.l.b16 %v3042_v37  ;;  %v3126_v32 = vunpack.c.l.b16 %v3043_v38  ;;  %vm2837_vm13 = vcmp.ne.s32.totalorder %v2833_v35, %v7680_v56 }
  0x52   : > { %v7829_v42 = vor.u32 %v2069_v27, %v2066_v26  ;;  %v3044_v44 = vsel %vm7831_vm9, %v2362_v28, 0  ;;  %vm9971_vm2 = vsmask.f32 7424  ;;  %v3526_v48 = vsel %vm7714_vm15, %v3493_v31, 0  ;;  %vm7845_vm3 = vmpackc.low %vm2837_vm13, %vm2836_vm0 }
  0x53   : > { %v3127_v50 = vunpack.c.l.b16 %v3044_v44  ;;  %v3158_v51 = vpack.c.b16 %v3126_v32, %v3125_v18  ;;  %v3527_v55 = vsel %vm7743_vm6, %v3494_v40, 0  ;;  %v3045_v57 = vsel %vm7845_vm3, %v2363_v33, 0 }
  0x54   : > { %v7843_v4 = vsel %vm9970_vm12, %v2062_v23, %v7829_v42  ;;  %v3528_v58 = vsel %vm7736_vm5, %v3495_v6, 0  ;;  %v3529_v59 = vsel %vm7760_vm11, %v3496_v43, 0  ;;  %v3609_v60 = vunpack.c.l.b16 %v3526_v48 }
  0x55   : > { %v3128_v61 = vunpack.c.l.b16 %v3045_v57  ;;  %v3177_v63 = vshrl.u32 %v3158_v51, 16  ;;  %v3179_v0 = vshll.u32 %v3158_v51, 16  ;;  %v3610_v13 = vunpack.c.l.b16 %v3527_v55 }
  0x56   : > { %v3611_v7 = vunpack.c.l.b16 %v3528_v58  ;;  %v3612_v8 = vunpack.c.l.b16 %v3529_v59  ;;  %v482_v9 = vadd.s32 32, %v7590_v53  ;;  %v483_v10 = vadd.s32 40, %v7590_v53 }
  0x57   : > { %v3159_v14 = vpack.c.b16 %v3128_v61, %v3127_v50  ;;  %v3181_v62 = vrot.slane %v3179_v0, 1  ;;  %v3642_v20 = vpack.c.b16 %v3610_v13, %v3609_v60  ;;  %v2558_v15 = vrot.slane %v7775_v52, 4 }
  0x58   : > { %v3643_v21 = vpack.c.b16 %v3612_v8, %v3611_v7  ;;  %v542_v23 = vand.u32 15, %v482_v9  ;;  %v549_v24 = vand.u32 15, %v483_v10  ;;  %v484_v26 = vadd.s32 48, %v7590_v53 }
  0x59   : > { %v3182_v27 = vor.u32 %v3181_v62, %v3177_v63  ;;  %v3184_v28 = vshll.u32 %v3159_v14, 16  ;;  %v3660_v17 = vshrl.u32 %v3642_v20, 16  ;;  %v3663_v31 = vshll.u32 %v3642_v20, 16  ;;  %v2364_v63 = vld [vmem:[#allocation2 + $0x14] sm:$0xf] }
  0x5a   : > { %v3668_v33 = vshrl.u32 %v3643_v21, 16  ;;  %v3671_v35 = vshll.u32 %v3643_v21, 16  ;;  %vm898_vm7 = vcmp.ge.s32.totalorder %v542_v23, 1  ;;  %vm7861_vm8 = vcmp.lt.s32.totalorder %v549_v24, 15 }
  0x5b   : > { %1925 = vmatmul.bf16.gmra.mxu1 %v6916_v2  ;;  %1945 = vmatmul.bf16.gmra.mxu2 %v6920_v3  ;;  %v3186_v52 = vrot.slane %v3184_v28, 1  ;;  %v3662_v38 = vrot.slane %v3660_v17, 3  ;;  %v3665_v40 = vrot.slane %v3663_v31, 4  ;;  %vm1059_vm0 = vmpackc.low %vm898_vm7, %vm898_vm7  ;;  %v2566_v18 = vsel %vm7769_vm14, %v2558_v15, %v7754_v34 }
  0x5c   : > { %1905 = vmatmul.bf16.gmra.mxu0 %v6912_v5  ;;  %v3670_v32 = vrot.slane %v3668_v33, 3  ;;  %v3673_v6 = vrot.slane %v3671_v35, 4  ;;  %v1091_v43 = vsel %vm1059_vm0, 65537, %v9994_v1  ;;  %vm2462_vm13 = vmpackc.low %vm7861_vm8, %vm7861_vm8  ;;  %v2839_v44 = vunpack.c.l.b16 %v2566_v18 }
  0x5d   : > { %v7873_v48 = vsel %vm9971_vm2, %v3182_v27, %v3186_v52  ;;  %v3666_v50 = vor.u32 %v3665_v40, %v3662_v38  ;;  %v1162_v51 = vshll.u32 %v1091_v43, 16  ;;  %v1166_v55 = vshrl.u32 %v1091_v43, 16  ;;  %v3497_v27 = vld [vmem:[#allocation2 + $0x18] sm:$0xf]  ;;  %v6949_v38 = vld [vmem:[#allocation2 + $0xc] sm:$0xff] }
  0x5e   : > { %1965 = vmatmul.bf16.gmra.mxu3 %v6924_v19  ;;  %v7875_v57 = vor.u32 %v3673_v6, %v3670_v32  ;;  %v2494_v58 = vsel %vm2462_vm13, 65537, %v9994_v1  ;;  %v2840_v59 = vunpack.c.h.b16 %v2566_v18  ;;  %vm2843_vm7 = vcmp.ne.s32.totalorder %v2839_v44, %v7677_v54  ;;  %v963_v43 = vld [vmem:[#allocation2 + $0x14] sm:$0xf] }
  0x5f   : > { %v1164_v60 = vrot.slane %v1162_v51, 5  ;;  %v1168_v61 = vrot.slane %v1166_v55, 4  ;;  %v2569_v0 = vshrl.u32 %v2494_v58, 16  ;;  %v2572_v13 = vshll.u32 %v2494_v58, 16  ;;  %v3498_v51 = vld [vmem:[#allocation2 + $0x1c] sm:$0xf] }
  0x60   : > { %v7881_v2 = vsel %vm9970_vm12, %v3666_v50, %v7875_v57  ;;  %vm2844_vm8 = vcmp.ne.s32.totalorder %v2840_v59, %v7680_v56  ;;  %v3188_v3 = vshrl.u32 %v3159_v14, 16  ;;  %v556_v7 = vand.u32 15, %v484_v26  ;;  %v962_v14 = vld [vmem:[#allocation2 + $0x10] sm:$0xf]  ;;  %v2365_v59 = vld [vmem:[#allocation2 + $0x18] sm:$0xf] }
  0x61   : > { %v1165_v8 = vsel %vm7664_vm10, %v7668_v47, %v1164_v60  ;;  %v1169_v9 = vor.u32 %v1168_v61, %v1164_v60  ;;  %v2571_v10 = vrot.slane %v2569_v0, 7  ;;  %vm7887_vm0 = vmpackc.low %vm2844_vm8, %vm2843_vm7  ;;  %v10135_v5 = vmov 0 }
  0x62   : > { %v10136_v5 = vsel %vm7887_vm0, 4294967295, %v10135_v5  ;;  %v485_v62 = vadd.s32 56, %v7590_v53  ;;  %v1469_v20 = vunpack.c.l.b16 %v1165_v8  ;;  %v1470_v15 = vunpack.c.h.b16 %v1165_v8 }
  0x63   : > { %v3046_v19 = vsel %vm7887_vm0, %v2364_v63, 0  ;;  %v7894_v21 = vor.u32 %v3188_v3, %v3186_v52  ;;  %v1170_v23 = vrot.slane %v1169_v9, 4  ;;  %v2574_v24 = vor.u32 %v2572_v13, %v2571_v10 }
  0x64   : > { %v3129_v26 = vunpack.c.l.b16 %v3046_v19  ;;  %vm900_vm13 = vcmp.ge.s32.totalorder %v556_v7, 1  ;;  %vm1473_vm12 = vcmp.ne.s32.totalorder %v1469_v20, %v7677_v54  ;;  %vm1474_vm7 = vcmp.ne.s32.totalorder %v1470_v15, %v7680_v56 }
  0x65   : > { %vm1061_vm8 = vmpackc.low %vm900_vm13, %vm900_vm13  ;;  %v563_v28 = vand.u32 15, %v485_v62  ;;  %v2576_v17 = vrot.slane %v2571_v10, 4  ;;  %v1175_v31 = vsel %vm7664_vm10, %v1170_v23, %v7636_v30  ;;  %v10137_v33 = vmov 0 }
  0x66   : > { %vm7901_vm2 = vmpackc.low %vm1474_vm7, %vm1473_vm12  ;;  %v2575_v35 = vsel %vm7769_vm14, %v7758_v39, %v2574_v24  ;;  %v1093_v37 = vsel %vm1061_vm8, 65537, %v9994_v1  ;;  %v7910_v52 = vadd.s32 64, %v7590_v53  ;;  %v1476_v40 = vunpack.c.l.b16 %v1175_v31  ;;  %v7011_v24 = vld [vmem:[%s9967_s3 + $0x1b0] sm:$0xff] }
  0x67   : > { %v10138_v33 = vsel %vm7901_vm2, 4294967295, %v10137_v33  ;;  %v1477_v18 = vunpack.c.h.b16 %v1175_v31  ;;  %v1676_v32 = vsel %vm7901_vm2, %v962_v14, 0  ;;  %v2846_v6 = vunpack.c.l.b16 %v2575_v35  ;;  %v964_v31 = vld [vmem:[#allocation2 + $0x18] sm:$0xf]  ;;  %5144 = vmatpush.bf16.msra.mxu2 %v7011_v24 }
  0x68   : > { %v2008_v44 = vunpack.c.l.b16 %v1676_v32  ;;  %v2847_v50 = vunpack.c.h.b16 %v2575_v35  ;;  %v3530_v55 = vsel %vm7901_vm2, %v3497_v27, 0  ;;  %v1182_v58 = vshll.u32 %v1093_v37, 16  ;;  %v7019_v27 = vld [vmem:[%s9967_s3 + $0x1f0] sm:$0xff] }
  0x69   : > { %vm1480_vm12 = vcmp.ne.s32.totalorder %v1476_v40, %v7677_v54  ;;  %vm1481_vm13 = vcmp.ne.s32.totalorder %v1477_v18, %v7680_v56  ;;  %vm2850_vm7 = vcmp.ne.s32.totalorder %v2846_v6, %v7677_v54  ;;  %v3613_v60 = vunpack.c.l.b16 %v3530_v55  ;;  %5426 = vmatpush.bf16.msra.mxu3 %v7019_v27 }
  0x6a   : > { %vm7919_vm8 = vmpackc.low %vm1481_vm13, %vm1480_vm12  ;;  %v10139_v61 = vmov 0  ;;  %vm2851_vm0 = vcmp.ne.s32.totalorder %v2847_v50, %v7680_v56  ;;  %v1184_v63 = vrot.slane %v1182_v58, 5  ;;  %v1186_v0 = vshrl.u32 %v1093_v37, 16 }
  0x6b   : > { %v10140_v61 = vsel %vm7919_vm8, 4294967295, %v10139_v61  ;;  %vm7924_vm11 = vcmp.lt.s32.totalorder %v563_v28, 15  ;;  %2279 = vmatmul.bf16.vlgmr.msrb.gmra.mxu1 %v7843_v4  ;;  %3380 = vmatmul.bf16.vlgmr.msrb.gmra.mxu2 %v7873_v48  ;;  %v1677_v3 = vsel %vm7919_vm8, %v963_v43, 0  ;;  %vm7932_vm2 = vmpackc.low %vm2851_vm0, %vm2850_vm7  ;;  %v10143_v7 = vmov 0 }
  0x6c   : > { %v10144_v7 = vsel %vm7932_vm2, 4294967295, %v10143_v7  ;;  %v3531_v8 = vsel %vm7919_vm8, %v3498_v51, 0  ;;  %v7941_v9 = vsel %vm7769_vm14, %v2576_v17, %v7754_v34  ;;  %v570_v10 = vand.u32 15, %v7910_v52  ;;  %4165 = vmatmul.bf16.vlgmr.msrb.gmra.mxu0 %v6949_v38  ;;  %vm2464_vm0 = vmpackc.low %vm7924_vm11, %vm7924_vm11  ;;  %v7027_v38 = vld [vmem:[%s9967_s3 + $0x230] sm:$0xff]  ;;  %v2367_v52 = vld [vmem:[#allocation2 + $0x20] sm:$0xf] }
  0x6d   : > { %v2009_v4 = vunpack.c.l.b16 %v1677_v3  ;;  %v3047_v48 = vsel %vm7932_vm2, %v2365_v59, 0  ;;  %v3614_v62 = vunpack.c.l.b16 %v3531_v8  ;;  %v1185_v20 = vsel %vm7664_vm10, %v7668_v47, %v1184_v63  ;;  %5909 = vmatpush.bf16.msra.mxu0 %v7027_v38 }
  0x6e   : > { %3883 = vmatmul.bf16.vlgmr.msrb.gmra.mxu3 %v7881_v2  ;;  %v3130_v15 = vunpack.c.l.b16 %v3047_v48  ;;  %v1188_v19 = vrot.slane %v1186_v0, 4  ;;  %v1483_v14 = vunpack.c.l.b16 %v1185_v20  ;;  %v1484_v23 = vunpack.c.h.b16 %v1185_v20  ;;  %v6987_v2 = vld [vmem:[%s9967_s3 + $0x170] sm:$0xff] }
  0x6f   : > { %v2039_v28 = vpack.c.b16 %v2009_v4, %v2008_v44  ;;  %v3644_v17 = vpack.c.b16 %v3614_v62, %v3613_v60  ;;  %v2496_v35 = vsel %vm2464_vm0, 65537, %v9994_v1  ;;  %v2853_v37 = vunpack.c.l.b16 %v7941_v9  ;;  %4641 = vmatpush.bf16.msra.mxu1 %v6987_v2  ;;  %v6950_v2 = vld [vmem:[#allocation2 + $0x14] sm:$0xff] }
  0x70   : > { %v3160_v40 = vpack.c.b16 %v3130_v15, %v3129_v26  ;;  %v1189_v18 = vor.u32 %v1188_v19, %v1184_v63  ;;  %vm1487_vm11 = vcmp.ne.s32.totalorder %v1483_v14, %v7677_v54  ;;  %vm1488_vm12 = vcmp.ne.s32.totalorder %v1484_v23, %v7680_v56  ;;  %v3499_v19 = vld [vmem:[#allocation2 + $0x20] sm:$0xf]  ;;  %v965_v23 = vld [vmem:[#allocation2 + $0x1c] sm:$0xf] }
  0x71   : > { %v2073_v32 = vshrl.u32 %v2039_v28, 16  ;;  %v2076_v6 = vshll.u32 %v2039_v28, 16  ;;  %v3677_v43 = vshrl.u32 %v3644_v17, 16  ;;  %v3680_v44 = vshll.u32 %v3644_v17, 16  ;;  %vm7969_vm13 = vmpackc.low %vm1488_vm12, %vm1487_vm11  ;;  %v3500_v28 = vld [vmem:[#allocation2 + $0x24] sm:$0xf] }
  0x72   : > { %v10145_v50 = vmov 0  ;;  %v3192_v51 = vshll.u32 %v3160_v40, 16  ;;  %v1190_v55 = vrot.slane %v1189_v18, 4  ;;  %v1678_v26 = vsel %vm7969_vm13, %v964_v31, 0 }
  0x73   : > { %v10146_v50 = vsel %vm7969_vm13, 4294967295, %v10145_v50  ;;  %v2587_v58 = vshrl.u32 %v2496_v35, 16  ;;  %v2075_v59 = vrot.slane %v2073_v32, 3  ;;  %v2078_v60 = vrot.slane %v2076_v6, 4 }
  0x74   : > { %10147 = vst [vmem:[#allocation3_spill] sm:$0xff] %v10146_v50  ;;  %v3679_v63 = vrot.slane %v3677_v43, 3  ;;  %v3682_v0 = vrot.slane %v3680_v44, 4  ;;  %v3194_v13 = vrot.slane %v3192_v51, 1  ;;  %v1195_v3 = vsel %vm7664_vm10, %v1190_v55, %v7636_v30 }
  0x75   : > { %v2010_v8 = vunpack.c.l.b16 %v1678_v26  ;;  %v7978_v4 = vrot.slane %v2587_v58, 7  ;;  %v7980_v48 = vor.u32 %v2078_v60, %v2075_v59  ;;  %v1490_v20 = vunpack.c.l.b16 %v1195_v3 }
  0x76   : > { %v7982_v62 = vor.u32 %v3682_v0, %v3679_v63  ;;  %v1491_v15 = vunpack.c.h.b16 %v1195_v3  ;;  %vm10148_vm7 = vsmask.f32 7424  ;;  %v2590_v24 = vshll.u32 %v2496_v35, 16 }
  0x77   : > { %v3195_v14 = vsel %vm10148_vm7, %v7894_v21, %v3194_v13  ;;  %v2854_v27 = vunpack.c.h.b16 %v7941_v9  ;;  %vm2857_vm0 = vcmp.ne.s32.totalorder %v2853_v37, %v7677_v54  ;;  %vm10149_vm11 = vsmask.f32 4352  ;;  %v2366_v21 = vld [vmem:[#allocation2 + $0x1c] sm:$0xf] }
  0x78   : > { %v2080_v17 = vsel %vm10149_vm11, %v7829_v42, %v7980_v48  ;;  %vm10150_vm12 = vmmov %vm10149_vm11  ;;  %vm1494_vm2 = vcmp.ne.s32.totalorder %v1490_v20, %v7677_v54  ;;  %vm1495_vm8 = vcmp.ne.s32.totalorder %v1491_v15, %v7680_v56  ;;  %v10151_v35 = vmov 0 }
  0x79   : > { %v3684_v31 = vsel %vm10150_vm12, %v7875_v57, %v7982_v62  ;;  %vm7996_vm7 = vmpackc.low %vm1495_vm8, %vm1494_vm2  ;;  %v2592_v9 = vor.u32 %v2590_v24, %v7978_v4  ;;  %vm2858_vm5 = vcmp.ne.s32.totalorder %v2854_v27, %v7680_v56  ;;  %v3196_v37 = vshrl.u32 %v3160_v40, 16 }
  0x7a   : > { %v10152_v35 = vsel %vm7996_vm7, 4294967295, %v10151_v35  ;;  %v3532_v42 = vsel %vm7969_vm13, %v3499_v19, 0  ;;  %v1679_v57 = vsel %vm7996_vm7, %v965_v23, 0  ;;  %vm8006_vm11 = vmpackc.low %vm2858_vm5, %vm2857_vm0  ;;  %v10154_v38 = vmov 0 }
  0x7b   : > { %10153 = vst [vmem:[#allocation4_spill] sm:$0xff] %v10152_v35  ;;  %v10155_v38 = vsel %vm8006_vm11, 4294967295, %v10154_v38  ;;  %v3533_v18 = vsel %vm7996_vm7, %v3500_v28, 0  ;;  %v3615_v32 = vunpack.c.l.b16 %v3532_v42  ;;  %vm902_vm2 = vcmp.ge.s32.totalorder %v570_v10, 1  ;;  %2284 = vmatmul.bf16.gmra.mxu1 %v2080_v17  ;;  %3385 = vmatmul.bf16.gmra.mxu2 %v3195_v14 }
  0x7c   : > { %v2011_v6 = vunpack.c.l.b16 %v1679_v57  ;;  %v2593_v40 = vsel %vm7769_vm14, %v7758_v39, %v2592_v9  ;;  %v3048_v43 = vsel %vm8006_vm11, %v2366_v21, 0  ;;  %v8019_v44 = vor.u32 %v3196_v37, %v3194_v13  ;;  %vm1063_vm5 = vmpackc.low %vm902_vm2, %vm902_vm2  ;;  %4170 = vmatmul.bf16.gmra.mxu0 %v6950_v2 }
  0x7d   : > { %v2860_v51 = vunpack.c.l.b16 %v2593_v40  ;;  %v2861_v55 = vunpack.c.h.b16 %v2593_v40  ;;  %v3131_v26 = vunpack.c.l.b16 %v3048_v43  ;;  %v3616_v58 = vunpack.c.l.b16 %v3533_v18 }
  0x7e   : > { %v2040_v59 = vpack.c.b16 %v2011_v6, %v2010_v8  ;;  %v1095_v10 = vsel %vm1063_vm5, 65537, %v9994_v1  ;;  %v487_v60 = vadd.s32 72, %v7590_v53  ;;  %v2594_v63 = vrot.slane %v7978_v4, 4  ;;  %3888 = vmatmul.bf16.gmra.mxu3 %v3684_v31 }
  0x7f   : > { %vm2864_vm8 = vcmp.ne.s32.totalorder %v2860_v51, %v7677_v54  ;;  %vm2865_vm0 = vcmp.ne.s32.totalorder %v2861_v55, %v7680_v56  ;;  %v3645_v0 = vpack.c.b16 %v3616_v58, %v3615_v32  ;;  %v1202_v13 = vshll.u32 %v1095_v10, 16  ;;  %v966_v58 = vld [vmem:[#allocation2 + $0x20] sm:$0xf] }
  0x80   : > { %v2082_v3 = vshrl.u32 %v2040_v59, 16  ;;  %v2085_v20 = vshll.u32 %v2040_v59, 16  ;;  %vm8026_vm12 = vmpackc.low %vm2865_vm0, %vm2864_vm8  ;;  %v10156_v15 = vmov 0  ;;  %v1206_v8 = vshrl.u32 %v1095_v10, 16 }
  0x81   : > { %v10157_v15 = vsel %vm8026_vm12, 4294967295, %v10156_v15  ;;  %v577_v19 = vand.u32 15, %v487_v60  ;;  %v3049_v14 = vsel %vm8026_vm12, %v2367_v52, 0  ;;  %v3686_v4 = vshrl.u32 %v3645_v0, 16 }
  0x82   : > { %10158 = vst [vmem:[#allocation5_spill] sm:$0xff] %v10157_v15  ;;  %v3689_v23 = vshll.u32 %v3645_v0, 16  ;;  %v1204_v24 = vrot.slane %v1202_v13, 5  ;;  %v2084_v27 = vrot.slane %v2082_v3, 3  ;;  %v2087_v28 = vrot.slane %v2085_v20, 4 }
  0x83   : > { %v3132_v17 = vunpack.c.l.b16 %v3049_v14  ;;  %v1208_v21 = vrot.slane %v1206_v8, 4  ;;  %v3688_v9 = vrot.slane %v3686_v4, 3  ;;  %vm935_vm2 = vcmp.lt.s32.totalorder %v577_v19, 15  ;;  %v2368_v8 = vld [vmem:[#allocation2 + $0x24] sm:$0xf] }
  0x84   : > { %v3691_v31 = vrot.slane %v3689_v23, 4  ;;  %v1205_v37 = vsel %vm7664_vm10, %v7668_v47, %v1204_v24  ;;  %v8035_v42 = vor.u32 %v2087_v28, %v2084_v27  ;;  %vm2466_vm5 = vmpackc.low %vm935_vm2, %vm935_vm2  ;;  %v2602_v43 = vsel %vm7769_vm14, %v2594_v63, %v7754_v34  ;;  %v3501_v14 = vld [vmem:[#allocation2 + $0x28] sm:$0xf]  ;;  %v967_v23 = vld [vmem:[#allocation2 + $0x24] sm:$0xf] }
  0x85   : > { %v3161_v2 = vpack.c.b16 %v3132_v17, %v3131_v26  ;;  %v1209_v57 = vor.u32 %v1208_v21, %v1204_v24  ;;  %v1497_v18 = vunpack.c.l.b16 %v1205_v37  ;;  %v1498_v6 = vunpack.c.h.b16 %v1205_v37  ;;  %v6951_v27 = vld [vmem:[#allocation2 + $0x1c] sm:$0xff] }
  0x86   : > { %v8037_v32 = vor.u32 %v3691_v31, %v3688_v9  ;;  %v2498_v40 = vsel %vm2466_vm5, 65537, %v9994_v1  ;;  %vm10159_vm8 = vsmask.f32 4352  ;;  %v2867_v0 = vunpack.c.l.b16 %v2602_v43  ;;  %v3502_v9 = vld [vmem:[#allocation2 + $0x2c] sm:$0xf] }
  0x87   : > { %v2089_v51 = vsel %vm10159_vm8, %v7980_v48, %v8035_v42  ;;  %v3200_v55 = vshll.u32 %v3161_v2, 16  ;;  %v1210_v59 = vrot.slane %v1209_v57, 4  ;;  %vm1501_vm0 = vcmp.ne.s32.totalorder %v1497_v18, %v7677_v54  ;;  %vm10160_vm2 = vmmov %vm10159_vm8 }
  0x88   : > { %v3693_v26 = vsel %vm10160_vm2, %v7982_v62, %v8037_v32  ;;  %vm1502_vm7 = vcmp.ne.s32.totalorder %v1498_v6, %v7680_v56  ;;  %v2605_v52 = vshrl.u32 %v2498_v40, 16  ;;  %v2608_v10 = vshll.u32 %v2498_v40, 16 }
  0x89   : > { %v3202_v60 = vrot.slane %v3200_v55, 1  ;;  %v1215_v63 = vsel %vm7664_vm10, %v1210_v59, %v7636_v30  ;;  %vm8054_vm5 = vmpackc.low %vm1502_vm7, %vm1501_vm0  ;;  %v10161_v48 = vmov 0  ;;  %v2868_v13 = vunpack.c.h.b16 %v2602_v43 }
  0x8a   : > { %v10162_v48 = vsel %vm8054_vm5, 4294967295, %v10161_v48  ;;  %v1504_v3 = vunpack.c.l.b16 %v1215_v63  ;;  %v1505_v20 = vunpack.c.h.b16 %v1215_v63  ;;  %v1680_v62 = vsel %vm8054_vm5, %v966_v58, 0 }
  0x8b   : > { %10163 = vst [vmem:[#allocation6_spill] sm:$0xff] %v10162_v48  ;;  %v2607_v19 = vrot.slane %v2605_v52, 7  ;;  %vm10164_vm8 = vsmask.f32 7424  ;;  %v2012_v24 = vunpack.c.l.b16 %v1680_v62  ;;  %vm2871_vm7 = vcmp.ne.s32.totalorder %v2867_v0, %v7677_v54  ;;  %2289 = vmatmul.bf16.gmra.mxu1 %v2089_v51  ;;  %v7018_v62 = vld [vmem:[%s9967_s3 + $0x1e8] sm:$0xff] }
  0x8c   : > { %v3203_v4 = vsel %vm10164_vm8, %v8019_v44, %v3202_v60  ;;  %vm2872_vm0 = vcmp.ne.s32.totalorder %v2868_v13, %v7680_v56  ;;  %vm1508_vm2 = vcmp.ne.s32.totalorder %v1504_v3, %v7677_v54  ;;  %vm1509_vm13 = vcmp.ne.s32.totalorder %v1505_v20, %v7680_v56  ;;  %4175 = vmatmul.bf16.gmra.mxu0 %v6951_v27 }
  0x8d   : > { %v2610_v28 = vor.u32 %v2608_v10, %v2607_v19  ;;  %vm8066_vm12 = vmpackc.low %vm2872_vm0, %vm2871_vm7  ;;  %v10165_v17 = vmov 0  ;;  %v3204_v21 = vshrl.u32 %v3161_v2, 16  ;;  %v10168_v44 = vmov 0  ;;  %3390 = vmatmul.bf16.gmra.mxu2 %v3203_v4  ;;  %v2369_v10 = vld [vmem:[#allocation2 + $0x28] sm:$0xf]  ;;  %5427 = vmatpush.bf16.msra.mxu3 %v7018_v62 }
  0x8e   : > { %v10166_v17 = vsel %vm8066_vm12, 4294967295, %v10165_v17  ;;  %vm8070_vm11 = vmpackc.low %vm1509_vm13, %vm1508_vm2  ;;  %v3050_v31 = vsel %vm8066_vm12, %v2368_v8, 0  ;;  %v3534_v37 = vsel %vm8054_vm5, %v3501_v14, 0  ;;  %v488_v57 = vadd.s32 80, %v7590_v53  ;;  %3893 = vmatmul.bf16.gmra.mxu3 %v3693_v26 }
  0x8f   : > { %10167 = vst [vmem:[#allocation7_spill] sm:$0xff] %v10166_v17  ;;  %v10169_v44 = vsel %vm8070_vm11, 4294967295, %v10168_v44  ;;  %v489_v18 = vadd.s32 88, %v7590_v53  ;;  %v1681_v6 = vsel %vm8070_vm11, %v967_v23, 0  ;;  %v2611_v2 = vsel %vm7769_vm14, %v7758_v39, %v2610_v28 }
  0x90   : > { %10170 = vst [vmem:[#allocation8_spill] sm:$0xff] %v10169_v44  ;;  %v3133_v40 = vunpack.c.l.b16 %v3050_v31  ;;  %v8085_v43 = vor.u32 %v3204_v21, %v3202_v60  ;;  %v2013_v55 = vunpack.c.l.b16 %v1681_v6  ;;  %v2874_v58 = vunpack.c.l.b16 %v2611_v2  ;;  %v7010_v60 = vld [vmem:[%s9967_s3 + $0x1a8] sm:$0xff] }
  0x91   : > { %v2875_v59 = vunpack.c.h.b16 %v2611_v2  ;;  %v3535_v52 = vsel %vm8070_vm11, %v3502_v9, 0  ;;  %v3617_v63 = vunpack.c.l.b16 %v3534_v37  ;;  %v584_v13 = vand.u32 15, %v488_v57  ;;  %5145 = vmatpush.bf16.msra.mxu2 %v7010_v60  ;;  %v6986_v37 = vld [vmem:[%s9967_s3 + $0x168] sm:$0xff] }
  0x92   : > { %v3618_v0 = vunpack.c.l.b16 %v3535_v52  ;;  %v591_v3 = vand.u32 15, %v489_v18  ;;  %v2041_v20 = vpack.c.b16 %v2013_v55, %v2012_v24  ;;  %vm2878_vm13 = vcmp.ne.s32.totalorder %v2874_v58, %v7677_v54  ;;  %v7026_v55 = vld [vmem:[%s9967_s3 + $0x228] sm:$0xff]  ;;  %4642 = vmatpush.bf16.msra.mxu1 %v6986_v37 }
  0x93   : > { %vm2879_vm8 = vcmp.ne.s32.totalorder %v2875_v59, %v7680_v56  ;;  %v2612_v51 = vrot.slane %v2607_v19, 4  ;;  %v10171_v8 = vmov 0  ;;  %vm904_vm0 = vcmp.ge.s32.totalorder %v584_v13, 1  ;;  %5910 = vmatpush.bf16.msra.mxu0 %v7026_v55 }
  0x94   : > { %vm8097_vm7 = vmpackc.low %vm2879_vm8, %vm2878_vm13  ;;  %v3646_v14 = vpack.c.b16 %v3618_v0, %v3617_v63  ;;  %vm8101_vm2 = vcmp.lt.s32.totalorder %v591_v3, 15  ;;  %v8106_v19 = vadd.s32 96, %v7590_v53  ;;  %v2091_v4 = vshrl.u32 %v2041_v20, 16 }
  0x95   : > { %v10172_v8 = vsel %vm8097_vm7, 4294967295, %v10171_v8  ;;  %v2094_v23 = vshll.u32 %v2041_v20, 16  ;;  %v3051_v24 = vsel %vm8097_vm7, %v2369_v10, 0  ;;  %vm1065_vm11 = vmpackc.low %vm904_vm0, %vm904_vm0  ;;  %v2620_v27 = vsel %vm7769_vm14, %v2612_v51, %v7754_v34 }
  0x96   : > { %10173 = vst [vmem:[#allocation9_spill] sm:$0xff] %v10172_v8  ;;  %v3134_v28 = vunpack.c.l.b16 %v3051_v24  ;;  %v3695_v21 = vshrl.u32 %v3646_v14, 16  ;;  %v3698_v9 = vshll.u32 %v3646_v14, 16  ;;  %v1097_v31 = vsel %vm1065_vm11, 65537, %v9994_v1  ;;  %vm2468_vm13 = vmpackc.low %vm8101_vm2, %vm8101_vm2 }
  0x97   : > { %v2093_v57 = vrot.slane %v2091_v4, 3  ;;  %v2096_v18 = vrot.slane %v2094_v23, 4  ;;  %v1222_v6 = vshll.u32 %v1097_v31, 16  ;;  %v1226_v2 = vshrl.u32 %v1097_v31, 16 }
  0x98   : > { %v3162_v58 = vpack.c.b16 %v3134_v28, %v3133_v40  ;;  %v3697_v59 = vrot.slane %v3695_v21, 3  ;;  %v3700_v52 = vrot.slane %v3698_v9, 4  ;;  %v2500_v10 = vsel %vm2468_vm13, 65537, %v9994_v1  ;;  %v968_v9 = vld [vmem:[#allocation2 + $0x28] sm:$0xf] }
  0x99   : > { %v8124_v63 = vor.u32 %v2096_v18, %v2093_v57  ;;  %v1224_v0 = vrot.slane %v1222_v6, 5  ;;  %v1228_v13 = vrot.slane %v1226_v2, 4  ;;  %v2623_v3 = vshrl.u32 %v2500_v10, 16  ;;  %v6952_v6 = vld [vmem:[#allocation2 + $0x24] sm:$0xff] }
  0x9a   : > { %v3208_v20 = vshll.u32 %v3162_v58, 16  ;;  %v8126_v51 = vor.u32 %v3700_v52, %v3697_v59  ;;  %v2626_v60 = vshll.u32 %v2500_v10, 16  ;;  %v2881_v62 = vunpack.c.l.b16 %v2620_v27 }
  0x9b   : > { %vm10176_vm11 = vsmask.f32 4352  ;;  %v1225_v14 = vsel %vm7664_vm10, %v7668_v47, %v1224_v0  ;;  %v1229_v26 = vor.u32 %v1228_v13, %v1224_v0  ;;  %v2625_v4 = vrot.slane %v2623_v3, 7  ;;  %v3503_v3 = vld [vmem:[#allocation2 + $0x30] sm:$0xf] }
  0x9c   : > { %v2098_v40 = vsel %vm10176_vm11, %v8035_v42, %v8124_v63  ;;  %v3210_v23 = vrot.slane %v3208_v20, 1  ;;  %vm10177_vm8 = vmmov %vm10176_vm11  ;;  %v1511_v28 = vunpack.c.l.b16 %v1225_v14  ;;  %v1512_v21 = vunpack.c.h.b16 %v1225_v14  ;;  %v969_v20 = vld [vmem:[#allocation2 + $0x2c] sm:$0xf]  ;;  %4180 = vmatmul.bf16.gmra.mxu0 %v6952_v6 }
  0x9d   : > { %v3702_v24 = vsel %vm10177_vm8, %v8037_v32, %v8126_v51  ;;  %v1230_v31 = vrot.slane %v1229_v26, 4  ;;  %v2628_v37 = vor.u32 %v2626_v60, %v2625_v4  ;;  %v2882_v57 = vunpack.c.h.b16 %v2620_v27  ;;  %v2370_v32 = vld [vmem:[#allocation2 + $0x2c] sm:$0xf]  ;;  %2294 = vmatmul.bf16.gmra.mxu1 %v2098_v40  ;;  %v3504_v26 = vld [vmem:[#allocation2 + $0x34] sm:$0xf] }
  0x9e   : > { %vm8138_vm0 = vcmp.ne.s32.totalorder %v2881_v62, %v7677_v54  ;;  %vm10180_vm2 = vsmask.f32 7424  ;;  %vm1515_vm13 = vcmp.ne.s32.totalorder %v1511_v28, %v7677_v54  ;;  %vm1516_vm11 = vcmp.ne.s32.totalorder %v1512_v21, %v7680_v56  ;;  %v2371_v28 = vld [vmem:[#allocation2 + $0x30] sm:$0xf]  ;;  %3898 = vmatmul.bf16.gmra.mxu3 %v3702_v24 }
  0x9f   : > { %v3211_v18 = vsel %vm10180_vm2, %v8085_v43, %v3210_v23  ;;  %v3212_v2 = vshrl.u32 %v3162_v58, 16  ;;  %v1235_v55 = vsel %vm7664_vm10, %v1230_v31, %v7636_v30  ;;  %vm8149_vm8 = vmpackc.low %vm1516_vm11, %vm1515_vm13  ;;  %v10181_v27 = vmov 0 }
  0xa0   : > { %v10182_v27 = vsel %vm8149_vm8, 4294967295, %v10181_v27  ;;  %v2629_v59 = vsel %vm7769_vm14, %v7758_v39, %v2628_v37  ;;  %vm2886_vm2 = vcmp.ne.s32.totalorder %v2882_v57, %v7680_v56  ;;  %v598_v43 = vand.u32 15, %v8106_v19  ;;  %3395 = vmatmul.bf16.gmra.mxu2 %v3211_v18 }
  0xa1   : > { %10183 = vst [vmem:[#allocation10_spill] sm:$0xff] %v10182_v27  ;;  %v1518_v52 = vunpack.c.l.b16 %v1235_v55  ;;  %v1519_v10 = vunpack.c.h.b16 %v1235_v55  ;;  %v1682_v58 = vsel %vm8149_vm8, %v968_v9, 0  ;;  %vm8162_vm5 = vmpackc.low %vm2886_vm2, %vm8138_vm0  ;;  %v10184_v0 = vmov 0 }
  0xa2   : > { %v10185_v0 = vsel %vm8162_vm5, 4294967295, %v10184_v0  ;;  %v2888_v13 = vunpack.c.l.b16 %v2629_v59  ;;  %v2014_v60 = vunpack.c.l.b16 %v1682_v58  ;;  %v2889_v62 = vunpack.c.h.b16 %v2629_v59 }
  0xa3   : > { %10186 = vst [vmem:[#allocation11_spill] sm:$0xff] %v10185_v0  ;;  %v3052_v19 = vsel %vm8162_vm5, %v2370_v32, 0  ;;  %v3214_v14 = vor.u32 %v3212_v2, %v3210_v23  ;;  %vm1522_vm13 = vcmp.ne.s32.totalorder %v1518_v52, %v7677_v54  ;;  %vm1523_vm0 = vcmp.ne.s32.totalorder %v1519_v10, %v7680_v56 }
  0xa4   : > { %vm2892_vm11 = vcmp.ne.s32.totalorder %v2888_v13, %v7677_v54  ;;  %v3135_v21 = vunpack.c.l.b16 %v3052_v19  ;;  %vm8171_vm2 = vmpackc.low %vm1523_vm0, %vm1522_vm13  ;;  %v10187_v40 = vmov 0  ;;  %vm2893_vm7 = vcmp.ne.s32.totalorder %v2889_v62, %v7680_v56 }
  0xa5   : > { %v10188_v40 = vsel %vm8171_vm2, 4294967295, %v10187_v40  ;;  %v3536_v23 = vsel %vm8149_vm8, %v3503_v3, 0  ;;  %vm906_vm5 = vcmp.ge.s32.totalorder %v598_v43, 1  ;;  %v491_v9 = vadd.s32 104, %v7590_v53  ;;  %vm8181_vm12 = vmpackc.low %vm2893_vm7, %vm2892_vm11 }
  0xa6   : > { %10189 = vst [vmem:[#allocation12_spill] sm:$0xff] %v10188_v40  ;;  %v1683_v31 = vsel %vm8171_vm2, %v969_v20, 0  ;;  %v10190_v37 = vmov 0  ;;  %v3537_v24 = vsel %vm8171_vm2, %v3504_v26, 0  ;;  %v3619_v57 = vunpack.c.l.b16 %v3536_v23  ;;  %vm1067_vm13 = vmpackc.low %vm906_vm5, %vm906_vm5 }
  0xa7   : > { %v10191_v37 = vsel %vm8181_vm12, 4294967295, %v10190_v37  ;;  %v2630_v42 = vrot.slane %v2625_v4, 4  ;;  %v2015_v18 = vunpack.c.l.b16 %v1683_v31  ;;  %v3053_v6 = vsel %vm8181_vm12, %v2371_v28, 0 }
  0xa8   : > { %10192 = vst [vmem:[#allocation13_spill] sm:$0xff] %v10191_v37  ;;  %v3620_v32 = vunpack.c.l.b16 %v3537_v24  ;;  %v605_v2 = vand.u32 15, %v491_v9  ;;  %v3136_v55 = vunpack.c.l.b16 %v3053_v6  ;;  %v1099_v59 = vsel %vm1067_vm13, 65537, %v9994_v1 }
  0xa9   : > { %v2638_v43 = vsel %vm7769_vm14, %v2630_v42, %v7754_v34  ;;  %v8194_v52 = vadd.s32 112, %v7590_v53  ;;  %v2042_v10 = vpack.c.b16 %v2015_v18, %v2014_v60  ;;  %v1242_v4 = vshll.u32 %v1099_v59, 16 }
  0xaa   : > { %v3647_v58 = vpack.c.b16 %v3620_v32, %v3619_v57  ;;  %v1246_v13 = vshrl.u32 %v1099_v59, 16  ;;  %v8196_v3 = vpack.c.b16 %v3136_v55, %v3135_v21  ;;  %vm939_vm7 = vcmp.lt.s32.totalorder %v605_v2, 15 }
  0xab   : > { %v2895_v20 = vunpack.c.l.b16 %v2638_v43  ;;  %v2896_v62 = vunpack.c.h.b16 %v2638_v43  ;;  %v2100_v19 = vshrl.u32 %v2042_v10, 16  ;;  %v2103_v26 = vshll.u32 %v2042_v10, 16  ;;  %vm2470_vm5 = vmpackc.low %vm939_vm7, %vm939_vm7 }
  0xac   : > { %v3704_v28 = vshrl.u32 %v3647_v58, 16  ;;  %v3707_v23 = vshll.u32 %v3647_v58, 16  ;;  %v3216_v9 = vshll.u32 %v8196_v3, 16  ;;  %v1244_v31 = vrot.slane %v1242_v4, 5  ;;  %v8209_v4 = vpop.f32.mrf.mxu1 }
  0xad   : > { %v1248_v24 = vrot.slane %v1246_v13, 4  ;;  %v2502_v42 = vsel %vm2470_vm5, 65537, %v9994_v1  ;;  %v2102_v60 = vrot.slane %v2100_v19, 3  ;;  %v2105_v57 = vrot.slane %v2103_v26, 4  ;;  %v6953_v19 = vld [vmem:[#allocation2 + $0x2c] sm:$0xff]  ;;  %v8215_v1 = vpop.f32.mrf.mxu0 }
  0xae   : > { %v3706_v18 = vrot.slane %v3704_v28, 3  ;;  %v3709_v6 = vrot.slane %v3707_v23, 4  ;;  %v8200_v21 = vrot.slane %v3216_v9, 1  ;;  %v1245_v32 = vsel %vm7664_vm10, %v7668_v47, %v1244_v31  ;;  %v970_v26 = vld [vmem:[#allocation2 + $0x30] sm:$0xf]  ;;  %4185 = vmatmul.bf16.gmra.mxu0 %v6953_v19 }
  0xaf   : > { %v1249_v2 = vor.u32 %v1248_v24, %v1244_v31  ;;  %v2641_v55 = vshrl.u32 %v2502_v42, 16  ;;  %v8205_v59 = vor.u32 %v2105_v57, %v2102_v60  ;;  %v1525_v10 = vunpack.c.l.b16 %v1245_v32  ;;  %v3505_v60 = vld [vmem:[#allocation2 + $0x38] sm:$0xf] }
  0xb0   : > { %v8207_v43 = vor.u32 %v3709_v6, %v3706_v18  ;;  %v1526_v58 = vunpack.c.h.b16 %v1245_v32  ;;  %vm10193_vm0 = vsmask.f32 7424  ;;  %v2644_v9 = vshll.u32 %v2502_v42, 16 }
  0xb1   : > { %v3219_v13 = vsel %vm10193_vm0, %v3214_v14, %v8200_v21  ;;  %v1250_v28 = vrot.slane %v1249_v2, 4  ;;  %v8213_v23 = vrot.slane %v2641_v55, 7  ;;  %vm10194_vm11 = vsmask.f32 4352  ;;  %v2372_v14 = vld [vmem:[#allocation2 + $0x34] sm:$0xf] }
  0xb2   : > { %v2107_v31 = vsel %vm10194_vm11, %v8124_v63, %v8205_v59  ;;  %vm10195_vm13 = vmmov %vm10194_vm11  ;;  %vm1529_vm7 = vcmp.ne.s32.totalorder %v1525_v10, %v7677_v54  ;;  %vm1530_vm5 = vcmp.ne.s32.totalorder %v1526_v58, %v7680_v56  ;;  %v10196_v57 = vmov 0  ;;  %3400 = vmatmul.bf16.gmra.mxu2 %v3219_v13  ;;  %v3506_v10 = vld [vmem:[#allocation2 + $0x3c] sm:$0xf] }
  0xb3   : > { %v3711_v24 = vsel %vm10195_vm13, %v8126_v51, %v8207_v43  ;;  %v1255_v42 = vsel %vm7664_vm10, %v1250_v28, %v7636_v30  ;;  %vm8228_vm0 = vmpackc.low %vm1530_vm5, %vm1529_vm7  ;;  %v2646_v63 = vor.u32 %v2644_v9, %v8213_v23  ;;  %vm2899_vm11 = vcmp.ne.s32.totalorder %v2895_v20, %v7677_v54  ;;  %2299 = vmatmul.bf16.gmra.mxu1 %v2107_v31  ;;  %v971_v51 = vld [vmem:[#allocation2 + $0x34] sm:$0xf]  ;;  %v2373_v31 = vld [vmem:[#allocation2 + $0x38] sm:$0xf] }
  0xb4   : > { %v10197_v57 = vsel %vm8228_vm0, 4294967295, %v10196_v57  ;;  %vm2900_vm13 = vcmp.ne.s32.totalorder %v2896_v62, %v7680_v56  ;;  %v1532_v18 = vunpack.c.l.b16 %v1255_v42  ;;  %v1533_v6 = vunpack.c.h.b16 %v1255_v42  ;;  %3903 = vmatmul.bf16.gmra.mxu3 %v3711_v24  ;;  %v7009_v24 = vld [vmem:[%s9967_s3 + $0x1a0] sm:$0xff] }
  0xb5   : > { %10198 = vst [vmem:[#allocation14_spill] sm:$0xff] %v10197_v57  ;;  %v1684_v32 = vsel %vm8228_vm0, %v970_v26, 0  ;;  %vm8237_vm12 = vmpackc.low %vm2900_vm13, %vm2899_vm11  ;;  %v10199_v2 = vmov 0  ;;  %v2647_v55 = vsel %vm7769_vm14, %v7758_v39, %v2646_v63  ;;  %v3220_v62 = vshrl.u32 %v8196_v3, 16  ;;  %v8251_v26 = vpop.f32.mrf.mxu2  ;;  %5146 = vmatpush.bf16.msra.mxu2 %v7009_v24  ;;  %v7025_v24 = vld [vmem:[%s9967_s3 + $0x220] sm:$0xff] }
  0xb6   : > { %v10200_v2 = vsel %vm8237_vm12, 4294967295, %v10199_v2  ;;  %v3054_v20 = vsel %vm8237_vm12, %v2372_v14, 0  ;;  %v3538_v58 = vsel %vm8228_vm0, %v3505_v60, 0  ;;  %vm1536_vm7 = vcmp.ne.s32.totalorder %v1532_v18, %v7677_v54  ;;  %v7017_v18 = vld [vmem:[%s9967_s3 + $0x1e0] sm:$0xff]  ;;  %5911 = vmatpush.bf16.msra.mxu0 %v7025_v24 }
  0xb7   : > { %10201 = vst [vmem:[#allocation15_spill] sm:$0xff] %v10200_v2  ;;  %vm1537_vm5 = vcmp.ne.s32.totalorder %v1533_v6, %v7680_v56  ;;  %v2902_v13 = vunpack.c.l.b16 %v2647_v55  ;;  %v2903_v19 = vunpack.c.h.b16 %v2647_v55  ;;  %v10202_v28 = vmov 0  ;;  %v8270_v6 = vpop.f32.mrf.mxu3  ;;  %5428 = vmatpush.bf16.msra.mxu3 %v7017_v18 }
  0xb8   : > { %vm8253_vm11 = vmpackc.low %vm1537_vm5, %vm1536_vm7  ;;  %v2016_v9 = vunpack.c.l.b16 %v1684_v32  ;;  %v3137_v3 = vunpack.c.l.b16 %v3054_v20  ;;  %v3621_v14 = vunpack.c.l.b16 %v3538_v58  ;;  %v612_v42 = vand.u32 15, %v8194_v52  ;;  %10205 = vst [vmem:[#allocation17_spill] sm:$0xff] %v8270_v6  ;;  %v8272_v52 = vpop.f32.mrf.mxu1  ;;  %v6985_v58 = vld [vmem:[%s9967_s3 + $0x160] sm:$0xff] }
  0xb9   : > { %v10203_v28 = vsel %vm8253_vm11, 4294967295, %v10202_v28  ;;  %v1685_v60 = vsel %vm8253_vm11, %v971_v51, 0  ;;  %vm2906_vm13 = vcmp.ne.s32.totalorder %v2902_v13, %v7677_v54  ;;  %vm2907_vm7 = vcmp.ne.s32.totalorder %v2903_v19, %v7680_v56  ;;  %10206 = vst [vmem:[#allocation18_spill] sm:$0xff] %v8272_v52  ;;  %v8286_v13 = vpop.f32.mrf.mxu0  ;;  %4643 = vmatpush.bf16.msra.mxu1 %v6985_v58 }
  0xba   : > { %10204 = vst [vmem:[#allocation16_spill] sm:$0xff] %v10203_v28  ;;  %v3539_v63 = vsel %vm8253_vm11, %v3506_v10, 0  ;;  %v2017_v32 = vunpack.c.l.b16 %v1685_v60  ;;  %vm8274_vm5 = vmpackc.low %vm2907_vm7, %vm2906_vm13  ;;  %v10207_v55 = vmov 0  ;;  %vm8278_vm12 = vcmp.ge.s32.totalorder %v612_v42, 1 }
  0xbb   : > { %v10208_v55 = vsel %vm8274_vm5, 4294967295, %v10207_v55  ;;  %v3622_v51 = vunpack.c.l.b16 %v3539_v63  ;;  %v493_v10 = vadd.s32 120, %v7590_v53  ;;  %10212 = vst [vmem:[#allocation20_spill] sm:$0xff] %v8286_v13  ;;  %v3055_v19 = vsel %vm8274_vm5, %v2373_v31, 0  ;;  %vm1069_vm13 = vmpackc.low %vm8278_vm12, %vm8278_vm12 }
  0xbc   : > { %10209 = vst [vmem:[#allocation19_spill] sm:$0xff] %v10208_v55  ;;  %v3222_v60 = vor.u32 %v3220_v62, %v8200_v21  ;;  %v2648_v42 = vrot.slane %v8213_v23, 4  ;;  %v8299_v63 = vadd.s32 128, %v7590_v53  ;;  %v2043_v52 = vpack.c.b16 %v2017_v32, %v2016_v9 }
  0xbd   : > { %v3138_v13 = vunpack.c.l.b16 %v3055_v19  ;;  %v3648_v6 = vpack.c.b16 %v3622_v51, %v3621_v14  ;;  %v10213_v31 = vmov 0   ;;  %v619_v20 = vand.u32 15, %v493_v10  ;;  %v8305_v14 = vpop.f32.mrf.mxu2 }
  0xbe   : > { %v1101_v55 = vsel %vm1069_vm13, 65537, %v10213_v31  ;;  %v2656_v23 = vsel %vm7769_vm14, %v2648_v42, %v7754_v34  ;;  %v2109_v18 = vshrl.u32 %v2043_v52, 16  ;;  %v2112_v2 = vshll.u32 %v2043_v52, 16  ;;  %10214 = vst [vmem:[#allocation21_spill] sm:$0xff] %v8305_v14 }
  0xbf   : > { %v1262_v21 = vshll.u32 %v1101_v55, 16  ;;  %v1266_v62 = vshrl.u32 %v1101_v55, 16  ;;  %v3164_v28 = vpack.c.b16 %v3138_v13, %v3137_v3  ;;  %v3713_v57 = vshrl.u32 %v3648_v6, 16  ;;  %v8311_v52 = vpop.f32.mrf.mxu3 }
  0xc0   : > { %v3716_v37 = vshll.u32 %v3648_v6, 16  ;;  %vm941_vm12 = vcmp.lt.s32.totalorder %v619_v20, 15  ;;  %v2111_v32 = vrot.slane %v2109_v18, 3  ;;  %v2114_v51 = vrot.slane %v2112_v2, 4  ;;  %10215 = vst [vmem:[#allocation22_spill] sm:$0xff] %v8311_v52  ;;  %v8313_v6 = vpop.f32.mrf.mxu1 }
  0xc1   : > { %v1264_v0 = vrot.slane %v1262_v21, 5  ;;  %v1268_v9 = vrot.slane %v1266_v62, 4  ;;  %v3224_v58 = vshll.u32 %v3164_v28, 16  ;;  %v3715_v55 = vrot.slane %v3713_v57, 3  ;;  %vm2472_vm7 = vmpackc.low %vm941_vm12, %vm941_vm12  ;;  %v6954_v21 = vld [vmem:[#allocation2 + $0x34] sm:$0xff]  ;;  %v8317_v57 = vpop.f32.mrf.mxu0 }
  0xc2   : > { %v3718_v10 = vrot.slane %v3716_v37, 4  ;;  %v2504_v3 = vsel %vm2472_vm7, 65537, %v10213_v31  ;;  %v8315_v13 = vor.u32 %v2114_v51, %v2111_v32  ;;  %v972_v20 = vld [vmem:[#allocation2 + $0x38] sm:$0xf]  ;;  %vm10216_vm13 = vsmask.f32 4352  ;;  %4190 = vmatmul.bf16.gmra.mxu0 %v6954_v21 }
  0xc3   : > { %v1265_v19 = vsel %vm7664_vm10, %v7668_v47, %v1264_v0  ;;  %v1269_v42 = vor.u32 %v1268_v9, %v1264_v0  ;;  %v3226_v24 = vrot.slane %v3224_v58, 1  ;;  %v2659_v14 = vshrl.u32 %v2504_v3, 16  ;;  %vm10218_vm11 = vmmov %vm10216_vm13  ;;  %v2374_v21 = vld [vmem:[#allocation2 + $0x3c] sm:$0xf] }
  0xc4   : > { %v1539_v2 = vunpack.c.l.b16 %v1265_v19  ;;  %v1540_v62 = vunpack.c.h.b16 %v1265_v19  ;;  %v8319_v37 = vor.u32 %v3718_v10, %v3715_v55  ;;  %v2662_v0 = vshll.u32 %v2504_v3, 16  ;;  %v3507_v55 = vld [vmem:[#allocation2 + $0x40] sm:$0xf] }
  0xc5   : > { %v1270_v18 = vrot.slane %v1269_v42, 4  ;;  %v2116_v9 = vsel %vm10216_vm13, %v8205_v59, %v8315_v13  ;;  %vm10217_vm12 = vsmask.f32 7424  ;;  %v10219_v58 = vmov 0 }
  0xc6   : > { %v3227_v52 = vsel %vm10217_vm12, %v3222_v60, %v3226_v24  ;;  %vm1543_vm7 = vcmp.ne.s32.totalorder %v1539_v2, %v7677_v54  ;;  %vm1544_vm5 = vcmp.ne.s32.totalorder %v1540_v62, %v7680_v56  ;;  %2304 = vmatmul.bf16.gmra.mxu1 %v2116_v9  ;;  %v3720_v32 = vsel %vm10218_vm11, %v8207_v43, %v8319_v37  ;;  %v973_v43 = vld [vmem:[#allocation2 + $0x3c] sm:$0xf]  ;;  %v8347_v9 = vpop.f32.mrf.mxu2 }
  0xc7   : > { %3405 = vmatmul.bf16.gmra.mxu2 %v3227_v52  ;;  %v1275_v51 = vsel %vm7664_vm10, %v1270_v18, %v7636_v30  ;;  %vm8333_vm0 = vmpackc.low %vm1544_vm5, %vm1543_vm7  ;;  %v8337_v59 = vrot.slane %v2659_v14, 7  ;;  %v2909_v60 = vunpack.c.l.b16 %v2656_v23  ;;  %v2910_v3 = vunpack.c.h.b16 %v2656_v23  ;;  %3908 = vmatmul.bf16.gmra.mxu3 %v3720_v32  ;;  %v3508_v18 = vld [vmem:[#allocation2 + $0x44] sm:$0xf] }
  0xc8   : > { %v10220_v58 = vsel %vm8333_vm0, 4294967295, %v10219_v58  ;;  %v1546_v10 = vunpack.c.l.b16 %v1275_v51  ;;  %v1547_v19 = vunpack.c.h.b16 %v1275_v51  ;;  %v1686_v42 = vsel %vm8333_vm0, %v972_v20, 0 }
  0xc9   : > { %10221 = vst [vmem:[#allocation23_spill] sm:$0xff] %v10220_v58  ;;  %v2018_v52 = vunpack.c.l.b16 %v1686_v42  ;;  %v2664_v2 = vor.u32 %v2662_v0, %v8337_v59  ;;  %vm8343_vm11 = vcmp.ne.s32.totalorder %v2909_v60, %v7677_v54  ;;  %v3228_v14 = vshrl.u32 %v3164_v28, 16  ;;  %v8364_v60 = vpop.f32.mrf.mxu3 }
  0xca   : > { %vm1550_vm5 = vcmp.ne.s32.totalorder %v1546_v10, %v7677_v54  ;;  %vm1551_vm13 = vcmp.ne.s32.totalorder %v1547_v19, %v7680_v56  ;;  %vm2914_vm12 = vcmp.ne.s32.totalorder %v2910_v3, %v7680_v56  ;;  %v3540_v23 = vsel %vm8333_vm0, %v3507_v55, 0  ;;  %10227 = vst [vmem:[#allocation25_spill] sm:$0xff] %v8364_v60  ;;  %v8366_v10 = vpop.f32.mrf.mxu1 }
  0xcb   : > { %vm8354_vm7 = vmpackc.low %vm1551_vm13, %vm1550_vm5  ;;  %v10224_v20 = vmov 0  ;;  %v2665_v28 = vsel %vm7769_vm14, %v7758_v39, %v2664_v2  ;;  %v8361_v0 = vor.u32 %v3228_v14, %v3226_v24  ;;  %v3623_v32 = vunpack.c.l.b16 %v3540_v23  ;;  %10228 = vst [vmem:[#allocation26_spill] sm:$0xff] %v8366_v10  ;;  %v8378_v2 = vpop.f32.mrf.mxu0  ;;  %v2375_v14 = vld [vmem:[#allocation2 + $0x40] sm:$0xf] }
  0xcc   : > { %v10225_v20 = vsel %vm8354_vm7, 4294967295, %v10224_v20  ;;  %v626_v51 = vand.u32 15, %v8299_v63  ;;  %v1687_v55 = vsel %vm8354_vm7, %v973_v43, 0  ;;  %vm8372_vm5 = vmpackc.low %vm2914_vm12, %vm8343_vm11  ;;  %v10229_v19 = vmov 0  ;;  %10232 = vst [vmem:[#allocation28_spill] sm:$0xff] %v8378_v2 }
  0xcd   : > { %10226 = vst [vmem:[#allocation24_spill] sm:$0xff] %v10225_v20  ;;  %v10230_v19 = vsel %vm8372_vm5, 4294967295, %v10229_v19  ;;  %v2916_v42 = vunpack.c.l.b16 %v2665_v28  ;;  %v2917_v3 = vunpack.c.h.b16 %v2665_v28  ;;  %v3541_v24 = vsel %vm8354_vm7, %v3508_v18, 0 }
  0xce   : > { %10231 = vst [vmem:[#allocation27_spill] sm:$0xff] %v10230_v19  ;;  %v2019_v63 = vunpack.c.l.b16 %v1687_v55  ;;  %v3056_v23 = vsel %vm8372_vm5, %v2374_v21, 0  ;;  %v3624_v10 = vunpack.c.l.b16 %v3541_v24  ;;  %vm910_vm13 = vcmp.ge.s32.totalorder %v626_v51, 1 }
  0xcf   : > { %vm2920_vm0 = vcmp.ne.s32.totalorder %v2916_v42, %v7677_v54  ;;  %vm2921_vm11 = vcmp.ne.s32.totalorder %v2917_v3, %v7680_v56  ;;  %v3139_v43 = vunpack.c.l.b16 %v3056_v23  ;;  %vm1071_vm12 = vmpackc.low %vm910_vm13, %vm910_vm13  ;;  %v495_v62 = vadd.s32 136, %v7590_v53 }
  0xd0   : > { %v2044_v28 = vpack.c.b16 %v2019_v63, %v2018_v52  ;;  %vm8385_vm2 = vmpackc.low %vm2921_vm11, %vm2920_vm0  ;;  %v10233_v18 = vmov 0  ;;  %v3649_v55 = vpack.c.b16 %v3624_v10, %v3623_v32  ;;  %v1103_v2 = vsel %vm1071_vm12, 65537, %v10213_v31  ;;  %v8393_v52 = vpop.f32.mrf.mxu2 }
  0xd1   : > { %v10234_v18 = vsel %vm8385_vm2, 4294967295, %v10233_v18  ;;  %v2666_v21 = vrot.slane %v8337_v59, 4  ;;  %v3057_v51 = vsel %vm8385_vm2, %v2375_v14, 0  ;;  %v1282_v42 = vshll.u32 %v1103_v2, 16  ;;  %10236 = vst [vmem:[#allocation30_spill] sm:$0xff] %v8393_v52  ;;  %v8397_v14 = vpop.f32.mrf.mxu3 }
  0xd2   : > { %10235 = vst [vmem:[#allocation29_spill] sm:$0xff] %v10234_v18  ;;  %v1286_v24 = vshrl.u32 %v1103_v2, 16  ;;  %v633_v3 = vand.u32 15, %v495_v62  ;;  %v2118_v23 = vshrl.u32 %v2044_v28, 16  ;;  %v2121_v60 = vshll.u32 %v2044_v28, 16  ;;  %v8399_v2 = vpop.f32.mrf.mxu1  ;;  %v6955_v28 = vld [vmem:[#allocation2 + $0x3c] sm:$0xff] }
  0xd3   : > { %v3140_v20 = vunpack.c.l.b16 %v3057_v51  ;;  %v3722_v58 = vshrl.u32 %v3649_v55, 16  ;;  %v3725_v63 = vshll.u32 %v3649_v55, 16  ;;  %v1284_v19 = vrot.slane %v1282_v42, 5  ;;  %10237 = vst [vmem:[#allocation31_spill] sm:$0xff] %v8397_v14  ;;  %4195 = vmatmul.bf16.gmra.mxu0 %v6955_v28 }
  0xd4   : > { %v1288_v40 = vrot.slane %v1286_v24, 4  ;;  %vm943_vm0 = vcmp.lt.s32.totalorder %v633_v3, 15  ;;  %v2120_v32 = vrot.slane %v2118_v23, 3  ;;  %v2123_v10 = vrot.slane %v2121_v60, 4  ;;  %v8405_v24 = vpop.f32.mrf.mxu0  ;;  %v974_v23 = vld [vmem:[#allocation2 + $0x40] sm:$0xf] }
  0xd5   : > { %v8395_v27 = vpack.c.b16 %v3140_v20, %v3139_v43  ;;  %v3724_v59 = vrot.slane %v3722_v58, 3  ;;  %vm2474_vm13 = vmpackc.low %vm943_vm0, %vm943_vm0  ;;  %v3727_v62 = vrot.slane %v3725_v63, 4  ;;  %v1285_v51 = vsel %vm7664_vm10, %v7668_v47, %v1284_v19 }
  0xd6   : > { %v1289_v55 = vor.u32 %v1288_v40, %v1284_v19  ;;  %v2506_v42 = vsel %vm2474_vm13, 65537, %v10213_v31  ;;  %v8407_v60 = vor.u32 %v2123_v10, %v2120_v32  ;;  %v1553_v20 = vunpack.c.l.b16 %v1285_v51 }
  0xd7   : > { %v3232_v58 = vshll.u32 %v8395_v27, 16  ;;  %v1554_v43 = vunpack.c.h.b16 %v1285_v51  ;;  %v8410_v3 = vor.u32 %v3727_v62, %v3724_v59  ;;  %v2674_v52 = vsel %vm7769_vm14, %v2666_v21, %v7754_v34  ;;  %v3509_v62 = vld [vmem:[#allocation2 + $0x48] sm:$0xf] }
  0xd8   : > { %v1290_v63 = vrot.slane %v1289_v55, 4  ;;  %v2677_v14 = vshrl.u32 %v2506_v42, 16  ;;  %vm10238_vm11 = vsmask.f32 4352  ;;  %vm1557_vm12 = vcmp.ne.s32.totalorder %v1553_v20, %v7677_v54  ;;  %v8436_v28 = vpop.f32.mrf.mxu2  ;;  %v975_v20 = vld [vmem:[#allocation2 + $0x44] sm:$0xf] }
  0xd9   : > { %v2125_v40 = vsel %vm10238_vm11, %v8315_v13, %v8407_v60  ;;  %v3234_v19 = vrot.slane %v3232_v58, 1  ;;  %vm1558_vm0 = vcmp.ne.s32.totalorder %v1554_v43, %v7680_v56  ;;  %vm10239_vm13 = vmmov %vm10238_vm11  ;;  %v10240_v10 = vmov 0  ;;  %10244 = vst [vmem:[#allocation33_spill] sm:$0xff] %v8436_v28 }
  0xda   : > { %2309 = vmatmul.bf16.gmra.mxu1 %v2125_v40  ;;  %v3729_v32 = vsel %vm10239_vm13, %v8319_v37, %v8410_v3  ;;  %v1295_v21 = vsel %vm7664_vm10, %v1290_v63, %v7636_v30  ;;  %vm8426_vm7 = vmpackc.low %vm1558_vm0, %vm1557_vm12  ;;  %v8430_v13 = vrot.slane %v2677_v14, 7  ;;  %v2680_v59 = vshll.u32 %v2506_v42, 16 }
  0xdb   : > { %v10241_v10 = vsel %vm8426_vm7, 4294967295, %v10240_v10  ;;  %vm10243_vm11 = vsmask.f32 7424  ;;  %3913 = vmatmul.bf16.gmra.mxu3 %v3729_v32  ;;  %v1560_v55 = vunpack.c.l.b16 %v1295_v21  ;;  %v1561_v58 = vunpack.c.h.b16 %v1295_v21  ;;  %v3510_v32 = vld [vmem:[#allocation2 + $0x4c] sm:$0xf]  ;;  %v8444_v21 = vpop.f32.mrf.mxu3 }
  0xdc   : > { %10242 = vst [vmem:[#allocation32_spill] sm:$0xff] %v10241_v10  ;;  %v3235_v51 = vsel %vm10243_vm11, %v8361_v0, %v3234_v19  ;;  %v1688_v37 = vsel %vm8426_vm7, %v974_v23, 0  ;;  %v2682_v63 = vor.u32 %v2680_v59, %v8430_v13  ;;  %v2923_v14 = vunpack.c.l.b16 %v2674_v52  ;;  %v2376_v0 = vld [vmem:[#allocation2 + $0x44] sm:$0xf]  ;;  %v8457_v59 = vpop.f32.mrf.mxu0 }
  0xdd   : > { %3410 = vmatmul.bf16.gmra.mxu2 %v3235_v51  ;;  %v2020_v43 = vunpack.c.l.b16 %v1688_v37  ;;  %v2924_v40 = vunpack.c.h.b16 %v2674_v52  ;;  %vm1564_vm12 = vcmp.ne.s32.totalorder %v1560_v55, %v7677_v54  ;;  %vm1565_vm0 = vcmp.ne.s32.totalorder %v1561_v58, %v7680_v56  ;;  %10245 = vst [vmem:[#allocation34_spill] sm:$0xff] %v8444_v21  ;;  %v8446_v51 = vpop.f32.mrf.mxu1 }
  0xde   : > { %v3236_v42 = vshrl.u32 %v8395_v27, 16  ;;  %v3542_v23 = vsel %vm8426_vm7, %v3509_v62, 0  ;;  %10246 = vst [vmem:[#allocation35_spill] sm:$0xff] %v8446_v51  ;;  %vm8448_vm13 = vmpackc.low %vm1565_vm0, %vm1564_vm12  ;;  %v10247_v37 = vmov 0  ;;  %v2683_v52 = vsel %vm7769_vm14, %v7758_v39, %v2682_v63  ;;  %v2377_v63 = vld [vmem:[#allocation2 + $0x48] sm:$0xf] }
  0xdf   : > { %v10248_v37 = vsel %vm8448_vm13, 4294967295, %v10247_v37  ;;  %vm2927_vm11 = vcmp.ne.s32.totalorder %v2923_v14, %v7677_v54  ;;  %vm2928_vm2 = vcmp.ne.s32.totalorder %v2924_v40, %v7680_v56  ;;  %v3625_v27 = vunpack.c.l.b16 %v3542_v23  ;;  %10250 = vst [vmem:[#allocation37_spill] sm:$0xff] %v8457_v59 }
  0xe0   : > { %10249 = vst [vmem:[#allocation36_spill] sm:$0xff] %v10248_v37  ;;  %v1689_v62 = vsel %vm8448_vm13, %v975_v20, 0  ;;  %vm8461_vm7 = vmpackc.low %vm2928_vm2, %vm2927_vm11  ;;  %v10251_v55 = vmov 0  ;;  %v2930_v58 = vunpack.c.l.b16 %v2683_v52  ;;  %v2931_v51 = vunpack.c.h.b16 %v2683_v52 }
  0xe1   : > { %v10252_v55 = vsel %vm8461_vm7, 4294967295, %v10251_v55  ;;  %v8465_v21 = vor.u32 %v3236_v42, %v3234_v19  ;;  %v2021_v10 = vunpack.c.l.b16 %v1689_v62  ;;  %v3058_v14 = vsel %vm8461_vm7, %v2376_v0, 0  ;;  %v7008_v19 = vld [vmem:[%s9967_s3 + $0x198] sm:$0xff] }
  0xe2   : > { %10253 = vst [vmem:[#allocation38_spill] sm:$0xff] %v10252_v55  ;;  %v3543_v40 = vsel %vm8448_vm13, %v3510_v32, 0  ;;  %v496_v23 = vadd.s32 144, %v7590_v53  ;;  %vm2934_vm12 = vcmp.ne.s32.totalorder %v2930_v58, %v7677_v54  ;;  %vm2935_vm2 = vcmp.ne.s32.totalorder %v2931_v51, %v7680_v56  ;;  %v7016_v42 = vld [vmem:[%s9967_s3 + $0x1d8] sm:$0xff]  ;;  %5147 = vmatpush.bf16.msra.mxu2 %v7008_v19 }
  0xe3   : > { %v3141_v20 = vunpack.c.l.b16 %v3058_v14  ;;  %v3626_v59 = vunpack.c.l.b16 %v3543_v40  ;;  %v2045_v0 = vpack.c.b16 %v2021_v10, %v2020_v43  ;;  %vm8480_vm0 = vmpackc.low %vm2935_vm2, %vm2934_vm12  ;;  %v10254_v52 = vmov 0  ;;  %v6984_v58 = vld [vmem:[%s9967_s3 + $0x158] sm:$0xff]  ;;  %5429 = vmatpush.bf16.msra.mxu3 %v7016_v42 }
  0xe4   : > { %v10255_v52 = vsel %vm8480_vm0, 4294967295, %v10254_v52  ;;  %v640_v32 = vand.u32 15, %v496_v23  ;;  %v497_v62 = vadd.s32 152, %v7590_v53  ;;  %v2684_v51 = vrot.slane %v8430_v13, 4  ;;  %v7024_v14 = vld [vmem:[%s9967_s3 + $0x218] sm:$0xff]  ;;  %v8500_v13 = vpop.f32.mrf.mxu2  ;;  %4644 = vmatpush.bf16.msra.mxu1 %v6984_v58  ;;  %v8512_v58 = vpop.f32.mrf.mxu0 }
  0xe5   : > { %10256 = vst [vmem:[#allocation39_spill] sm:$0xff] %v10255_v52  ;;  %v3059_v10 = vsel %vm8480_vm0, %v2377_v63, 0  ;;  %v3650_v43 = vpack.c.b16 %v3626_v59, %v3625_v27  ;;  %v8495_v40 = vadd.s32 160, %v7590_v53  ;;  %v8498_v23 = vadd.s32 168, %v7590_v53  ;;  %5912 = vmatpush.bf16.msra.mxu0 %v7024_v14  ;;  %v8505_v63 = vpop.f32.mrf.mxu3  ;;  %v8507_v19 = vpop.f32.mrf.mxu1 }
  0xe6   : > { %10257 = vst [vmem:[#allocation40_spill] sm:$0xff] %v8500_v13  ;;  %v2127_v55 = vshrl.u32 %v2045_v0, 16  ;;  %v2130_v37 = vshll.u32 %v2045_v0, 16  ;;  %v3142_v18 = vunpack.c.l.b16 %v3059_v10  ;;  %vm912_vm11 = vcmp.ge.s32.totalorder %v640_v32, 1  ;;  %v6956_v0 = vld [vmem:[#allocation2 + $0x44] sm:$0xff] }
  0xe7   : > { %v3731_v44 = vshrl.u32 %v3650_v43, 16  ;;  %v3734_v52 = vshll.u32 %v3650_v43, 16  ;;  %vm1073_vm12 = vmpackc.low %vm912_vm11, %vm912_vm11  ;;  %v647_v27 = vand.u32 15, %v497_v62  ;;  %v2692_v59 = vsel %vm7769_vm14, %v2684_v51, %v7754_v34  ;;  %10258 = vst [vmem:[#allocation41_spill] sm:$0xff] %v8505_v63  ;;  %4200 = vmatmul.bf16.gmra.mxu0 %v6956_v0 }
  0xe8   : > { %v2129_v42 = vrot.slane %v2127_v55, 3  ;;  %v2132_v13 = vrot.slane %v2130_v37, 4  ;;  %v8509_v48 = vpack.c.b16 %v3142_v18, %v3141_v20  ;;  %v1105_v32 = vsel %vm1073_vm12, 65537, %v10213_v31 }
  0xe9   : > { %v3733_v14 = vrot.slane %v3731_v44, 3  ;;  %v3736_v10 = vrot.slane %v3734_v52, 4  ;;  %v1302_v62 = vshll.u32 %v1105_v32, 16  ;;  %v1306_v43 = vshrl.u32 %v1105_v32, 16 }
  0xea   : > { %v8514_v28 = vor.u32 %v2132_v13, %v2129_v42  ;;  %v3240_v51 = vshll.u32 %v8509_v48, 16  ;;  %vm945_vm2 = vcmp.lt.s32.totalorder %v647_v27, 15  ;;  %v2937_v63 = vunpack.c.l.b16 %v2692_v59 }
  0xeb   : > { %v8517_v8 = vor.u32 %v3736_v10, %v3733_v14  ;;  %v1304_v37 = vrot.slane %v1302_v62, 5  ;;  %v1308_v18 = vrot.slane %v1306_v43, 4  ;;  %vm2476_vm11 = vmpackc.low %vm945_vm2, %vm945_vm2  ;;  %v2938_v55 = vunpack.c.h.b16 %v2692_v59  ;;  %v2378_v10 = vld [vmem:[#allocation2 + $0x4c] sm:$0xf]  ;;  %v976_v43 = vld [vmem:[#allocation2 + $0x48] sm:$0xf] }
  0xec   : > { %vm10259_vm12 = vsmask.f32 4352  ;;  %v8522_v44 = vrot.slane %v3240_v51, 1  ;;  %v2508_v52 = vsel %vm2476_vm11, 65537, %v10213_v31  ;;  %vm8526_vm0 = vcmp.ne.s32.totalorder %v2937_v63, %v7677_v54  ;;  %v8539_v63 = vpop.f32.mrf.mxu2 }
  0xed   : > { %v2134_v20 = vsel %vm10259_vm12, %v8407_v60, %v8514_v28  ;;  %vm10262_vm7 = vmmov %vm10259_vm12  ;;  %v1305_v59 = vsel %vm7664_vm10, %v7668_v47, %v1304_v37  ;;  %v1309_v60 = vor.u32 %v1308_v18, %v1304_v37  ;;  %v2695_v42 = vshrl.u32 %v2508_v52, 16  ;;  %10264 = vst [vmem:[#allocation42_spill] sm:$0xff] %v8539_v63  ;;  %v8544_v37 = vpop.f32.mrf.mxu1 }
  0xee   : > { %2314 = vmatmul.bf16.gmra.mxu1 %v2134_v20  ;;  %v3738_v27 = vsel %vm10262_vm7, %v8410_v3, %v8517_v8  ;;  %vm10263_vm2 = vsmask.f32 7424  ;;  %v1567_v32 = vunpack.c.l.b16 %v1305_v59  ;;  %v1568_v14 = vunpack.c.h.b16 %v1305_v59  ;;  %v8542_v20 = vpop.f32.mrf.mxu3  ;;  %10266 = vst [vmem:[#allocation44_spill] sm:$0xff] %v8544_v37  ;;  %v977_v37 = vld [vmem:[#allocation2 + $0x4c] sm:$0xf] }
  0xef   : > { %v3243_v0 = vsel %vm10263_vm2, %v8465_v21, %v8522_v44  ;;  %3918 = vmatmul.bf16.gmra.mxu3 %v3738_v27  ;;  %v2698_v62 = vshll.u32 %v2508_v52, 16  ;;  %v1310_v3 = vrot.slane %v1309_v60, 4  ;;  %v2697_v51 = vrot.slane %v2695_v42, 7  ;;  %10265 = vst [vmem:[#allocation43_spill] sm:$0xff] %v8542_v20  ;;  %v3511_v52 = vld [vmem:[#allocation2 + $0x50] sm:$0xf] }
  0xf0   : > { %3415 = vmatmul.bf16.gmra.mxu2 %v3243_v0  ;;  %vm2942_vm7 = vcmp.ne.s32.totalorder %v2938_v55, %v7680_v56  ;;  %vm1571_vm11 = vcmp.ne.s32.totalorder %v1567_v32, %v7677_v54  ;;  %vm1572_vm12 = vcmp.ne.s32.totalorder %v1568_v14, %v7680_v56  ;;  %v10267_v21 = vmov 0  ;;  %v8556_v55 = vpop.f32.mrf.mxu0  ;;  %v3512_v20 = vld [vmem:[#allocation2 + $0x54] sm:$0xf] }
  0xf1   : > { %vm8550_vm2 = vmpackc.low %vm2942_vm7, %vm8526_vm0  ;;  %v3244_v18 = vshrl.u32 %v8509_v48, 16  ;;  %v654_v27 = vand.u32 15, %v8495_v40  ;;  %10270 = vst [vmem:[#allocation46_spill] sm:$0xff] %v8556_v55  ;;  %v1315_v59 = vsel %vm7664_vm10, %v1310_v3, %v7636_v30  ;;  %v10271_v60 = vmov 0 }
  0xf2   : > { %v10268_v21 = vsel %vm8550_vm2, 4294967295, %v10267_v21  ;;  %vm8561_vm13 = vmpackc.low %vm1572_vm12, %vm1571_vm11  ;;  %v2700_v13 = vor.u32 %v2698_v62, %v2697_v51  ;;  %v3060_v42 = vsel %vm8550_vm2, %v2378_v10, 0  ;;  %v661_v0 = vand.u32 15, %v8498_v23 }
  0xf3   : > { %10269 = vst [vmem:[#allocation45_spill] sm:$0xff] %v10268_v21  ;;  %v10272_v60 = vsel %vm8561_vm13, 4294967295, %v10271_v60  ;;  %v1574_v48 = vunpack.c.l.b16 %v1315_v59  ;;  %v1575_v32 = vunpack.c.h.b16 %v1315_v59  ;;  %v1690_v40 = vsel %vm8561_vm13, %v976_v43, 0  ;;  %v2379_v59 = vld [vmem:[#allocation2 + $0x50] sm:$0xf] }
  0xf4   : > { %10273 = vst [vmem:[#allocation47_spill] sm:$0xff] %v10272_v60  ;;  %v3143_v14 = vunpack.c.l.b16 %v3060_v42  ;;  %v2022_v55 = vunpack.c.l.b16 %v1690_v40  ;;  %v2701_v3 = vsel %vm7769_vm14, %v7758_v39, %v2700_v13  ;;  %v3544_v62 = vsel %vm8561_vm13, %v3511_v52, 0 }
  0xf5   : > { %vm914_vm0 = vcmp.ge.s32.totalorder %v654_v27, 1  ;;  %vm1578_vm7 = vcmp.ne.s32.totalorder %v1574_v48, %v7677_v54  ;;  %vm1579_vm11 = vcmp.ne.s32.totalorder %v1575_v32, %v7680_v56  ;;  %v2944_v23 = vunpack.c.l.b16 %v2701_v3  ;;  %v8586_v27 = vpop.f32.mrf.mxu2 }
  0xf6   : > { %v2945_v10 = vunpack.c.h.b16 %v2701_v3  ;;  %vm1075_vm12 = vmpackc.low %vm914_vm0, %vm914_vm0  ;;  %v10274_v43 = vmov 0  ;;  %v3627_v42 = vunpack.c.l.b16 %v3544_v62  ;;  %vm8582_vm5 = vcmp.lt.s32.totalorder %v661_v0, 15  ;;  %10279 = vst [vmem:[#allocation49_spill] sm:$0xff] %v8586_v27 }
  0xf7   : > { %vm8577_vm2 = vmpackc.low %vm1579_vm11, %vm1578_vm7  ;;  %v1107_v13 = vsel %vm1075_vm12, 65537, %v10213_v31  ;;  %v2702_v52 = vrot.slane %v2697_v51, 4  ;;  %vm2948_vm0 = vcmp.ne.s32.totalorder %v2944_v23, %v7677_v54  ;;  %v10280_v3 = vmov 0  ;;  %v2280_v23 = vpop.f32.mrf.mxu1 }
  0xf8   : > { %v10275_v43 = vsel %vm8577_vm2, 4294967295, %v10274_v43  ;;  %v1691_v48 = vsel %vm8577_vm2, %v977_v37, 0  ;;  %vm2949_vm7 = vcmp.ne.s32.totalorder %v2945_v10, %v7680_v56  ;;  %v3545_v32 = vsel %vm8577_vm2, %v3512_v20, 0  ;;  %vm2478_vm11 = vmpackc.low %vm8582_vm5, %vm8582_vm5  ;;  %v8601_v37 = vpop.f32.mrf.mxu3  ;;  %v8613_v21 = vpop.f32.mrf.mxu0 }
  0xf9   : > { %10276 = vst [vmem:[#allocation48_spill] sm:$0xff] %v10275_v43  ;;  %v2023_v0 = vunpack.c.l.b16 %v1691_v48  ;;  %vm8597_vm12 = vmpackc.low %vm2949_vm7, %vm2948_vm0  ;;  %v3628_v51 = vunpack.c.l.b16 %v3545_v32  ;;  %v1322_v62 = vshll.u32 %v1107_v13, 16  ;;  %v1326_v60 = vshrl.u32 %v1107_v13, 16  ;;  %v6957_v43 = vld [vmem:[#allocation2 + $0x4c] sm:$0xff] }
  0xfa   : > { %v10281_v3 = vsel %vm8597_vm12, 4294967295, %v10280_v3  ;;  %10283 = vst [vmem:[#allocation51_spill] sm:$0xff] %v8601_v37  ;;  %v3061_v10 = vsel %vm8597_vm12, %v2379_v59, 0  ;;  %v3246_v20 = vor.u32 %v3244_v18, %v8522_v44  ;;  %v2510_v40 = vsel %vm2478_vm11, 65537, %v10213_v31  ;;  %4205 = vmatmul.bf16.gmra.mxu0 %v6957_v43 }
  0xfb   : > { %10282 = vst [vmem:[#allocation50_spill] sm:$0xff] %v10281_v3  ;;  %v8610_v48 = vsel %vm7769_vm14, %v2702_v52, %v7754_v34  ;;  %v2281_v32 = vadd.f32 %v2280_v23, %v8215_v1  ;;  %v2046_v13 = vpack.c.b16 %v2023_v0, %v2022_v55  ;;  %v3144_v37 = vunpack.c.l.b16 %v3061_v10 }
  0xfc   : > { %10284 = vst [vmem:[#allocation52_spill] sm:$0xff] %v8613_v21  ;;  %v3651_v27 = vpack.c.b16 %v3628_v51, %v3627_v42  ;;  %v1324_v63 = vrot.slane %v1322_v62, 5  ;;  %v1328_v3 = vrot.slane %v1326_v60, 4  ;;  %v2713_v59 = vshrl.u32 %v2510_v40, 16 }
  0xfd   : > { %v2716_v17 = vshll.u32 %v2510_v40, 16  ;;  %v2136_v44 = vshrl.u32 %v2046_v13, 16  ;;  %v2139_v18 = vshll.u32 %v2046_v13, 16  ;;  %v8615_v35 = vpack.c.b16 %v3144_v37, %v3143_v14  ;;  %v3381_v62 = vpop.f32.mrf.mxu2  ;;  %v978_v13 = vld [vmem:[#allocation2 + $0x50] sm:$0xf] }
  0xfe   : > { %v3740_v50 = vshrl.u32 %v3651_v27, 16  ;;  %v3743_v15 = vshll.u32 %v3651_v27, 16  ;;  %v1325_v1 = vsel %vm7664_vm10, %v7668_v47, %v1324_v63  ;;  %v1329_v52 = vor.u32 %v1328_v3, %v1324_v63 }
  0xff   : > { %v8620_v23 = vrot.slane %v2713_v59, 7  ;;  %v2138_v55 = vrot.slane %v2136_v44, 3  ;;  %v2141_v42 = vrot.slane %v2139_v18, 4  ;;  %v3248_v60 = vshll.u32 %v8615_v35, 16  ;;  %v8628_v59 = vpop.f32.mrf.mxu1 }
 0x100   : > { %v3742_v0 = vrot.slane %v3740_v50, 3  ;;  %v3745_v51 = vrot.slane %v3743_v15, 4  ;;  %v1330_v10 = vrot.slane %v1329_v52, 4  ;;  %v1581_v14 = vunpack.c.l.b16 %v1325_v1  ;;  %v3884_v3 = vpop.f32.mrf.mxu3  ;;  %10285 = vst [vmem:[#allocation53_spill] sm:$0xff] %v8628_v59  ;;  %v8641_v44 = vpop.f32.mrf.mxu0 }
 0x101   : > { %v1582_v37 = vunpack.c.h.b16 %v1325_v1  ;;  %v8623_v40 = vor.u32 %v2141_v42, %v2138_v55  ;;  %v3250_v43 = vrot.slane %v3248_v60, 1  ;;  %v3461_v27 = vadd.f32 %v3381_v62, %v2281_v32  ;;  %10289 = vst [vmem:[#allocation55_spill] sm:$0xff] %v8641_v44  ;;  %v3513_v42 = vld [vmem:[#allocation2 + $0x58] sm:$0xf]  ;;  %v979_v60 = vld [vmem:[#allocation2 + $0x54] sm:$0xf] }
 0x102   : > { %v2718_v21 = vor.u32 %v2716_v17, %v8620_v23  ;;  %v8626_v63 = vor.u32 %v3745_v51, %v3742_v0  ;;  %v1335_v50 = vsel %vm7664_vm10, %v1330_v10, %v7636_v30  ;;  %vm1585_vm5 = vcmp.ne.s32.totalorder %v1581_v14, %v7677_v54  ;;  %v3514_v14 = vld [vmem:[#allocation2 + $0x5c] sm:$0xf] }
 0x103   : > { %vm1586_vm0 = vcmp.ne.s32.totalorder %v1582_v37, %v7680_v56  ;;  %vm10286_vm7 = vsmask.f32 4352  ;;  %vm10287_vm11 = vsmask.f32 7424  ;;  %v8639_v17 = vadd.f32 %v3884_v3, %v3461_v27  ;;  %v2381_v3 = vld [vmem:[#allocation2 + $0x58] sm:$0xf] }
 0x104   : > { %v2143_v15 = vsel %vm10286_vm7, %v8514_v28, %v8623_v40  ;;  %v3251_v32 = vsel %vm10287_vm11, %v3246_v20, %v3250_v43  ;;  %vm8643_vm2 = vmpackc.low %vm1586_vm0, %vm1585_vm5  ;;  %v10290_v18 = vmov 0  ;;  %v8648_v1 = vadd.s32 176, %v7590_v53 }
 0x105   : > { %10288 = vst [vmem:[#allocation54_spill] sm:$0xff] %v8639_v17  ;;  %v10291_v18 = vsel %vm8643_vm2, 4294967295, %v10290_v18  ;;  %2319 = vmatmul.bf16.gmra.mxu1 %v2143_v15  ;;  %3420 = vmatmul.bf16.gmra.mxu2 %v3251_v32  ;;  %vm10293_vm13 = vmmov %vm10286_vm7  ;;  %v1588_v28 = vunpack.c.l.b16 %v1335_v50  ;;  %v1589_v55 = vunpack.c.h.b16 %v1335_v50  ;;  %v1692_v20 = vsel %vm8643_vm2, %v978_v13, 0  ;;  %v8671_v50 = vpop.f32.mrf.mxu2  ;;  %v10553_v32 = vld [vmem:[#allocation20_spill] sm:$0xff] }
 0x106   : > { %10292 = vst [vmem:[#allocation56_spill] sm:$0xff] %v10291_v18  ;;  %v3747_v52 = vsel %vm10293_vm13, %v8517_v8, %v8626_v63  ;;  %v2024_v0 = vunpack.c.l.b16 %v1692_v20  ;;  %v2719_v51 = vsel %vm7769_vm14, %v7758_v39, %v2718_v21  ;;  %v2951_v62 = vunpack.c.l.b16 %v8610_v48  ;;  %v2380_v8 = vld [vmem:[#allocation2 + $0x54] sm:$0xf] }
 0x107   : > { %3923 = vmatmul.bf16.gmra.mxu3 %v3747_v52  ;;  %v2952_v10 = vunpack.c.h.b16 %v8610_v48  ;;  %vm1592_vm13 = vcmp.ne.s32.totalorder %v1588_v28, %v7677_v54  ;;  %vm1593_vm5 = vcmp.ne.s32.totalorder %v1589_v55, %v7680_v56  ;;  %v2958_v37 = vunpack.c.l.b16 %v2719_v51  ;;  %10297 = vst [vmem:[#allocation58_spill] sm:$0xff] %v8671_v50 }
 0x108   : > { %v2959_v27 = vunpack.c.h.b16 %v2719_v51  ;;  %vm8662_vm0 = vmpackc.low %vm1593_vm5, %vm1592_vm13  ;;  %v10294_v13 = vmov 0  ;;  %vm2955_vm7 = vcmp.ne.s32.totalorder %v2951_v62, %v7677_v54  ;;  %v3252_v21 = vshrl.u32 %v8615_v35, 16  ;;  %v8689_v20 = vpop.f32.mrf.mxu3 }
 0x109   : > { %v10295_v13 = vsel %vm8662_vm0, 4294967295, %v10294_v13  ;;  %vm2956_vm11 = vcmp.ne.s32.totalorder %v2952_v10, %v7680_v56  ;;  %v3546_v48 = vsel %vm8643_vm2, %v3513_v42, 0  ;;  %v1693_v15 = vsel %vm8662_vm0, %v979_v60, 0  ;;  %10303 = vst [vmem:[#allocation60_spill] sm:$0xff] %v8689_v20  ;;  %v2285_v42 = vpop.f32.mrf.mxu1  ;;  %v7015_v20 = vld [vmem:[%s9967_s3 + $0x1d0] sm:$0xff] }
 0x10a   : > { %10296 = vst [vmem:[#allocation57_spill] sm:$0xff] %v10295_v13  ;;  %vm8675_vm12 = vmpackc.low %vm2956_vm11, %vm2955_vm7  ;;  %vm2962_vm13 = vcmp.ne.s32.totalorder %v2958_v37, %v7677_v54  ;;  %vm2963_vm5 = vcmp.ne.s32.totalorder %v2959_v27, %v7680_v56  ;;  %v3547_v52 = vsel %vm8662_vm0, %v3514_v14, 0  ;;  %v2025_v35 = vunpack.c.l.b16 %v1693_v15  ;;  %v6958_v37 = vld [vmem:[#allocation2 + $0x54] sm:$0xff]  ;;  %v8694_v27 = vpop.f32.mrf.mxu0  ;;  %5430 = vmatpush.bf16.msra.mxu3 %v7015_v20 }
 0x10b   : > { %vm8683_vm8 = vmpackc.low %vm2963_vm5, %vm2962_vm13  ;;  %v10300_v28 = vmov 0  ;;  %v3062_v55 = vsel %vm8675_vm12, %v2380_v8, 0  ;;  %v3629_v62 = vunpack.c.l.b16 %v3546_v48  ;;  %v3630_v10 = vunpack.c.l.b16 %v3547_v52  ;;  %10304 = vst [vmem:[#allocation61_spill] sm:$0xff] %v8694_v27  ;;  %v7007_v8 = vld [vmem:[%s9967_s3 + $0x190] sm:$0xff]  ;;  %4210 = vmatmul.bf16.gmra.mxu0 %v6958_v37 }
 0x10c   : > { %v10301_v28 = vsel %vm8683_vm8, 4294967295, %v10300_v28  ;;  %v3063_v60 = vsel %vm8683_vm8, %v2381_v3, 0  ;;  %v3145_v51 = vunpack.c.l.b16 %v3062_v55  ;;  %v2286_v14 = vadd.f32 %v2285_v42, %v8317_v57  ;;  %5148 = vmatpush.bf16.msra.mxu2 %v7007_v8 }
 0x10d   : > { %10302 = vst [vmem:[#allocation59_spill] sm:$0xff] %v10301_v28  ;;  %v2047_v15 = vpack.c.b16 %v2025_v35, %v2024_v0  ;;  %v3146_v44 = vunpack.c.l.b16 %v3063_v60  ;;  %v3254_v17 = vor.u32 %v3252_v21, %v3250_v43  ;;  %v3652_v3 = vpack.c.b16 %v3630_v10, %v3629_v62  ;;  %v6983_v0 = vld [vmem:[%s9967_s3 + $0x150] sm:$0xff] }
 0x10e   : > { %v668_v48 = vand.u32 15, %v8648_v1  ;;  %v501_v52 = vadd.s32 184, %v7590_v53  ;;  %v2720_v57 = vrot.slane %v8620_v23, 4  ;;  %v7023_v43 = vld [vmem:[%s9967_s3 + $0x210] sm:$0xff]  ;;  %v502_v1 = vadd.s32 192, %v7590_v53  ;;  %4645 = vmatpush.bf16.msra.mxu1 %v6983_v0 }
 0x10f   : > { %v2145_v21 = vshrl.u32 %v2047_v15, 16  ;;  %v2148_v35 = vshll.u32 %v2047_v15, 16  ;;  %v8711_v55 = vpack.c.b16 %v3146_v44, %v3145_v51  ;;  %v3749_v42 = vshrl.u32 %v3652_v3, 16  ;;  %5913 = vmatpush.bf16.msra.mxu0 %v7023_v43  ;;  %v3386_v15 = vpop.f32.mrf.mxu2 }
 0x110   : > { %v3752_v60 = vshll.u32 %v3652_v3, 16  ;;  %vm916_vm7 = vcmp.ge.s32.totalorder %v668_v48, 1  ;;  %v675_v23 = vand.u32 15, %v501_v52  ;;  %v2728_v44 = vsel %vm7769_vm14, %v2720_v57, %v7754_v34 }
 0x111   : > { %v2147_v62 = vrot.slane %v2145_v21, 3  ;;  %v2150_v10 = vrot.slane %v2148_v35, 4  ;;  %v3256_v27 = vshll.u32 %v8711_v55, 16  ;;  %vm1077_vm11 = vmpackc.low %vm916_vm7, %vm916_vm7  ;;  %v3751_v51 = vrot.slane %v3749_v42, 3  ;;  %v3889_v21 = vpop.f32.mrf.mxu3  ;;  %v8725_v35 = vpop.f32.mrf.mxu1 }
 0x112   : > { %v3754_v20 = vrot.slane %v3752_v60, 4  ;;  %v1109_v8 = vsel %vm1077_vm11, 65537, %v10213_v31  ;;  %vm949_vm13 = vcmp.lt.s32.totalorder %v675_v23, 15  ;;  %v3463_v48 = vadd.f32 %v3386_v15, %v2286_v14  ;;  %10305 = vst [vmem:[#allocation62_spill] sm:$0xff] %v8725_v35  ;;  %v8735_v14 = vpop.f32.mrf.mxu0  ;;  %v3516_v35 = vld [vmem:[#allocation2 + $0x64] sm:$0xf] }
 0x113   : > { %v8719_v37 = vor.u32 %v2150_v10, %v2147_v62  ;;  %v8721_v3 = vrot.slane %v3256_v27, 1  ;;  %v1342_v52 = vshll.u32 %v1109_v8, 16  ;;  %vm2480_vm5 = vmpackc.low %vm949_vm13, %vm949_vm13  ;;  %v1346_v57 = vshrl.u32 %v1109_v8, 16  ;;  %10309 = vst [vmem:[#allocation64_spill] sm:$0xff] %v8735_v14  ;;  %v2382_v14 = vld [vmem:[#allocation2 + $0x5c] sm:$0xf] }
 0x114   : > { %v8723_v0 = vor.u32 %v3754_v20, %v3751_v51  ;;  %v2512_v43 = vsel %vm2480_vm5, 65537, %v10213_v31  ;;  %v2965_v42 = vunpack.c.l.b16 %v2728_v44  ;;  %vm10306_vm7 = vsmask.f32 4352 }
 0x115   : > { %v2152_v60 = vsel %vm10306_vm7, %v8623_v40, %v8719_v37  ;;  %vm10307_vm11 = vsmask.f32 7424  ;;  %v8733_v23 = vadd.f32 %v3889_v21, %v3463_v48  ;;  %vm10310_vm13 = vmmov %vm10306_vm7  ;;  %v1344_v10 = vrot.slane %v1342_v52, 5 }
 0x116   : > { %v3259_v27 = vsel %vm10307_vm11, %v3254_v17, %v8721_v3  ;;  %2324 = vmatmul.bf16.gmra.mxu1 %v2152_v60  ;;  %v3756_v62 = vsel %vm10310_vm13, %v8626_v63, %v8723_v0  ;;  %v1348_v51 = vrot.slane %v1346_v57, 4  ;;  %v2731_v20 = vshrl.u32 %v2512_v43, 16 }
 0x117   : > { %10308 = vst [vmem:[#allocation63_spill] sm:$0xff] %v8733_v23  ;;  %3425 = vmatmul.bf16.gmra.mxu2 %v3259_v27  ;;  %3928 = vmatmul.bf16.gmra.mxu3 %v3756_v62  ;;  %v2734_v15 = vshll.u32 %v2512_v43, 16  ;;  %v2966_v8 = vunpack.c.h.b16 %v2728_v44  ;;  %vm2969_vm5 = vcmp.ne.s32.totalorder %v2965_v42, %v7677_v54  ;;  %v1345_v40 = vsel %vm7664_vm10, %v7668_v47, %v1344_v10  ;;  %v8747_v63 = vpop.f32.mrf.mxu2  ;;  %v980_v42 = vld [vmem:[#allocation2 + $0x58] sm:$0xf]  ;;  %v3515_v62 = vld [vmem:[#allocation2 + $0x60] sm:$0xf] }
 0x118   : > { %v1349_v17 = vor.u32 %v1348_v51, %v1344_v10  ;;  %v8744_v48 = vrot.slane %v2731_v20, 7  ;;  %v682_v21 = vand.u32 15, %v502_v1  ;;  %v1595_v60 = vunpack.c.l.b16 %v1345_v40  ;;  %10311 = vst [vmem:[#allocation65_spill] sm:$0xff] %v8747_v63 }
 0x119   : > { %v1596_v27 = vunpack.c.h.b16 %v1345_v40  ;;  %vm2970_vm7 = vcmp.ne.s32.totalorder %v2966_v8, %v7680_v56  ;;  %v10312_v57 = vmov 0  ;;  %v3260_v1 = vshrl.u32 %v8711_v55, 16  ;;  %v8764_v10 = vpop.f32.mrf.mxu3  ;;  %v2290_v51 = vpop.f32.mrf.mxu1  ;;  %v6959_v40 = vld [vmem:[#allocation2 + $0x5c] sm:$0xff] }
 0x11a   : > { %v1350_v52 = vrot.slane %v1349_v17, 4  ;;  %v2736_v44 = vor.u32 %v2734_v15, %v8744_v48  ;;  %vm8750_vm11 = vmpackc.low %vm2970_vm7, %vm2969_vm5  ;;  %vm8754_vm13 = vcmp.ge.s32.totalorder %v682_v21, 1  ;;  %vm1599_vm0 = vcmp.ne.s32.totalorder %v1595_v60, %v7677_v54  ;;  %10317 = vst [vmem:[#allocation67_spill] sm:$0xff] %v8764_v10  ;;  %v8780_v60 = vpop.f32.mrf.mxu0  ;;  %v981_v10 = vld [vmem:[#allocation2 + $0x5c] sm:$0xf] }
 0x11b   : > { %v10313_v57 = vsel %vm8750_vm11, 4294967295, %v10312_v57  ;;  %vm1600_vm2 = vcmp.ne.s32.totalorder %v1596_v27, %v7680_v56  ;;  %vm1079_vm8 = vmpackc.low %vm8754_vm13, %vm8754_vm13  ;;  %v10318_v15 = vmov 0  ;;  %v3064_v8 = vsel %vm8750_vm11, %v2382_v14, 0  ;;  %10321 = vst [vmem:[#allocation69_spill] sm:$0xff] %v8780_v60  ;;  %4215 = vmatmul.bf16.gmra.mxu0 %v6959_v40 }
 0x11c   : > { %10314 = vst [vmem:[#allocation66_spill] sm:$0xff] %v10313_v57  ;;  %v1355_v20 = vsel %vm7664_vm10, %v1350_v52, %v7636_v30  ;;  %vm8769_vm5 = vmpackc.low %vm1600_vm2, %vm1599_vm0  ;;  %v2737_v55 = vsel %vm7769_vm14, %v7758_v39, %v2736_v44  ;;  %v503_v17 = vadd.s32 200, %v7590_v53  ;;  %v2291_v21 = vadd.f32 %v2290_v51, %v8405_v24  ;;  %v2383_v51 = vld [vmem:[#allocation2 + $0x60] sm:$0xf] }
 0x11d   : > { %v10319_v15 = vsel %vm8769_vm5, 4294967295, %v10318_v15  ;;  %v1602_v27 = vunpack.c.l.b16 %v1355_v20  ;;  %v1603_v52 = vunpack.c.h.b16 %v1355_v20  ;;  %v1111_v43 = vsel %vm1079_vm8, 65537, %v10213_v31 }
 0x11e   : > { %10320 = vst [vmem:[#allocation68_spill] sm:$0xff] %v10319_v15  ;;  %v1694_v23 = vsel %vm8769_vm5, %v980_v42, 0  ;;  %v2972_v63 = vunpack.c.l.b16 %v2737_v55  ;;  %v2973_v44 = vunpack.c.h.b16 %v2737_v55  ;;  %v3548_v14 = vsel %vm8769_vm5, %v3515_v62, 0 }
 0x11f   : > { %vm1606_vm2 = vcmp.ne.s32.totalorder %v1602_v27, %v7677_v54  ;;  %vm1607_vm0 = vcmp.ne.s32.totalorder %v1603_v52, %v7680_v56  ;;  %v2026_v24 = vunpack.c.l.b16 %v1694_v23  ;;  %v3631_v60 = vunpack.c.l.b16 %v3548_v14  ;;  %v3391_v40 = vpop.f32.mrf.mxu2 }
 0x120   : > { %vm8789_vm7 = vmpackc.low %vm1607_vm0, %vm1606_vm2  ;;  %v10322_v20 = vmov 0  ;;  %vm2976_vm8 = vcmp.ne.s32.totalorder %v2972_v63, %v7677_v54  ;;  %vm2977_vm13 = vcmp.ne.s32.totalorder %v2973_v44, %v7680_v56  ;;  %v1362_v42 = vshll.u32 %v1111_v43, 16 }
 0x121   : > { %v10323_v20 = vsel %vm8789_vm7, 4294967295, %v10322_v20  ;;  %v1366_v55 = vshrl.u32 %v1111_v43, 16  ;;  %v1695_v62 = vsel %vm8789_vm7, %v981_v10, 0  ;;  %vm8797_vm5 = vmpackc.low %vm2977_vm13, %vm2976_vm8  ;;  %v10324_v27 = vmov 0  ;;  %v3894_v28 = vpop.f32.mrf.mxu3 }
 0x122   : > { %v10325_v27 = vsel %vm8797_vm5, 4294967295, %v10324_v27  ;;  %v3147_v23 = vunpack.c.l.b16 %v3064_v8  ;;  %v3549_v52 = vsel %vm8789_vm7, %v3516_v35, 0  ;;  %v689_v14 = vand.u32 15, %v503_v17  ;;  %v8806_v8 = vpop.f32.mrf.mxu1 }
 0x123   : > { %v2027_v15 = vunpack.c.l.b16 %v1695_v62  ;;  %v3065_v63 = vsel %vm8797_vm5, %v2383_v51, 0  ;;  %v3632_v44 = vunpack.c.l.b16 %v3549_v52  ;;  %v1364_v57 = vrot.slane %v1362_v42, 5  ;;  %10326 = vst [vmem:[#allocation70_spill] sm:$0xff] %v8806_v8  ;;  %v8816_v42 = vpop.f32.mrf.mxu0  ;;  %v2385_v8 = vld [vmem:[#allocation2 + $0x68] sm:$0xf] }
 0x124   : > { %v3148_v43 = vunpack.c.l.b16 %v3065_v63  ;;  %v3262_v50 = vor.u32 %v3260_v1, %v8721_v3  ;;  %v3465_v10 = vadd.f32 %v3391_v40, %v2291_v21  ;;  %v1368_v59 = vrot.slane %v1366_v55, 4  ;;  %10328 = vst [vmem:[#allocation72_spill] sm:$0xff] %v8816_v42 }
 0x125   : > { %v2048_v13 = vpack.c.b16 %v2027_v15, %v2026_v24  ;;  %v3653_v18 = vpack.c.b16 %v3632_v44, %v3631_v60  ;;  %v1365_v35 = vsel %vm7664_vm10, %v7668_v47, %v1364_v57  ;;  %v2738_v17 = vrot.slane %v8744_v48, 4 }
 0x126   : > { %v8812_v51 = vpack.c.b16 %v3148_v43, %v3147_v23  ;;  %v8814_v62 = vadd.f32 %v3894_v28, %v3465_v10  ;;  %v1369_v3 = vor.u32 %v1368_v59, %v1364_v57  ;;  %vm8818_vm2 = vcmp.lt.s32.totalorder %v689_v14, 15  ;;  %v982_v43 = vld [vmem:[#allocation2 + $0x60] sm:$0xf] }
 0x127   : > { %v2154_v15 = vshrl.u32 %v2048_v13, 16  ;;  %v2157_v21 = vshll.u32 %v2048_v13, 16  ;;  %v3758_v60 = vshrl.u32 %v3653_v18, 16  ;;  %v3761_v24 = vshll.u32 %v3653_v18, 16  ;;  %vm2482_vm0 = vmpackc.low %vm8818_vm2, %vm8818_vm2  ;;  %v8837_v14 = vpop.f32.mrf.mxu2 }
 0x128   : > { %10327 = vst [vmem:[#allocation71_spill] sm:$0xff] %v8814_v62  ;;  %v3264_v55 = vshll.u32 %v8812_v51, 16  ;;  %v1370_v52 = vrot.slane %v1369_v3, 4  ;;  %v1609_v63 = vunpack.c.l.b16 %v1365_v35  ;;  %v1610_v48 = vunpack.c.h.b16 %v1365_v35 }
 0x129   : > { %v2156_v23 = vrot.slane %v2154_v15, 3  ;;  %v2159_v44 = vrot.slane %v2157_v21, 4  ;;  %v3760_v28 = vrot.slane %v3758_v60, 3  ;;  %v3763_v40 = vrot.slane %v3761_v24, 4  ;;  %10331 = vst [vmem:[#allocation73_spill] sm:$0xff] %v8837_v14 }
 0x12a   : > { %v8826_v59 = vrot.slane %v3264_v55, 1  ;;  %v1375_v18 = vsel %vm7664_vm10, %v1370_v52, %v7636_v30  ;;  %vm1613_vm8 = vcmp.ne.s32.totalorder %v1609_v63, %v7677_v54  ;;  %vm1614_vm13 = vcmp.ne.s32.totalorder %v1610_v48, %v7680_v56  ;;  %v983_v15 = vld [vmem:[#allocation2 + $0x64] sm:$0xf]  ;;  %v2295_v63 = vpop.f32.mrf.mxu1  ;;  %v3517_v48 = vld [vmem:[#allocation2 + $0x68] sm:$0xf] }
 0x12b   : > { %v8833_v13 = vor.u32 %v2159_v44, %v2156_v23  ;;  %v8835_v57 = vor.u32 %v3763_v40, %v3760_v28  ;;  %vm8839_vm7 = vmpackc.low %vm1614_vm13, %vm1613_vm8  ;;  %v10332_v10 = vmov 0  ;;  %v1616_v35 = vunpack.c.l.b16 %v1375_v18  ;;  %v6960_v23 = vld [vmem:[#allocation2 + $0x64] sm:$0xff]  ;;  %v8862_v44 = vpop.f32.mrf.mxu0  ;;  %v3518_v40 = vld [vmem:[#allocation2 + $0x6c] sm:$0xf] }
 0x12c   : > { %v10333_v10 = vsel %vm8839_vm7, 4294967295, %v10332_v10  ;;  %v1617_v3 = vunpack.c.h.b16 %v1375_v18  ;;  %vm10335_vm2 = vsmask.f32 7424  ;;  %v1696_v21 = vsel %vm8839_vm7, %v982_v43, 0  ;;  %10339 = vst [vmem:[#allocation76_spill] sm:$0xff] %v8862_v44  ;;  %4220 = vmatmul.bf16.gmra.mxu0 %v6960_v23 }
 0x12d   : > { %10334 = vst [vmem:[#allocation74_spill] sm:$0xff] %v10333_v10  ;;  %v3267_v1 = vsel %vm10335_vm2, %v3262_v50, %v8826_v59  ;;  %v2514_v60 = vsel %vm2482_vm0, 65537, %v10213_v31  ;;  %v2746_v24 = vsel %vm7769_vm14, %v2738_v17, %v7754_v34  ;;  %vm10336_vm8 = vsmask.f32 4352  ;;  %v8857_v50 = vpop.f32.mrf.mxu3 }
 0x12e   : > { %v2161_v55 = vsel %vm10336_vm8, %v8719_v37, %v8833_v13  ;;  %3430 = vmatmul.bf16.gmra.mxu2 %v3267_v1  ;;  %vm10337_vm13 = vmmov %vm10336_vm8  ;;  %10338 = vst [vmem:[#allocation75_spill] sm:$0xff] %v8857_v50  ;;  %vm1620_vm2 = vcmp.ne.s32.totalorder %v1616_v35, %v7677_v54  ;;  %vm1621_vm0 = vcmp.ne.s32.totalorder %v1617_v3, %v7680_v56  ;;  %v10340_v37 = vmov 0 }
 0x12f   : > { %v3765_v52 = vsel %vm10337_vm13, %v8723_v0, %v8835_v57  ;;  %2329 = vmatmul.bf16.gmra.mxu1 %v2161_v55  ;;  %v2296_v17 = vadd.f32 %v2295_v63, %v8512_v58  ;;  %vm8864_vm8 = vmpackc.low %vm1621_vm0, %vm1620_vm2  ;;  %v2028_v0 = vunpack.c.l.b16 %v1696_v21  ;;  %v2749_v28 = vshrl.u32 %v2514_v60, 16  ;;  %v2384_v55 = vld [vmem:[#allocation2 + $0x64] sm:$0xf] }
 0x130   : > { %3933 = vmatmul.bf16.gmra.mxu3 %v3765_v52  ;;  %v10341_v37 = vsel %vm8864_vm8, 4294967295, %v10340_v37  ;;  %v1697_v43 = vsel %vm8864_vm8, %v983_v15, 0  ;;  %v2752_v18 = vshll.u32 %v2514_v60, 16  ;;  %v2979_v35 = vunpack.c.l.b16 %v2746_v24 }
 0x131   : > { %10342 = vst [vmem:[#allocation77_spill] sm:$0xff] %v10341_v37  ;;  %v2980_v3 = vunpack.c.h.b16 %v2746_v24  ;;  %v2029_v1 = vunpack.c.l.b16 %v1697_v43  ;;  %v2751_v52 = vrot.slane %v2749_v28, 7  ;;  %v3550_v58 = vsel %vm8839_vm7, %v3517_v48, 0  ;;  %v3396_v43 = vpop.f32.mrf.mxu2 }
 0x132   : > { %vm2983_vm13 = vcmp.ne.s32.totalorder %v2979_v35, %v7677_v54  ;;  %v3551_v21 = vsel %vm8864_vm8, %v3518_v40, 0  ;;  %v3633_v63 = vunpack.c.l.b16 %v3550_v58  ;;  %v10343_v60 = vmov 0  ;;  %v8894_v62 = vpop.f32.mrf.mxu1 }
 0x133   : > { %vm2984_vm2 = vcmp.ne.s32.totalorder %v2980_v3, %v7680_v56  ;;  %v2049_v44 = vpack.c.b16 %v2029_v1, %v2028_v0  ;;  %v2754_v15 = vor.u32 %v2752_v18, %v2751_v52  ;;  %v3634_v24 = vunpack.c.l.b16 %v3551_v21  ;;  %v7006_v18 = vld [vmem:[%s9967_s3 + $0x188] sm:$0xff]  ;;  %10345 = vst [vmem:[#allocation78_spill] sm:$0xff] %v8894_v62  ;;  %v8902_v10 = vpop.f32.mrf.mxu0 }
 0x134   : > { %vm8876_vm0 = vmpackc.low %vm2984_vm2, %vm2983_vm13  ;;  %v504_v35 = vadd.s32 208, %v7590_v53  ;;  %v505_v3 = vadd.s32 216, %v7590_v53  ;;  %v2756_v0 = vrot.slane %v2751_v52, 4  ;;  %v7014_v1 = vld [vmem:[%s9967_s3 + $0x1c8] sm:$0xff]  ;;  %v3467_v42 = vadd.f32 %v3396_v43, %v2296_v17  ;;  %10346 = vst [vmem:[#allocation79_spill] sm:$0xff] %v8902_v10  ;;  %5149 = vmatpush.bf16.msra.mxu2 %v7006_v18 }
 0x135   : > { %v10344_v60 = vsel %vm8876_vm0, 4294967295, %v10343_v60  ;;  %v3066_v28 = vsel %vm8876_vm0, %v2384_v55, 0  ;;  %v2163_v40 = vshrl.u32 %v2049_v44, 16  ;;  %v2166_v58 = vshll.u32 %v2049_v44, 16  ;;  %v3899_v50 = vpop.f32.mrf.mxu3  ;;  %v6982_v44 = vld [vmem:[%s9967_s3 + $0x148] sm:$0xff]  ;;  %5431 = vmatpush.bf16.msra.mxu3 %v7014_v1 }
 0x136   : > { %v2755_v23 = vsel %vm7769_vm14, %v7758_v39, %v2754_v15  ;;  %v3654_v48 = vpack.c.b16 %v3634_v24, %v3633_v63  ;;  %v7022_v52 = vld [vmem:[%s9967_s3 + $0x208] sm:$0xff]  ;;  %v3149_v37 = vunpack.c.l.b16 %v3066_v28  ;;  %4646 = vmatpush.bf16.msra.mxu1 %v6982_v44  ;;  %v10347_v43 = vmov 0 }
 0x137   : > { %v2986_v55 = vunpack.c.l.b16 %v2755_v23  ;;  %v2987_v21 = vunpack.c.h.b16 %v2755_v23  ;;  %v2165_v15 = vrot.slane %v2163_v40, 3  ;;  %v2168_v14 = vrot.slane %v2166_v58, 4  ;;  %5914 = vmatpush.bf16.msra.mxu0 %v7022_v52 }
 0x138   : > { %v696_v23 = vand.u32 15, %v504_v35  ;;  %v3767_v17 = vshrl.u32 %v3654_v48, 16  ;;  %v3770_v63 = vshll.u32 %v3654_v48, 16  ;;  %v8912_v28 = vadd.f32 %v3899_v50, %v3467_v42 }
 0x139   : > { %vm2990_vm13 = vcmp.ne.s32.totalorder %v2986_v55, %v7677_v54  ;;  %vm2991_vm2 = vcmp.ne.s32.totalorder %v2987_v21, %v7680_v56  ;;  %v8906_v24 = vor.u32 %v2168_v14, %v2165_v15  ;;  %v703_v35 = vand.u32 15, %v505_v3  ;;  %v8925_v3 = vpop.f32.mrf.mxu2 }
 0x13a   : > { %vm8908_vm8 = vmpackc.low %vm2991_vm2, %vm2990_vm13  ;;  %10349 = vst [vmem:[#allocation80_spill] sm:$0xff] %v8912_v28  ;;  %vm920_vm7 = vcmp.ge.s32.totalorder %v696_v23, 1  ;;  %v3769_v58 = vrot.slane %v3767_v17, 3  ;;  %v3772_v18 = vrot.slane %v3770_v63, 4  ;;  %v2764_v48 = vsel %vm7769_vm14, %v2756_v0, %v7754_v34  ;;  %v2300_v23 = vpop.f32.mrf.mxu1 }
 0x13b   : > { %v10348_v43 = vsel %vm8908_vm8, 4294967295, %v10347_v43  ;;  %v3067_v40 = vsel %vm8908_vm8, %v2385_v8, 0  ;;  %vm1081_vm0 = vmpackc.low %vm920_vm7, %vm920_vm7  ;;  %vm10350_vm13 = vsmask.f32 4352  ;;  %vm953_vm2 = vcmp.lt.s32.totalorder %v703_v35, 15  ;;  %10351 = vst [vmem:[#allocation81_spill] sm:$0xff] %v8925_v3 }
 0x13c   : > { %v2170_v14 = vsel %vm10350_vm13, %v8833_v13, %v8906_v24  ;;  %v3150_v1 = vunpack.c.l.b16 %v3067_v40  ;;  %v1113_v42 = vsel %vm1081_vm0, 65537, %v10213_v31  ;;  %v8923_v50 = vor.u32 %v3772_v18, %v3769_v58  ;;  %vm2484_vm8 = vmpackc.low %vm953_vm2, %vm953_vm2  ;;  %v6961_v40 = vld [vmem:[#allocation2 + $0x6c] sm:$0xff] }
 0x13d   : > { %v1382_v8 = vshll.u32 %v1113_v42, 16  ;;  %v1386_v55 = vshrl.u32 %v1113_v42, 16  ;;  %v2993_v21 = vunpack.c.l.b16 %v2764_v48  ;;  %v2516_v0 = vsel %vm2484_vm8, 65537, %v10213_v31  ;;  %vm10352_vm7 = vmmov %vm10350_vm13  ;;  %v8933_v15 = vpop.f32.mrf.mxu3  ;;  %4225 = vmatmul.bf16.gmra.mxu0 %v6961_v40 }
 0x13e   : > { %v8927_v44 = vpack.c.b16 %v3150_v1, %v3149_v37  ;;  %v2994_v52 = vunpack.c.h.b16 %v2764_v48  ;;  %v3774_v13 = vsel %vm10352_vm7, %v8835_v57, %v8923_v50  ;;  %10353 = vst [vmem:[#allocation82_spill] sm:$0xff] %v8933_v15  ;;  %v2767_v35 = vshrl.u32 %v2516_v0, 16  ;;  %v8939_v48 = vpop.f32.mrf.mxu0 }
 0x13f   : > { %v1384_v17 = vrot.slane %v1382_v8, 5  ;;  %v1388_v63 = vrot.slane %v1386_v55, 4  ;;  %2334 = vmatmul.bf16.gmra.mxu1 %v2170_v14  ;;  %v10354_v58 = vshrl.u32 %v8812_v51, 16  ;;  %10355 = vst [vmem:[#allocation83_spill] sm:$0xff] %v8939_v48  ;;  %v2770_v1 = vshll.u32 %v2516_v0, 16 }
 0x140   : > { %v3272_v18 = vshll.u32 %v8927_v44, 16  ;;  %3938 = vmatmul.bf16.gmra.mxu3 %v3774_v13  ;;  %v2386_v8 = vld [vmem:[#allocation2 + $0x6c] sm:$0xf]  ;;  %v8944_v55 = vrot.slane %v2767_v35, 7  ;;  %vm2997_vm8 = vcmp.ne.s32.totalorder %v2993_v21, %v7677_v54  ;;  %vm2998_vm0 = vcmp.ne.s32.totalorder %v2994_v52, %v7680_v56  ;;  %v984_v13 = vld [vmem:[#allocation2 + $0x68] sm:$0xf] }
 0x141   : > { %v3270_v37 = vor.u32 %v10354_v58, %v8826_v59  ;;  %v1385_v57 = vsel %vm7664_vm10, %v7668_v47, %v1384_v17  ;;  %v1389_v42 = vor.u32 %v1388_v63, %v1384_v17  ;;  %vm8951_vm13 = vmpackc.low %vm2998_vm0, %vm2997_vm8  ;;  %v10356_v48 = vmov 0  ;;  %v3519_v52 = vld [vmem:[#allocation2 + $0x70] sm:$0xf] }
 0x142   : > { %v8947_v14 = vrot.slane %v3272_v18, 1  ;;  %v1623_v51 = vunpack.c.l.b16 %v1385_v57  ;;  %v1624_v59 = vunpack.c.h.b16 %v1385_v57  ;;  %v2772_v0 = vor.u32 %v2770_v1, %v8944_v55  ;;  %v3401_v18 = vpop.f32.mrf.mxu2  ;;  %v8977_v28 = vpop.f32.mrf.mxu1 }
 0x143   : > { %v1390_v58 = vrot.slane %v1389_v42, 4  ;;  %v10357_v48 = vsel %vm8951_vm13, 4294967295, %v10356_v48  ;;  %vm10358_vm2 = vsmask.f32 7424  ;;  %v3068_v21 = vsel %vm8951_vm13, %v2386_v8, 0  ;;  %10362 = vst [vmem:[#allocation85_spill] sm:$0xff] %v8977_v28 }
 0x144   : > { %v3275_v17 = vsel %vm10358_vm2, %v3270_v37, %v8947_v14  ;;  %vm1627_vm7 = vcmp.ne.s32.totalorder %v1623_v51, %v7677_v54  ;;  %vm1628_vm5 = vcmp.ne.s32.totalorder %v1624_v59, %v7680_v56  ;;  %v2301_v63 = vadd.f32 %v2300_v23, %v8209_v4  ;;  %v985_v8 = vld [vmem:[#allocation2 + $0x6c] sm:$0xf] }
 0x145   : > { %3435 = vmatmul.bf16.gmra.mxu2 %v3275_v17  ;;  %v1395_v35 = vsel %vm7664_vm10, %v1390_v58, %v7636_v30  ;;  %vm8965_vm8 = vmpackc.low %vm1628_vm5, %vm1627_vm7  ;;  %v10359_v40 = vmov 0  ;;  %v2773_v37 = vsel %vm7769_vm14, %v7758_v39, %v2772_v0  ;;  %v506_v1 = vadd.s32 224, %v7590_v53  ;;  %v3520_v58 = vld [vmem:[#allocation2 + $0x74] sm:$0xf]  ;;  %v3904_v15 = vpop.f32.mrf.mxu3 }
 0x146   : > { %v10360_v40 = vsel %vm8965_vm8, 4294967295, %v10359_v40  ;;  %v1630_v57 = vunpack.c.l.b16 %v1395_v35  ;;  %v1631_v42 = vunpack.c.h.b16 %v1395_v35  ;;  %v1698_v4 = vsel %vm8965_vm8, %v984_v13, 0  ;;  %v2387_v35 = vld [vmem:[#allocation2 + $0x70] sm:$0xf]  ;;  %v8982_v13 = vpop.f32.mrf.mxu0 }
 0x147   : > { %10361 = vst [vmem:[#allocation84_spill] sm:$0xff] %v10360_v40  ;;  %v3000_v23 = vunpack.c.l.b16 %v2773_v37  ;;  %v3001_v51 = vunpack.c.h.b16 %v2773_v37  ;;  %v3151_v59 = vunpack.c.l.b16 %v3068_v21  ;;  %v3552_v17 = vsel %vm8965_vm8, %v3519_v52, 0 }
 0x148   : > { %v3469_v10 = vadd.f32 %v3401_v18, %v2301_v63  ;;  %vm1634_vm5 = vcmp.ne.s32.totalorder %v1630_v57, %v7677_v54  ;;  %vm1635_vm0 = vcmp.ne.s32.totalorder %v1631_v42, %v7680_v56  ;;  %v2030_v0 = vunpack.c.l.b16 %v1698_v4  ;;  %10363 = vst [vmem:[#allocation86_spill] sm:$0xff] %v8982_v13 }
 0x149   : > { %vm3004_vm2 = vcmp.ne.s32.totalorder %v3000_v23, %v7677_v54  ;;  %vm8984_vm7 = vmpackc.low %vm1635_vm0, %vm1634_vm5  ;;  %v10364_v21 = vmov 0  ;;  %vm3005_vm8 = vcmp.ne.s32.totalorder %v3001_v51, %v7680_v56  ;;  %v3635_v52 = vunpack.c.l.b16 %v3552_v17 }
 0x14a   : > { %v10365_v21 = vsel %vm8984_vm7, 4294967295, %v10364_v21  ;;  %v8989_v63 = vadd.f32 %v3904_v15, %v3469_v10  ;;  %v710_v37 = vand.u32 15, %v506_v1  ;;  %v1699_v18 = vsel %vm8984_vm7, %v985_v8, 0  ;;  %vm8993_vm13 = vmpackc.low %vm3005_vm8, %vm3004_vm2 }
 0x14b   : > { %10366 = vst [vmem:[#allocation87_spill] sm:$0xff] %v10365_v21  ;;  %v10368_v57 = vmov 0  ;;  %v3553_v42 = vsel %vm8984_vm7, %v3520_v58, 0  ;;  %v507_v4 = vadd.s32 232, %v7590_v53  ;;  %v2774_v23 = vrot.slane %v8944_v55, 4 }
 0x14c   : > { %10367 = vst [vmem:[#allocation88_spill] sm:$0xff] %v8989_v63  ;;  %v10369_v57 = vsel %vm8993_vm13, 4294967295, %v10368_v57  ;;  %v2031_v13 = vunpack.c.l.b16 %v1699_v18  ;;  %v3069_v10 = vsel %vm8993_vm13, %v2387_v35, 0  ;;  %v3636_v15 = vunpack.c.l.b16 %v3553_v42  ;;  %v9004_v63 = vpop.f32.mrf.mxu2 }
 0x14d   : > { %vm922_vm5 = vcmp.ge.s32.totalorder %v710_v37, 1  ;;  %v3152_v1 = vunpack.c.l.b16 %v3069_v10  ;;  %v3276_v8 = vshrl.u32 %v8927_v44, 16  ;;  %10370 = vst [vmem:[#allocation89_spill] sm:$0xff] %v9004_v63  ;;  %v2782_v55 = vsel %vm7769_vm14, %v2774_v23, %v7754_v34  ;;  %v9012_v62 = vpop.f32.mrf.mxu3 }
 0x14e   : > { %vm1083_vm8 = vmpackc.low %vm922_vm5, %vm922_vm5  ;;  %v2050_v51 = vpack.c.b16 %v2031_v13, %v2030_v0  ;;  %v3655_v17 = vpack.c.b16 %v3636_v15, %v3635_v52  ;;  %v717_v42 = vand.u32 15, %v507_v4  ;;  %10371 = vst [vmem:[#allocation90_spill] sm:$0xff] %v9012_v62  ;;  %v2305_v0 = vpop.f32.mrf.mxu1  ;;  %v6962_v13 = vld [vmem:[#allocation2 + $0x74] sm:$0xff]  ;;  %v9016_v63 = vpop.f32.mrf.mxu0  ;;  %vm10373_vm5 = vsmask.f32 7424 }
 0x14f   : > { %v1115_v58 = vsel %vm1083_vm8, 65537, %v10213_v31  ;;  %v9010_v18 = vpack.c.b16 %v3152_v1, %v3151_v59  ;;  %v3278_v52 = vor.u32 %v3276_v8, %v8947_v14  ;;  %10372 = vst [vmem:[#allocation91_spill] sm:$0xff] %v9016_v63  ;;  %v3007_v59 = vunpack.c.l.b16 %v2782_v55  ;;  %4230 = vmatmul.bf16.gmra.mxu0 %v6962_v13 }
 0x150   : > { %v1402_v28 = vshll.u32 %v1115_v58, 16  ;;  %v1406_v35 = vshrl.u32 %v1115_v58, 16  ;;  %v2172_v37 = vshrl.u32 %v2050_v51, 16  ;;  %v2175_v10 = vshll.u32 %v2050_v51, 16 }
 0x151   : > { %v3776_v3 = vshrl.u32 %v3655_v17, 16  ;;  %v3779_v44 = vshll.u32 %v3655_v17, 16  ;;  %v3280_v15 = vshll.u32 %v9010_v18, 16  ;;  %vm955_vm0 = vcmp.lt.s32.totalorder %v717_v42, 15 }
 0x152   : > { %v1404_v23 = vrot.slane %v1402_v28, 5  ;;  %v2174_v1 = vrot.slane %v2172_v37, 3  ;;  %v2177_v21 = vrot.slane %v2175_v10, 4  ;;  %v1408_v17 = vrot.slane %v1406_v35, 4  ;;  %vm2486_vm2 = vmpackc.low %vm955_vm0, %vm955_vm0 }
 0x153   : > { %v3778_v58 = vrot.slane %v3776_v3, 3  ;;  %v3781_v4 = vrot.slane %v3779_v44, 4  ;;  %v9018_v40 = vrot.slane %v3280_v15, 1  ;;  %v986_v3 = vld [vmem:[#allocation2 + $0x70] sm:$0xf]  ;;  %v2518_v10 = vsel %vm2486_vm2, 65537, %v10213_v31 }
 0x154   : > { %v1405_v51 = vsel %vm7664_vm10, %v7668_v47, %v1404_v23  ;;  %v9023_v62 = vor.u32 %v2177_v21, %v2174_v1  ;;  %v1409_v37 = vor.u32 %v1408_v17, %v1404_v23  ;;  %v3008_v44 = vunpack.c.h.b16 %v2782_v55  ;;  %v3521_v15 = vld [vmem:[#allocation2 + $0x78] sm:$0xf]  ;;  %v3406_v42 = vpop.f32.mrf.mxu2 }
 0x155   : > { %v9025_v14 = vor.u32 %v3781_v4, %v3778_v58  ;;  %v1637_v8 = vunpack.c.l.b16 %v1405_v51  ;;  %v1638_v63 = vunpack.c.h.b16 %v1405_v51  ;;  %v3283_v28 = vsel %vm10373_vm5, %v3278_v52, %v9018_v40 }
 0x156   : > { %vm10374_vm8 = vsmask.f32 4352  ;;  %3440 = vmatmul.bf16.gmra.mxu2 %v3283_v28  ;;  %v1410_v13 = vrot.slane %v1409_v37, 4  ;;  %v10376_v55 = vmov 0  ;;  %v2785_v52 = vshrl.u32 %v2518_v10, 16  ;;  %v9048_v1 = vpop.f32.mrf.mxu1  ;;  %v9055_v17 = vpop.f32.mrf.mxu0 }
 0x157   : > { %v2179_v21 = vsel %vm10374_vm8, %v8906_v24, %v9023_v62  ;;  %vm10375_vm7 = vmmov %vm10374_vm8  ;;  %vm1641_vm0 = vcmp.ne.s32.totalorder %v1637_v8, %v7677_v54  ;;  %vm1642_vm13 = vcmp.ne.s32.totalorder %v1638_v63, %v7680_v56  ;;  %v2788_v23 = vshll.u32 %v2518_v10, 16  ;;  %v3909_v63 = vpop.f32.mrf.mxu3  ;;  %10378 = vst [vmem:[#allocation92_spill] sm:$0xff] %v9048_v1 }
 0x158   : > { %v3783_v35 = vsel %vm10375_vm7, %v8923_v50, %v9025_v14  ;;  %2339 = vmatmul.bf16.gmra.mxu1 %v2179_v21  ;;  %vm9038_vm2 = vmpackc.low %vm1642_vm13, %vm1641_vm0  ;;  %vm3011_vm5 = vcmp.ne.s32.totalorder %v3007_v59, %v7677_v54  ;;  %vm3012_vm7 = vcmp.ne.s32.totalorder %v3008_v44, %v7680_v56  ;;  %v508_v58 = vadd.s32 240, %v7590_v53  ;;  %10379 = vst [vmem:[#allocation93_spill] sm:$0xff] %v9055_v17  ;;  %v987_v44 = vld [vmem:[#allocation2 + $0x74] sm:$0xf] }
 0x159   : > { %3943 = vmatmul.bf16.gmra.mxu3 %v3783_v35  ;;  %v10377_v55 = vsel %vm9038_vm2, 4294967295, %v10376_v55  ;;  %v1700_v24 = vsel %vm9038_vm2, %v986_v3, 0  ;;  %v3554_v50 = vsel %vm9038_vm2, %v3521_v15, 0  ;;  %v2306_v4 = vadd.f32 %v2305_v0, %v8313_v6  ;;  %v2388_v3 = vld [vmem:[#allocation2 + $0x74] sm:$0xf]  ;;  %vm9057_vm13 = vmpackc.low %vm3012_vm7, %vm3011_vm5 }
 0x15a   : > { %v1415_v51 = vsel %vm7664_vm10, %v1410_v13, %v7636_v30  ;;  %v2787_v59 = vrot.slane %v2785_v52, 7  ;;  %v10380_v37 = vmov 0  ;;  %v3284_v10 = vshrl.u32 %v9010_v18, 16  ;;  %v3522_v6 = vld [vmem:[#allocation2 + $0x7c] sm:$0xf] }
 0x15b   : > { %v1644_v8 = vunpack.c.l.b16 %v1415_v51  ;;  %v1645_v28 = vunpack.c.h.b16 %v1415_v51  ;;  %v10381_v37 = vsel %vm9057_vm13, 4294967295, %v10380_v37  ;;  %v2032_v15 = vunpack.c.l.b16 %v1700_v24 }
 0x15c   : > { %v2790_v21 = vor.u32 %v2788_v23, %v2787_v59  ;;  %v3637_v0 = vunpack.c.l.b16 %v3554_v50  ;;  %v3471_v35 = vadd.f32 %v3406_v42, %v2306_v4  ;;  %v724_v13 = vand.u32 15, %v508_v58  ;;  %v7005_v50 = vld [vmem:[%s9967_s3 + $0x180] sm:$0xff] }
 0x15d   : > { %vm1648_vm8 = vcmp.ne.s32.totalorder %v1644_v8, %v7677_v54  ;;  %vm1649_vm0 = vcmp.ne.s32.totalorder %v1645_v28, %v7680_v56  ;;  %v509_v52 = vadd.s32 248, %v7590_v53  ;;  %v10382_v51 = vmov 0  ;;  %v7013_v28 = vld [vmem:[%s9967_s3 + $0x1c0] sm:$0xff]  ;;  %5150 = vmatpush.bf16.msra.mxu2 %v7005_v50 }
 0x15e   : > { %vm9065_vm2 = vmpackc.low %vm1649_vm0, %vm1648_vm8  ;;  %v2791_v18 = vsel %vm7769_vm14, %v7758_v39, %v2790_v21  ;;  %v3070_v23 = vsel %vm9057_vm13, %v2388_v3, 0  ;;  %v9074_v24 = vadd.f32 %v3909_v63, %v3471_v35  ;;  %v2792_v42 = vrot.slane %v2787_v59, 4  ;;  %v6981_v63 = vld [vmem:[%s9967_s3 + $0x140] sm:$0xff]  ;;  %v2389_v21 = vld [vmem:[#allocation2 + $0x78] sm:$0xf]  ;;  %v9092_v35 = vpop.f32.mrf.mxu2  ;;  %5432 = vmatpush.bf16.msra.mxu3 %v7013_v28 }
 0x15f   : > { %v10383_v51 = vsel %vm9065_vm2, 4294967295, %v10382_v51  ;;  %v1701_v53 = vsel %vm9065_vm2, %v987_v44, 0  ;;  %v3014_v58 = vunpack.c.l.b16 %v2791_v18  ;;  %v3015_v4 = vunpack.c.h.b16 %v2791_v18  ;;  %v7021_v59 = vld [vmem:[%s9967_s3 + $0x200] sm:$0xff]  ;;  %10385 = vst [vmem:[#allocation95_spill] sm:$0xff] %v9092_v35  ;;  %v9101_v17 = vpop.f32.mrf.mxu3  ;;  %4647 = vmatpush.bf16.msra.mxu1 %v6981_v63  ;;  %v9110_v35 = vpop.f32.mrf.mxu0 }
 0x160   : > { %10384 = vst [vmem:[#allocation94_spill] sm:$0xff] %v9074_v24  ;;  %v3555_v8 = vsel %vm9065_vm2, %v3522_v6, 0  ;;  %v2033_v3 = vunpack.c.l.b16 %v1701_v53  ;;  %vm9094_vm5 = vcmp.ge.s32.totalorder %v724_v13, 1  ;;  %v3286_v6 = vor.u32 %v3284_v10, %v9018_v40  ;;  %5915 = vmatpush.bf16.msra.mxu0 %v7021_v59 }
 0x161   : > { %v3638_v44 = vunpack.c.l.b16 %v3555_v8  ;;  %vm3018_vm7 = vcmp.ne.s32.totalorder %v3014_v58, %v7677_v54  ;;  %vm3019_vm8 = vcmp.ne.s32.totalorder %v3015_v4, %v7680_v56  ;;  %10388 = vst [vmem:[#allocation96_spill] sm:$0xff] %v9101_v17  ;;  %vm1085_vm0 = vmpackc.low %vm9094_vm5, %vm9094_vm5  ;;  %v731_v53 = vand.u32 15, %v509_v52  ;;  %v6963_v8 = vld [vmem:[#allocation2 + $0x7c] sm:$0xff]  ;;  %v2310_v4 = vpop.f32.mrf.mxu1 }
 0x162   : > { %v2051_v13 = vpack.c.b16 %v2033_v3, %v2032_v15  ;;  %vm9106_vm2 = vmpackc.low %vm3019_vm8, %vm3018_vm7  ;;  %v10389_v24 = vmov 0  ;;  %v3153_v50 = vunpack.c.l.b16 %v3070_v23  ;;  %10391 = vst [vmem:[#allocation97_spill] sm:$0xff] %v9110_v35  ;;  %v1117_v40 = vsel %vm1085_vm0, 65537, %v10213_v31  ;;  %4235 = vmatmul.bf16.gmra.mxu0 %v6963_v8 }
 0x163   : > { %v10390_v24 = vsel %vm9106_vm2, 4294967295, %v10389_v24  ;;  %v3656_v58 = vpack.c.b16 %v3638_v44, %v3637_v0  ;;  %v3071_v10 = vsel %vm9106_vm2, %v2389_v21, 0  ;;  %v1422_v52 = vshll.u32 %v1117_v40, 16 }
 0x164   : > { %v1426_v18 = vshrl.u32 %v1117_v40, 16  ;;  %v9118_v15 = vsel %vm7769_vm14, %v2792_v42, %v7754_v34  ;;  %v2181_v28 = vshrl.u32 %v2051_v13, 16  ;;  %v2184_v63 = vshll.u32 %v2051_v13, 16 }
 0x165   : > { %v3154_v23 = vunpack.c.l.b16 %v3071_v10  ;;  %v3785_v0 = vshrl.u32 %v3656_v58, 16  ;;  %v3788_v3 = vshll.u32 %v3656_v58, 16  ;;  %v1424_v44 = vrot.slane %v1422_v52, 5 }
 0x166   : > { %v1428_v35 = vrot.slane %v1426_v18, 4  ;;  %vm957_vm5 = vcmp.lt.s32.totalorder %v731_v53, 15  ;;  %v2183_v59 = vrot.slane %v2181_v28, 3  ;;  %v2186_v17 = vrot.slane %v2184_v63, 4 }
 0x167   : > { %v9120_v1 = vpack.c.b16 %v3154_v23, %v3153_v50  ;;  %v3787_v21 = vrot.slane %v3785_v0, 3  ;;  %vm2488_vm7 = vmpackc.low %vm957_vm5, %vm957_vm5  ;;  %v3790_v40 = vrot.slane %v3788_v3, 4  ;;  %v1425_v34 = vsel %vm7664_vm10, %v7668_v47, %v1424_v44  ;;  %v988_v50 = vld [vmem:[#allocation2 + $0x78] sm:$0xf]  ;;  %v3914_v23 = vpop.f32.mrf.mxu3 }
 0x168   : > { %v1429_v42 = vor.u32 %v1428_v35, %v1424_v44  ;;  %v2520_v13 = vsel %vm2488_vm7, 65537, %v10213_v31  ;;  %v9126_v10 = vor.u32 %v2186_v17, %v2183_v59  ;;  %v1651_v53 = vunpack.c.l.b16 %v1425_v34  ;;  %v3411_v31 = vpop.f32.mrf.mxu2 }
 0x169   : > { %v3288_v58 = vshll.u32 %v9120_v1, 16  ;;  %v1652_v8 = vunpack.c.h.b16 %v1425_v34  ;;  %v9129_v52 = vor.u32 %v3790_v40, %v3787_v21  ;;  %v2803_v28 = vshrl.u32 %v2520_v13, 16  ;;  %v9138_v17 = vpop.f32.mrf.mxu1  ;;  %v3523_v40 = vld [vmem:[#allocation2 + $0x80] sm:$0xf]  ;;  %v9153_v34 = vpop.f32.mrf.mxu0 }
 0x16a   : > { %v1430_v18 = vrot.slane %v1429_v42, 4  ;;  %v2806_v63 = vshll.u32 %v2520_v13, 16  ;;  %vm10392_vm8 = vsmask.f32 4352  ;;  %vm1655_vm0 = vcmp.ne.s32.totalorder %v1651_v53, %v7677_v54  ;;  %10396 = vst [vmem:[#allocation98_spill] sm:$0xff] %v9153_v34 }
 0x16b   : > { %v2188_v0 = vsel %vm10392_vm8, %v9023_v62, %v9126_v10  ;;  %v9134_v35 = vrot.slane %v3288_v58, 1  ;;  %vm1656_vm5 = vcmp.ne.s32.totalorder %v1652_v8, %v7680_v56  ;;  %vm10393_vm7 = vmmov %vm10392_vm8  ;;  %v10394_v62 = vmov 0  ;;  %v989_v58 = vld [vmem:[#allocation2 + $0x7c] sm:$0xf] }
 0x16c   : > { %2344 = vmatmul.bf16.gmra.mxu1 %v2188_v0  ;;  %v3792_v3 = vsel %vm10393_vm7, %v9025_v14, %v9129_v52  ;;  %v1435_v44 = vsel %vm7664_vm10, %v1430_v18, %v7636_v30  ;;  %vm9146_vm2 = vmpackc.low %vm1656_vm5, %vm1655_vm0  ;;  %v9150_v59 = vrot.slane %v2803_v28, 7  ;;  %v3021_v21 = vunpack.c.l.b16 %v9118_v15  ;;  %v3524_v18 = vld [vmem:[#allocation2 + $0x84] sm:$0xf] }
 0x16d   : > { %v10395_v62 = vsel %vm9146_vm2, 4294967295, %v10394_v62  ;;  %vm10397_vm8 = vsmask.f32 7424  ;;  %3948 = vmatmul.bf16.gmra.mxu3 %v3792_v3  ;;  %v1658_v14 = vunpack.c.l.b16 %v1435_v44  ;;  %v1659_v13 = vunpack.c.h.b16 %v1435_v44  ;;  %v10625_v3 = vld [vmem:[#allocation26_spill] sm:$0xff] }
 0x16e   : > { %v3291_v42 = vsel %vm10397_vm8, %v3286_v6, %v9134_v35  ;;  %v1702_v30 = vsel %vm9146_vm2, %v988_v50, 0  ;;  %v2311_v45 = vadd.f32 %v2310_v4, %v8399_v2  ;;  %v2808_v53 = vor.u32 %v2806_v63, %v9150_v59  ;;  %v2390_v6 = vld [vmem:[#allocation2 + $0x7c] sm:$0xf] }
 0x16f   : > { %3445 = vmatmul.bf16.gmra.mxu2 %v3291_v42  ;;  %v3022_v8 = vunpack.c.h.b16 %v9118_v15  ;;  %vm3025_vm10 = vcmp.ne.s32.totalorder %v3021_v21, %v7677_v54  ;;  %vm1662_vm0 = vcmp.ne.s32.totalorder %v1658_v14, %v7677_v54  ;;  %vm1663_vm5 = vcmp.ne.s32.totalorder %v1659_v13, %v7680_v56  ;;  %v2391_v14 = vld [vmem:[#allocation2 + $0x80] sm:$0xf] }
 0x170   : > { %v3556_v28 = vsel %vm9146_vm2, %v3523_v40, 0  ;;  %v1665_v50 = vunpack.c.l.b16 %v7668_v47  ;;  %vm9168_vm7 = vmpackc.low %vm1663_vm5, %vm1662_vm0  ;;  %v10398_v2 = vmov 0  ;;  %v2034_v4 = vunpack.c.l.b16 %v1702_v30 }
 0x171   : > { %v10399_v2 = vsel %vm9168_vm7, 4294967295, %v10398_v2  ;;  %v2809_v15 = vsel %vm7769_vm14, %v7758_v39, %v2808_v53  ;;  %vm3026_vm8 = vcmp.ne.s32.totalorder %v3022_v8, %v7680_v56  ;;  %v3473_v63 = vadd.f32 %v3411_v31, %v2311_v45  ;;  %v9188_v31 = vpop.f32.mrf.mxu3  ;;  %v9192_v45 = vpop.f32.mrf.mxu2 }
 0x172   : > { %v1703_v0 = vsel %vm9168_vm7, %v989_v58, 0  ;;  %vm9178_vm13 = vmpackc.low %vm3026_vm8, %vm3025_vm10  ;;  %v3028_v44 = vunpack.c.l.b16 %v2809_v15  ;;  %v3029_v21 = vunpack.c.h.b16 %v2809_v15  ;;  %v3639_v40 = vunpack.c.l.b16 %v3556_v28 }
 0x173   : > { %v2035_v42 = vunpack.c.l.b16 %v1703_v0  ;;  %v3072_v13 = vsel %vm9178_vm13, %v2390_v6, 0  ;;  %v3557_v39 = vsel %vm9168_vm7, %v3524_v18, 0  ;;  %v9186_v46 = vadd.f32 %v3914_v23, %v3473_v63  ;;  %v9199_v18 = vpop.f32.mrf.mxu0  ;;  %v2315_v63 = vpop.f32.mrf.mxu1 }
 0x174   : > { %vm3032_vm14 = vcmp.ne.s32.totalorder %v3028_v44, %v7677_v54  ;;  %vm3033_vm10 = vcmp.ne.s32.totalorder %v3029_v21, %v7680_v56  ;;  %v3640_v30 = vunpack.c.l.b16 %v3557_v39  ;;  %v3155_v8 = vunpack.c.l.b16 %v3072_v13  ;;  %10404 = vst [vmem:[#allocation99_spill] sm:$0xff] %v9199_v18 }
 0x175   : > { %v2052_v58 = vpack.c.b16 %v2035_v42, %v2034_v4  ;;  %vm9194_vm0 = vmpackc.low %vm3033_vm10, %vm3032_vm14  ;;  %v3292_v6 = vshrl.u32 %v9120_v1, 16  ;;  %v1666_v23 = vunpack.c.h.b16 %v7668_v47  ;;  %vm1669_vm5 = vcmp.ne.s32.totalorder %v1665_v50, %v7677_v54  ;;  %v990_v42 = vld [vmem:[#allocation2 + $0x80] sm:$0xf] }
 0x176   : > { %v3073_v28 = vsel %vm9194_vm0, %v2391_v14, 0  ;;  %v3657_v15 = vpack.c.b16 %v3640_v30, %v3639_v40  ;;  %v2810_v4 = vrot.slane %v9150_v59, 4 }
 0x177   : > { %v2190_v0 = vshrl.u32 %v2052_v58, 16  ;;  %v2193_v44 = vshll.u32 %v2052_v58, 16  ;;  %v3156_v21 = vunpack.c.l.b16 %v3073_v28  ;;  %vm1670_vm8 = vcmp.ne.s32.totalorder %v1666_v23, %v7680_v56 }
 0x178   : > { %v3794_v13 = vshrl.u32 %v3657_v15, 16  ;;  %v3797_v39 = vshll.u32 %v3657_v15, 16  ;;  %v3035_v1 = vunpack.c.l.b16 %v2810_v4  ;;  %v3294_v40 = vor.u32 %v3292_v6, %v9134_v35  ;;  %vm9210_vm14 = vmpackc.low %vm1670_vm8, %vm1669_vm5  ;;  %v7329_v6 = vld [vmem:[%s9966_s2] ss:$0 sm:$0xff] }
 0x179   : > { %v2192_v18 = vrot.slane %v2190_v0, 3  ;;  %v2195_v47 = vrot.slane %v2193_v44, 4  ;;  %v9207_v34 = vpack.c.b16 %v3156_v21, %v3155_v8  ;;  %v1704_v30 = vsel %vm9210_vm14, %v990_v42, 0  ;;  %v2392_v0 = vld [vmem:[#allocation2 + $0x84] sm:$0x1]  ;;  %v3416_v42 = vpop.f32.mrf.mxu2 }
 0x17a   : > { %v3796_v59 = vrot.slane %v3794_v13, 3  ;;  %v3799_v50 = vrot.slane %v3797_v39, 4  ;;  %v3036_v58 = vunpack.c.h.b16 %v2810_v4  ;;  %v2036_v15 = vunpack.c.l.b16 %v1704_v30 }
 0x17b   : > { %v9216_v28 = vor.u32 %v2195_v47, %v2192_v18  ;;  %v3296_v23 = vshll.u32 %v9207_v34, 16  ;;  %vm3039_vm10 = vcmp.ne.s32.totalorder %v3035_v1, %v7677_v54  ;;  %v2316_v35 = vadd.f32 %v2315_v63, %v8507_v19  ;;  %v3919_v19 = vpop.f32.mrf.mxu3  ;;  %v9240_v39 = vpop.f32.mrf.mxu0 }
 0x17c   : > { %v9220_v8 = vor.u32 %v3799_v50, %v3796_v59  ;;  %vm3040_vm5 = vcmp.ne.s32.totalorder %v3036_v58, %v7680_v56  ;;  %v374_v4 = vadd.f32 %v7329_v6, %v7657_v36  ;;  %vm10407_vm8 = vsmask.f32 4352  ;;  %10411 = vst [vmem:[#allocation100_spill] sm:$0xff] %v9240_v39  ;;  %v4278_v50 = vld [vmem:[#allocation2 + $0xc] sm:$0xf] }
 0x17d   : > { %v2197_v18 = vsel %vm10407_vm8, %v9126_v10, %v9216_v28  ;;  %v3298_v44 = vrot.slane %v3296_v23, 1  ;;  %v2053_v21 = vpack.c.b16 %v2036_v15, %v2036_v15  ;;  %vm9231_vm7 = vmpackc.low %vm3040_vm5, %vm3039_vm10  ;;  %v3475_v13 = vadd.f32 %v3416_v42, %v2316_v35  ;;  %v9245_v23 = vpop.f32.mrf.mxu1  ;;  %v4280_v15 = vld [vmem:[#allocation2 + $0x14] sm:$0xf]  ;;  %v4761_v35 = vld [vmem:[#allocation2 + $0x10] sm:$0x8] }
 0x17e   : > { %2349 = vmatmul.bf16.gmra.mxu1 %v2197_v18  ;;  %vm10410_vm2 = vmmov %vm10407_vm8  ;;  %v3074_v36 = vsel %vm9231_vm7, %v2392_v0, 0  ;;  %v406_v63 = vmax.f32 %v374_v4, 0.0  ;;  %vm10412_vm8 = vsmask.f32 7424  ;;  %10414 = vst [vmem:[#allocation102_spill] sm:$0xff] %v9245_v23  ;;  %vm10416_vm10 = vnez %v10118_v41 }
 0x17f   : > { %v3801_v56 = vsel %vm10410_vm2, %v9129_v52, %v9220_v8  ;;  %v3299_v10 = vsel %vm10412_vm8, %v3294_v40, %v3298_v44  ;;  %v2199_v1 = vshrl.u32 %v2053_v21, 16  ;;  %v2202_v47 = vshll.u32 %v2053_v21, 16  ;;  %v4279_v52 = vld [vmem:[#allocation2 + $0x10] sm:$0xf]  ;;  %v4281_v0 = vld [vmem:[#allocation2 + $0x18] sm:$0xf] }
 0x180   : > { %3953 = vmatmul.bf16.gmra.mxu3 %v3801_v56  ;;  %v3157_v59 = vunpack.c.l.b16 %v3074_v36  ;;  %3450 = vmatmul.bf16.gmra.mxu2 %v3299_v10  ;;  %v444_v30 = vpack.c.bf16 %v406_v63, %v406_v63  ;;  %v9243_v58 = vadd.f32 %v3919_v19, %v3475_v13  ;;  %v4762_v4 = vld [vmem:[#allocation2 + $0x14] sm:$0xf]  ;;  %v4763_v18 = vld [vmem:[#allocation2 + $0x18] sm:$0xf]  ;;  %v4764_v56 = vld [vmem:[#allocation2 + $0x1c] sm:$0xf]  ;;  %vm10415_vm2 = vnez %v10114_v22 }
 0x181   : > { %v2201_v42 = vrot.slane %v2199_v1, 3  ;;  %v2204_v40 = vrot.slane %v2202_v47, 4  ;;  %v4311_v21 = vsel %vm7807_vm1, %v4278_v50, 0  ;;  %v4312_v19 = vsel %vm7819_vm4, %v4279_v52, 0  ;;  %v5547_v39 = vld [vmem:[#allocation2 + $0x18] sm:$0xf] }
 0x182   : > { %10413 = vst [vmem:[#allocation101_spill] sm:$0xff] %v9243_v58  ;;  %v3174_v6 = vpack.c.b16 %v3157_v59, %v3157_v59  ;;  %v3300_v36 = vshrl.u32 %v9207_v34, 16  ;;  %v4313_v63 = vsel %vm7831_vm9, %v4280_v15, 0  ;;  %v4794_v13 = vsel %vm7714_vm15, %v4761_v35, 0  ;;  %v5546_v35 = vld [vmem:[#allocation2 + $0x14] sm:$0xf] }
 0x183   : > { %476 = vst [vmem:[#allocation2 + $0x88] sm:$0xf] %v444_v30  ;;  %v4795_v10 = vsel %vm7743_vm6, %v4762_v4, 0  ;;  %v4314_v47 = vsel %vm7845_vm3, %v4281_v0, 0  ;;  %v4796_v59 = vsel %vm10415_vm2, %v4763_v18, 0  ;;  %v4797_v50 = vsel %vm10416_vm10, %v4764_v56, 0  ;;  %v9264_v30 = vpop.f32.mrf.mxu2  ;;  %v9266_v52 = vpop.f32.mrf.mxu0  ;;  %vm10420_vm6 = vmmov %vm10412_vm8 }
 0x184   : > { %v3304_v1 = vshll.u32 %v3174_v6, 16  ;;  %v2205_v34 = vor.u32 %v2204_v40, %v2201_v42  ;;  %10417 = vst [vmem:[#allocation103_spill] sm:$0xff] %v9264_v30  ;;  %v4394_v12 = vunpack.c.l.b16 %v4311_v21  ;;  %v4395_v15 = vunpack.c.l.b16 %v4312_v19  ;;  %v9268_v25 = vpop.f32.mrf.mxu3  ;;  %v5548_v23 = vld [vmem:[#allocation2 + $0x1c] sm:$0xf]  ;;  %v5549_v41 = vld [vmem:[#allocation2 + $0x20] sm:$0xf]  ;;  %vm10428_vm8 = vmmov %vm10420_vm6 }
 0x185   : > { %10418 = vst [vmem:[#allocation104_spill] sm:$0xff] %v9266_v52  ;;  %v4877_v6 = vunpack.c.l.b16 %v4794_v13  ;;  %v4878_v4 = vunpack.c.l.b16 %v4795_v10  ;;  %v4396_v0 = vunpack.c.l.b16 %v4313_v63  ;;  %v4397_v58 = vunpack.c.l.b16 %v4314_v47  ;;  %v2320_v10 = vpop.f32.mrf.mxu1  ;;  %vm10429_vm2 = vmmov %vm10420_vm6 }
 0x186   : > { %v4879_v22 = vunpack.c.l.b16 %v4796_v59  ;;  %v4880_v18 = vunpack.c.l.b16 %v4797_v50  ;;  %v3302_v56 = vor.u32 %v3300_v36, %v3298_v44  ;;  %v3306_v42 = vrot.slane %v3304_v1, 1 }
 0x187   : > { %v5579_v21 = vsel %vm7807_vm1, %v5546_v35, 0  ;;  %vm10419_vm15 = vsmask.f32 4352  ;;  %v4427_v63 = vpack.c.b16 %v4395_v15, %v4394_v12  ;;  %v5580_v47 = vsel %vm7819_vm4, %v5547_v39, 0 }
 0x188   : > { %v2206_v19 = vsel %vm10419_vm15, %v9216_v28, %v2205_v34  ;;  %v4910_v44 = vpack.c.b16 %v4878_v4, %v4877_v6  ;;  %v5581_v36 = vsel %vm7831_vm9, %v5548_v23, 0  ;;  %v5582_v16 = vsel %vm7845_vm3, %v5549_v41, 0  ;;  %vm10422_vm1 = vmmov %vm10419_vm15 }
 0x189   : > { %v9282_v1 = vpack.c.b16 %v4397_v58, %v4396_v0  ;;  %v4911_v28 = vpack.c.b16 %v4880_v18, %v4879_v22  ;;  %v5662_v50 = vunpack.c.l.b16 %v5579_v21  ;;  %v3307_v34 = vsel %vm10420_vm6, %v3302_v56, %v3306_v42  ;;  %vm10430_vm10 = vmmov %vm10422_vm1 }
 0x18a   : > { %v3525_v40 = vld [vmem:[#allocation2 + $0x88] sm:$0xf]  ;;  %v4445_v12 = vshrl.u32 %v4427_v63, 16  ;;  %v5663_v15 = vunpack.c.l.b16 %v5580_v47  ;;  %v2321_v29 = vadd.f32 %v2320_v10, %v8251_v26  ;;  %v4447_v39 = vshll.u32 %v4427_v63, 16 }
 0x18b   : > { %v6964_v30 = vld [vmem:[#allocation2 + $0x84] sm:$0xff]  ;;  %v3558_v13 = vsel %vm9210_vm14, %v3525_v40, 0  ;;  %v5665_v6 = vunpack.c.l.b16 %v5582_v16  ;;  %v9286_v11 = vpop.f32.mrf.mxu0  ;;  %v4928_v4 = vshrl.u32 %v4910_v44, 16  ;;  %v4931_v0 = vshll.u32 %v4910_v44, 16  ;;  %v3421_v56 = vpop.f32.mrf.mxu2 }
 0x18c   : > { %v3641_v59 = vunpack.c.l.b16 %v3558_v13  ;;  %4240 = vmatmul.bf16.gmra.mxu0 %v6964_v30  ;;  %v5664_v30 = vunpack.c.l.b16 %v5581_v36  ;;  %10421 = vst [vmem:[#allocation105_spill] sm:$0xff] %v9286_v11  ;;  %v5695_v58 = vpack.c.b16 %v5663_v15, %v5662_v50  ;;  %v4936_v22 = vshrl.u32 %v4911_v28, 16  ;;  %v4765_v36 = vld [vmem:[#allocation2 + $0x20] sm:$0xf]  ;;  %v4766_v50 = vld [vmem:[#allocation2 + $0x24] sm:$0xf] }
 0x18d   : > { %v4939_v18 = vshll.u32 %v4911_v28, 16  ;;  %v4452_v13 = vshll.u32 %v9282_v1, 16  ;;  %v3477_v63 = vadd.f32 %v3421_v56, %v2321_v29  ;;  %v9292_v47 = vpop.f32.mrf.mxu1  ;;  %v4449_v16 = vrot.slane %v4447_v39, 1  ;;  %v4283_v11 = vld [vmem:[#allocation2 + $0x20] sm:$0xf] }
 0x18e   : > { %v3658_v35 = vpack.c.b16 %v3641_v59, %v3641_v59  ;;  %2354 = vmatmul.bf16.gmra.mxu1 %v2206_v19  ;;  %v9288_v41 = vpack.c.b16 %v5665_v6, %v5664_v30  ;;  %v5713_v21 = vshrl.u32 %v5695_v58, 16  ;;  %v5715_v26 = vshll.u32 %v5695_v58, 16  ;;  %v3924_v19 = vpop.f32.mrf.mxu3  ;;  %v4282_v59 = vld [vmem:[#allocation2 + $0x1c] sm:$0xf] }
 0x18f   : > { %v4933_v15 = vrot.slane %v4931_v0, 4  ;;  %v9294_v6 = vadd.f32 %v3924_v19, %v3477_v63  ;;  %v4938_v58 = vrot.slane %v4936_v22, 3  ;;  %v4941_v29 = vrot.slane %v4939_v18, 4 }
 0x190   : > { %v3803_v23 = vshrl.u32 %v3658_v35, 16  ;;  %v3806_v49 = vshll.u32 %v3658_v35, 16  ;;  %3455 = vmatmul.bf16.gmra.mxu2 %v3307_v34  ;;  %v5720_v10 = vshll.u32 %v9288_v41, 16  ;;  %v5717_v28 = vrot.slane %v5715_v26, 1  ;;  %v5550_v34 = vld [vmem:[#allocation2 + $0x24] sm:$0xf] }
 0x191   : > { %v4930_v35 = vrot.slane %v4928_v4, 3  ;;  %vm10424_vm4 = vnez %v10138_v33  ;;  %vm10425_vm9 = vnez %v10140_v61  ;;  %vm10426_vm3 = vnez %v10136_v5 }
 0x192   : > { %v3805_v42 = vrot.slane %v3803_v23, 3  ;;  %v3808_v40 = vrot.slane %v3806_v49, 4  ;;  %v5722_v30 = vrot.slane %v5720_v10, 1  ;;  %v5551_v23 = vld [vmem:[#allocation2 + $0x28] sm:$0xf]  ;;  %v5718_v56 = vor.u32 %v5717_v28, %v5713_v21 }
 0x193   : > { %v9298_v52 = vpop.f32.mrf.mxu0  ;;  %v4798_v39 = vsel %vm10424_vm4, %v4765_v36, 0  ;;  %v4799_v4 = vsel %vm10425_vm9, %v4766_v50, 0  ;;  %v5583_v0 = vsel %vm10426_vm3, %v5550_v34, 0  ;;  %vm10427_vm5 = vnez %v10144_v7  ;;  %v9311_v21 = vpop.f32.mrf.mxu2  ;;  %vm10440_vm9 = vmmov %vm10429_vm2 }
 0x194   : > { %v3809_v44 = vor.u32 %v3808_v40, %v3805_v42  ;;  %10423 = vst [vmem:[#allocation106_spill] sm:$0xff] %v9298_v52  ;;  %v4450_v42 = vor.u32 %v4449_v16, %v4445_v12  ;;  %v4454_v40 = vrot.slane %v4452_v13, 1  ;;  %v5584_v22 = vsel %vm10427_vm5, %v5551_v23, 0 }
 0x195   : > { %v5723_v18 = vsel %vm10428_vm8, %v5718_v56, %v5722_v30  ;;  %v4316_v33 = vsel %vm10427_vm5, %v4283_v11, 0  ;;  %v5666_v61 = vunpack.c.l.b16 %v5583_v0  ;;  %v5667_v26 = vunpack.c.l.b16 %v5584_v22  ;;  %v6989_v56 = vld [vmem:[#allocation2 + $0x14] sm:$0xff]  ;;  %v5553_v0 = vld [vmem:[#allocation2 + $0x30] sm:$0xf]  ;;  %v4767_v22 = vld [vmem:[#allocation2 + $0x28] sm:$0xf] }
 0x196   : > { %v3810_v49 = vsel %vm10422_vm1, %v9220_v8, %v3809_v44  ;;  %v4315_v8 = vsel %vm10426_vm3, %v4282_v59, 0  ;;  %v4934_v19 = vor.u32 %v4933_v15, %v4930_v35  ;;  %v4942_v10 = vor.u32 %v4941_v29, %v4938_v58  ;;  %v9315_v63 = vpop.f32.mrf.mxu3  ;;  %v2325_v44 = vpop.f32.mrf.mxu1  ;;  %vm10441_vm3 = vmmov %vm10429_vm2 }
 0x197   : > { %3958 = vmatmul.bf16.gmra.mxu3 %v3810_v49  ;;  %v4881_v12 = vunpack.c.l.b16 %v4798_v39  ;;  %v4882_v13 = vunpack.c.l.b16 %v4799_v4  ;;  %v4455_v5 = vsel %vm10429_vm2, %v4450_v42, %v4454_v40  ;;  %v4398_v59 = vunpack.c.l.b16 %v4315_v8  ;;  %v5552_v4 = vld [vmem:[#allocation2 + $0x2c] sm:$0xf]  ;;  %vm10442_vm5 = vmmov %vm10430_vm10 }
 0x198   : > { %v4399_v36 = vunpack.c.l.b16 %v4316_v33  ;;  %v9318_v16 = vpack.c.b16 %v5667_v26, %v5666_v61  ;;  %v4943_v28 = vsel %vm10430_vm10, %v4934_v19, %v4942_v10  ;;  %v2326_v50 = vadd.f32 %v2325_v44, %v8347_v9  ;;  %v4284_v61 = vld [vmem:[#allocation2 + $0x24] sm:$0xf]  ;;  %v4285_v26 = vld [vmem:[#allocation2 + $0x28] sm:$0xf] }
 0x199   : > { %v4912_v7 = vpack.c.b16 %v4882_v13, %v4881_v12  ;;  %v5724_v35 = vshrl.u32 %v9288_v41, 16  ;;  %v4456_v42 = vshrl.u32 %v9282_v1, 16  ;;  %vm10432_vm15 = vnez %v10155_v38 }
 0x19a   : > { %v9324_v34 = vpack.c.b16 %v4399_v36, %v4398_v59  ;;  %v5728_v15 = vshll.u32 %v9318_v16, 16  ;;  %v5585_v13 = vsel %vm10432_vm15, %v5552_v4, 0  ;;  %v10436_v36 = vld [vmem:[#allocation3_spill] sm:$0xff] }
 0x19b   : > { %v9321_v11 = vpop.f32.mrf.mxu0  ;;  %v3426_v23 = vpop.f32.mrf.mxu2  ;;  %v4945_v49 = vshrl.u32 %v4912_v7, 16  ;;  %v4948_v58 = vshll.u32 %v4912_v7, 16  ;;  %v5726_v33 = vor.u32 %v5724_v35, %v5722_v30  ;;  %vm10437_vm1 = vnez %v10436_v36 }
 0x19c   : > { %5916 = vmatmul.bf16.vlgmr.msra.gmra.mxu0 %v5723_v18  ;;  %10431 = vst [vmem:[#allocation107_spill] sm:$0xff] %v9321_v11  ;;  %v3479_v29 = vadd.f32 %v3426_v23, %v2326_v50  ;;  %v4460_v8 = vshll.u32 %v9324_v34, 16  ;;  %v4768_v18 = vld [vmem:[#allocation2 + $0x2c] sm:$0xf]  ;;  %v5730_v41 = vrot.slane %v5728_v15, 1  ;;  %v4800_v44 = vsel %vm10437_vm1, %v4767_v22, 0  ;;  %vm10458_vm1 = vmmov %vm10441_vm3 }
 0x19d   : > { %v4947_v19 = vrot.slane %v4945_v49, 3  ;;  %v4950_v12 = vrot.slane %v4948_v58, 4  ;;  %v4458_v7 = vor.u32 %v4456_v42, %v4454_v40  ;;  %v4317_v15 = vsel %vm10432_vm15, %v4284_v61, 0 }
 0x19e   : > { %4648 = vmatmul.bf16.vlgmr.msra.gmra.mxu1 %v4455_v5  ;;  %v3929_v39 = vpop.f32.mrf.mxu3  ;;  %v10433_v5 = vld [vmem:[#allocation5_spill] sm:$0xff]  ;;  %v4462_v50 = vrot.slane %v4460_v8, 1  ;;  %v9342_v35 = vpop.f32.mrf.mxu1  ;;  %v5731_v49 = vsel %vm10440_vm9, %v5726_v33, %v5730_v41  ;;  %v5668_v58 = vunpack.c.l.b16 %v5585_v13 }
 0x19f   : > { %v9330_v9 = vadd.f32 %v3929_v39, %v3479_v29  ;;  %vm10434_vm6 = vnez %v10433_v5  ;;  %v4883_v39 = vunpack.c.l.b16 %v4800_v44  ;;  %v5554_v44 = vld [vmem:[#allocation2 + $0x34] sm:$0xf] }
 0x1a0   : > { %5151 = vmatmul.bf16.vlgmr.msra.gmra.mxu2 %v4943_v28  ;;  %v5586_v59 = vsel %vm10434_vm6, %v5553_v0, 0  ;;  %v10438_v28 = vld [vmem:[#allocation4_spill] sm:$0xff]  ;;  %v4318_v23 = vsel %vm10434_vm6, %v4285_v26, 0  ;;  %v4400_v0 = vunpack.c.l.b16 %v4317_v15  ;;  %v4463_v40 = vsel %vm10441_vm3, %v4458_v7, %v4462_v50  ;;  %v4286_v7 = vld [vmem:[#allocation2 + $0x2c] sm:$0xf]  ;;  %vm10454_vm6 = vmmov %vm10441_vm3 }
 0x1a1   : > { %vm10439_vm4 = vnez %v10438_v28  ;;  %v5669_v29 = vunpack.c.l.b16 %v5586_v59  ;;  %v4401_v22 = vunpack.c.l.b16 %v4318_v23  ;;  %v6990_v28 = vld [vmem:[#allocation2 + $0x1c] sm:$0xff]  ;;  %v4769_v15 = vld [vmem:[#allocation2 + $0x30] sm:$0xf]  ;;  %v4770_v23 = vld [vmem:[#allocation2 + $0x34] sm:$0xf] }
 0x1a2   : > { %v4801_v30 = vsel %vm10439_vm4, %v4768_v18, 0  ;;  %vm10459_vm4 = vmmov %vm10442_vm5 }
 0x1a3   : > { %v9336_v1 = vpop.f32.mrf.mxu0  ;;  %v4884_v4 = vunpack.c.l.b16 %v4801_v30  ;;  %v9350_v42 = vpop.f32.mrf.mxu2  ;;  %v9352_v8 = vpack.c.b16 %v5669_v29, %v5668_v58  ;;  %v9357_v33 = vpack.c.b16 %v4401_v22, %v4400_v0  ;;  %v4287_v29 = vld [vmem:[#allocation2 + $0x30] sm:$0xf]  ;;  %v10449_v0 = vld [vmem:[#allocation33_spill] sm:$0xff] }
 0x1a4   : > { %10435 = vst [vmem:[#allocation5_spill] sm:$0xff] %v9336_v1 }
 0x1a5   : > { %v4913_v61 = vpack.c.b16 %v4884_v4, %v4883_v39  ;;  %v5736_v13 = vshll.u32 %v9352_v8, 16  ;;  %v4468_v30 = vshll.u32 %v9357_v33, 16  ;;  %v10445_v39 = vld [vmem:[#allocation7_spill] sm:$0xff] }
 0x1a6   : > { %v9355_v18 = vpop.f32.mrf.mxu3  ;;  %vm10446_vm8 = vnez %v10445_v39 }
 0x1a7   : > { %5433 = vmatmul.bf16.vlgmr.msra.gmra.mxu3 %v6989_v56  ;;  %v4951_v56 = vor.u32 %v4950_v12, %v4947_v19  ;;  %10443 = vst [vmem:[#allocation3_spill] sm:$0xff] %v9355_v18  ;;  %v4464_v19 = vshrl.u32 %v9324_v34, 16  ;;  %v5732_v12 = vshrl.u32 %v9318_v16, 16  ;;  %v4954_v59 = vshrl.u32 %v4913_v61, 16  ;;  %v10447_v16 = vld [vmem:[#allocation9_spill] sm:$0xff] }
 0x1a8   : > { %v4957_v36 = vshll.u32 %v4913_v61, 16  ;;  %v5738_v58 = vrot.slane %v5736_v13, 1  ;;  %v5587_v34 = vsel %vm10446_vm8, %v5554_v44, 0  ;;  %vm10448_vm2 = vnez %v10447_v16  ;;  %v10452_v13 = vld [vmem:[#allocation8_spill] sm:$0xff] }
 0x1a9   : > { %v4952_v38 = vsel %vm10442_vm5, %v4942_v10, %v4951_v56  ;;  %v5555_v10 = vld [vmem:[#allocation2 + $0x38] sm:$0xf]  ;;  %v4319_v11 = vsel %vm10446_vm8, %v4286_v7, 0  ;;  %vm10453_vm15 = vnez %v10452_v13  ;;  %v5556_v13 = vld [vmem:[#allocation2 + $0x3c] sm:$0xf] }
 0x1aa   : > { %v5588_v4 = vsel %vm10448_vm2, %v5555_v10, 0  ;;  %v4959_v61 = vrot.slane %v4957_v36, 4  ;;  %v4803_v44 = vsel %vm10453_vm15, %v4770_v23, 0  ;;  %v4402_v39 = vunpack.c.l.b16 %v4319_v11  ;;  %vm10475_vm15 = vmmov %vm10459_vm4 }
 0x1ab   : > { %v9359_v26 = vpop.f32.mrf.mxu0  ;;  %v5740_v11 = vshrl.u32 %v9352_v8, 16  ;;  %v10463_v8 = vld [vmem:[#allocation10_spill] sm:$0xff] }
 0x1ac   : > { %5921 = vmatmul.bf16.gmra.mxu0 %v5731_v49  ;;  %10444 = vst [vmem:[#allocation4_spill] sm:$0xff] %v9359_v26  ;;  %v2330_v5 = vpop.f32.mrf.mxu1  ;;  %v5734_v49 = vor.u32 %v5732_v12, %v5730_v41  ;;  %v4470_v26 = vrot.slane %v4468_v30, 1  ;;  %v10450_v41 = vld [vmem:[#allocation6_spill] sm:$0xff]  ;;  %vm10464_vm9 = vnez %v10463_v8 }
 0x1ad   : > { %v2331_v22 = vadd.f32 %v2330_v5, %v10449_v0  ;;  %vm10451_vm10 = vnez %v10450_v41  ;;  %v4320_v5 = vsel %vm10448_vm2, %v4287_v29, 0  ;;  %vm10471_vm2 = vmmov %vm10458_vm1 }
 0x1ae   : > { %4653 = vmatmul.bf16.gmra.mxu1 %v4463_v40  ;;  %v4466_v40 = vor.u32 %v4464_v19, %v4462_v50  ;;  %v4802_v12 = vsel %vm10451_vm10, %v4769_v15, 0  ;;  %v5670_v50 = vunpack.c.l.b16 %v5587_v34  ;;  %v5671_v19 = vunpack.c.l.b16 %v5588_v4  ;;  %vm10473_vm10 = vmmov %vm10458_vm1 }
 0x1af   : > { %v4885_v7 = vunpack.c.l.b16 %v4802_v12  ;;  %v4886_v15 = vunpack.c.l.b16 %v4803_v44  ;;  %v4403_v23 = vunpack.c.l.b16 %v4320_v5  ;;  %v5557_v44 = vld [vmem:[#allocation2 + $0x40] sm:$0xf] }
 0x1b0   : > { %5156 = vmatmul.bf16.gmra.mxu2 %v4952_v38  ;;  %v4956_v38 = vrot.slane %v4954_v59, 3  ;;  %v5739_v59 = vsel %vm10454_vm6, %v5734_v49, %v5738_v58  ;;  %v9386_v16 = vpack.c.b16 %v5671_v19, %v5670_v50  ;;  %v5742_v19 = vor.u32 %v5740_v11, %v5738_v58 }
 0x1b1   : > { %v3431_v1 = vpop.f32.mrf.mxu2  ;;  %v4914_v34 = vpack.c.b16 %v4886_v15, %v4885_v7  ;;  %v9389_v49 = vpack.c.b16 %v4403_v23, %v4402_v39  ;;  %v4289_v7 = vld [vmem:[#allocation2 + $0x38] sm:$0xf]  ;;  %v10465_v39 = vld [vmem:[#allocation12_spill] sm:$0xff] }
 0x1b2   : > { %v3481_v18 = vadd.f32 %v3431_v1, %v2331_v22  ;;  %v4960_v10 = vor.u32 %v4959_v61, %v4956_v38  ;;  %v4471_v1 = vsel %vm10458_vm1, %v4466_v40, %v4470_v26  ;;  %v4771_v40 = vld [vmem:[#allocation2 + $0x38] sm:$0xf]  ;;  %v4772_v38 = vld [vmem:[#allocation2 + $0x3c] sm:$0xf]  ;;  %vm10466_vm3 = vnez %v10465_v39 }
 0x1b3   : > { %v3934_v52 = vpop.f32.mrf.mxu3  ;;  %v9379_v36 = vpop.f32.mrf.mxu0  ;;  %v4963_v0 = vshrl.u32 %v4914_v34, 16  ;;  %v4966_v22 = vshll.u32 %v4914_v34, 16  ;;  %v4476_v41 = vshll.u32 %v9389_v49, 16  ;;  %v4804_v15 = vsel %vm10464_vm9, %v4771_v40, 0 }
 0x1b4   : > { %10455 = vst [vmem:[#allocation7_spill] sm:$0xff] %v9379_v36  ;;  %v9383_v30 = vpop.f32.mrf.mxu1  ;;  %v4961_v29 = vsel %vm10459_vm4, %v4951_v56, %v4960_v10  ;;  %v4472_v56 = vshrl.u32 %v9357_v33, 16  ;;  %v4805_v23 = vsel %vm10466_vm3, %v4772_v38, 0  ;;  %v10467_v33 = vld [vmem:[#allocation11_spill] sm:$0xff]  ;;  %v10469_v36 = vld [vmem:[#allocation13_spill] sm:$0xff]  ;;  %v4887_v40 = vunpack.c.l.b16 %v4804_v15  ;;  %vm10488_vm3 = vmmov %vm10471_vm2 }
 0x1b5   : > { %10457 = vst [vmem:[#allocation33_spill] sm:$0xff] %v9383_v30  ;;  %vm10468_vm5 = vnez %v10467_v33  ;;  %vm10470_vm8 = vnez %v10469_v36  ;;  %v4888_v8 = vunpack.c.l.b16 %v4805_v23  ;;  %v4773_v33 = vld [vmem:[#allocation2 + $0x40] sm:$0xf]  ;;  %v10484_v30 = vld [vmem:[#allocation19_spill] sm:$0xff] }
 0x1b6   : > { %v5589_v34 = vsel %vm10468_vm5, %v5556_v13, 0  ;;  %v4322_v11 = vsel %vm10470_vm8, %v4289_v7, 0  ;;  %vm10485_vm9 = vnez %v10484_v30 }
 0x1b7   : > { %5438 = vmatmul.bf16.gmra.mxu3 %v6990_v28  ;;  %v9381_v28 = vadd.f32 %v3934_v52, %v3481_v18  ;;  %v5744_v52 = vshll.u32 %v9386_v16, 16  ;;  %v6991_v18 = vld [vmem:[#allocation2 + $0x24] sm:$0xff] }
 0x1b9   : > { %10456 = vst [vmem:[#allocation9_spill] sm:$0xff] %v9381_v28  ;;  %v9395_v61 = vpop.f32.mrf.mxu2  ;;  %v5746_v50 = vrot.slane %v5744_v52, 1  ;;  %v4478_v52 = vrot.slane %v4476_v41, 1  ;;  %v4915_v41 = vpack.c.b16 %v4888_v8, %v4887_v40  ;;  %v4480_v40 = vshrl.u32 %v9389_v49, 16  ;;  %v5558_v8 = vld [vmem:[#allocation2 + $0x44] sm:$0xf] }
 0x1ba   : > { %10461 = vst [vmem:[#allocation8_spill] sm:$0xff] %v9395_v61 }
 0x1bb   : > { %v9391_v4 = vpop.f32.mrf.mxu3  ;;  %v9399_v12 = vpop.f32.mrf.mxu0 }
 0x1bc   : > { %5926 = vmatmul.bf16.gmra.mxu0 %v5739_v59  ;;  %10460 = vst [vmem:[#allocation6_spill] sm:$0xff] %v9391_v4  ;;  %v2335_v5 = vpop.f32.mrf.mxu1  ;;  %v4288_v59 = vld [vmem:[#allocation2 + $0x34] sm:$0xf]  ;;  %v4474_v4 = vor.u32 %v4472_v56, %v4470_v26 }
 0x1bd   : > { %10462 = vst [vmem:[#allocation108_spill] sm:$0xff] %v9399_v12  ;;  %v5590_v12 = vsel %vm10470_vm8, %v5557_v44, 0  ;;  %v4321_v58 = vsel %vm10468_vm5, %v4288_v59, 0  ;;  %v4405_v44 = vunpack.c.l.b16 %v4322_v11  ;;  %v4774_v11 = vld [vmem:[#allocation2 + $0x44] sm:$0xf]  ;;  %vm10490_vm5 = vmmov %vm10471_vm2 }
 0x1be   : > { %4658 = vmatmul.bf16.gmra.mxu1 %v4471_v1  ;;  %v4965_v1 = vrot.slane %v4963_v0, 3  ;;  %v5747_v0 = vsel %vm10471_vm2, %v5742_v19, %v5746_v50  ;;  %v5673_v38 = vunpack.c.l.b16 %v5590_v12  ;;  %v4404_v28 = vunpack.c.l.b16 %v4321_v58  ;;  %vm10491_vm8 = vmmov %vm10475_vm15 }
 0x1bf   : > { %v4479_v56 = vsel %vm10473_vm10, %v4474_v4, %v4478_v52  ;;  %v5748_v4 = vshrl.u32 %v9386_v16, 16  ;;  %v4975_v58 = vshll.u32 %v4915_v41, 16 }
 0x1c0   : > { %5161 = vmatmul.bf16.gmra.mxu2 %v4961_v29  ;;  %v4968_v29 = vrot.slane %v4966_v22, 4  ;;  %v5672_v22 = vunpack.c.l.b16 %v5589_v34  ;;  %v9424_v23 = vpack.c.b16 %v4405_v44, %v4404_v28  ;;  %v6992_v34 = vld [vmem:[#allocation2 + $0x2c] sm:$0xff] }
 0x1c1   : > { %v10477_v28 = vld [vmem:[#allocation49_spill] sm:$0xff]  ;;  %v10478_v44 = vld [vmem:[#allocation14_spill] sm:$0xff] }
 0x1c2   : > { %v9414_v39 = vor.u32 %v4968_v29, %v4965_v1  ;;  %v9420_v7 = vpack.c.b16 %v5673_v38, %v5672_v22  ;;  %vm10479_vm6 = vnez %v10478_v44 }
 0x1c3   : > { %v3939_v13 = vpop.f32.mrf.mxu3  ;;  %v9418_v36 = vpop.f32.mrf.mxu0 }
 0x1c4   : > { %10474 = vst [vmem:[#allocation10_spill] sm:$0xff] %v9418_v36  ;;  %v4970_v19 = vsel %vm10475_vm15, %v4960_v10, %v9414_v39  ;;  %v2337_v15 = vpop.f32.mrf.mxu1  ;;  %v5752_v29 = vshll.u32 %v9420_v7, 16  ;;  %v4484_v10 = vshll.u32 %v9424_v23, 16  ;;  %v4977_v36 = vrot.slane %v4975_v58, 4 }
 0x1c5   : > { %v2338_v22 = vadd.f32 %v2337_v15, %v10477_v28 }
 0x1c6   : > { %v4486_v28 = vrot.slane %v4484_v10, 1  ;;  %v10489_v10 = vld [vmem:[#allocation17_spill] sm:$0xff] }
 0x1c7   : > { %5443 = vmatmul.bf16.gmra.mxu3 %v6991_v18  ;;  %v10472_v18 = vld [vmem:[#allocation42_spill] sm:$0xff] }
 0x1c8   : > { %v2336_v26 = vadd.f32 %v2335_v5, %v10472_v18  ;;  %v3436_v59 = vpop.f32.mrf.mxu2  ;;  %v4972_v5 = vshrl.u32 %v4915_v41, 16  ;;  %v4806_v18 = vsel %vm10479_vm6, %v4773_v33, 0  ;;  %v10480_v41 = vld [vmem:[#allocation16_spill] sm:$0xff] }
 0x1c9   : > { %vm10481_vm1 = vnez %v10480_v41 }
 0x1ca   : > { %v3483_v12 = vadd.f32 %v3436_v59, %v2336_v26  ;;  %v5750_v26 = vor.u32 %v5748_v4, %v5746_v50  ;;  %v4290_v59 = vld [vmem:[#allocation2 + $0x3c] sm:$0xf]  ;;  %v4889_v50 = vunpack.c.l.b16 %v4806_v18 }
 0x1cb   : > { %v3941_v38 = vpop.f32.mrf.mxu3  ;;  %v9441_v33 = vpop.f32.mrf.mxu0 }
 0x1cc   : > { %5931 = vmatmul.bf16.gmra.mxu0 %v5747_v0  ;;  %v9426_v1 = vadd.f32 %v3939_v13, %v3483_v12  ;;  %v5559_v0 = vld [vmem:[#allocation2 + $0x48] sm:$0xf]  ;;  %v4974_v13 = vrot.slane %v4972_v5, 3  ;;  %v4807_v12 = vsel %vm10481_vm1, %v4774_v11, 0  ;;  %v4482_v5 = vor.u32 %v4480_v40, %v4478_v52  ;;  %10486 = vst [vmem:[#allocation11_spill] sm:$0xff] %v9441_v33  ;;  %vm10504_vm1 = vmmov %vm10488_vm3 }
 0x1cd   : > { %v5592_v15 = vsel %vm10485_vm9, %v5559_v0, 0 }
 0x1ce   : > { %4663 = vmatmul.bf16.gmra.mxu1 %v4479_v56  ;;  %10476 = vst [vmem:[#allocation12_spill] sm:$0xff] %v9426_v1  ;;  %v5754_v56 = vrot.slane %v5752_v29, 1  ;;  %v10482_v1 = vld [vmem:[#allocation15_spill] sm:$0xff]  ;;  %v5675_v0 = vunpack.c.l.b16 %v5592_v15 }
 0x1cf   : > { %vm10483_vm4 = vnez %v10482_v1 }
 0x1d0   : > { %5166 = vmatmul.bf16.gmra.mxu2 %v4970_v19  ;;  %v3438_v16 = vpop.f32.mrf.mxu2  ;;  %v4291_v19 = vld [vmem:[#allocation2 + $0x40] sm:$0xf]  ;;  %v5591_v61 = vsel %vm10483_vm4, %v5558_v8, 0  ;;  %v4323_v11 = vsel %vm10483_vm4, %v4290_v59, 0  ;;  %v5755_v8 = vsel %vm10488_vm3, %v5750_v26, %v5754_v56  ;;  %vm10506_vm4 = vmmov %vm10504_vm1 }
 0x1d1   : > { %v3484_v49 = vadd.f32 %v3438_v16, %v2338_v22  ;;  %v4324_v58 = vsel %vm10485_vm9, %v4291_v19, 0  ;;  %v4890_v22 = vunpack.c.l.b16 %v4807_v12  ;;  %v5674_v44 = vunpack.c.l.b16 %v5591_v61  ;;  %vm10507_vm9 = vmmov %vm10491_vm8 }
 0x1d2   : > { %v4406_v52 = vunpack.c.l.b16 %v4323_v11  ;;  %v4407_v40 = vunpack.c.l.b16 %v4324_v58  ;;  %v4488_v11 = vshrl.u32 %v9424_v23, 16 }
 0x1d3   : > { %v9443_v4 = vadd.f32 %v3941_v38, %v3484_v49  ;;  %v4487_v38 = vsel %vm10490_vm5, %v4482_v5, %v4486_v28  ;;  %v4916_v16 = vpack.c.b16 %v4890_v22, %v4889_v50  ;;  %v9454_v59 = vpack.c.b16 %v5675_v0, %v5674_v44  ;;  %v9463_v12 = vpop.f32.mrf.mxu0  ;;  %v6993_v5 = vld [vmem:[#allocation2 + $0x34] sm:$0xff]  ;;  %v4775_v22 = vld [vmem:[#allocation2 + $0x48] sm:$0xf] }
 0x1d4   : > { %10493 = vst [vmem:[#allocation49_spill] sm:$0xff] %v9463_v12  ;;  %v5756_v49 = vshrl.u32 %v9420_v7, 16  ;;  %v10494_v44 = vld [vmem:[#allocation22_spill] sm:$0xff]  ;;  %v4293_v7 = vld [vmem:[#allocation2 + $0x48] sm:$0xf]  ;;  %v10499_v12 = vld [vmem:[#allocation23_spill] sm:$0xff] }
 0x1d5   : > { %10487 = vst [vmem:[#allocation13_spill] sm:$0xff] %v9443_v4  ;;  %v2340_v29 = vpop.f32.mrf.mxu1  ;;  %v4981_v19 = vshrl.u32 %v4916_v16, 16  ;;  %v5760_v15 = vshll.u32 %v9454_v59, 16  ;;  %v4984_v50 = vshll.u32 %v4916_v16, 16  ;;  %v10497_v16 = vld [vmem:[#allocation29_spill] sm:$0xff]  ;;  %vm10500_vm15 = vnez %v10499_v12 }
 0x1d6   : > { %v2341_v18 = vadd.f32 %v2340_v29, %v10489_v10  ;;  %v5560_v29 = vld [vmem:[#allocation2 + $0x4c] sm:$0xf]  ;;  %vm10498_vm10 = vnez %v10497_v16  ;;  %v4808_v33 = vsel %vm10500_vm15, %v4775_v22, 0  ;;  %vm10520_vm15 = vmmov %vm10504_vm1 }
 0x1d7   : > { %5448 = vmatmul.bf16.gmra.mxu3 %v6992_v34  ;;  %v9450_v34 = vor.u32 %v4977_v36, %v4974_v13  ;;  %v9459_v36 = vpack.c.b16 %v4407_v40, %v4406_v52  ;;  %v4983_v52 = vrot.slane %v4981_v19, 3  ;;  %v4292_v40 = vld [vmem:[#allocation2 + $0x44] sm:$0xf]  ;;  %v4986_v23 = vrot.slane %v4984_v50, 4  ;;  %v10508_v16 = vld [vmem:[#allocation25_spill] sm:$0xff] }
 0x1d8   : > { %v4891_v22 = vunpack.c.l.b16 %v4808_v33 }
 0x1d9   : > { %v3441_v1 = vpop.f32.mrf.mxu2  ;;  %v4979_v30 = vsel %vm10491_vm8, %v9414_v39, %v9450_v34  ;;  %v5561_v39 = vld [vmem:[#allocation2 + $0x50] sm:$0xf]  ;;  %v4492_v58 = vshll.u32 %v9459_v36, 16 }
 0x1da   : > { %v3485_v26 = vadd.f32 %v3441_v1, %v2341_v18  ;;  %v5758_v18 = vor.u32 %v5756_v49, %v5754_v56  ;;  %v10495_v1 = vld [vmem:[#allocation27_spill] sm:$0xff] }
 0x1db   : > { %vm10496_vm2 = vnez %v10495_v1  ;;  %v4494_v56 = vrot.slane %v4492_v58, 1 }
 0x1dc   : > { %5936 = vmatmul.bf16.gmra.mxu0 %v5755_v8  ;;  %v3944_v61 = vpop.f32.mrf.mxu3  ;;  %v4776_v8 = vld [vmem:[#allocation2 + $0x4c] sm:$0xf]  ;;  %v4325_v49 = vsel %vm10496_vm2, %v4292_v40, 0 }
 0x1dd   : > { %v9461_v13 = vadd.f32 %v3944_v61, %v3485_v26  ;;  %v2342_v41 = vpop.f32.mrf.mxu1  ;;  %v5594_v26 = vsel %vm10498_vm10, %v5561_v39, 0 }
 0x1de   : > { %4668 = vmatmul.bf16.gmra.mxu1 %v4487_v38  ;;  %v2343_v0 = vadd.f32 %v2342_v41, %v10494_v44  ;;  %v5762_v38 = vrot.slane %v5760_v15, 1  ;;  %v4490_v44 = vor.u32 %v4488_v11, %v4486_v28  ;;  %v5677_v50 = vunpack.c.l.b16 %v5594_v26 }
 0x1df   : > { %10492 = vst [vmem:[#allocation42_spill] sm:$0xff] %v9461_v13  ;;  %v10501_v13 = vld [vmem:[#allocation24_spill] sm:$0xff]  ;;  %v4408_v28 = vunpack.c.l.b16 %v4325_v49 }
 0x1e0   : > { %5171 = vmatmul.bf16.gmra.mxu2 %v4979_v30  ;;  %v5593_v30 = vsel %vm10496_vm2, %v5560_v29, 0  ;;  %vm10502_vm6 = vnez %v10501_v13  ;;  %v4326_v29 = vsel %vm10498_vm10, %v4293_v7, 0  ;;  %v5763_v12 = vsel %vm10504_vm1, %v5758_v18, %v5762_v38  ;;  %vm10518_vm10 = vmmov %vm10504_vm1 }
 0x1e1   : > { %v3443_v10 = vpop.f32.mrf.mxu2  ;;  %v4809_v41 = vsel %vm10502_vm6, %v4776_v8, 0  ;;  %v5676_v39 = vunpack.c.l.b16 %v5593_v30  ;;  %v9485_v13 = vor.u32 %v4986_v23, %v4983_v52  ;;  %v9487_v8 = vpop.f32.mrf.mxu0  ;;  %v4409_v11 = vunpack.c.l.b16 %v4326_v29  ;;  %vm10522_vm6 = vmmov %vm10507_vm9 }
 0x1e2   : > { %v3486_v61 = vadd.f32 %v3443_v10, %v2343_v0  ;;  %v4892_v0 = vunpack.c.l.b16 %v4809_v41  ;;  %10505 = vst [vmem:[#allocation16_spill] sm:$0xff] %v9487_v8  ;;  %v4495_v58 = vsel %vm10506_vm4, %v4490_v44, %v4494_v56  ;;  %v5764_v52 = vshrl.u32 %v9454_v59, 16  ;;  %v4777_v41 = vld [vmem:[#allocation2 + $0x50] sm:$0xf] }
 0x1e3   : > { %v9490_v40 = vpack.c.b16 %v5677_v50, %v5676_v39  ;;  %v4988_v7 = vsel %vm10507_vm9, %v9450_v34, %v9485_v13  ;;  %v9495_v33 = vpack.c.b16 %v4409_v11, %v4408_v28  ;;  %v4496_v34 = vshrl.u32 %v9459_v36, 16  ;;  %v5562_v39 = vld [vmem:[#allocation2 + $0x54] sm:$0xf]  ;;  %v5563_v50 = vld [vmem:[#allocation2 + $0x58] sm:$0xf] }
 0x1e4   : > { %v3946_v19 = vpop.f32.mrf.mxu3  ;;  %v4917_v10 = vpack.c.b16 %v4892_v0, %v4891_v22  ;;  %v4294_v36 = vld [vmem:[#allocation2 + $0x4c] sm:$0xf]  ;;  %v4295_v8 = vld [vmem:[#allocation2 + $0x50] sm:$0xf] }
 0x1e5   : > { %v9480_v15 = vadd.f32 %v3946_v19, %v3486_v61  ;;  %v5768_v18 = vshll.u32 %v9490_v40, 16  ;;  %v6994_v61 = vld [vmem:[#allocation2 + $0x3c] sm:$0xff]  ;;  %v4778_v19 = vld [vmem:[#allocation2 + $0x54] sm:$0xf]  ;;  %v4500_v29 = vshll.u32 %v9495_v33, 16 }
 0x1e6   : > { %v4990_v1 = vshrl.u32 %v4917_v10, 16  ;;  %v4993_v30 = vshll.u32 %v4917_v10, 16  ;;  %v10512_v10 = vld [vmem:[#allocation36_spill] sm:$0xff] }
 0x1e7   : > { %5453 = vmatmul.bf16.gmra.mxu3 %v6993_v5  ;;  %10503 = vst [vmem:[#allocation14_spill] sm:$0xff] %v9480_v15  ;;  %v5770_v22 = vrot.slane %v5768_v18, 1  ;;  %vm10513_vm5 = vnez %v10512_v10  ;;  %v10514_v15 = vld [vmem:[#allocation38_spill] sm:$0xff]  ;;  %v4502_v18 = vrot.slane %v4500_v29, 1 }
 0x1e8   : > { %v4992_v28 = vrot.slane %v4990_v1, 3  ;;  %v4995_v11 = vrot.slane %v4993_v30, 4  ;;  %vm10515_vm8 = vnez %v10514_v15 }
 0x1e9   : > { %v2345_v5 = vpop.f32.mrf.mxu1  ;;  %v9502_v0 = vpop.f32.mrf.mxu0  ;;  %v5595_v4 = vsel %vm10515_vm8, %v5562_v39, 0 }
 0x1ea   : > { %v2346_v26 = vadd.f32 %v2345_v5, %v10508_v16  ;;  %10509 = vst [vmem:[#allocation15_spill] sm:$0xff] %v9502_v0  ;;  %v10510_v5 = vld [vmem:[#allocation32_spill] sm:$0xff]  ;;  %v9520_v0 = vor.u32 %v4995_v11, %v4992_v28 }
 0x1eb   : > { %vm10511_vm3 = vnez %v10510_v5  ;;  %v10519_v5 = vld [vmem:[#allocation31_spill] sm:$0xff] }
 0x1ec   : > { %5941 = vmatmul.bf16.gmra.mxu0 %v5763_v12  ;;  %v5766_v12 = vor.u32 %v5764_v52, %v5762_v38  ;;  %v4498_v52 = vor.u32 %v4496_v34, %v4494_v56 }
 0x1ee   : > { %4673 = vmatmul.bf16.gmra.mxu1 %v4495_v58  ;;  %v4810_v58 = vsel %vm10511_vm3, %v4777_v41, 0  ;;  %v5771_v1 = vsel %vm10518_vm10, %v5766_v12, %v5770_v22  ;;  %v4503_v56 = vsel %vm10520_vm15, %v4498_v52, %v4502_v18 }
 0x1ef   : > { %v4893_v30 = vunpack.c.l.b16 %v4810_v58 }
 0x1f0   : > { %5176 = vmatmul.bf16.gmra.mxu2 %v4988_v7  ;;  %v3949_v23 = vpop.f32.mrf.mxu3  ;;  %v4811_v7 = vsel %vm10513_vm5, %v4778_v19, 0  ;;  %v4327_v19 = vsel %vm10515_vm8, %v4294_v36, 0  ;;  %v5772_v36 = vshrl.u32 %v9490_v40, 16  ;;  %vm10535_vm5 = vmmov %vm10518_vm10 }
 0x1f1   : > { %v2347_v49 = vpop.f32.mrf.mxu1  ;;  %v4894_v41 = vunpack.c.l.b16 %v4811_v7  ;;  %vm10537_vm8 = vmmov %vm10535_vm5 }
 0x1f2   : > { %v3446_v44 = vpop.f32.mrf.mxu2  ;;  %v2348_v39 = vadd.f32 %v2347_v49, %v10519_v5  ;;  %v5774_v40 = vor.u32 %v5772_v36, %v5770_v22  ;;  %vm10542_vm10 = vmmov %vm10535_vm5 }
 0x1f3   : > { %v3487_v59 = vadd.f32 %v3446_v44, %v2346_v26  ;;  %v10516_v26 = vld [vmem:[#allocation39_spill] sm:$0xff]  ;;  %v5678_v44 = vunpack.c.l.b16 %v5595_v4  ;;  %v4918_v15 = vpack.c.b16 %v4894_v41, %v4893_v30  ;;  %v4997_v4 = vsel %vm10522_vm6, %v9485_v13, %v9520_v0  ;;  %vm10543_vm15 = vmmov %vm10535_vm5 }
 0x1f4   : > { %vm10517_vm2 = vnez %v10516_v26  ;;  %v4504_v41 = vshrl.u32 %v9495_v33, 16  ;;  %v4297_v13 = vld [vmem:[#allocation2 + $0x58] sm:$0xf] }
 0x1f5   : > { %v9508_v16 = vadd.f32 %v3949_v23, %v3487_v59  ;;  %v5596_v38 = vsel %vm10517_vm2, %v5563_v50, 0  ;;  %v4328_v23 = vsel %vm10517_vm2, %v4295_v8, 0  ;;  %v4410_v50 = vunpack.c.l.b16 %v4327_v19  ;;  %v9530_v8 = vpop.f32.mrf.mxu0  ;;  %v4296_v19 = vld [vmem:[#allocation2 + $0x54] sm:$0xf]  ;;  %vm10538_vm2 = vmmov %vm10522_vm6 }
 0x1f6   : > { %v5679_v59 = vunpack.c.l.b16 %v5596_v38  ;;  %v4411_v12 = vunpack.c.l.b16 %v4328_v23  ;;  %10523 = vst [vmem:[#allocation17_spill] sm:$0xff] %v9530_v8  ;;  %v4999_v28 = vshrl.u32 %v4918_v15, 16  ;;  %v5002_v11 = vshll.u32 %v4918_v15, 16  ;;  %v10524_v38 = vld [vmem:[#allocation34_spill] sm:$0xff]  ;;  %v10532_v8 = vld [vmem:[#allocation48_spill] sm:$0xff] }
 0x1f7   : > { %5458 = vmatmul.bf16.gmra.mxu3 %v6994_v61  ;;  %vm10533_vm3 = vnez %v10532_v8 }
 0x1f8   : > { %v3951_v10 = vpop.f32.mrf.mxu3  ;;  %v9523_v58 = vpack.c.b16 %v5679_v59, %v5678_v44  ;;  %v9532_v49 = vpack.c.b16 %v4411_v12, %v4410_v50  ;;  %v5001_v5 = vrot.slane %v4999_v28, 3  ;;  %v10525_v50 = vld [vmem:[#allocation45_spill] sm:$0xff]  ;;  %v10527_v12 = vld [vmem:[#allocation50_spill] sm:$0xff] }
 0x1f9   : > { %vm10526_vm1 = vnez %v10525_v50  ;;  %vm10528_vm4 = vnez %v10527_v12 }
 0x1fa   : > { %v3448_v61 = vpop.f32.mrf.mxu2  ;;  %v5776_v26 = vshll.u32 %v9523_v58, 16  ;;  %v4508_v59 = vshll.u32 %v9532_v49, 16  ;;  %v4330_v15 = vsel %vm10528_vm4, %v4297_v13, 0 }
 0x1fb   : > { %v3488_v34 = vadd.f32 %v3448_v61, %v2348_v39  ;;  %v2350_v29 = vpop.f32.mrf.mxu1  ;;  %v4779_v39 = vld [vmem:[#allocation2 + $0x58] sm:$0xf] }
 0x1fc   : > { %5946 = vmatmul.bf16.gmra.mxu0 %v5771_v1  ;;  %v2351_v52 = vadd.f32 %v2350_v29, %v10524_v38  ;;  %v6995_v1 = vld [vmem:[#allocation2 + $0x44] sm:$0xff]  ;;  %v4329_v29 = vsel %vm10526_vm1, %v4296_v19, 0  ;;  %v4510_v22 = vrot.slane %v4508_v59, 1 }
 0x1fd   : > { %v9525_v7 = vadd.f32 %v3951_v10, %v3488_v34  ;;  %v4780_v10 = vld [vmem:[#allocation2 + $0x5c] sm:$0xf]  ;;  %v5778_v34 = vrot.slane %v5776_v26, 1  ;;  %v4412_v8 = vunpack.c.l.b16 %v4329_v29 }
 0x1fe   : > { %4678 = vmatmul.bf16.gmra.mxu1 %v4503_v56  ;;  %v5004_v56 = vrot.slane %v5002_v11, 4  ;;  %v4813_v28 = vsel %vm10533_vm3, %v4780_v10, 0  ;;  %v4506_v11 = vor.u32 %v4504_v41, %v4502_v18  ;;  %v10536_v18 = vld [vmem:[#allocation41_spill] sm:$0xff]  ;;  %vm10562_vm3 = vnez %v10325_v27 }
 0x1ff   : > { %10521 = vst [vmem:[#allocation19_spill] sm:$0xff] %v9525_v7  ;;  %v5564_v7 = vld [vmem:[#allocation2 + $0x5c] sm:$0xf] }
 0x200   : > { %5181 = vmatmul.bf16.gmra.mxu2 %v4997_v4  ;;  %v10530_v4 = vld [vmem:[#allocation47_spill] sm:$0xff]  ;;  %v5597_v36 = vsel %vm10526_vm1, %v5564_v7, 0  ;;  %v4511_v7 = vsel %vm10537_vm8, %v4506_v11, %v4510_v22 }
 0x201   : > { %vm10531_vm9 = vnez %v10530_v4  ;;  %v5680_v13 = vunpack.c.l.b16 %v5597_v36 }
 0x202   : > { %v4812_v38 = vsel %vm10531_vm9, %v4779_v39, 0  ;;  %v4413_v39 = vunpack.c.l.b16 %v4330_v15  ;;  %vm10552_vm9 = vmmov %vm10538_vm2 }
 0x203   : > { %v3954_v30 = vpop.f32.mrf.mxu3  ;;  %v3451_v23 = vpop.f32.mrf.mxu2  ;;  %v4895_v10 = vunpack.c.l.b16 %v4812_v38  ;;  %v5780_v38 = vshrl.u32 %v9523_v58, 16 }
 0x204   : > { %v2352_v44 = vpop.f32.mrf.mxu1  ;;  %v3489_v61 = vadd.f32 %v3451_v23, %v2351_v52  ;;  %v5565_v52 = vld [vmem:[#allocation2 + $0x60] sm:$0xf] }
 0x205   : > { %v5598_v26 = vsel %vm10528_vm4, %v5565_v52, 0  ;;  %v2353_v41 = vadd.f32 %v2352_v44, %v10536_v18  ;;  %v4512_v52 = vshrl.u32 %v9532_v49, 16 }
 0x206   : > { %v9543_v33 = vadd.f32 %v3954_v30, %v3489_v61  ;;  %v5779_v30 = vsel %vm10535_vm5, %v5774_v40, %v5778_v34  ;;  %v5681_v23 = vunpack.c.l.b16 %v5598_v26  ;;  %v4896_v61 = vunpack.c.l.b16 %v4813_v28 }
 0x207   : > { %5463 = vmatmul.bf16.gmra.mxu3 %v6995_v1  ;;  %v9555_v1 = vor.u32 %v5004_v56, %v5001_v5  ;;  %v9565_v40 = vpack.c.b16 %v4413_v39, %v4412_v8  ;;  %v4514_v18 = vor.u32 %v4512_v52, %v4510_v22  ;;  %v4782_v52 = vld [vmem:[#allocation2 + $0x64] sm:$0xf] }
 0x208   : > { %10529 = vst [vmem:[#allocation22_spill] sm:$0xff] %v9543_v33  ;;  %v9560_v4 = vpack.c.b16 %v5681_v23, %v5680_v13  ;;  %v4919_v29 = vpack.c.b16 %v4896_v61, %v4895_v10  ;;  %v6996_v13 = vld [vmem:[#allocation2 + $0x4c] sm:$0xff]  ;;  %v5782_v10 = vor.u32 %v5780_v38, %v5778_v34  ;;  %v10544_v38 = vld [vmem:[#allocation59_spill] sm:$0xff] }
 0x209   : > { %v9553_v19 = vpop.f32.mrf.mxu0  ;;  %v5006_v56 = vsel %vm10538_vm2, %v9520_v0, %v9555_v1  ;;  %v4516_v11 = vshll.u32 %v9565_v40, 16  ;;  %v10541_v0 = vld [vmem:[#allocation43_spill] sm:$0xff]  ;;  %vm10545_vm6 = vnez %v10544_v38  ;;  %vm10566_vm2 = vnez %v10323_v20  ;;  %v10568_v20 = vld [vmem:[#allocation28_spill] sm:$0xff] }
 0x20a   : > { %10534 = vst [vmem:[#allocation27_spill] sm:$0xff] %v9553_v19  ;;  %v5784_v28 = vshll.u32 %v9560_v4, 16  ;;  %v5008_v36 = vshrl.u32 %v4919_v29, 16  ;;  %v5011_v26 = vshll.u32 %v4919_v29, 16  ;;  %v10559_v19 = vld [vmem:[#allocation60_spill] sm:$0xff] }
 0x20b   : > { %v3453_v59 = vpop.f32.mrf.mxu2  ;;  %v3956_v5 = vpop.f32.mrf.mxu3 }
 0x20c   : > { %v2355_v50 = vpop.f32.mrf.mxu1  ;;  %5951 = vmatmul.bf16.gmra.mxu0 %v5779_v30  ;;  %v3490_v12 = vadd.f32 %v3453_v59, %v2353_v41  ;;  %v5786_v61 = vrot.slane %v5784_v28, 1  ;;  %v4518_v41 = vrot.slane %v4516_v11, 1  ;;  %v5010_v59 = vrot.slane %v5008_v36, 3  ;;  %v4781_v28 = vld [vmem:[#allocation2 + $0x60] sm:$0xf]  ;;  %v10547_v36 = vld [vmem:[#allocation51_spill] sm:$0xff] }
 0x20d   : > { %v2356_v30 = vadd.f32 %v2355_v50, %v10541_v0  ;;  %v5013_v58 = vrot.slane %v5011_v26, 4 }
 0x20e   : > { %v9567_v15 = vadd.f32 %v3956_v5, %v3490_v12  ;;  %4683 = vmatmul.bf16.gmra.mxu1 %v4511_v7  ;;  %v5787_v49 = vsel %vm10542_vm10, %v5782_v10, %v5786_v61  ;;  %v4298_v12 = vld [vmem:[#allocation2 + $0x5c] sm:$0xf]  ;;  %v4299_v5 = vld [vmem:[#allocation2 + $0x60] sm:$0xf]  ;;  %v4519_v50 = vsel %vm10543_vm15, %v4514_v18, %v4518_v41  ;;  %vm10567_vm10 = vmmov %vm10552_vm9  ;;  %vm10576_vm15 = vnez %v10344_v60 }
 0x20f   : > { %v9580_v29 = vor.u32 %v5013_v58, %v5010_v59  ;;  %v4331_v34 = vsel %vm8675_vm12, %v4298_v12, 0  ;;  %v4332_v22 = vsel %vm10545_vm6, %v4299_v5, 0  ;;  %v10548_v59 = vld [vmem:[#allocation56_spill] sm:$0xff]  ;;  %v10550_v12 = vld [vmem:[#allocation57_spill] sm:$0xff] }
 0x210   : > { %10539 = vst [vmem:[#allocation29_spill] sm:$0xff] %v9567_v15  ;;  %5186 = vmatmul.bf16.gmra.mxu2 %v5006_v56  ;;  %v4414_v0 = vunpack.c.l.b16 %v4331_v34  ;;  %vm10549_vm1 = vnez %v10548_v59  ;;  %vm10551_vm4 = vnez %v10550_v12 }
 0x211   : > { %v9569_v44 = vpop.f32.mrf.mxu0  ;;  %v4814_v58 = vsel %vm10549_vm1, %v4781_v28, 0  ;;  %v5015_v34 = vsel %vm10552_vm9, %v9555_v1, %v9580_v29  ;;  %vm10578_vm1 = vmmov %vm10535_vm5 }
 0x212   : > { %10540 = vst [vmem:[#allocation23_spill] sm:$0xff] %v9569_v44  ;;  %v4815_v44 = vsel %vm10551_vm4, %v4782_v52, 0 }
 0x213   : > { %v3456_v23 = vpop.f32.mrf.mxu2 }
 0x214   : > { %v2357_v8 = vpop.f32.mrf.mxu1  ;;  %v3491_v39 = vadd.f32 %v3456_v23, %v2356_v30  ;;  %v4415_v30 = vunpack.c.l.b16 %v4332_v22  ;;  %v5567_v23 = vld [vmem:[#allocation2 + $0x68] sm:$0xf]  ;;  %v4898_v22 = vunpack.c.l.b16 %v4815_v44 }
 0x215   : > { %v2358_v26 = vadd.f32 %v2357_v8, %v10547_v36 }
 0x216   : > { %v9600_v28 = vpack.c.b16 %v4415_v30, %v4414_v0  ;;  %v6997_v30 = vld [vmem:[#allocation2 + $0x54] sm:$0xff] }
 0x217   : > { %5468 = vmatmul.bf16.gmra.mxu3 %v6996_v13  ;;  %v5566_v13 = vld [vmem:[#allocation2 + $0x64] sm:$0xf] }
 0x218   : > { %v5599_v5 = vsel %vm8675_vm12, %v5566_v13, 0  ;;  %v10554_v13 = vld [vmem:[#allocation53_spill] sm:$0xff]  ;;  %vm10560_vm12 = vmmov %vm10535_vm5 }
 0x219   : > { %v9576_v7 = vpop.f32.mrf.mxu0  ;;  %v2283_v12 = vadd.f32 %v10554_v13, %v10553_v32 }
 0x21a   : > { %v3959_v56 = vpop.f32.mrf.mxu3 }
 0x21b   : > { %v9586_v11 = vadd.f32 %v3959_v56, %v3491_v39  ;;  %v3458_v10 = vpop.f32.mrf.mxu2  ;;  %v5600_v39 = vsel %vm10545_vm6, %v5567_v23, 0  ;;  %v4897_v56 = vunpack.c.l.b16 %v4814_v58  ;;  %v10555_v58 = vld [vmem:[#allocation58_spill] sm:$0xff]  ;;  %vm10577_vm6 = vnez %v10348_v43 }
 0x21c   : > { %v4649_v18 = vpop.f32.mrf.mxu1  ;;  %5956 = vmatmul.bf16.gmra.mxu0 %v5787_v49  ;;  %v3492_v8 = vadd.f32 %v3458_v10, %v2358_v26  ;;  %v5682_v49 = vunpack.c.l.b16 %v5599_v5  ;;  %v5683_v36 = vunpack.c.l.b16 %v5600_v39  ;;  %v5788_v26 = vshrl.u32 %v9560_v4, 16 }
 0x21d   : > { %10546 = vst [vmem:[#allocation24_spill] sm:$0xff] %v9586_v11  ;;  %v4920_v59 = vpack.c.b16 %v4898_v22, %v4897_v56  ;;  %v4520_v5 = vshrl.u32 %v9565_v40, 16  ;;  %v4524_v39 = vshll.u32 %v9600_v28, 16  ;;  %v10557_v56 = vld [vmem:[#allocation54_spill] sm:$0xff] }
 0x21e   : > { %4688 = vmatmul.bf16.gmra.mxu1 %v4519_v50  ;;  %v9602_v52 = vpack.c.b16 %v5683_v36, %v5682_v49  ;;  %v3462_v50 = vadd.f32 %v10555_v58, %v2283_v12  ;;  %v5790_v13 = vor.u32 %v5788_v26, %v5786_v61  ;;  %v10563_v26 = vld [vmem:[#allocation55_spill] sm:$0xff] }
 0x21f   : > { %v5017_v10 = vshrl.u32 %v4920_v59, 16  ;;  %v5020_v1 = vshll.u32 %v4920_v59, 16  ;;  %v9618_v12 = vrot.slane %v4524_v39, 1  ;;  %v5569_v39 = vld [vmem:[#allocation2 + $0x70] sm:$0xf] }
 0x220   : > { %5191 = vmatmul.bf16.gmra.mxu2 %v5015_v34  ;;  %v5792_v44 = vshll.u32 %v9602_v52, 16  ;;  %v10558_v34 = vld [vmem:[#allocation52_spill] sm:$0xff]  ;;  %v3965_v11 = vadd.f32 %v10559_v19, %v3462_v50 }
 0x221   : > { %v9606_v38 = vpop.f32.mrf.mxu0  ;;  %v4246_v22 = vadd.f32 %v10558_v34, %v10557_v56  ;;  %v5019_v4 = vrot.slane %v5017_v10, 3  ;;  %v5022_v32 = vrot.slane %v5020_v1, 4  ;;  %v4300_v34 = vld [vmem:[#allocation2 + $0x64] sm:$0xf] }
 0x222   : > { %v3961_v23 = vpop.f32.mrf.mxu3  ;;  %v5794_v59 = vrot.slane %v5792_v44, 1  ;;  %v4333_v61 = vsel %vm8750_vm11, %v4300_v34, 0  ;;  %v4247_v44 = vadd.f32 %v10563_v26, %v3965_v11  ;;  %v5602_v11 = vsel %vm10562_vm3, %v5569_v39, 0 }
 0x223   : > { %v9611_v0 = vadd.f32 %v3961_v23, %v3492_v8  ;;  %v5152_v49 = vpop.f32.mrf.mxu2  ;;  %v4729_v15 = vadd.f32 %v4649_v18, %v4246_v22  ;;  %v4522_v8 = vor.u32 %v4520_v5, %v4518_v41  ;;  %v9622_v58 = vor.u32 %v5022_v32, %v5019_v4  ;;  %v4783_v18 = vld [vmem:[#allocation2 + $0x68] sm:$0xf]  ;;  %v4784_v41 = vld [vmem:[#allocation2 + $0x6c] sm:$0xf]  ;;  %v10564_v4 = vld [vmem:[#allocation68_spill] sm:$0xff] }
 0x224   : > { %v4651_v36 = vpop.f32.mrf.mxu1  ;;  %v5795_v56 = vsel %vm10560_vm12, %v5790_v13, %v5794_v59  ;;  %v4416_v50 = vunpack.c.l.b16 %v4333_v61  ;;  %v5568_v5 = vld [vmem:[#allocation2 + $0x6c] sm:$0xf]  ;;  %vm10565_vm8 = vnez %v10564_v4  ;;  %v5685_v4 = vunpack.c.l.b16 %v5602_v11  ;;  %vm10583_vm12 = vmmov %vm10567_vm10 }
 0x225   : > { %10556 = vst [vmem:[#allocation25_spill] sm:$0xff] %v9611_v0  ;;  %v5232_v23 = vadd.f32 %v5152_v49, %v4729_v15  ;;  %v4301_v0 = vld [vmem:[#allocation2 + $0x68] sm:$0xf]  ;;  %v4527_v15 = vsel %vm10535_vm5, %v4522_v8, %v9618_v12  ;;  %v4816_v32 = vsel %vm10565_vm8, %v4783_v18, 0  ;;  %v5601_v13 = vsel %vm8750_vm11, %v5568_v5, 0  ;;  %vm10574_vm11 = vmmov %vm10535_vm5 }
 0x226   : > { %v4334_v19 = vsel %vm10562_vm3, %v4301_v0, 0  ;;  %v4817_v0 = vsel %vm10566_vm2, %v4784_v41, 0  ;;  %v4730_v34 = vadd.f32 %v4651_v36, %v4247_v44  ;;  %v5024_v61 = vsel %vm10567_vm10, %v9580_v29, %v9622_v58  ;;  %v10569_v41 = vld [vmem:[#allocation62_spill] sm:$0xff]  ;;  %v10571_v44 = vld [vmem:[#allocation63_spill] sm:$0xff]  ;;  %vm10590_vm3 = vmmov %vm10578_vm1 }
 0x227   : > { %5473 = vmatmul.bf16.gmra.mxu3 %v6997_v30  ;;  %v4417_v30 = vunpack.c.l.b16 %v4334_v19  ;;  %v4900_v26 = vunpack.c.l.b16 %v4817_v0  ;;  %v5684_v18 = vunpack.c.l.b16 %v5601_v13  ;;  %v2288_v33 = vadd.f32 %v10569_v41, %v10568_v20  ;;  %vm10594_vm2 = vmmov %vm10578_vm1 }
 0x228   : > { %v5796_v36 = vshrl.u32 %v9602_v52, 16  ;;  %vm10592_vm5 = vnez %v10357_v48  ;;  %vm10593_vm8 = vnez %v10369_v57 }
 0x229   : > { %v9620_v40 = vpop.f32.mrf.mxu0  ;;  %v9643_v19 = vpack.c.b16 %v4417_v30, %v4416_v50  ;;  %v9647_v27 = vpack.c.b16 %v5685_v4, %v5684_v18  ;;  %v10572_v50 = vld [vmem:[#allocation61_spill] sm:$0xff] }
 0x22a   : > { %v5434_v10 = vpop.f32.mrf.mxu3  ;;  %v4248_v30 = vadd.f32 %v10572_v50, %v10571_v44 }
 0x22b   : > { %v5154_v22 = vpop.f32.mrf.mxu2  ;;  %v5514_v8 = vadd.f32 %v5434_v10, %v5232_v23  ;;  %v10570_v23 = vld [vmem:[#allocation65_spill] sm:$0xff]  ;;  %v5800_v52 = vshll.u32 %v9647_v27, 16 }
 0x22c   : > { %v4654_v49 = vpop.f32.mrf.mxu1  ;;  %5961 = vmatmul.bf16.gmra.mxu0 %v5795_v56  ;;  %v4899_v56 = vunpack.c.l.b16 %v4816_v32  ;;  %v5233_v1 = vadd.f32 %v5154_v22, %v4730_v34  ;;  %v3464_v10 = vadd.f32 %v10570_v23, %v2288_v33  ;;  %v4528_v32 = vshrl.u32 %v9600_v28, 16  ;;  %v6998_v33 = vld [vmem:[#allocation2 + $0x5c] sm:$0xff] }
 0x22d   : > { %v5997_v29 = vadd.f32 %v9576_v7, %v5514_v8  ;;  %v4731_v34 = vadd.f32 %v4654_v49, %v4248_v30  ;;  %v9660_v4 = vrot.slane %v5800_v52, 1  ;;  %v10573_v28 = vld [vmem:[#allocation67_spill] sm:$0xff]  ;;  %v4302_v30 = vld [vmem:[#allocation2 + $0x6c] sm:$0xf]  ;;  %v4786_v52 = vld [vmem:[#allocation2 + $0x74] sm:$0xf] }
 0x22e   : > { %4693 = vmatmul.bf16.gmra.mxu1 %v4527_v15  ;;  %v4921_v5 = vpack.c.b16 %v4900_v26, %v4899_v56  ;;  %v4532_v15 = vshll.u32 %v9643_v19, 16  ;;  %v5798_v56 = vor.u32 %v5796_v36, %v5794_v59  ;;  %v3967_v20 = vadd.f32 %v10573_v28, %v3464_v10  ;;  %v10579_v28 = vld [vmem:[#allocation74_spill] sm:$0xff] }
 0x22f   : > { %v6067_v41 = vmul.f32 %v5997_v29, %v5997_v29  ;;  %v4530_v49 = vor.u32 %v4528_v32, %v9618_v12  ;;  %v10575_v12 = vld [vmem:[#allocation64_spill] sm:$0xff]  ;;  %vm10580_vm4 = vnez %v10579_v28 }
 0x230   : > { %5196 = vmatmul.bf16.gmra.mxu2 %v5024_v61  ;;  %v5026_v22 = vshrl.u32 %v4921_v5, 16  ;;  %v5029_v13 = vshll.u32 %v4921_v5, 16  ;;  %v5803_v50 = vsel %vm10574_vm11, %v5798_v56, %v9660_v4  ;;  %v4249_v32 = vadd.f32 %v10575_v12, %v3967_v20  ;;  %v5570_v56 = vld [vmem:[#allocation2 + $0x74] sm:$0xf] }
 0x231   : > { %v9654_v39 = vpop.f32.mrf.mxu0 }
 0x232   : > { %v5436_v0 = vpop.f32.mrf.mxu3  ;;  %v5028_v26 = vrot.slane %v5026_v22, 3  ;;  %v5031_v18 = vrot.slane %v5029_v13, 4  ;;  %v4785_v13 = vld [vmem:[#allocation2 + $0x70] sm:$0xf] }
 0x233   : > { %v5515_v11 = vadd.f32 %v5436_v0, %v5233_v1  ;;  %v5157_v7 = vpop.f32.mrf.mxu2  ;;  %v9671_v1 = vrot.slane %v4532_v15, 1  ;;  %v4303_v0 = vld [vmem:[#allocation2 + $0x70] sm:$0xf]  ;;  %v4335_v15 = vsel %vm10576_vm15, %v4302_v30, 0  ;;  %v4818_v20 = vsel %vm10580_vm4, %v4785_v13, 0  ;;  %v10584_v13 = vld [vmem:[#allocation37_spill] sm:$0xff] }
 0x234   : > { %v4656_v8 = vpop.f32.mrf.mxu1  ;;  %v5234_v36 = vadd.f32 %v5157_v7, %v4731_v34  ;;  %v9676_v44 = vor.u32 %v5031_v18, %v5028_v26  ;;  %v4418_v34 = vunpack.c.l.b16 %v4335_v15  ;;  %vm10609_vm4 = vnez %v10390_v24 }
 0x235   : > { %v5998_v61 = vadd.f32 %v9606_v38, %v5515_v11  ;;  %v4732_v30 = vadd.f32 %v4656_v8, %v4249_v32  ;;  %v5804_v8 = vshrl.u32 %v9647_v27, 16  ;;  %v10586_v32 = vld [vmem:[#allocation73_spill] sm:$0xff] }
 0x236   : > { %v6999_v27 = vld [vmem:[#allocation2 + $0x64] sm:$0xff] }
 0x237   : > { %v6029_v59 = vadd.f32 %v5998_v61, %v5997_v29  ;;  %v6068_v38 = vmul.f32 %v5998_v61, %v5998_v61  ;;  %v7171_v5 = vpack.c.bf16 %v5998_v61, %v5997_v29  ;;  %5478 = vmatmul.bf16.gmra.mxu3 %v6998_v33  ;;  %v4336_v29 = vsel %vm10577_vm6, %v4303_v0, 0  ;;  %v5571_v61 = vld [vmem:[#allocation2 + $0x78] sm:$0xf] }
 0x238   : > { %v4535_v33 = vsel %vm10578_vm1, %v4530_v49, %v9671_v1  ;;  %v4419_v7 = vunpack.c.l.b16 %v4336_v29  ;;  %v5033_v0 = vsel %vm10583_vm12, %v9622_v58, %v9676_v44 }
 0x239   : > { %v6099_v23 = vadd.f32 %v6068_v38, %v6067_v41  ;;  %7172 = vst [vmem:[%s9668_s21] sm:$0xff] %v7171_v5   ;;  %v9674_v10 = vpop.f32.mrf.mxu0  ;;  %v10581_v41 = vld [vmem:[#allocation77_spill] sm:$0xff]  ;;  %v5603_v5 = vsel %vm10576_vm15, %v5570_v56, 0  ;;  %vm10599_vm15 = vmmov %vm10583_vm12  ;;  %vm10611_vm12 = vnez %v10377_v55 }
 0x23a   : > { %v5439_v22 = vpop.f32.mrf.mxu3  ;;  %vm10582_vm9 = vnez %v10581_v41  ;;  %v5686_v15 = vunpack.c.l.b16 %v5603_v5 }
 0x23b   : > { %v5516_v11 = vadd.f32 %v5439_v22, %v5234_v36  ;;  %v5159_v26 = vpop.f32.mrf.mxu2  ;;  %v4819_v38 = vsel %vm10582_vm9, %v4786_v52, 0  ;;  %v5604_v36 = vsel %vm10577_vm6, %v5571_v61, 0  ;;  %v4901_v22 = vunpack.c.l.b16 %v4818_v20  ;;  %v10585_v52 = vld [vmem:[#allocation70_spill] sm:$0xff]  ;;  %vm10606_vm6 = vmmov %vm10578_vm1 }
 0x23c   : > { %v4659_v18 = vpop.f32.mrf.mxu1  ;;  %5966 = vmatmul.bf16.gmra.mxu0 %v5803_v50  ;;  %v9699_v50 = vpack.c.b16 %v4419_v7, %v4418_v34  ;;  %v4902_v12 = vunpack.c.l.b16 %v4819_v38  ;;  %v5687_v29 = vunpack.c.l.b16 %v5604_v36  ;;  %v2293_v60 = vadd.f32 %v10585_v52, %v10584_v13  ;;  %v10587_v34 = vld [vmem:[#allocation71_spill] sm:$0xff]  ;;  %v10588_v7 = vld [vmem:[#allocation69_spill] sm:$0xff]  ;;  %vm10610_vm9 = vmmov %vm10594_vm2 }
 0x23d   : > { %v5999_v49 = vadd.f32 %v9620_v40, %v5516_v11  ;;  %v5235_v43 = vadd.f32 %v5159_v26, %v4732_v30  ;;  %v4250_v20 = vadd.f32 %v10588_v7, %v10587_v34  ;;  %v4536_v38 = vshrl.u32 %v9643_v19, 16  ;;  %v10589_v52 = vld [vmem:[#allocation75_spill] sm:$0xff] }
 0x23e   : > { %4698 = vmatmul.bf16.gmra.mxu1 %v4535_v33  ;;  %v4922_v61 = vpack.c.b16 %v4902_v12, %v4901_v22  ;;  %v9703_v40 = vpack.c.b16 %v5687_v29, %v5686_v15  ;;  %v3466_v58 = vadd.f32 %v10586_v32, %v2293_v60  ;;  %v4540_v26 = vshll.u32 %v9699_v50, 16 }
 0x23f   : > { %v6030_v56 = vadd.f32 %v6029_v59, %v5999_v49  ;;  %v6069_v28 = vmul.f32 %v5999_v49, %v5999_v49  ;;  %v4733_v22 = vadd.f32 %v4659_v18, %v4250_v20  ;;  %v5806_v15 = vor.u32 %v5804_v8, %v9660_v4  ;;  %v4304_v20 = vld [vmem:[#allocation2 + $0x74] sm:$0xf] }
 0x240   : > { %5201 = vmatmul.bf16.gmra.mxu2 %v5033_v0  ;;  %v5035_v33 = vshrl.u32 %v4922_v61, 16  ;;  %v5038_v5 = vshll.u32 %v4922_v61, 16  ;;  %v5808_v36 = vshll.u32 %v9703_v40, 16  ;;  %v3969_v60 = vadd.f32 %v10589_v52, %v3466_v58  ;;  %v4305_v58 = vld [vmem:[#allocation2 + $0x78] sm:$0xf] }
 0x241   : > { %v6100_v11 = vadd.f32 %v6099_v23, %v6069_v28  ;;  %v9709_v41 = vpop.f32.mrf.mxu0  ;;  %v4538_v28 = vor.u32 %v4536_v38, %v9671_v1  ;;  %v9720_v61 = vrot.slane %v4540_v26, 1  ;;  %v10591_v1 = vld [vmem:[#allocation72_spill] sm:$0xff]  ;;  %v4788_v26 = vld [vmem:[#allocation2 + $0x7c] sm:$0xf]  ;;  %vm10608_vm1 = vnez %v10381_v37 }
 0x242   : > { %v5441_v59 = vpop.f32.mrf.mxu3  ;;  %v5037_v29 = vrot.slane %v5035_v33, 3  ;;  %v5040_v13 = vrot.slane %v5038_v5, 4  ;;  %v9716_v19 = vrot.slane %v5808_v36, 1  ;;  %v4251_v38 = vadd.f32 %v10591_v1, %v3969_v60 }
 0x243   : > { %v5517_v30 = vadd.f32 %v5441_v59, %v5235_v43  ;;  %v5162_v12 = vpop.f32.mrf.mxu2  ;;  %v4543_v5 = vsel %vm10594_vm2, %v4538_v28, %v9720_v61 }
 0x244   : > { %v4661_v23 = vpop.f32.mrf.mxu1  ;;  %v5236_v34 = vadd.f32 %v5162_v12, %v4733_v22  ;;  %v5811_v8 = vsel %vm10590_vm3, %v5806_v15, %v9716_v19  ;;  %v5573_v22 = vld [vmem:[#allocation2 + $0x80] sm:$0xf]  ;;  %vm10612_vm3 = vnez %v10383_v51 }
 0x245   : > { %v6000_v0 = vadd.f32 %v9654_v39, %v5517_v30  ;;  %v9725_v39 = vor.u32 %v5040_v13, %v5037_v29  ;;  %v10597_v13 = vld [vmem:[#allocation87_spill] sm:$0xff] }
 0x246   : > { %vm10598_vm11 = vnez %v10597_v13 }
 0x247   : > { %v6031_v43 = vadd.f32 %v6030_v56, %v6000_v0  ;;  %v6070_v32 = vmul.f32 %v6000_v0, %v6000_v0  ;;  %v7176_v18 = vpack.c.bf16 %v6000_v0, %v5999_v49  ;;  %5483 = vmatmul.bf16.gmra.mxu3 %v6999_v27  ;;  %v4337_v56 = vsel %vm10592_vm5, %v4304_v20, 0  ;;  %v5572_v27 = vld [vmem:[#allocation2 + $0x7c] sm:$0xf]  ;;  %v10595_v0 = vld [vmem:[#allocation84_spill] sm:$0xff] }
 0x248   : > { %v4338_v49 = vsel %vm10593_vm8, %v4305_v58, 0  ;;  %v4420_v36 = vunpack.c.l.b16 %v4337_v56  ;;  %vm10596_vm10 = vnez %v10595_v0  ;;  %v4821_v52 = vsel %vm10598_vm11, %v4788_v26, 0  ;;  %v10600_v56 = vld [vmem:[#allocation46_spill] sm:$0xff] }
 0x249   : > { %v6101_v7 = vadd.f32 %v6100_v11, %v6070_v32  ;;  %7278 = vst [vmem:[%s9668_s21 + $0x8] sm:$0xff] %v7176_v18   ;;  %v9723_v4 = vpop.f32.mrf.mxu0  ;;  %v4787_v11 = vld [vmem:[#allocation2 + $0x78] sm:$0xf]  ;;  %v4421_v30 = vunpack.c.l.b16 %v4338_v49  ;;  %v5605_v60 = vsel %vm10592_vm5, %v5572_v27, 0  ;;  %v5606_v32 = vsel %vm10593_vm8, %v5573_v22, 0  ;;  %v10601_v49 = vld [vmem:[#allocation78_spill] sm:$0xff]  ;;  %vm10613_vm5 = vmmov %vm10599_vm15 }
 0x24a   : > { %v5444_v59 = vpop.f32.mrf.mxu3  ;;  %v4820_v29 = vsel %vm10596_vm10, %v4787_v11, 0  ;;  %v4734_v18 = vadd.f32 %v4661_v23, %v4251_v38  ;;  %v4904_v58 = vunpack.c.l.b16 %v4821_v52  ;;  %v5689_v1 = vunpack.c.l.b16 %v5606_v32  ;;  %v10602_v38 = vld [vmem:[#allocation81_spill] sm:$0xff]  ;;  %vm10620_vm8 = vmmov %vm10594_vm2 }
 0x24b   : > { %v5518_v33 = vadd.f32 %v5444_v59, %v5236_v34  ;;  %v5164_v12 = vpop.f32.mrf.mxu2  ;;  %v5042_v34 = vsel %vm10599_vm15, %v9676_v44, %v9725_v39  ;;  %v4903_v20 = vunpack.c.l.b16 %v4820_v29  ;;  %v5688_v59 = vunpack.c.l.b16 %v5605_v60  ;;  %vm10624_vm15 = vmmov %vm10613_vm5 }
 0x24c   : > { %v4664_v15 = vpop.f32.mrf.mxu1  ;;  %5971 = vmatmul.bf16.gmra.mxu0 %v5811_v8  ;;  %v9748_v8 = vpack.c.b16 %v4421_v30, %v4420_v36  ;;  %v2298_v48 = vadd.f32 %v10601_v49, %v10600_v56  ;;  %v5237_v57 = vadd.f32 %v5164_v12, %v4734_v18  ;;  %v5812_v23 = vshrl.u32 %v9703_v40, 16  ;;  %v10603_v36 = vld [vmem:[#allocation80_spill] sm:$0xff]  ;;  %v7000_v40 = vld [vmem:[#allocation2 + $0x6c] sm:$0xff] }
 0x24d   : > { %v6001_v28 = vadd.f32 %v9674_v10, %v5518_v33  ;;  %v4923_v27 = vpack.c.b16 %v4904_v58, %v4903_v20  ;;  %v9752_v10 = vpack.c.b16 %v5689_v1, %v5688_v59  ;;  %v10604_v30 = vld [vmem:[#allocation76_spill] sm:$0xff]  ;;  %v4544_v29 = vshrl.u32 %v9699_v50, 16  ;;  %v10605_v1 = vld [vmem:[#allocation82_spill] sm:$0xff] }
 0x24e   : > { %4703 = vmatmul.bf16.gmra.mxu1 %v4543_v5  ;;  %v3468_v44 = vadd.f32 %v10602_v38, %v2298_v48  ;;  %v4252_v22 = vadd.f32 %v10604_v30, %v10603_v36  ;;  %v4548_v12 = vshll.u32 %v9748_v8, 16  ;;  %v5814_v20 = vor.u32 %v5812_v23, %v9716_v19  ;;  %v4306_v36 = vld [vmem:[#allocation2 + $0x7c] sm:$0xf] }
 0x24f   : > { %v6032_v11 = vadd.f32 %v6031_v43, %v6001_v28  ;;  %v6071_v26 = vmul.f32 %v6001_v28, %v6001_v28  ;;  %v5044_v5 = vshrl.u32 %v4923_v27, 16  ;;  %v5047_v13 = vshll.u32 %v4923_v27, 16 }
 0x250   : > { %5206 = vmatmul.bf16.gmra.mxu2 %v5042_v34  ;;  %v5816_v52 = vshll.u32 %v9752_v10, 16  ;;  %v4735_v32 = vadd.f32 %v4664_v15, %v4252_v22  ;;  %v3971_v56 = vadd.f32 %v10605_v1, %v3468_v44  ;;  %v4546_v49 = vor.u32 %v4544_v29, %v9720_v61  ;;  %v4307_v44 = vld [vmem:[#allocation2 + $0x80] sm:$0xf]  ;;  %v10607_v61 = vld [vmem:[#allocation79_spill] sm:$0xff]  ;;  %v4790_v29 = vld [vmem:[#allocation2 + $0x84] sm:$0xf] }
 0x251   : > { %v6102_v33 = vadd.f32 %v6101_v7, %v6071_v26  ;;  %v9758_v0 = vpop.f32.mrf.mxu0  ;;  %v5046_v58 = vrot.slane %v5044_v5, 3  ;;  %v5049_v59 = vrot.slane %v5047_v13, 4  ;;  %v9769_v48 = vrot.slane %v4548_v12, 1 }
 0x252   : > { %v5446_v43 = vpop.f32.mrf.mxu3  ;;  %v9765_v50 = vrot.slane %v5816_v52, 1  ;;  %v4253_v22 = vadd.f32 %v10607_v61, %v3971_v56  ;;  %v5574_v52 = vld [vmem:[#allocation2 + $0x84] sm:$0xf]  ;;  %v10616_v61 = vld [vmem:[#allocation89_spill] sm:$0xff]  ;;  %vm10622_vm10 = vnez %v10395_v62  ;;  %vm10623_vm11 = vnez %v10399_v2 }
 0x253   : > { %v5519_v60 = vadd.f32 %v5446_v43, %v5237_v57  ;;  %v5167_v18 = vpop.f32.mrf.mxu2  ;;  %v4551_v12 = vsel %vm10610_vm9, %v4546_v49, %v9769_v48 }
 0x254   : > { %v4666_v7 = vpop.f32.mrf.mxu1  ;;  %v5238_v27 = vadd.f32 %v5167_v18, %v4735_v32  ;;  %v5819_v23 = vsel %vm10606_vm6, %v5814_v20, %v9765_v50  ;;  %v4823_v20 = vsel %vm10612_vm3, %v4790_v29, 0 }
 0x255   : > { %v6002_v34 = vadd.f32 %v9709_v41, %v5519_v60  ;;  %v9774_v41 = vor.u32 %v5049_v59, %v5046_v58  ;;  %v5575_v60 = vld [vmem:[#allocation2 + $0x88] sm:$0xf]  ;;  %v4736_v1 = vadd.f32 %v4666_v7, %v4253_v22  ;;  %v5820_v7 = vshrl.u32 %v9752_v10, 16  ;;  %v7001_v10 = vld [vmem:[#allocation2 + $0x74] sm:$0xff] }
 0x256   : > { %v5608_v58 = vsel %vm10609_vm4, %v5575_v60, 0 }
 0x257   : > { %v6033_v26 = vadd.f32 %v6032_v11, %v6002_v34  ;;  %v6072_v57 = vmul.f32 %v6002_v34, %v6002_v34  ;;  %v7181_v15 = vpack.c.bf16 %v6002_v34, %v6001_v28  ;;  %5488 = vmatmul.bf16.gmra.mxu3 %v7000_v40  ;;  %v4339_v11 = vsel %vm10608_vm1, %v4306_v36, 0 }
 0x258   : > { %v4340_v28 = vsel %vm10609_vm4, %v4307_v44, 0  ;;  %v4422_v5 = vunpack.c.l.b16 %v4339_v11  ;;  %v5607_v34 = vsel %vm10608_vm1, %v5574_v52, 0  ;;  %v5051_v56 = vsel %vm10613_vm5, %v9725_v39, %v9774_v41  ;;  %v10617_v11 = vld [vmem:[#allocation88_spill] sm:$0xff]  ;;  %vm10640_vm1 = vmmov %vm10613_vm5 }
 0x259   : > { %v6103_v38 = vadd.f32 %v6102_v33, %v6072_v57  ;;  %7279 = vst [vmem:[%s9668_s21 + $0x10] sm:$0xff] %v7181_v15   ;;  %v9772_v19 = vpop.f32.mrf.mxu0  ;;  %v4789_v33 = vld [vmem:[#allocation2 + $0x80] sm:$0xf]  ;;  %v4423_v13 = vunpack.c.l.b16 %v4340_v28  ;;  %v4906_v57 = vunpack.c.l.b16 %v4823_v20  ;;  %v5690_v15 = vunpack.c.l.b16 %v5607_v34  ;;  %v10618_v28 = vld [vmem:[#allocation83_spill] sm:$0xff] }
 0x25a   : > { %v5449_v30 = vpop.f32.mrf.mxu3  ;;  %v4822_v18 = vsel %vm10611_vm12, %v4789_v33, 0  ;;  %v5691_v51 = vunpack.c.l.b16 %v5608_v58  ;;  %v4254_v33 = vadd.f32 %v10618_v28, %v10617_v11  ;;  %v5822_v20 = vor.u32 %v5820_v7, %v9765_v50 }
 0x25b   : > { %v5520_v43 = vadd.f32 %v5449_v30, %v5238_v27  ;;  %v5169_v40 = vpop.f32.mrf.mxu2  ;;  %v9797_v49 = vpack.c.b16 %v4423_v13, %v4422_v5  ;;  %v4905_v55 = vunpack.c.l.b16 %v4822_v18  ;;  %v10614_v27 = vld [vmem:[#allocation18_spill] sm:$0xff] }
 0x25c   : > { %v4669_v32 = vpop.f32.mrf.mxu1  ;;  %5976 = vmatmul.bf16.gmra.mxu0 %v5819_v23  ;;  %v10615_v23 = vld [vmem:[#allocation85_spill] sm:$0xff]  ;;  %v5239_v24 = vadd.f32 %v5169_v40, %v4736_v1 }
 0x25d   : > { %v6003_v59 = vadd.f32 %v9723_v4, %v5520_v43  ;;  %v2303_v37 = vadd.f32 %v10615_v23, %v10614_v27  ;;  %v4924_v30 = vpack.c.b16 %v4906_v57, %v4905_v55  ;;  %v9801_v4 = vpack.c.b16 %v5691_v51, %v5690_v15 }
 0x25e   : > { %4708 = vmatmul.bf16.gmra.mxu1 %v4551_v12  ;;  %v4552_v43 = vshrl.u32 %v9748_v8, 16  ;;  %v4556_v5 = vshll.u32 %v9797_v49, 16  ;;  %v4737_v40 = vadd.f32 %v4669_v32, %v4254_v33 }
 0x25f   : > { %v6034_v36 = vadd.f32 %v6033_v26, %v6003_v59  ;;  %v6073_v44 = vmul.f32 %v6003_v59, %v6003_v59  ;;  %v3470_v39 = vadd.f32 %v10616_v61, %v2303_v37  ;;  %v5053_v12 = vshrl.u32 %v4924_v30, 16 }
 0x260   : > { %5211 = vmatmul.bf16.gmra.mxu2 %v5051_v56  ;;  %v5056_v13 = vshll.u32 %v4924_v30, 16  ;;  %v5824_v52 = vshll.u32 %v9801_v4, 16  ;;  %v10619_v56 = vld [vmem:[#allocation90_spill] sm:$0xff]  ;;  %v4554_v57 = vor.u32 %v4552_v43, %v9769_v48  ;;  %v9818_v15 = vrot.slane %v4556_v5, 1  ;;  %v4309_v30 = vld [vmem:[#allocation2 + $0x88] sm:$0xf] }
 0x261   : > { %v6104_v22 = vadd.f32 %v6103_v38, %v6073_v44  ;;  %v9807_v29 = vpop.f32.mrf.mxu0  ;;  %v5055_v58 = vrot.slane %v5053_v12, 3  ;;  %v3973_v55 = vadd.f32 %v10619_v56, %v3470_v39  ;;  %v10621_v48 = vld [vmem:[#allocation86_spill] sm:$0xff]  ;;  %v4791_v39 = vld [vmem:[#allocation2 + $0x88] sm:$0xf] }
 0x262   : > { %v5451_v26 = vpop.f32.mrf.mxu3  ;;  %v5058_v1 = vrot.slane %v5056_v13, 4  ;;  %v9814_v8 = vrot.slane %v5824_v52, 1  ;;  %v4559_v28 = vsel %vm10594_vm2, %v4554_v57, %v9818_v15  ;;  %v5577_v5 = vld [vmem:[#allocation2 + $0x90] sm:$0xf]  ;;  %v4824_v52 = vsel %vm10622_vm10, %v4791_v39, 0  ;;  %v10629_v39 = vld [vmem:[#allocation91_spill] sm:$0xff] }
 0x263   : > { %v5521_v60 = vadd.f32 %v5451_v26, %v5239_v24  ;;  %v5172_v18 = vpop.f32.mrf.mxu2  ;;  %v4308_v24 = vld [vmem:[#allocation2 + $0x84] sm:$0xf]  ;;  %v4255_v61 = vadd.f32 %v10621_v48, %v3973_v55  ;;  %v5576_v26 = vld [vmem:[#allocation2 + $0x8c] sm:$0xf] }
 0x264   : > { %v4671_v38 = vpop.f32.mrf.mxu1  ;;  %v5240_v23 = vadd.f32 %v5172_v18, %v4737_v40  ;;  %v5827_v44 = vsel %vm10620_vm8, %v5822_v20, %v9814_v8  ;;  %v5610_v40 = vsel %vm9194_vm0, %v5577_v5, 0 }
 0x265   : > { %v6004_v34 = vadd.f32 %v9758_v0, %v5521_v60  ;;  %v9823_v0 = vor.u32 %v5058_v1, %v5055_v58  ;;  %v4738_v20 = vadd.f32 %v4671_v38, %v4255_v61  ;;  %v4907_v58 = vunpack.c.l.b16 %v4824_v52  ;;  %v10630_v52 = vld [vmem:[#allocation96_spill] sm:$0xff] }
 0x266   : > { %v5693_v56 = vunpack.c.l.b16 %v5610_v40 }
 0x267   : > { %v6035_v51 = vadd.f32 %v6034_v36, %v6004_v34  ;;  %v6074_v27 = vmul.f32 %v6004_v34, %v6004_v34  ;;  %v7186_v32 = vpack.c.bf16 %v6004_v34, %v6003_v59  ;;  %5493 = vmatmul.bf16.gmra.mxu3 %v7001_v10  ;;  %v4341_v36 = vsel %vm9178_vm13, %v4308_v24, 0  ;;  %v10627_v24 = vld [vmem:[#allocation95_spill] sm:$0xff] }
 0x268   : > { %v4342_v59 = vsel %vm9194_vm0, %v4309_v30, 0  ;;  %v4424_v33 = vunpack.c.l.b16 %v4341_v36  ;;  %v5609_v10 = vsel %vm9178_vm13, %v5576_v26, 0  ;;  %v5060_v34 = vsel %vm10624_vm15, %v9774_v41, %v9823_v0  ;;  %vm10631_vm13 = vmmov %vm10594_vm2 }
 0x269   : > { %v6105_v37 = vadd.f32 %v6104_v22, %v6074_v27  ;;  %7280 = vst [vmem:[%s9668_s21 + $0x18] sm:$0xff] %v7186_v32   ;;  %v9821_v50 = vpop.f32.mrf.mxu0  ;;  %v4792_v22 = vld [vmem:[#allocation2 + $0x8c] sm:$0xf]  ;;  %v4425_v43 = vunpack.c.l.b16 %v4342_v59  ;;  %v5692_v62 = vunpack.c.l.b16 %v5609_v10  ;;  %v10626_v27 = vld [vmem:[#allocation92_spill] sm:$0xff]  ;;  %v5828_v41 = vshrl.u32 %v9801_v4, 16  ;;  %v10628_v59 = vld [vmem:[#allocation94_spill] sm:$0xff] }
 0x26a   : > { %v5454_v7 = vpop.f32.mrf.mxu3  ;;  %v4825_v60 = vsel %vm10623_vm11, %v4792_v22, 0  ;;  %v2308_v32 = vadd.f32 %v10626_v27, %v10625_v3  ;;  %v4256_v22 = vadd.f32 %v10629_v39, %v10628_v59  ;;  %v5578_v27 = vld [vmem:[#allocation2 + $0x94] sm:$0x1]  ;;  %vm10633_vm0 = vmmov %vm10594_vm2 }
 0x26b   : > { %v5522_v11 = vadd.f32 %v5454_v7, %v5240_v23  ;;  %v5174_v12 = vpop.f32.mrf.mxu2  ;;  %v4908_v1 = vunpack.c.l.b16 %v4825_v60  ;;  %v9848_v53 = vpack.c.b16 %v4425_v43, %v4424_v33  ;;  %v5830_v5 = vor.u32 %v5828_v41, %v9814_v8  ;;  %v4310_v8 = vld [vmem:[#allocation2 + $0x8c] sm:$0x1]  ;;  %vm10639_vm6 = vmmov %vm10633_vm0 }
 0x26c   : > { %v4674_v13 = vpop.f32.mrf.mxu1  ;;  %5981 = vmatmul.bf16.gmra.mxu0 %v5827_v44  ;;  %v5241_v57 = vadd.f32 %v5174_v12, %v4738_v20  ;;  %v3472_v30 = vadd.f32 %v10627_v24, %v2308_v32  ;;  %v10632_v32 = vld [vmem:[#allocation93_spill] sm:$0xff] }
 0x26d   : > { %v6005_v18 = vadd.f32 %v9772_v19, %v5522_v11  ;;  %v4925_v23 = vpack.c.b16 %v4908_v1, %v4907_v58  ;;  %v9850_v19 = vpack.c.b16 %v5693_v56, %v5692_v62  ;;  %v7002_v11 = vld [vmem:[#allocation2 + $0x7c] sm:$0xff]  ;;  %v4564_v43 = vshll.u32 %v9848_v53, 16 }
 0x26e   : > { %4713 = vmatmul.bf16.gmra.mxu1 %v4559_v28  ;;  %v4739_v26 = vadd.f32 %v4674_v13, %v4256_v22  ;;  %v3975_v60 = vadd.f32 %v10630_v52, %v3472_v30  ;;  %v4793_v13 = vld [vmem:[#allocation2 + $0x90] sm:$0xf] }
 0x26f   : > { %v6036_v55 = vadd.f32 %v6035_v51, %v6005_v18  ;;  %v6075_v2 = vmul.f32 %v6005_v18, %v6005_v18  ;;  %v5062_v7 = vshrl.u32 %v4925_v23, 16  ;;  %v5065_v48 = vshll.u32 %v4925_v23, 16 }
 0x270   : > { %5216 = vmatmul.bf16.gmra.mxu2 %v5060_v34  ;;  %v5832_v61 = vshll.u32 %v9850_v19, 16  ;;  %v4566_v62 = vrot.slane %v4564_v43, 1  ;;  %v4257_v23 = vadd.f32 %v10632_v32, %v3975_v60 }
 0x271   : > { %v6106_v38 = vadd.f32 %v6105_v37, %v6075_v2  ;;  %v9852_v44 = vpop.f32.mrf.mxu0  ;;  %v4560_v37 = vshrl.u32 %v9797_v49, 16  ;;  %v5064_v10 = vrot.slane %v5062_v7, 3  ;;  %v5067_v40 = vrot.slane %v5065_v48, 4 }
 0x272   : > { %v5456_v51 = vpop.f32.mrf.mxu3  ;;  %v5834_v12 = vrot.slane %v5832_v61, 1  ;;  %v5611_v7 = vsel %vm9231_vm7, %v5578_v27, 0 }
 0x273   : > { %v5523_v36 = vadd.f32 %v5456_v51, %v5241_v57  ;;  %v5177_v28 = vpop.f32.mrf.mxu2  ;;  %v4562_v49 = vor.u32 %v4560_v37, %v9818_v15  ;;  %v9869_v3 = vor.u32 %v5067_v40, %v5064_v10  ;;  %v5694_v59 = vunpack.c.l.b16 %v5611_v7  ;;  %v10636_v40 = vld [vmem:[#allocation97_spill] sm:$0xff] }
 0x274   : > { %v4676_v33 = vpop.f32.mrf.mxu1  ;;  %v5242_v1 = vadd.f32 %v5177_v28, %v4739_v26  ;;  %v10635_v28 = vld [vmem:[#allocation35_spill] sm:$0xff] }
 0x275   : > { %v6006_v4 = vadd.f32 %v9807_v29, %v5523_v36  ;;  %v5835_v29 = vsel %vm10631_vm13, %v5830_v5, %v5834_v12  ;;  %v4567_v30 = vsel %vm10633_vm0, %v4562_v49, %v4566_v62  ;;  %v4740_v61 = vadd.f32 %v4676_v33, %v4257_v23 }
 0x276   : > { %v2313_v37 = vadd.f32 %v9138_v17, %v10635_v28 }
 0x277   : > { %v6037_v20 = vadd.f32 %v6036_v55, %v6006_v4  ;;  %v6076_v34 = vmul.f32 %v6006_v4, %v6006_v4  ;;  %v7191_v58 = vpack.c.bf16 %v6006_v4, %v6005_v18  ;;  %5498 = vmatmul.bf16.gmra.mxu3 %v7002_v11  ;;  %v4343_v55 = vsel %vm9231_vm7, %v4310_v8, 0  ;;  %vm10637_vm7 = vmmov %vm10633_vm0 }
 0x278   : > { %v4826_v18 = vsel %vm9210_vm14, %v4793_v13, 0  ;;  %v4426_v51 = vunpack.c.l.b16 %v4343_v55  ;;  %vm10634_vm14 = vmmov %vm10613_vm5  ;;  %v5711_v4 = vpack.c.b16 %v5694_v59, %v5694_v59  ;;  %v3474_v33 = vadd.f32 %v9192_v45, %v2313_v37 }
 0x279   : > { %v6107_v56 = vadd.f32 %v6106_v38, %v6076_v34  ;;  %7281 = vst [vmem:[%s9668_s21 + $0x20] sm:$0xff] %v7191_v58   ;;  %v9866_v2 = vpop.f32.mrf.mxu0  ;;  %v4909_v38 = vunpack.c.l.b16 %v4826_v18  ;;  %v5069_v14 = vsel %vm10634_vm14, %v9823_v0, %v9869_v3  ;;  %v7003_v34 = vld [vmem:[#allocation2 + $0x84] sm:$0xff] }
 0x27a   : > { %v5459_v57 = vpop.f32.mrf.mxu3  ;;  %v4443_v43 = vpack.c.b16 %v4426_v51, %v4426_v51  ;;  %v5840_v60 = vshll.u32 %v5711_v4, 16  ;;  %v3977_v8 = vadd.f32 %v9188_v31, %v3474_v33  ;;  %v10645_v33 = vld [vmem:[#allocation99_spill] sm:$0xff] }
 0x27b   : > { %v5524_v15 = vadd.f32 %v5459_v57, %v5242_v1  ;;  %v5179_v41 = vpop.f32.mrf.mxu2  ;;  %v4926_v36 = vpack.c.b16 %v4909_v38, %v4909_v38  ;;  %v4568_v1 = vshrl.u32 %v9848_v53, 16 }
 0x27c   : > { %v4679_v24 = vpop.f32.mrf.mxu1  ;;  %5986 = vmatmul.bf16.gmra.mxu0 %v5835_v29  ;;  %v5243_v11 = vadd.f32 %v5179_v41, %v4740_v61  ;;  %v4572_v49 = vshll.u32 %v4443_v43, 16  ;;  %v5842_v45 = vrot.slane %v5840_v60, 1  ;;  %v10643_v43 = vld [vmem:[#allocation103_spill] sm:$0xff] }
 0x27d   : > { %v6007_v48 = vadd.f32 %v9821_v50, %v5524_v15  ;;  %v5836_v50 = vshrl.u32 %v9850_v19, 16  ;;  %v5071_v0 = vshrl.u32 %v4926_v36, 16  ;;  %v5074_v52 = vshll.u32 %v4926_v36, 16 }
 0x27e   : > { %4718 = vmatmul.bf16.gmra.mxu1 %v4567_v30  ;;  %v4570_v15 = vor.u32 %v4568_v1, %v4566_v62  ;;  %v4574_v32 = vrot.slane %v4572_v49, 1 }
 0x27f   : > { %v6038_v39 = vadd.f32 %v6037_v20, %v6007_v48  ;;  %v6077_v22 = vmul.f32 %v6007_v48, %v6007_v48  ;;  %v4258_v20 = vadd.f32 %v10636_v40, %v9186_v46  ;;  %v5838_v29 = vor.u32 %v5836_v50, %v5834_v12 }
 0x280   : > { %5221 = vmatmul.bf16.gmra.mxu2 %v5069_v14  ;;  %v5073_v13 = vrot.slane %v5071_v0, 3  ;;  %v5076_v57 = vrot.slane %v5074_v52, 4  ;;  %v4575_v7 = vsel %vm10639_vm6, %v4570_v15, %v4574_v32  ;;  %v7004_v0 = vld [vmem:[#allocation2 + $0x8c] sm:$0xff] }
 0x281   : > { %v6108_v54 = vadd.f32 %v6107_v56, %v6077_v22  ;;  %v5949_v26 = vpop.f32.mrf.mxu0  ;;  %v4741_v19 = vadd.f32 %v4679_v24, %v4258_v20  ;;  %v5843_v38 = vsel %vm10637_vm7, %v5838_v29, %v5842_v45  ;;  %v10638_v24 = vld [vmem:[#allocation98_spill] sm:$0xff]  ;;  %v10646_v29 = vld [vmem:[#allocation100_spill] sm:$0xff] }
 0x282   : > { %v5461_v5 = vpop.f32.mrf.mxu3  ;;  %v5077_v41 = vor.u32 %v5076_v57, %v5073_v13  ;;  %v4259_v30 = vadd.f32 %v10638_v24, %v3977_v8  ;;  %v10642_v22 = vld [vmem:[#allocation102_spill] sm:$0xff] }
 0x283   : > { %v5525_v10 = vadd.f32 %v5461_v5, %v5243_v11  ;;  %v5182_v58 = vpop.f32.mrf.mxu2 }
 0x284   : > { %v4681_v17 = vpop.f32.mrf.mxu1  ;;  %v5244_v46 = vadd.f32 %v5182_v58, %v4741_v19  ;;  %v5078_v62 = vsel %vm10640_vm1, %v9869_v3, %v5077_v41  ;;  %v10648_v41 = vld [vmem:[#allocation104_spill] sm:$0xff] }
 0x285   : > { %v6008_v56 = vadd.f32 %v9852_v44, %v5525_v10  ;;  %v4742_v61 = vadd.f32 %v4681_v17, %v4259_v30 }
 0x287   : > { %v6039_v55 = vadd.f32 %v6038_v39, %v6008_v56  ;;  %v6078_v18 = vmul.f32 %v6008_v56, %v6008_v56  ;;  %v7196_v27 = vpack.c.bf16 %v6008_v56, %v6007_v48  ;;  %5503 = vmatmul.bf16.gmra.mxu3 %v7003_v34  ;;  %v10641_v39 = vld [vmem:[#allocation44_spill] sm:$0xff] }
 0x288   : > { %v2318_v11 = vadd.f32 %v10642_v22, %v10641_v39 }
 0x289   : > { %v6109_v23 = vadd.f32 %v6108_v54, %v6078_v18  ;;  %7282 = vst [vmem:[%s9668_s21 + $0x28] sm:$0xff] %v7196_v27   ;;  %v5952_v53 = vpop.f32.mrf.mxu0 }
 0x28a   : > { %v5464_v44 = vpop.f32.mrf.mxu3  ;;  %v3476_v4 = vadd.f32 %v10643_v43, %v2318_v11 }
 0x28b   : > { %v5526_v12 = vadd.f32 %v5464_v44, %v5244_v46  ;;  %v5184_v31 = vpop.f32.mrf.mxu2 }
 0x28c   : > { %v4684_v51 = vpop.f32.mrf.mxu1  ;;  %5991 = vmatmul.bf16.gmra.mxu0 %v5843_v38  ;;  %v5245_v59 = vadd.f32 %v5184_v31, %v4742_v61  ;;  %v3979_v40 = vadd.f32 %v9268_v25, %v3476_v4  ;;  %v10647_v25 = vld [vmem:[#allocation21_spill] sm:$0xff] }
 0x28d   : > { %v6009_v48 = vadd.f32 %v9866_v2, %v5526_v12  ;;  %v10644_v2 = vld [vmem:[#allocation101_spill] sm:$0xff]  ;;  %v2323_v46 = vadd.f32 %v9292_v47, %v10647_v25  ;;  %v4262_v12 = vadd.f32 %v10648_v41, %v9294_v6  ;;  %v10654_v25 = vld [vmem:[#allocation40_spill] sm:$0xff] }
 0x28e   : > { %4723 = vmatmul.bf16.gmra.mxu1 %v4575_v7  ;;  %v4260_v5 = vadd.f32 %v10645_v33, %v10644_v2  ;;  %v4261_v45 = vadd.f32 %v10646_v29, %v3979_v40 }
 0x28f   : > { %v6040_v14 = vadd.f32 %v6039_v55, %v6009_v48  ;;  %v6079_v36 = vmul.f32 %v6009_v48, %v6009_v48 }
 0x290   : > { %5226 = vmatmul.bf16.gmra.mxu2 %v5078_v62  ;;  %v4743_v10 = vadd.f32 %v4684_v51, %v4260_v5 }
 0x291   : > { %v6110_v28 = vadd.f32 %v6109_v23, %v6079_v36  ;;  %v5954_v37 = vpop.f32.mrf.mxu0  ;;  %v3478_v23 = vadd.f32 %v9311_v21, %v2323_v46  ;;  %v10655_v46 = vld [vmem:[#allocation33_spill] sm:$0xff] }
 0x292   : > { %v5466_v54 = vpop.f32.mrf.mxu3 }
 0x293   : > { %v5527_v50 = vadd.f32 %v5466_v54, %v5245_v59  ;;  %v5187_v3 = vpop.f32.mrf.mxu2  ;;  %v3981_v51 = vadd.f32 %v9315_v63, %v3478_v23  ;;  %v10649_v59 = vld [vmem:[#allocation105_spill] sm:$0xff]  ;;  %v10650_v54 = vld [vmem:[#allocation30_spill] sm:$0xff] }
 0x294   : > { %v4686_v52 = vpop.f32.mrf.mxu1  ;;  %v5246_v17 = vadd.f32 %v5187_v3, %v4743_v10  ;;  %v2328_v63 = vadd.f32 %v9342_v35, %v10650_v54  ;;  %v10651_v3 = vld [vmem:[#allocation106_spill] sm:$0xff] }
 0x295   : > { %v6010_v60 = vadd.f32 %v5949_v26, %v5527_v50  ;;  %v4744_v55 = vadd.f32 %v4686_v52, %v4261_v45  ;;  %v4263_v39 = vadd.f32 %v10649_v59, %v3981_v51  ;;  %v4264_v52 = vadd.f32 %v10651_v3, %v9330_v9  ;;  %v10653_v45 = vld [vmem:[#allocation107_spill] sm:$0xff]  ;;  %v10661_v3 = vld [vmem:[#allocation12_spill] sm:$0xff] }
 0x296   : > { %v3480_v33 = vadd.f32 %v9350_v42, %v2328_v63 }
 0x297   : > { %v6041_v20 = vadd.f32 %v6040_v14, %v6010_v60  ;;  %v6080_v34 = vmul.f32 %v6010_v60, %v6010_v60  ;;  %v7201_v58 = vpack.c.bf16 %v6010_v60, %v6009_v48  ;;  %5508 = vmatmul.bf16.gmra.mxu3 %v7004_v0 }
 0x299   : > { %v6111_v1 = vadd.f32 %v6110_v28, %v6080_v34  ;;  %7283 = vst [vmem:[%s9668_s21 + $0x30] sm:$0xff] %v7201_v58   ;;  %v5957_v49 = vpop.f32.mrf.mxu0  ;;  %v10652_v34 = vld [vmem:[#allocation3_spill] sm:$0xff] }
 0x29a   : > { %v5469_v56 = vpop.f32.mrf.mxu3  ;;  %v3983_v58 = vadd.f32 %v10652_v34, %v3480_v33 }
 0x29b   : > { %v5528_v19 = vadd.f32 %v5469_v56, %v5246_v17  ;;  %v5189_v8 = vpop.f32.mrf.mxu2 }
 0x29c   : > { %v4689_v13 = vpop.f32.mrf.mxu1  ;;  %v5247_v27 = vadd.f32 %v5189_v8, %v4744_v55  ;;  %v4265_v8 = vadd.f32 %v10653_v45, %v3983_v58 }
 0x29d   : > { %v6011_v57 = vadd.f32 %v5952_v53, %v5528_v19  ;;  %v4745_v31 = vadd.f32 %v4689_v13, %v4262_v12 }
 0x29f   : > { %v6042_v26 = vadd.f32 %v6041_v20, %v6011_v57  ;;  %v6081_v18 = vmul.f32 %v6011_v57, %v6011_v57 }
 0x2a1   : > { %v6112_v15 = vadd.f32 %v6111_v1, %v6081_v18  ;;  %v5959_v32 = vpop.f32.mrf.mxu0 }
 0x2a2   : > { %v5471_v38 = vpop.f32.mrf.mxu3 }
 0x2a3   : > { %v5529_v44 = vadd.f32 %v5471_v38, %v5247_v27  ;;  %v5192_v24 = vpop.f32.mrf.mxu2  ;;  %v10656_v38 = vld [vmem:[#allocation8_spill] sm:$0xff] }
 0x2a4   : > { %v4691_v30 = vpop.f32.mrf.mxu1  ;;  %v5248_v47 = vadd.f32 %v5192_v24, %v4745_v31  ;;  %v10657_v24 = vld [vmem:[#allocation9_spill] sm:$0xff] }
 0x2a5   : > { %v6012_v53 = vadd.f32 %v5954_v37, %v5529_v44  ;;  %v4746_v28 = vadd.f32 %v4691_v30, %v4263_v39  ;;  %v10658_v30 = vld [vmem:[#allocation5_spill] sm:$0xff] }
 0x2a7   : > { %v6043_v7 = vadd.f32 %v6042_v26, %v6012_v53  ;;  %v6082_v48 = vmul.f32 %v6012_v53, %v6012_v53  ;;  %v7206_v61 = vpack.c.bf16 %v6012_v53, %v6011_v57  ;;  %v4266_v53 = vadd.f32 %v10658_v30, %v10657_v24 }
 0x2a9   : > { %v6113_v62 = vadd.f32 %v6112_v15, %v6082_v48  ;;  %7284 = vst [vmem:[%s9668_s21 + $0x38] sm:$0xff] %v7206_v61   ;;  %v5962_v14 = vpop.f32.mrf.mxu0  ;;  %v2333_v15 = vadd.f32 %v10655_v46, %v10654_v25  ;;  %v10659_v61 = vld [vmem:[#allocation6_spill] sm:$0xff] }
 0x2aa   : > { %v5474_v36 = vpop.f32.mrf.mxu3 }
 0x2ab   : > { %v5530_v21 = vadd.f32 %v5474_v36, %v5248_v47  ;;  %v5194_v22 = vpop.f32.mrf.mxu2  ;;  %v3482_v44 = vadd.f32 %v10656_v38, %v2333_v15  ;;  %v10666_v38 = vld [vmem:[#allocation10_spill] sm:$0xff] }
 0x2ac   : > { %v4694_v11 = vpop.f32.mrf.mxu1  ;;  %v5249_v4 = vadd.f32 %v5194_v22, %v4746_v28 }
 0x2ad   : > { %v6013_v6 = vadd.f32 %v5957_v49, %v5530_v21  ;;  %v4747_v20 = vadd.f32 %v4694_v11, %v4264_v52  ;;  %v3985_v47 = vadd.f32 %v10659_v61, %v3482_v44  ;;  %v10662_v52 = vld [vmem:[#allocation7_spill] sm:$0xff] }
 0x2af   : > { %v6044_v43 = vadd.f32 %v6043_v7, %v6013_v6  ;;  %v6083_v37 = vmul.f32 %v6013_v6, %v6013_v6 }
 0x2b1   : > { %v6114_v50 = vadd.f32 %v6113_v62, %v6083_v37  ;;  %v5964_v2 = vpop.f32.mrf.mxu0 }
 0x2b2   : > { %v5476_v5 = vpop.f32.mrf.mxu3 }
 0x2b3   : > { %v5531_v0 = vadd.f32 %v5476_v5, %v5249_v4  ;;  %v5197_v60 = vpop.f32.mrf.mxu2 }
 0x2b4   : > { %v4696_v10 = vpop.f32.mrf.mxu1  ;;  %v5250_v35 = vadd.f32 %v5197_v60, %v4747_v20  ;;  %v4268_v60 = vadd.f32 %v10662_v52, %v10661_v3 }
 0x2b5   : > { %v6014_v40 = vadd.f32 %v5959_v32, %v5531_v0  ;;  %v4748_v55 = vadd.f32 %v4696_v10, %v4265_v8 }
 0x2b7   : > { %v6045_v17 = vadd.f32 %v6044_v43, %v6014_v40  ;;  %v6084_v1 = vmul.f32 %v6014_v40, %v6014_v40  ;;  %v7211_v49 = vpack.c.bf16 %v6014_v40, %v6013_v6  ;;  %v10660_v6 = vld [vmem:[#allocation4_spill] sm:$0xff] }
 0x2b8   : > { %v4267_v28 = vadd.f32 %v10660_v6, %v3985_v47 }
 0x2b9   : > { %v6115_v56 = vadd.f32 %v6114_v50, %v6084_v1  ;;  %7285 = vst [vmem:[%s9668_s21 + $0x40] sm:$0xff] %v7211_v49   ;;  %v5967_v19 = vpop.f32.mrf.mxu0 }
 0x2ba   : > { %v5479_v29 = vpop.f32.mrf.mxu3 }
 0x2bb   : > { %v5532_v42 = vadd.f32 %v5479_v29, %v5250_v35  ;;  %v5199_v13 = vpop.f32.mrf.mxu2  ;;  %v10664_v29 = vld [vmem:[#allocation108_spill] sm:$0xff] }
 0x2bc   : > { %v4699_v57 = vpop.f32.mrf.mxu1  ;;  %v5251_v27 = vadd.f32 %v5199_v13, %v4748_v55 }
 0x2bd   : > { %v6015_v9 = vadd.f32 %v5962_v14, %v5532_v42  ;;  %v4749_v48 = vadd.f32 %v4699_v57, %v4266_v53 }
 0x2bf   : > { %v6046_v26 = vadd.f32 %v6045_v17, %v6015_v9  ;;  %v6085_v18 = vmul.f32 %v6015_v9, %v6015_v9 }
 0x2c1   : > { %v6116_v32 = vadd.f32 %v6115_v56, %v6085_v18  ;;  %v5969_v23 = vpop.f32.mrf.mxu0 }
 0x2c2   : > { %v5481_v41 = vpop.f32.mrf.mxu3 }
 0x2c3   : > { %v5533_v12 = vadd.f32 %v5481_v41, %v5251_v27  ;;  %v5202_v31 = vpop.f32.mrf.mxu2 }
 0x2c4   : > { %v4701_v51 = vpop.f32.mrf.mxu1  ;;  %v5252_v21 = vadd.f32 %v5202_v31, %v4749_v48 }
 0x2c5   : > { %v6016_v7 = vadd.f32 %v5964_v2, %v5533_v12  ;;  %v4750_v54 = vadd.f32 %v4701_v51, %v4267_v28 }
 0x2c7   : > { %v6047_v62 = vadd.f32 %v6046_v26, %v6016_v7  ;;  %v6086_v14 = vmul.f32 %v6016_v7, %v6016_v7  ;;  %v7216_v36 = vpack.c.bf16 %v6016_v7, %v6015_v9 }
 0x2c9   : > { %v6117_v59 = vadd.f32 %v6116_v32, %v6086_v14  ;;  %7286 = vst [vmem:[%s9668_s21 + $0x48] sm:$0xff] %v7216_v36   ;;  %v5972_v39 = vpop.f32.mrf.mxu0  ;;  %v10667_v14 = vld [vmem:[#allocation14_spill] sm:$0xff]  ;;  %v10668_v36 = vld [vmem:[#allocation11_spill] sm:$0xff] }
 0x2ca   : > { %v5484_v22 = vpop.f32.mrf.mxu3 }
 0x2cb   : > { %v5534_v11 = vadd.f32 %v5484_v22, %v5252_v21  ;;  %v5204_v43 = vpop.f32.mrf.mxu2  ;;  %v4271_v21 = vadd.f32 %v10668_v36, %v10667_v14 }
 0x2cc   : > { %v4704_v37 = vpop.f32.mrf.mxu1  ;;  %v5253_v2 = vadd.f32 %v5204_v43, %v4750_v54 }
 0x2cd   : > { %v6017_v4 = vadd.f32 %v5967_v19, %v5534_v11  ;;  %v4751_v58 = vadd.f32 %v4704_v37, %v4268_v60  ;;  %v10663_v19 = vld [vmem:[#allocation13_spill] sm:$0xff] }
 0x2ce   : > { %v4269_v42 = vadd.f32 %v10664_v29, %v10663_v19 }
 0x2cf   : > { %v6048_v63 = vadd.f32 %v6047_v62, %v6017_v4  ;;  %v6087_v50 = vmul.f32 %v6017_v4, %v6017_v4 }
 0x2d1   : > { %v6118_v33 = vadd.f32 %v6117_v59, %v6087_v50  ;;  %v5974_v10 = vpop.f32.mrf.mxu0  ;;  %v10669_v50 = vld [vmem:[#allocation49_spill] sm:$0xff] }
 0x2d2   : > { %v5486_v5 = vpop.f32.mrf.mxu3 }
 0x2d3   : > { %v5535_v0 = vadd.f32 %v5486_v5, %v5253_v2  ;;  %v5207_v40 = vpop.f32.mrf.mxu2  ;;  %v4272_v2 = vadd.f32 %v10669_v50, %v9508_v16 }
 0x2d4   : > { %v4706_v20 = vpop.f32.mrf.mxu1  ;;  %v5254_v1 = vadd.f32 %v5207_v40, %v4751_v58 }
 0x2d5   : > { %v6018_v34 = vadd.f32 %v5969_v23, %v5535_v0  ;;  %v4752_v9 = vadd.f32 %v4706_v20, %v4269_v42  ;;  %v10665_v23 = vld [vmem:[#allocation42_spill] sm:$0xff] }
 0x2d6   : > { %v4270_v44 = vadd.f32 %v10666_v38, %v10665_v23 }
 0x2d7   : > { %v7221_v17 = vpack.c.bf16 %v6018_v34, %v6017_v4  ;;  %v6088_v35 = vmul.f32 %v6018_v34, %v6018_v34  ;;  %v6049_v13 = vadd.f32 %v6048_v63, %v6018_v34 }
 0x2d9   : > { %7287 = vst [vmem:[%s9668_s21 + $0x50] sm:$0xff] %v7221_v17   ;;  %v5977_v55 = vpop.f32.mrf.mxu0  ;;  %v6119_v26 = vadd.f32 %v6118_v33, %v6088_v35  ;;  %v10670_v17 = vld [vmem:[#allocation19_spill] sm:$0xff] }
 0x2da   : > { %v5489_v49 = vpop.f32.mrf.mxu3 }
 0x2db   : > { %v5536_v56 = vadd.f32 %v5489_v49, %v5254_v1  ;;  %v5209_v45 = vpop.f32.mrf.mxu2  ;;  %v10671_v1 = vld [vmem:[#allocation16_spill] sm:$0xff] }
 0x2dc   : > { %v4709_v8 = vpop.f32.mrf.mxu1  ;;  %v5255_v25 = vadd.f32 %v5209_v45, %v4752_v9  ;;  %v4273_v49 = vadd.f32 %v10671_v1, %v10670_v17 }
 0x2dd   : > { %v6019_v57 = vadd.f32 %v5972_v39, %v5536_v56  ;;  %v4753_v30 = vadd.f32 %v4709_v8, %v4270_v44 }
 0x2df   : > { %v6050_v18 = vadd.f32 %v6049_v13, %v6019_v57  ;;  %v6089_v27 = vmul.f32 %v6019_v57, %v6019_v57 }
 0x2e1   : > { %v6120_v46 = vadd.f32 %v6119_v26, %v6089_v27  ;;  %v5979_v48 = vpop.f32.mrf.mxu0  ;;  %v10673_v26 = vld [vmem:[#allocation15_spill] sm:$0xff] }
 0x2e2   : > { %v5491_v15 = vpop.f32.mrf.mxu3 }
 0x2e3   : > { %v5537_v32 = vadd.f32 %v5491_v15, %v5255_v25  ;;  %v5212_v41 = vpop.f32.mrf.mxu2 }
 0x2e4   : > { %v4711_v12 = vpop.f32.mrf.mxu1  ;;  %v5256_v7 = vadd.f32 %v5212_v41, %v4753_v30 }
 0x2e5   : > { %v6020_v24 = vadd.f32 %v5974_v10, %v5537_v32  ;;  %v4754_v11 = vadd.f32 %v4711_v12, %v4271_v21 }
 0x2e7   : > { %v6051_v53 = vadd.f32 %v6050_v18, %v6020_v24  ;;  %v6090_v31 = vmul.f32 %v6020_v24, %v6020_v24  ;;  %v7226_v51 = vpack.c.bf16 %v6020_v24, %v6019_v57 }
 0x2e9   : > { %v6121_v61 = vadd.f32 %v6120_v46, %v6090_v31  ;;  %7288 = vst [vmem:[%s9668_s21 + $0x58] sm:$0xff] %v7226_v51   ;;  %v5982_v4 = vpop.f32.mrf.mxu0  ;;  %v10675_v31 = vld [vmem:[#allocation17_spill] sm:$0xff] }
 0x2ea   : > { %v5494_v47 = vpop.f32.mrf.mxu3 }
 0x2eb   : > { %v5538_v62 = vadd.f32 %v5494_v47, %v5256_v7  ;;  %v5214_v59 = vpop.f32.mrf.mxu2 }
 0x2ec   : > { %v4714_v39 = vpop.f32.mrf.mxu1  ;;  %v5257_v43 = vadd.f32 %v5214_v59, %v4754_v11  ;;  %v10676_v11 = vld [vmem:[#allocation24_spill] sm:$0xff] }
 0x2ed   : > { %v6021_v22 = vadd.f32 %v5977_v55, %v5538_v62  ;;  %v4755_v3 = vadd.f32 %v4714_v39, %v4272_v2  ;;  %v10672_v55 = vld [vmem:[#allocation22_spill] sm:$0xff] }
 0x2ee   : > { %v4274_v18 = vadd.f32 %v10673_v26, %v10672_v55 }
 0x2ef   : > { %v6052_v6 = vadd.f32 %v6051_v53, %v6021_v22  ;;  %v6091_v28 = vmul.f32 %v6021_v22, %v6021_v22  ;;  %v10674_v53 = vld [vmem:[#allocation29_spill] sm:$0xff] }
 0x2f0   : > { %v4275_v51 = vadd.f32 %v10675_v31, %v10674_v53 }
 0x2f1   : > { %v6122_v37 = vadd.f32 %v6121_v61, %v6091_v28  ;;  %v5984_v35 = vpop.f32.mrf.mxu0 }
 0x2f2   : > { %v5496_v54 = vpop.f32.mrf.mxu3 }
 0x2f3   : > { %v5539_v63 = vadd.f32 %v5496_v54, %v5257_v43  ;;  %v5217_v33 = vpop.f32.mrf.mxu2 }
 0x2f4   : > { %v4716_v5 = vpop.f32.mrf.mxu1  ;;  %v5258_v40 = vadd.f32 %v5217_v33, %v4755_v3 }
 0x2f5   : > { %v6022_v0 = vadd.f32 %v5979_v48, %v5539_v63  ;;  %v4756_v16 = vadd.f32 %v4716_v5, %v4273_v49 }
 0x2f7   : > { %v6053_v52 = vadd.f32 %v6052_v6, %v6022_v0  ;;  %v6092_v60 = vmul.f32 %v6022_v0, %v6022_v0  ;;  %v7231_v10 = vpack.c.bf16 %v6022_v0, %v6021_v22  ;;  %v10677_v6 = vld [vmem:[#allocation27_spill] sm:$0xff] }
 0x2f8   : > { %v4276_v28 = vadd.f32 %v10677_v6, %v10676_v11 }
 0x2f9   : > { %v6123_v20 = vadd.f32 %v6122_v37, %v6092_v60  ;;  %7289 = vst [vmem:[%s9668_s21 + $0x60] sm:$0xff] %v7231_v10   ;;  %v5987_v15 = vpop.f32.mrf.mxu0  ;;  %v10678_v60 = vld [vmem:[#allocation25_spill] sm:$0xff]  ;;  %v10679_v10 = vld [vmem:[#allocation23_spill] sm:$0xff] }
 0x2fa   : > { %v5499_v34 = vpop.f32.mrf.mxu3 }
 0x2fb   : > { %v5540_v58 = vadd.f32 %v5499_v34, %v5258_v40  ;;  %v5219_v56 = vpop.f32.mrf.mxu2  ;;  %v4277_v40 = vadd.f32 %v10679_v10, %v10678_v60 }
 0x2fc   : > { %v4719_v19 = vpop.f32.mrf.mxu1  ;;  %v5259_v8 = vadd.f32 %v5219_v56, %v4756_v16 }
 0x2fd   : > { %v6023_v29 = vadd.f32 %v5982_v4, %v5540_v58  ;;  %v4757_v46 = vadd.f32 %v4719_v19, %v4274_v18 }
 0x2ff   : > { %v6054_v42 = vadd.f32 %v6053_v52, %v6023_v29  ;;  %v6093_v45 = vmul.f32 %v6023_v29, %v6023_v29 }
 0x301   : > { %v6124_v13 = vadd.f32 %v6123_v20, %v6093_v45  ;;  %v5989_v14 = vpop.f32.mrf.mxu0 }
 0x302   : > { %v5501_v57 = vpop.f32.mrf.mxu3 }
 0x303   : > { %v5541_v9 = vadd.f32 %v5501_v57, %v5259_v8  ;;  %v5222_v27 = vpop.f32.mrf.mxu2 }
 0x304   : > { %v4721_v32 = vpop.f32.mrf.mxu1  ;;  %v5260_v41 = vadd.f32 %v5222_v27, %v4757_v46 }
 0x305   : > { %v6024_v25 = vadd.f32 %v5984_v35, %v5541_v9  ;;  %v4758_v61 = vadd.f32 %v4721_v32, %v4275_v51 }
 0x307   : > { %v6055_v23 = vadd.f32 %v6054_v42, %v6024_v25  ;;  %v6094_v38 = vmul.f32 %v6024_v25, %v6024_v25  ;;  %v7236_v44 = vpack.c.bf16 %v6024_v25, %v6023_v29 }
 0x309   : > { %v6125_v12 = vadd.f32 %v6124_v13, %v6094_v38  ;;  %7290 = vst [vmem:[%s9668_s21 + $0x68] sm:$0xff] %v7236_v44   ;;  %v5992_v5 = vpop.f32.mrf.mxu0 }
 0x30a   : > { %v5504_v24 = vpop.f32.mrf.mxu3 }
 0x30b   : > { %v5542_v30 = vadd.f32 %v5504_v24, %v5260_v41  ;;  %v5224_v7 = vpop.f32.mrf.mxu2 }
 0x30c   : > { %v5261_v36 = vadd.f32 %v5224_v7, %v4758_v61  ;;  %v4724_v21 = vpop.f32.mrf.mxu1 }
 0x30d   : > { %v6025_v48 = vadd.f32 %v5987_v15, %v5542_v30  ;;  %v4759_v4 = vadd.f32 %v4724_v21, %v4276_v28 }
 0x30f   : > { %v6056_v47 = vadd.f32 %v6055_v23, %v6025_v48  ;;  %v6095_v62 = vmul.f32 %v6025_v48, %v6025_v48 }
 0x311   : > { %v6126_v59 = vadd.f32 %v6125_v12, %v6095_v62  ;;  %v5994_v29 = vpop.f32.mrf.mxu0 }
 0x312   : > { %v5506_v39 = vpop.f32.mrf.mxu3 }
 0x313   : > { %v5543_v22 = vadd.f32 %v5506_v39, %v5261_v36  ;;  %v5227_v43 = vpop.f32.mrf.mxu2 }
 0x314   : > { %v5262_v2 = vadd.f32 %v5227_v43, %v4759_v4  ;;  %v4726_v3 = vpop.f32.mrf.mxu1 }
 0x315   : > { %v6026_v37 = vadd.f32 %v5989_v14, %v5543_v22  ;;  %v4760_v58 = vadd.f32 %v4726_v3, %v4277_v40 }
 0x317   : > { %v6057_v54 = vadd.f32 %v6056_v47, %v6026_v37  ;;  %v6096_v63 = vmul.f32 %v6026_v37, %v6026_v37  ;;  %v7241_v50 = vpack.c.bf16 %v6026_v37, %v6025_v48 }
 0x319   : > { %v6127_v33 = vadd.f32 %v6126_v59, %v6096_v63  ;;  %7291 = vst [vmem:[%s9668_s21 + $0x70] sm:$0xff] %v7241_v50  }
 0x31a   : > { %v5509_v0 = vpop.f32.mrf.mxu3 }
 0x31b   : > { %v5544_v52 = vadd.f32 %v5509_v0, %v5262_v2  ;;  %v5229_v20 = vpop.f32.mrf.mxu2 }
 0x31c   : > { %v5263_v49 = vadd.f32 %v5229_v20, %v4760_v58 }
 0x31d   : > { %v6027_v34 = vadd.f32 %v5992_v5, %v5544_v52 }
 0x31f   : > { %v6058_v17 = vadd.f32 %v6057_v54, %v6027_v34  ;;  %v6097_v1 = vmul.f32 %v6027_v34, %v6027_v34 }
 0x321   : > { %v6128_v35 = vadd.f32 %v6127_v33, %v6097_v1 }
 0x322   : > { %v5511_v56 = vpop.f32.mrf.mxu3 }
 0x323   : > { %v5545_v19 = vadd.f32 %v5511_v56, %v5263_v49 }
 0x325   : > { %v6028_v16 = vadd.f32 %v5994_v29, %v5545_v19 }
 0x327   : > { %v6059_v42 = vadd.f32 %v6058_v17, %v6028_v16  ;;  %v6098_v45 = vmul.f32 %v6028_v16, %v6028_v16  ;;  %v7246_v8 = vpack.c.bf16 %v6028_v16, %v6027_v34 }
 0x329   : > { %v6060_v13 = vrot.slane %v6059_v42, 4  ;;  %v6129_v57 = vadd.f32 %v6128_v35, %v6098_v45  ;;  %7292 = vst [vmem:[%s9668_s21 + $0x78] sm:$0xff] %v7246_v8  }
 0x32b   : > { %v6061_v9 = vadd.f32 %v6060_v13, %v6059_v42  ;;  %v6130_v55 = vrot.slane %v6129_v57, 4 }
 0x32d   : > { %v6062_v26 = vrot.slane %v6061_v9, 2  ;;  %v6131_v18 = vadd.f32 %v6130_v55, %v6129_v57 }
 0x32f   : > { %v6063_v27 = vadd.f32 %v6062_v26, %v6061_v9  ;;  %v6132_v25 = vrot.slane %v6131_v18, 2 }
 0x331   : > { %v6064_v46 = vrot.slane %v6063_v27, 1  ;;  %v6133_v15 = vadd.f32 %v6132_v25, %v6131_v18 }
 0x333   : > { %v6065_v32 = vadd.f32 %v6064_v46, %v6063_v27  ;;  %v6134_v23 = vrot.slane %v6133_v15, 1 }
 0x335   : > { %6066 = vst [vmem:[%s235_s24] sm:$0x1] %v6065_v32  ;;  %v6135_v38 = vadd.f32 %v6134_v23, %v6133_v15 }
 0x337   : > { %6136 = vst [vmem:[%s235_s24 + $0x1] sm:$0x1] %v6135_v38 }
 0x338 PF: > { %s16_s18 = sadd.s32 1, %s7336_s18  }
 0x339   : > { %p13_p4 = scmp.ge.s32.totalorder %s16_s18, 4  }
 0x33b   :  { %15 = sbr.rel (!%p13_p4) target bundleno = 1 (0x1), region = 86 }

</bundles_post_ra>
